<compile_context>
chip_gen: v7x
topology: tpu7x:2x2x1
jax: 0.10.0
libtpu: 0.0.40
codegen_flags: <defaults>
</compile_context>

<pallas_src>
import functools

import jax
import jax.numpy as jnp
from jax.experimental import pallas as pl
from jax.experimental.pallas import tpu as pltpu


# ----------------------------------------------------------------------------
# helpers
# ----------------------------------------------------------------------------
def _round_up(x, m):
    return (x + m - 1) // m * m


def _pick_rb(h, target):
    """Largest even divisor of h that is <= target (h is even in all uses)."""
    rb = min(h, target)
    rb -= rb % 2
    rb = max(rb, 2)
    while h % rb != 0:
        rb -= 2
    return rb


# ----------------------------------------------------------------------------
# Pallas kernels
# ----------------------------------------------------------------------------
def _conv3x3_relu_pool_kernel(cin, cout, rb, w2k,
                              em_ref, eh_ref, om_ref, oh_ref, w_ref, b_ref,
                              o_ref):
    """Fused Conv2d(3x3, pad=1) + bias + ReLU + MaxPool2d(2) on a row band.

    em/om: (1, rb, w2k+1, cin)  even/odd column phases of the padded input.
    eh/oh: (1, 2,  w2k+1, cin)  two halo rows below the band.
    w:     (3, 3, cin, cout) bf16 ;  b: (1, cout) f32
    o:     (1, rb//2, w2k, cout)
    """
    tr = rb // 2
    eb = jnp.concatenate([em_ref[0], eh_ref[0]], axis=0)   # (rb+2, w2k+1, cin)
    ob = jnp.concatenate([om_ref[0], oh_ref[0]], axis=0)

    acc_e = jnp.zeros((rb * w2k, cout), jnp.float32)
    acc_o = jnp.zeros((rb * w2k, cout), jnp.float32)
    for dy in range(3):
        er = eb[dy:dy + rb]                                 # (rb, w2k+1, cin)
        orow = ob[dy:dy + rb]
        e0 = er[:, 0:w2k, :].reshape(rb * w2k, cin)
        e1 = er[:, 1:w2k + 1, :].reshape(rb * w2k, cin)
        o0 = orow[:, 0:w2k, :].reshape(rb * w2k, cin)
        o1 = orow[:, 1:w2k + 1, :].reshape(rb * w2k, cin)
        # (even-phase tap, odd-phase tap) for dx = 0, 1, 2
        taps = ((e0, o0), (o0, e1), (e1, o1))
        for dx in range(3):
            wt = w_ref[dy, dx]                              # (cin, cout) bf16
            te, to = taps[dx]
            if cin == 1:
                # VPU path: broadcast multiply instead of a K=1 MXU matmul.
                wf = wt.astype(jnp.float32)
                acc_e = acc_e + te.astype(jnp.float32) * wf
                acc_o = acc_o + to.astype(jnp.float32) * wf
            else:
                acc_e = acc_e + jnp.dot(te, wt,
                                        preferred_element_type=jnp.float32)
                acc_o = acc_o + jnp.dot(to, wt,
                                        preferred_element_type=jnp.float32)

    bias = b_ref[...]                                       # (1, cout) f32
    cmax = jnp.maximum(acc_e, acc_o)                        # horizontal pool
    for t in range(tr):                                     # vertical pool
        top = cmax[(2 * t) * w2k:(2 * t + 1) * w2k]
        bot = cmax[(2 * t + 1) * w2k:(2 * t + 2) * w2k]
        row = jnp.maximum(jnp.maximum(top, bot) + bias, 0.0)
        o_ref[0, t] = row.astype(o_ref.dtype)


def _conv3x3_relu_kernel(cin, cout, rb, wk,
                         xm_ref, xh_ref, w_ref, b_ref, o_ref):
    """Fused Conv2d(3x3, pad=1) + bias + ReLU on a row band (no pooling)."""
    band = jnp.concatenate([xm_ref[0], xh_ref[0]], axis=0)  # (rb+2, wk+2, cin)
    acc = jnp.zeros((rb * wk, cout), jnp.float32)
    for dy in range(3):
        rows = band[dy:dy + rb]                             # (rb, wk+2, cin)
        for dx in range(3):
            tap = rows[:, dx:dx + wk, :].reshape(rb * wk, cin)
            wt = w_ref[dy, dx]
            if cin == 1:
                acc = acc + tap.astype(jnp.float32) * wt.astype(jnp.float32)
            else:
                acc = acc + jnp.dot(tap, wt,
                                    preferred_element_type=jnp.float32)
    bias = b_ref[...]
    for h in range(rb):
        row = jnp.maximum(acc[h * wk:(h + 1) * wk] + bias, 0.0)
        o_ref[0, h] = row.astype(o_ref.dtype)


def _matmul_bias_act_kernel(apply_relu, x_ref, w_ref, b_ref, o_ref):
    acc = jnp.dot(x_ref[...], w_ref[...], preferred_element_type=jnp.float32)
    acc = acc + b_ref[...]
    if apply_relu:
        acc = jnp.maximum(acc, 0.0)
    o_ref[...] = acc.astype(o_ref.dtype)


def _decoder_tail_kernel(x_ref, w2_ref, b2_ref, w3_ref, b3_ref, o_ref):
    """Fused ConvT(128->64,k2,s2)+ReLU then ConvT(64->1,k2,s2) on an M tile."""
    c_mid = w3_ref.shape[0]
    n_tap2 = w2_ref.shape[1] // c_mid
    h = jnp.dot(x_ref[...], w2_ref[...], preferred_element_type=jnp.float32)
    h = jnp.maximum(h + b2_ref[...], 0.0)                   # (tm, 4*c_mid) f32
    hb = h.astype(jnp.bfloat16)
    w3 = w3_ref[...]                                        # (c_mid, 4) bf16
    cols = []
    for t in range(n_tap2):
        cols.append(jnp.dot(hb[:, t * c_mid:(t + 1) * c_mid], w3,
                            preferred_element_type=jnp.float32))
    y = jnp.concatenate(cols, axis=-1) + b3_ref[...]        # (tm, 16)
    o_ref[...] = y.astype(o_ref.dtype)


def _add3_kernel(a_ref, b_ref, c_ref, o_ref):
    o_ref[...] = (a_ref[...].astype(jnp.float32)
                  + b_ref[...].astype(jnp.float32)
                  + c_ref[...].astype(jnp.float32)).astype(o_ref.dtype)


# ----------------------------------------------------------------------------
# layer wrappers
# ----------------------------------------------------------------------------
def conv3x3_relu_pool(x, w, b, *, rb_target=16, out_dtype=jnp.bfloat16):
    """Conv2d(3x3, pad=1) + ReLU + MaxPool2d(2).  x: (NB,H,W,Cin); w PyTorch layout."""
    nb, h, wdt, cin = x.shape
    cout = w.shape[0]
    assert h % 2 == 0 and wdt % 2 == 0
    w2 = wdt // 2
    w2k = _round_up(w2, 8)          # lane/sublane friendly kernel width
    rb = _pick_rb(h, rb_target)     # conv rows per grid step (even)
    tr = rb // 2

    # Even/odd column phases of the zero-padded (pad=1) input, with extra right
    # padding so in-kernel (rb, w2k, cin)->(rb*w2k, cin) flattening is layout-clean.
    xr = x.reshape(nb, h, w2, 2, cin)
    ecols = xr[:, :, :, 0, :]                    # original even columns
    ocols = xr[:, :, :, 1, :]                    # original odd columns
    e_arr = jnp.pad(ocols, ((0, 0), (1, 1), (1, w2k - w2), (0, 0)))
    o_arr = jnp.pad(ecols, ((0, 0), (1, 1), (0, w2k + 1 - w2), (0, 0)))
    e_arr = e_arr.astype(jnp.bfloat16)
    o_arr = o_arr.astype(jnp.bfloat16)

    wt = jnp.transpose(w, (2, 3, 1, 0)).astype(jnp.bfloat16)   # (3,3,cin,cout)
    bt = b.reshape(1, cout).astype(jnp.float32)

    kern = functools.partial(_conv3x3_relu_pool_kernel, cin, cout, rb, w2k)
    out = pl.pallas_call(
        kern,
        out_shape=jax.ShapeDtypeStruct((nb, h // 2, w2k, cout), out_dtype),
        grid=(nb, h // rb),
        in_specs=[
            pl.BlockSpec((1, rb, w2k + 1, cin), lambda n, r: (n, r, 0, 0)),
            pl.BlockSpec((1, 2, w2k + 1, cin),
                         lambda n, r: (n, (rb // 2) * (r + 1), 0, 0)),
            pl.BlockSpec((1, rb, w2k + 1, cin), lambda n, r: (n, r, 0, 0)),
            pl.BlockSpec((1, 2, w2k + 1, cin),
                         lambda n, r: (n, (rb // 2) * (r + 1), 0, 0)),
            pl.BlockSpec((3, 3, cin, cout), lambda n, r: (0, 0, 0, 0)),
            pl.BlockSpec((1, cout), lambda n, r: (0, 0)),
        ],
        out_specs=pl.BlockSpec((1, tr, w2k, cout), lambda n, r: (n, r, 0, 0)),
        compiler_params=pltpu.CompilerParams(
            dimension_semantics=("parallel", "parallel")),
    )(e_arr, e_arr, o_arr, o_arr, wt, bt)
    if w2k != w2:
        out = out[:, :, :w2, :]
    return out


def conv3x3_relu(x, w, b, *, rb_target=64, out_dtype=jnp.bfloat16):
    """Conv2d(3x3, pad=1) + ReLU (no pooling).  Used by combiner_16."""
    nb, h, wdt, cin = x.shape
    cout = w.shape[0]
    assert h % 2 == 0
    wk = _round_up(wdt, 8)
    rb = _pick_rb(h, rb_target)
    xp = jnp.pad(x, ((0, 0), (1, 1), (1, wk + 1 - wdt), (0, 0)))
    xp = xp.astype(jnp.bfloat16)                              # (nb, h+2, wk+2, cin)
    wt = jnp.transpose(w, (2, 3, 1, 0)).astype(jnp.bfloat16)
    bt = b.reshape(1, cout).astype(jnp.float32)

    kern = functools.partial(_conv3x3_relu_kernel, cin, cout, rb, wk)
    out = pl.pallas_call(
        kern,
        out_shape=jax.ShapeDtypeStruct((nb, h, wk, cout), out_dtype),
        grid=(nb, h // rb),
        in_specs=[
            pl.BlockSpec((1, rb, wk + 2, cin), lambda n, r: (n, r, 0, 0)),
            pl.BlockSpec((1, 2, wk + 2, cin),
                         lambda n, r: (n, (rb // 2) * (r + 1), 0, 0)),
            pl.BlockSpec((3, 3, cin, cout), lambda n, r: (0, 0, 0, 0)),
            pl.BlockSpec((1, cout), lambda n, r: (0, 0)),
        ],
        out_specs=pl.BlockSpec((1, rb, wk, cout), lambda n, r: (n, r, 0, 0)),
        compiler_params=pltpu.CompilerParams(
            dimension_semantics=("parallel", "parallel")),
    )(xp, xp, wt, bt)
    if wk != wdt:
        out = out[:, :, :wdt, :]
    return out


def matmul_bias_act(x, w, b, *, relu, out_dtype=jnp.bfloat16, tm=512):
    """M-tiled matmul + bias (+ReLU); weights/bias stay VMEM-resident."""
    m, k = x.shape
    _, n = w.shape
    tm = min(tm, m)
    b2 = b.reshape(1, n).astype(jnp.float32)
    kern = functools.partial(_matmul_bias_act_kernel, relu)
    return pl.pallas_call(
        kern,
        out_shape=jax.ShapeDtypeStruct((m, n), out_dtype),
        grid=(pl.cdiv(m, tm),),
        in_specs=[
            pl.BlockSpec((tm, k), lambda i: (i, 0)),
            pl.BlockSpec((k, n), lambda i: (0, 0)),
            pl.BlockSpec((1, n), lambda i: (0, 0)),
        ],
        out_specs=pl.BlockSpec((tm, n), lambda i: (i, 0)),
        compiler_params=pltpu.CompilerParams(dimension_semantics=("parallel",)),
    )(x.astype(jnp.bfloat16), w.astype(jnp.bfloat16), b2)


def add3(a, b, c, *, out_dtype=jnp.bfloat16, tm=512):
    m, ch = a.shape
    tm = min(tm, m)
    spec = pl.BlockSpec((tm, ch), lambda i: (i, 0))
    return pl.pallas_call(
        _add3_kernel,
        out_shape=jax.ShapeDtypeStruct((m, ch), out_dtype),
        grid=(pl.cdiv(m, tm),),
        in_specs=[spec, spec, spec],
        out_specs=spec,
        compiler_params=pltpu.CompilerParams(dimension_semantics=("parallel",)),
    )(a, b, c)


def decoder_tail(x_flat, w2, b2, w3, b3, *, tm=512):
    """Fused ConvT(128->64,k2,s2)+ReLU and ConvT(64->1,k2,s2). x_flat: (M,128)."""
    m, k = x_flat.shape
    tm = min(tm, m)
    c_mid = w2.shape[1]                                       # 64
    w2m = jnp.transpose(w2, (0, 2, 3, 1)).reshape(k, 4 * c_mid).astype(jnp.bfloat16)
    b2m = jnp.tile(b2, 4).reshape(1, 4 * c_mid).astype(jnp.float32)
    w3m = jnp.transpose(w3, (0, 2, 3, 1)).reshape(c_mid, 4).astype(jnp.bfloat16)
    b3m = b3.reshape(1, 1).astype(jnp.float32)
    return pl.pallas_call(
        _decoder_tail_kernel,
        out_shape=jax.ShapeDtypeStruct((m, 16), jnp.float32),
        grid=(pl.cdiv(m, tm),),
        in_specs=[
            pl.BlockSpec((tm, k), lambda i: (i, 0)),
            pl.BlockSpec((k, 4 * c_mid), lambda i: (0, 0)),
            pl.BlockSpec((1, 4 * c_mid), lambda i: (0, 0)),
            pl.BlockSpec((c_mid, 4), lambda i: (0, 0)),
            pl.BlockSpec((1, 1), lambda i: (0, 0)),
        ],
        out_specs=pl.BlockSpec((tm, 16), lambda i: (i, 0)),
        compiler_params=pltpu.CompilerParams(dimension_semantics=("parallel",)),
    )(x_flat.astype(jnp.bfloat16), w2m, b2m, w3m, b3m)


# ----------------------------------------------------------------------------
# model: parameters + forward
# ----------------------------------------------------------------------------
def init_params(key):
    ks = jax.random.split(key, 16)

    def conv_p(k, cout, cin, kh, kw):
        kw_, kb_ = jax.random.split(k)
        scale = 1.0 / jnp.sqrt(float(cin * kh * kw))
        w = jax.random.normal(kw_, (cout, cin, kh, kw), jnp.float32) * scale
        b = jax.random.normal(kb_, (cout,), jnp.float32) * scale
        return w, b

    def convT_p(k, cin, cout, kh, kw):
        kw_, kb_ = jax.random.split(k)
        scale = 1.0 / jnp.sqrt(float(cin * kh * kw))
        w = jax.random.normal(kw_, (cin, cout, kh, kw), jnp.float32) * scale
        b = jax.random.normal(kb_, (cout,), jnp.float32) * scale
        return w, b

    p = {}
    # encoder (fine_layers=False): 1->64, 64->128, 128->256 (all 3x3, pad 1)
    p["enc1_w"], p["enc1_b"] = conv_p(ks[0], 64, 1, 3, 3)
    p["enc2_w"], p["enc2_b"] = conv_p(ks[1], 128, 64, 3, 3)
    p["enc3_w"], p["enc3_b"] = conv_p(ks[2], 256, 128, 3, 3)
    # combiner_16: 256->16, 16->256
    p["c1_w"], p["c1_b"] = conv_p(ks[3], 16, 256, 3, 3)
    p["c2_w"], p["c2_b"] = conv_p(ks[4], 256, 16, 3, 3)
    # future_decoder: ConvT 256->128, 128->64, 64->1 (k=2, s=2)
    p["d1_w"], p["d1_b"] = convT_p(ks[5], 256, 128, 2, 2)
    p["d2_w"], p["d2_b"] = convT_p(ks[6], 128, 64, 2, 2)
    p["d3_w"], p["d3_b"] = convT_p(ks[7], 64, 1, 2, 2)
    return p


def denoising_cnn_512_forward(x_nchw, p):
    n, c, h, w = x_nchw.shape
    assert c == 3
    # torch.chunk(x, 3, dim=1) -> stack along batch: encoder weights are shared,
    # so the whole encoder runs once on a (3N) batch.
    xs = jnp.transpose(x_nchw, (1, 0, 2, 3)).reshape(3 * n, h, w)[..., None]
    xs = xs.astype(jnp.bfloat16)

    e = conv3x3_relu_pool(xs, p["enc1_w"], p["enc1_b"])     # (3n, h/2, w/2, 64)
    e = conv3x3_relu_pool(e, p["enc2_w"], p["enc2_b"])      # (3n, h/4, w/4, 128)
    e = conv3x3_relu_pool(e, p["enc3_w"], p["enc3_b"])      # (3n, h/8, w/8, 256)

    nb, hb, wb, cb = e.shape                                # nb == 3n
    ef = e.reshape(3, n * hb * wb, cb)
    s = add3(ef[0], ef[1], ef[2]).reshape(n, hb, wb, cb)    # x1 + x2 + x3

    # combiner_16
    # TODO(synk): fuse the two combiner convs so the 16-channel intermediate
    # stays in VMEM instead of a (small) lane-sparse HBM round trip.
    h1 = conv3x3_relu(s, p["c1_w"], p["c1_b"])              # (n, hb, wb, 16)
    h2 = conv3x3_relu(h1, p["c2_w"], p["c2_b"])             # (n, hb, wb, 256)

    # decoder d1: ConvT(256->128, k=2, s=2) + ReLU as M-tiled matmul + interleave
    w1 = jnp.transpose(p["d1_w"], (0, 2, 3, 1)).reshape(256, 4 * 128)
    b1 = jnp.tile(p["d1_b"], 4)
    y = matmul_bias_act(h2.reshape(n * hb * wb, 256), w1, b1, relu=True)
    y = y.reshape(n, hb, wb, 2, 2, 128)
    y = jnp.transpose(y, (0, 1, 3, 2, 4, 5)).reshape(n, 2 * hb, 2 * wb, 128)

    # decoder d2+d3 fused (ConvT 128->64 + ReLU, then ConvT 64->1)
    h1d, w1d = 2 * hb, 2 * wb
    m2 = n * h1d * w1d
    out = decoder_tail(y.reshape(m2, 128),
                       p["d2_w"], p["d2_b"], p["d3_w"], p["d3_b"])

    # interleave the 4x4 taps back into pixels: (a2,b2,a3,b3) -> (2a2+a3, 2b2+b3)
    out = out.reshape(n, h1d, w1d, 2, 2, 2, 2)
    out = jnp.transpose(out, (0, 1, 3, 5, 2, 4, 6)).reshape(n, 4 * h1d, 4 * w1d, 1)
    return jnp.transpose(out, (0, 3, 1, 2))                 # NCHW (n, 1, h, w)


if __name__ == "__main__":
    key = jax.random.PRNGKey(0)
    k_x, k_p = jax.random.split(key)

    # x: (N=2, C=3, H=16, W=16) — chunked into three 1-channel images.
    x = jax.random.normal(k_x, (2, 3, 16, 16), jnp.float32)
    params = init_params(k_p)

    fwd = jax.jit(denoising_cnn_512_forward)
    out = fwd(x, params)
    out = jax.block_until_ready(out)

    assert out.shape == (2, 1, 16, 16), out.shape
    assert out.dtype == jnp.float32
    assert bool(jnp.all(jnp.isfinite(out)))
    print("KERNEL_OK")
</pallas_src>

<mosaic_0001>
module attributes {stable_mosaic.version = 11 : i64} {
  func.func @_conv3x3_relu_pool_kernel(%arg0: i32, %arg1: i32, %arg2: memref<1x16x9x1xbf16, #tpu.memory_space<vmem>>, %arg3: memref<1x2x9x1xbf16, #tpu.memory_space<vmem>>, %arg4: memref<1x16x9x1xbf16, #tpu.memory_space<vmem>>, %arg5: memref<1x2x9x1xbf16, #tpu.memory_space<vmem>>, %arg6: memref<3x3x1x64xbf16, #tpu.memory_space<vmem>>, %arg7: memref<1x64xf32, #tpu.memory_space<vmem>>, %arg8: memref<1x8x8x64xbf16, #tpu.memory_space<vmem>>) attributes {dimension_semantics = [#tpu.dimension_semantics<parallel>, #tpu.dimension_semantics<parallel>], iteration_bounds = array<i64: 6, 1>, scalar_prefetch = 0 : i64, scratch_operands = 0 : i64, tpu.core_type = #tpu.core_type<tc>, window_params = [{transform_indices = @transform_0, window_bounds = array<i64: 1, 16, 9, 1>}, {transform_indices = @transform_1, window_bounds = array<i64: 1, 2, 9, 1>}, {transform_indices = @transform_2, window_bounds = array<i64: 1, 16, 9, 1>}, {transform_indices = @transform_3, window_bounds = array<i64: 1, 2, 9, 1>}, {pipeline_mode = #tpu.pipeline_mode<synchronous>, transform_indices = @transform_4, window_bounds = array<i64: 3, 3, 1, 64>}, {pipeline_mode = #tpu.pipeline_mode<synchronous>, transform_indices = @transform_5, window_bounds = array<i64: 1, 64>}, {transform_indices = @transform_6, window_bounds = array<i64: 1, 8, 8, 64>}]} {
    %c0 = arith.constant 0 : index
    %c0_0 = arith.constant 0 : index
    %c0_1 = arith.constant 0 : index
    %c0_2 = arith.constant 0 : index
    %0 = vector.load %arg2[%c0, %c0_0, %c0_1, %c0_2] : memref<1x16x9x1xbf16, #tpu.memory_space<vmem>>, vector<1x16x9x1xbf16>
    %1 = vector.shape_cast %0 : vector<1x16x9x1xbf16> to vector<16x9x1xbf16>
    %c0_3 = arith.constant 0 : index
    %c0_4 = arith.constant 0 : index
    %c0_5 = arith.constant 0 : index
    %c0_6 = arith.constant 0 : index
    %2 = vector.load %arg3[%c0_3, %c0_4, %c0_5, %c0_6] : memref<1x2x9x1xbf16, #tpu.memory_space<vmem>>, vector<1x2x9x1xbf16>
    %3 = vector.shape_cast %2 : vector<1x2x9x1xbf16> to vector<2x9x1xbf16>
    %4 = tpu.concatenate %1, %3 in 0 : vector<16x9x1xbf16>, vector<2x9x1xbf16> -> vector<18x9x1xbf16>
    %c0_7 = arith.constant 0 : index
    %c0_8 = arith.constant 0 : index
    %c0_9 = arith.constant 0 : index
    %c0_10 = arith.constant 0 : index
    %5 = vector.load %arg4[%c0_7, %c0_8, %c0_9, %c0_10] : memref<1x16x9x1xbf16, #tpu.memory_space<vmem>>, vector<1x16x9x1xbf16>
    %6 = vector.shape_cast %5 : vector<1x16x9x1xbf16> to vector<16x9x1xbf16>
    %c0_11 = arith.constant 0 : index
    %c0_12 = arith.constant 0 : index
    %c0_13 = arith.constant 0 : index
    %c0_14 = arith.constant 0 : index
    %7 = vector.load %arg5[%c0_11, %c0_12, %c0_13, %c0_14] : memref<1x2x9x1xbf16, #tpu.memory_space<vmem>>, vector<1x2x9x1xbf16>
    %8 = vector.shape_cast %7 : vector<1x2x9x1xbf16> to vector<2x9x1xbf16>
    %9 = tpu.concatenate %6, %8 in 0 : vector<16x9x1xbf16>, vector<2x9x1xbf16> -> vector<18x9x1xbf16>
    %cst = arith.constant 0.000000e+00 : f32
    %10 = vector.broadcast %cst : f32 to vector<128x64xf32>
    %cst_15 = arith.constant 0.000000e+00 : f32
    %11 = vector.broadcast %cst_15 : f32 to vector<128x64xf32>
    %12 = vector.extract_strided_slice %4 {offsets = [0, 0, 0], sizes = [16, 9, 1], strides = [1, 1, 1]} : vector<18x9x1xbf16> to vector<16x9x1xbf16>
    %13 = vector.extract_strided_slice %9 {offsets = [0, 0, 0], sizes = [16, 9, 1], strides = [1, 1, 1]} : vector<18x9x1xbf16> to vector<16x9x1xbf16>
    %14 = vector.extract_strided_slice %12 {offsets = [0, 0, 0], sizes = [16, 8, 1], strides = [1, 1, 1]} : vector<16x9x1xbf16> to vector<16x8x1xbf16>
    %15 = vector.shape_cast %14 : vector<16x8x1xbf16> to vector<128x1xbf16>
    %16 = vector.extract_strided_slice %12 {offsets = [0, 1, 0], sizes = [16, 8, 1], strides = [1, 1, 1]} : vector<16x9x1xbf16> to vector<16x8x1xbf16>
    %17 = vector.shape_cast %16 : vector<16x8x1xbf16> to vector<128x1xbf16>
    %18 = vector.extract_strided_slice %13 {offsets = [0, 0, 0], sizes = [16, 8, 1], strides = [1, 1, 1]} : vector<16x9x1xbf16> to vector<16x8x1xbf16>
    %19 = vector.shape_cast %18 : vector<16x8x1xbf16> to vector<128x1xbf16>
    %20 = vector.extract_strided_slice %13 {offsets = [0, 1, 0], sizes = [16, 8, 1], strides = [1, 1, 1]} : vector<16x9x1xbf16> to vector<16x8x1xbf16>
    %21 = vector.shape_cast %20 : vector<16x8x1xbf16> to vector<128x1xbf16>
    %c0_16 = arith.constant 0 : index
    %c0_17 = arith.constant 0 : index
    %c0_18 = arith.constant 0 : index
    %c0_19 = arith.constant 0 : index
    %22 = vector.load %arg6[%c0_16, %c0_17, %c0_18, %c0_19] : memref<3x3x1x64xbf16, #tpu.memory_space<vmem>>, vector<1x1x1x64xbf16>
    %23 = vector.shape_cast %22 : vector<1x1x1x64xbf16> to vector<1x64xbf16>
    %24 = arith.extf %23 : vector<1x64xbf16> to vector<1x64xf32>
    %25 = arith.extf %15 : vector<128x1xbf16> to vector<128x1xf32>
    %26 = vector.broadcast %25 : vector<128x1xf32> to vector<128x64xf32>
    %27 = vector.broadcast %24 : vector<1x64xf32> to vector<128x64xf32>
    %28 = arith.mulf %26, %27 : vector<128x64xf32>
    %29 = arith.addf %10, %28 : vector<128x64xf32>
    %30 = arith.extf %19 : vector<128x1xbf16> to vector<128x1xf32>
    %31 = vector.broadcast %30 : vector<128x1xf32> to vector<128x64xf32>
    %32 = vector.broadcast %24 : vector<1x64xf32> to vector<128x64xf32>
    %33 = arith.mulf %31, %32 : vector<128x64xf32>
    %34 = arith.addf %11, %33 : vector<128x64xf32>
    %c0_20 = arith.constant 0 : index
    %c1 = arith.constant 1 : index
    %c0_21 = arith.constant 0 : index
    %c0_22 = arith.constant 0 : index
    %35 = vector.load %arg6[%c0_20, %c1, %c0_21, %c0_22] : memref<3x3x1x64xbf16, #tpu.memory_space<vmem>>, vector<1x1x1x64xbf16>
    %36 = vector.shape_cast %35 : vector<1x1x1x64xbf16> to vector<1x64xbf16>
    %37 = arith.extf %36 : vector<1x64xbf16> to vector<1x64xf32>
    %38 = arith.extf %19 : vector<128x1xbf16> to vector<128x1xf32>
    %39 = vector.broadcast %38 : vector<128x1xf32> to vector<128x64xf32>
    %40 = vector.broadcast %37 : vector<1x64xf32> to vector<128x64xf32>
    %41 = arith.mulf %39, %40 : vector<128x64xf32>
    %42 = arith.addf %29, %41 : vector<128x64xf32>
    %43 = arith.extf %17 : vector<128x1xbf16> to vector<128x1xf32>
    %44 = vector.broadcast %43 : vector<128x1xf32> to vector<128x64xf32>
    %45 = vector.broadcast %37 : vector<1x64xf32> to vector<128x64xf32>
    %46 = arith.mulf %44, %45 : vector<128x64xf32>
    %47 = arith.addf %34, %46 : vector<128x64xf32>
    %c0_23 = arith.constant 0 : index
    %c2 = arith.constant 2 : index
    %c0_24 = arith.constant 0 : index
    %c0_25 = arith.constant 0 : index
    %48 = vector.load %arg6[%c0_23, %c2, %c0_24, %c0_25] : memref<3x3x1x64xbf16, #tpu.memory_space<vmem>>, vector<1x1x1x64xbf16>
    %49 = vector.shape_cast %48 : vector<1x1x1x64xbf16> to vector<1x64xbf16>
    %50 = arith.extf %49 : vector<1x64xbf16> to vector<1x64xf32>
    %51 = arith.extf %17 : vector<128x1xbf16> to vector<128x1xf32>
    %52 = vector.broadcast %51 : vector<128x1xf32> to vector<128x64xf32>
    %53 = vector.broadcast %50 : vector<1x64xf32> to vector<128x64xf32>
    %54 = arith.mulf %52, %53 : vector<128x64xf32>
    %55 = arith.addf %42, %54 : vector<128x64xf32>
    %56 = arith.extf %21 : vector<128x1xbf16> to vector<128x1xf32>
    %57 = vector.broadcast %56 : vector<128x1xf32> to vector<128x64xf32>
    %58 = vector.broadcast %50 : vector<1x64xf32> to vector<128x64xf32>
    %59 = arith.mulf %57, %58 : vector<128x64xf32>
    %60 = arith.addf %47, %59 : vector<128x64xf32>
    %61 = vector.extract_strided_slice %4 {offsets = [1, 0, 0], sizes = [16, 9, 1], strides = [1, 1, 1]} : vector<18x9x1xbf16> to vector<16x9x1xbf16>
    %62 = vector.extract_strided_slice %9 {offsets = [1, 0, 0], sizes = [16, 9, 1], strides = [1, 1, 1]} : vector<18x9x1xbf16> to vector<16x9x1xbf16>
    %63 = vector.extract_strided_slice %61 {offsets = [0, 0, 0], sizes = [16, 8, 1], strides = [1, 1, 1]} : vector<16x9x1xbf16> to vector<16x8x1xbf16>
    %64 = vector.shape_cast %63 : vector<16x8x1xbf16> to vector<128x1xbf16>
    %65 = vector.extract_strided_slice %61 {offsets = [0, 1, 0], sizes = [16, 8, 1], strides = [1, 1, 1]} : vector<16x9x1xbf16> to vector<16x8x1xbf16>
    %66 = vector.shape_cast %65 : vector<16x8x1xbf16> to vector<128x1xbf16>
    %67 = vector.extract_strided_slice %62 {offsets = [0, 0, 0], sizes = [16, 8, 1], strides = [1, 1, 1]} : vector<16x9x1xbf16> to vector<16x8x1xbf16>
    %68 = vector.shape_cast %67 : vector<16x8x1xbf16> to vector<128x1xbf16>
    %69 = vector.extract_strided_slice %62 {offsets = [0, 1, 0], sizes = [16, 8, 1], strides = [1, 1, 1]} : vector<16x9x1xbf16> to vector<16x8x1xbf16>
    %70 = vector.shape_cast %69 : vector<16x8x1xbf16> to vector<128x1xbf16>
    %c1_26 = arith.constant 1 : index
    %c0_27 = arith.constant 0 : index
    %c0_28 = arith.constant 0 : index
    %c0_29 = arith.constant 0 : index
    %71 = vector.load %arg6[%c1_26, %c0_27, %c0_28, %c0_29] : memref<3x3x1x64xbf16, #tpu.memory_space<vmem>>, vector<1x1x1x64xbf16>
    %72 = vector.shape_cast %71 : vector<1x1x1x64xbf16> to vector<1x64xbf16>
    %73 = arith.extf %72 : vector<1x64xbf16> to vector<1x64xf32>
    %74 = arith.extf %64 : vector<128x1xbf16> to vector<128x1xf32>
    %75 = vector.broadcast %74 : vector<128x1xf32> to vector<128x64xf32>
    %76 = vector.broadcast %73 : vector<1x64xf32> to vector<128x64xf32>
    %77 = arith.mulf %75, %76 : vector<128x64xf32>
    %78 = arith.addf %55, %77 : vector<128x64xf32>
    %79 = arith.extf %68 : vector<128x1xbf16> to vector<128x1xf32>
    %80 = vector.broadcast %79 : vector<128x1xf32> to vector<128x64xf32>
    %81 = vector.broadcast %73 : vector<1x64xf32> to vector<128x64xf32>
    %82 = arith.mulf %80, %81 : vector<128x64xf32>
    %83 = arith.addf %60, %82 : vector<128x64xf32>
    %c1_30 = arith.constant 1 : index
    %c1_31 = arith.constant 1 : index
    %c0_32 = arith.constant 0 : index
    %c0_33 = arith.constant 0 : index
    %84 = vector.load %arg6[%c1_30, %c1_31, %c0_32, %c0_33] : memref<3x3x1x64xbf16, #tpu.memory_space<vmem>>, vector<1x1x1x64xbf16>
    %85 = vector.shape_cast %84 : vector<1x1x1x64xbf16> to vector<1x64xbf16>
    %86 = arith.extf %85 : vector<1x64xbf16> to vector<1x64xf32>
    %87 = arith.extf %68 : vector<128x1xbf16> to vector<128x1xf32>
    %88 = vector.broadcast %87 : vector<128x1xf32> to vector<128x64xf32>
    %89 = vector.broadcast %86 : vector<1x64xf32> to vector<128x64xf32>
    %90 = arith.mulf %88, %89 : vector<128x64xf32>
    %91 = arith.addf %78, %90 : vector<128x64xf32>
    %92 = arith.extf %66 : vector<128x1xbf16> to vector<128x1xf32>
    %93 = vector.broadcast %92 : vector<128x1xf32> to vector<128x64xf32>
    %94 = vector.broadcast %86 : vector<1x64xf32> to vector<128x64xf32>
    %95 = arith.mulf %93, %94 : vector<128x64xf32>
    %96 = arith.addf %83, %95 : vector<128x64xf32>
    %c1_34 = arith.constant 1 : index
    %c2_35 = arith.constant 2 : index
    %c0_36 = arith.constant 0 : index
    %c0_37 = arith.constant 0 : index
    %97 = vector.load %arg6[%c1_34, %c2_35, %c0_36, %c0_37] : memref<3x3x1x64xbf16, #tpu.memory_space<vmem>>, vector<1x1x1x64xbf16>
    %98 = vector.shape_cast %97 : vector<1x1x1x64xbf16> to vector<1x64xbf16>
    %99 = arith.extf %98 : vector<1x64xbf16> to vector<1x64xf32>
    %100 = arith.extf %66 : vector<128x1xbf16> to vector<128x1xf32>
    %101 = vector.broadcast %100 : vector<128x1xf32> to vector<128x64xf32>
    %102 = vector.broadcast %99 : vector<1x64xf32> to vector<128x64xf32>
    %103 = arith.mulf %101, %102 : vector<128x64xf32>
    %104 = arith.addf %91, %103 : vector<128x64xf32>
    %105 = arith.extf %70 : vector<128x1xbf16> to vector<128x1xf32>
    %106 = vector.broadcast %105 : vector<128x1xf32> to vector<128x64xf32>
    %107 = vector.broadcast %99 : vector<1x64xf32> to vector<128x64xf32>
    %108 = arith.mulf %106, %107 : vector<128x64xf32>
    %109 = arith.addf %96, %108 : vector<128x64xf32>
    %110 = vector.extract_strided_slice %4 {offsets = [2, 0, 0], sizes = [16, 9, 1], strides = [1, 1, 1]} : vector<18x9x1xbf16> to vector<16x9x1xbf16>
    %111 = vector.extract_strided_slice %9 {offsets = [2, 0, 0], sizes = [16, 9, 1], strides = [1, 1, 1]} : vector<18x9x1xbf16> to vector<16x9x1xbf16>
    %112 = vector.extract_strided_slice %110 {offsets = [0, 0, 0], sizes = [16, 8, 1], strides = [1, 1, 1]} : vector<16x9x1xbf16> to vector<16x8x1xbf16>
    %113 = vector.shape_cast %112 : vector<16x8x1xbf16> to vector<128x1xbf16>
    %114 = vector.extract_strided_slice %110 {offsets = [0, 1, 0], sizes = [16, 8, 1], strides = [1, 1, 1]} : vector<16x9x1xbf16> to vector<16x8x1xbf16>
    %115 = vector.shape_cast %114 : vector<16x8x1xbf16> to vector<128x1xbf16>
    %116 = vector.extract_strided_slice %111 {offsets = [0, 0, 0], sizes = [16, 8, 1], strides = [1, 1, 1]} : vector<16x9x1xbf16> to vector<16x8x1xbf16>
    %117 = vector.shape_cast %116 : vector<16x8x1xbf16> to vector<128x1xbf16>
    %118 = vector.extract_strided_slice %111 {offsets = [0, 1, 0], sizes = [16, 8, 1], strides = [1, 1, 1]} : vector<16x9x1xbf16> to vector<16x8x1xbf16>
    %119 = vector.shape_cast %118 : vector<16x8x1xbf16> to vector<128x1xbf16>
    %c2_38 = arith.constant 2 : index
    %c0_39 = arith.constant 0 : index
    %c0_40 = arith.constant 0 : index
    %c0_41 = arith.constant 0 : index
    %120 = vector.load %arg6[%c2_38, %c0_39, %c0_40, %c0_41] : memref<3x3x1x64xbf16, #tpu.memory_space<vmem>>, vector<1x1x1x64xbf16>
    %121 = vector.shape_cast %120 : vector<1x1x1x64xbf16> to vector<1x64xbf16>
    %122 = arith.extf %121 : vector<1x64xbf16> to vector<1x64xf32>
    %123 = arith.extf %113 : vector<128x1xbf16> to vector<128x1xf32>
    %124 = vector.broadcast %123 : vector<128x1xf32> to vector<128x64xf32>
    %125 = vector.broadcast %122 : vector<1x64xf32> to vector<128x64xf32>
    %126 = arith.mulf %124, %125 : vector<128x64xf32>
    %127 = arith.addf %104, %126 : vector<128x64xf32>
    %128 = arith.extf %117 : vector<128x1xbf16> to vector<128x1xf32>
    %129 = vector.broadcast %128 : vector<128x1xf32> to vector<128x64xf32>
    %130 = vector.broadcast %122 : vector<1x64xf32> to vector<128x64xf32>
    %131 = arith.mulf %129, %130 : vector<128x64xf32>
    %132 = arith.addf %109, %131 : vector<128x64xf32>
    %c2_42 = arith.constant 2 : index
    %c1_43 = arith.constant 1 : index
    %c0_44 = arith.constant 0 : index
    %c0_45 = arith.constant 0 : index
    %133 = vector.load %arg6[%c2_42, %c1_43, %c0_44, %c0_45] : memref<3x3x1x64xbf16, #tpu.memory_space<vmem>>, vector<1x1x1x64xbf16>
    %134 = vector.shape_cast %133 : vector<1x1x1x64xbf16> to vector<1x64xbf16>
    %135 = arith.extf %134 : vector<1x64xbf16> to vector<1x64xf32>
    %136 = arith.extf %117 : vector<128x1xbf16> to vector<128x1xf32>
    %137 = vector.broadcast %136 : vector<128x1xf32> to vector<128x64xf32>
    %138 = vector.broadcast %135 : vector<1x64xf32> to vector<128x64xf32>
    %139 = arith.mulf %137, %138 : vector<128x64xf32>
    %140 = arith.addf %127, %139 : vector<128x64xf32>
    %141 = arith.extf %115 : vector<128x1xbf16> to vector<128x1xf32>
    %142 = vector.broadcast %141 : vector<128x1xf32> to vector<128x64xf32>
    %143 = vector.broadcast %135 : vector<1x64xf32> to vector<128x64xf32>
    %144 = arith.mulf %142, %143 : vector<128x64xf32>
    %145 = arith.addf %132, %144 : vector<128x64xf32>
    %c2_46 = arith.constant 2 : index
    %c2_47 = arith.constant 2 : index
    %c0_48 = arith.constant 0 : index
    %c0_49 = arith.constant 0 : index
    %146 = vector.load %arg6[%c2_46, %c2_47, %c0_48, %c0_49] : memref<3x3x1x64xbf16, #tpu.memory_space<vmem>>, vector<1x1x1x64xbf16>
    %147 = vector.shape_cast %146 : vector<1x1x1x64xbf16> to vector<1x64xbf16>
    %148 = arith.extf %147 : vector<1x64xbf16> to vector<1x64xf32>
    %149 = arith.extf %115 : vector<128x1xbf16> to vector<128x1xf32>
    %150 = vector.broadcast %149 : vector<128x1xf32> to vector<128x64xf32>
    %151 = vector.broadcast %148 : vector<1x64xf32> to vector<128x64xf32>
    %152 = arith.mulf %150, %151 : vector<128x64xf32>
    %153 = arith.addf %140, %152 : vector<128x64xf32>
    %154 = arith.extf %119 : vector<128x1xbf16> to vector<128x1xf32>
    %155 = vector.broadcast %154 : vector<128x1xf32> to vector<128x64xf32>
    %156 = vector.broadcast %148 : vector<1x64xf32> to vector<128x64xf32>
    %157 = arith.mulf %155, %156 : vector<128x64xf32>
    %158 = arith.addf %145, %157 : vector<128x64xf32>
    %c0_50 = arith.constant 0 : index
    %c0_51 = arith.constant 0 : index
    %159 = vector.load %arg7[%c0_50, %c0_51] : memref<1x64xf32, #tpu.memory_space<vmem>>, vector<1x64xf32>
    %160 = arith.maximumf %153, %158 : vector<128x64xf32>
    %161 = vector.extract_strided_slice %160 {offsets = [0, 0], sizes = [8, 64], strides = [1, 1]} : vector<128x64xf32> to vector<8x64xf32>
    %162 = vector.extract_strided_slice %160 {offsets = [8, 0], sizes = [8, 64], strides = [1, 1]} : vector<128x64xf32> to vector<8x64xf32>
    %163 = arith.maximumf %161, %162 : vector<8x64xf32>
    %164 = vector.broadcast %159 : vector<1x64xf32> to vector<8x64xf32>
    %165 = arith.addf %163, %164 : vector<8x64xf32>
    %cst_52 = arith.constant 0.000000e+00 : f32
    %166 = vector.broadcast %cst_52 : f32 to vector<8x64xf32>
    %167 = arith.maximumf %165, %166 : vector<8x64xf32>
    %168 = arith.truncf %167 : vector<8x64xf32> to vector<8x64xbf16>
    %c0_53 = arith.constant 0 : index
    %c0_54 = arith.constant 0 : index
    %c0_55 = arith.constant 0 : index
    %c0_56 = arith.constant 0 : index
    %169 = vector.load %arg8[%c0_53, %c0_54, %c0_55, %c0_56] : memref<1x8x8x64xbf16, #tpu.memory_space<vmem>>, vector<1x1x8x64xbf16>
    %170 = vector.shape_cast %169 : vector<1x1x8x64xbf16> to vector<8x64xbf16>
    %171 = vector.shape_cast %168 : vector<8x64xbf16> to vector<1x1x8x64xbf16>
    tpu.vector_store %arg8[%c0_53, %c0_54, %c0_55, %c0_56], %171 {strides = array<i32>} : memref<1x8x8x64xbf16, #tpu.memory_space<vmem>>, vector<1x1x8x64xbf16>,
    %172 = vector.extract_strided_slice %160 {offsets = [16, 0], sizes = [8, 64], strides = [1, 1]} : vector<128x64xf32> to vector<8x64xf32>
    %173 = vector.extract_strided_slice %160 {offsets = [24, 0], sizes = [8, 64], strides = [1, 1]} : vector<128x64xf32> to vector<8x64xf32>
    %174 = arith.maximumf %172, %173 : vector<8x64xf32>
    %175 = vector.broadcast %159 : vector<1x64xf32> to vector<8x64xf32>
    %176 = arith.addf %174, %175 : vector<8x64xf32>
    %cst_57 = arith.constant 0.000000e+00 : f32
    %177 = vector.broadcast %cst_57 : f32 to vector<8x64xf32>
    %178 = arith.maximumf %176, %177 : vector<8x64xf32>
    %179 = arith.truncf %178 : vector<8x64xf32> to vector<8x64xbf16>
    %c0_58 = arith.constant 0 : index
    %c1_59 = arith.constant 1 : index
    %c0_60 = arith.constant 0 : index
    %c0_61 = arith.constant 0 : index
    %180 = vector.load %arg8[%c0_58, %c1_59, %c0_60, %c0_61] : memref<1x8x8x64xbf16, #tpu.memory_space<vmem>>, vector<1x1x8x64xbf16>
    %181 = vector.shape_cast %180 : vector<1x1x8x64xbf16> to vector<8x64xbf16>
    %182 = vector.shape_cast %179 : vector<8x64xbf16> to vector<1x1x8x64xbf16>
    tpu.vector_store %arg8[%c0_58, %c1_59, %c0_60, %c0_61], %182 {strides = array<i32>} : memref<1x8x8x64xbf16, #tpu.memory_space<vmem>>, vector<1x1x8x64xbf16>,
    %183 = vector.extract_strided_slice %160 {offsets = [32, 0], sizes = [8, 64], strides = [1, 1]} : vector<128x64xf32> to vector<8x64xf32>
    %184 = vector.extract_strided_slice %160 {offsets = [40, 0], sizes = [8, 64], strides = [1, 1]} : vector<128x64xf32> to vector<8x64xf32>
    %185 = arith.maximumf %183, %184 : vector<8x64xf32>
    %186 = vector.broadcast %159 : vector<1x64xf32> to vector<8x64xf32>
    %187 = arith.addf %185, %186 : vector<8x64xf32>
    %cst_62 = arith.constant 0.000000e+00 : f32
    %188 = vector.broadcast %cst_62 : f32 to vector<8x64xf32>
    %189 = arith.maximumf %187, %188 : vector<8x64xf32>
    %190 = arith.truncf %189 : vector<8x64xf32> to vector<8x64xbf16>
    %c0_63 = arith.constant 0 : index
    %c2_64 = arith.constant 2 : index
    %c0_65 = arith.constant 0 : index
    %c0_66 = arith.constant 0 : index
    %191 = vector.load %arg8[%c0_63, %c2_64, %c0_65, %c0_66] : memref<1x8x8x64xbf16, #tpu.memory_space<vmem>>, vector<1x1x8x64xbf16>
    %192 = vector.shape_cast %191 : vector<1x1x8x64xbf16> to vector<8x64xbf16>
    %193 = vector.shape_cast %190 : vector<8x64xbf16> to vector<1x1x8x64xbf16>
    tpu.vector_store %arg8[%c0_63, %c2_64, %c0_65, %c0_66], %193 {strides = array<i32>} : memref<1x8x8x64xbf16, #tpu.memory_space<vmem>>, vector<1x1x8x64xbf16>,
    %194 = vector.extract_strided_slice %160 {offsets = [48, 0], sizes = [8, 64], strides = [1, 1]} : vector<128x64xf32> to vector<8x64xf32>
    %195 = vector.extract_strided_slice %160 {offsets = [56, 0], sizes = [8, 64], strides = [1, 1]} : vector<128x64xf32> to vector<8x64xf32>
    %196 = arith.maximumf %194, %195 : vector<8x64xf32>
    %197 = vector.broadcast %159 : vector<1x64xf32> to vector<8x64xf32>
    %198 = arith.addf %196, %197 : vector<8x64xf32>
    %cst_67 = arith.constant 0.000000e+00 : f32
    %199 = vector.broadcast %cst_67 : f32 to vector<8x64xf32>
    %200 = arith.maximumf %198, %199 : vector<8x64xf32>
    %201 = arith.truncf %200 : vector<8x64xf32> to vector<8x64xbf16>
    %c0_68 = arith.constant 0 : index
    %c3 = arith.constant 3 : index
    %c0_69 = arith.constant 0 : index
    %c0_70 = arith.constant 0 : index
    %202 = vector.load %arg8[%c0_68, %c3, %c0_69, %c0_70] : memref<1x8x8x64xbf16, #tpu.memory_space<vmem>>, vector<1x1x8x64xbf16>
    %203 = vector.shape_cast %202 : vector<1x1x8x64xbf16> to vector<8x64xbf16>
    %204 = vector.shape_cast %201 : vector<8x64xbf16> to vector<1x1x8x64xbf16>
    tpu.vector_store %arg8[%c0_68, %c3, %c0_69, %c0_70], %204 {strides = array<i32>} : memref<1x8x8x64xbf16, #tpu.memory_space<vmem>>, vector<1x1x8x64xbf16>,
    %205 = vector.extract_strided_slice %160 {offsets = [64, 0], sizes = [8, 64], strides = [1, 1]} : vector<128x64xf32> to vector<8x64xf32>
    %206 = vector.extract_strided_slice %160 {offsets = [72, 0], sizes = [8, 64], strides = [1, 1]} : vector<128x64xf32> to vector<8x64xf32>
    %207 = arith.maximumf %205, %206 : vector<8x64xf32>
    %208 = vector.broadcast %159 : vector<1x64xf32> to vector<8x64xf32>
    %209 = arith.addf %207, %208 : vector<8x64xf32>
    %cst_71 = arith.constant 0.000000e+00 : f32
    %210 = vector.broadcast %cst_71 : f32 to vector<8x64xf32>
    %211 = arith.maximumf %209, %210 : vector<8x64xf32>
    %212 = arith.truncf %211 : vector<8x64xf32> to vector<8x64xbf16>
    %c0_72 = arith.constant 0 : index
    %c4 = arith.constant 4 : index
    %c0_73 = arith.constant 0 : index
    %c0_74 = arith.constant 0 : index
    %213 = vector.load %arg8[%c0_72, %c4, %c0_73, %c0_74] : memref<1x8x8x64xbf16, #tpu.memory_space<vmem>>, vector<1x1x8x64xbf16>
    %214 = vector.shape_cast %213 : vector<1x1x8x64xbf16> to vector<8x64xbf16>
    %215 = vector.shape_cast %212 : vector<8x64xbf16> to vector<1x1x8x64xbf16>
    tpu.vector_store %arg8[%c0_72, %c4, %c0_73, %c0_74], %215 {strides = array<i32>} : memref<1x8x8x64xbf16, #tpu.memory_space<vmem>>, vector<1x1x8x64xbf16>,
    %216 = vector.extract_strided_slice %160 {offsets = [80, 0], sizes = [8, 64], strides = [1, 1]} : vector<128x64xf32> to vector<8x64xf32>
    %217 = vector.extract_strided_slice %160 {offsets = [88, 0], sizes = [8, 64], strides = [1, 1]} : vector<128x64xf32> to vector<8x64xf32>
    %218 = arith.maximumf %216, %217 : vector<8x64xf32>
    %219 = vector.broadcast %159 : vector<1x64xf32> to vector<8x64xf32>
    %220 = arith.addf %218, %219 : vector<8x64xf32>
    %cst_75 = arith.constant 0.000000e+00 : f32
    %221 = vector.broadcast %cst_75 : f32 to vector<8x64xf32>
    %222 = arith.maximumf %220, %221 : vector<8x64xf32>
    %223 = arith.truncf %222 : vector<8x64xf32> to vector<8x64xbf16>
    %c0_76 = arith.constant 0 : index
    %c5 = arith.constant 5 : index
    %c0_77 = arith.constant 0 : index
    %c0_78 = arith.constant 0 : index
    %224 = vector.load %arg8[%c0_76, %c5, %c0_77, %c0_78] : memref<1x8x8x64xbf16, #tpu.memory_space<vmem>>, vector<1x1x8x64xbf16>
    %225 = vector.shape_cast %224 : vector<1x1x8x64xbf16> to vector<8x64xbf16>
    %226 = vector.shape_cast %223 : vector<8x64xbf16> to vector<1x1x8x64xbf16>
    tpu.vector_store %arg8[%c0_76, %c5, %c0_77, %c0_78], %226 {strides = array<i32>} : memref<1x8x8x64xbf16, #tpu.memory_space<vmem>>, vector<1x1x8x64xbf16>,
    %227 = vector.extract_strided_slice %160 {offsets = [96, 0], sizes = [8, 64], strides = [1, 1]} : vector<128x64xf32> to vector<8x64xf32>
    %228 = vector.extract_strided_slice %160 {offsets = [104, 0], sizes = [8, 64], strides = [1, 1]} : vector<128x64xf32> to vector<8x64xf32>
    %229 = arith.maximumf %227, %228 : vector<8x64xf32>
    %230 = vector.broadcast %159 : vector<1x64xf32> to vector<8x64xf32>
    %231 = arith.addf %229, %230 : vector<8x64xf32>
    %cst_79 = arith.constant 0.000000e+00 : f32
    %232 = vector.broadcast %cst_79 : f32 to vector<8x64xf32>
    %233 = arith.maximumf %231, %232 : vector<8x64xf32>
    %234 = arith.truncf %233 : vector<8x64xf32> to vector<8x64xbf16>
    %c0_80 = arith.constant 0 : index
    %c6 = arith.constant 6 : index
    %c0_81 = arith.constant 0 : index
    %c0_82 = arith.constant 0 : index
    %235 = vector.load %arg8[%c0_80, %c6, %c0_81, %c0_82] : memref<1x8x8x64xbf16, #tpu.memory_space<vmem>>, vector<1x1x8x64xbf16>
    %236 = vector.shape_cast %235 : vector<1x1x8x64xbf16> to vector<8x64xbf16>
    %237 = vector.shape_cast %234 : vector<8x64xbf16> to vector<1x1x8x64xbf16>
    tpu.vector_store %arg8[%c0_80, %c6, %c0_81, %c0_82], %237 {strides = array<i32>} : memref<1x8x8x64xbf16, #tpu.memory_space<vmem>>, vector<1x1x8x64xbf16>,
    %238 = vector.extract_strided_slice %160 {offsets = [112, 0], sizes = [8, 64], strides = [1, 1]} : vector<128x64xf32> to vector<8x64xf32>
    %239 = vector.extract_strided_slice %160 {offsets = [120, 0], sizes = [8, 64], strides = [1, 1]} : vector<128x64xf32> to vector<8x64xf32>
    %240 = arith.maximumf %238, %239 : vector<8x64xf32>
    %241 = vector.broadcast %159 : vector<1x64xf32> to vector<8x64xf32>
    %242 = arith.addf %240, %241 : vector<8x64xf32>
    %cst_83 = arith.constant 0.000000e+00 : f32
    %243 = vector.broadcast %cst_83 : f32 to vector<8x64xf32>
    %244 = arith.maximumf %242, %243 : vector<8x64xf32>
    %245 = arith.truncf %244 : vector<8x64xf32> to vector<8x64xbf16>
    %c0_84 = arith.constant 0 : index
    %c7 = arith.constant 7 : index
    %c0_85 = arith.constant 0 : index
    %c0_86 = arith.constant 0 : index
    %246 = vector.load %arg8[%c0_84, %c7, %c0_85, %c0_86] : memref<1x8x8x64xbf16, #tpu.memory_space<vmem>>, vector<1x1x8x64xbf16>
    %247 = vector.shape_cast %246 : vector<1x1x8x64xbf16> to vector<8x64xbf16>
    %248 = vector.shape_cast %245 : vector<8x64xbf16> to vector<1x1x8x64xbf16>
    tpu.vector_store %arg8[%c0_84, %c7, %c0_85, %c0_86], %248 {strides = array<i32>} : memref<1x8x8x64xbf16, #tpu.memory_space<vmem>>, vector<1x1x8x64xbf16>,
    return
  }
  func.func @transform_0(%arg0: i32, %arg1: i32) -> (i32, i32, i32, i32) {
    %c0_i32 = arith.constant 0 : i32
    %c0_i32_0 = arith.constant 0 : i32
    %c0_i32_1 = arith.constant 0 : i32
    return %arg0, %arg1, %c0_i32, %c0_i32_0 : i32, i32, i32, i32
  }
  func.func @transform_1(%arg0: i32, %arg1: i32) -> (i32, i32, i32, i32) {
    %c1_i32 = arith.constant 1 : i32
    %0 = arith.addi %arg1, %c1_i32 : i32
    %c8_i32 = arith.constant 8 : i32
    %1 = arith.muli %c8_i32, %0 : i32
    %c0_i32 = arith.constant 0 : i32
    %c0_i32_0 = arith.constant 0 : i32
    %c0_i32_1 = arith.constant 0 : i32
    return %arg0, %1, %c0_i32, %c0_i32_0 : i32, i32, i32, i32
  }
  func.func @transform_2(%arg0: i32, %arg1: i32) -> (i32, i32, i32, i32) {
    %c0_i32 = arith.constant 0 : i32
    %c0_i32_0 = arith.constant 0 : i32
    %c0_i32_1 = arith.constant 0 : i32
    return %arg0, %arg1, %c0_i32, %c0_i32_0 : i32, i32, i32, i32
  }
  func.func @transform_3(%arg0: i32, %arg1: i32) -> (i32, i32, i32, i32) {
    %c1_i32 = arith.constant 1 : i32
    %0 = arith.addi %arg1, %c1_i32 : i32
    %c8_i32 = arith.constant 8 : i32
    %1 = arith.muli %c8_i32, %0 : i32
    %c0_i32 = arith.constant 0 : i32
    %c0_i32_0 = arith.constant 0 : i32
    %c0_i32_1 = arith.constant 0 : i32
    return %arg0, %1, %c0_i32, %c0_i32_0 : i32, i32, i32, i32
  }
  func.func @transform_4(%arg0: i32, %arg1: i32) -> (i32, i32, i32, i32) {
    %c0_i32 = arith.constant 0 : i32
    %c0_i32_0 = arith.constant 0 : i32
    %c0_i32_1 = arith.constant 0 : i32
    %c0_i32_2 = arith.constant 0 : i32
    %c0_i32_3 = arith.constant 0 : i32
    return %c0_i32, %c0_i32_0, %c0_i32_1, %c0_i32_2 : i32, i32, i32, i32
  }
  func.func @transform_5(%arg0: i32, %arg1: i32) -> (i32, i32) {
    %c0_i32 = arith.constant 0 : i32
    %c0_i32_0 = arith.constant 0 : i32
    %c0_i32_1 = arith.constant 0 : i32
    return %c0_i32, %c0_i32_0 : i32, i32
  }
  func.func @transform_6(%arg0: i32, %arg1: i32) -> (i32, i32, i32, i32) {
    %c0_i32 = arith.constant 0 : i32
    %c0_i32_0 = arith.constant 0 : i32
    %c0_i32_1 = arith.constant 0 : i32
    return %arg0, %arg1, %c0_i32, %c0_i32_0 : i32, i32, i32, i32
  }
}

module attributes {stable_mosaic.version = 11 : i64} {
  func.func @_conv3x3_relu_pool_kernel(%arg0: i32, %arg1: i32, %arg2: memref<1x8x9x64xbf16, #tpu.memory_space<vmem>>, %arg3: memref<1x2x9x64xbf16, #tpu.memory_space<vmem>>, %arg4: memref<1x8x9x64xbf16, #tpu.memory_space<vmem>>, %arg5: memref<1x2x9x64xbf16, #tpu.memory_space<vmem>>, %arg6: memref<3x3x64x128xbf16, #tpu.memory_space<vmem>>, %arg7: memref<1x128xf32, #tpu.memory_space<vmem>>, %arg8: memref<1x4x8x128xbf16, #tpu.memory_space<vmem>>) attributes {dimension_semantics = [#tpu.dimension_semantics<parallel>, #tpu.dimension_semantics<parallel>], iteration_bounds = array<i64: 6, 1>, scalar_prefetch = 0 : i64, scratch_operands = 0 : i64, tpu.core_type = #tpu.core_type<tc>, window_params = [{transform_indices = @transform_0, window_bounds = array<i64: 1, 8, 9, 64>}, {transform_indices = @transform_1, window_bounds = array<i64: 1, 2, 9, 64>}, {transform_indices = @transform_2, window_bounds = array<i64: 1, 8, 9, 64>}, {transform_indices = @transform_3, window_bounds = array<i64: 1, 2, 9, 64>}, {pipeline_mode = #tpu.pipeline_mode<synchronous>, transform_indices = @transform_4, window_bounds = array<i64: 3, 3, 64, 128>}, {pipeline_mode = #tpu.pipeline_mode<synchronous>, transform_indices = @transform_5, window_bounds = array<i64: 1, 128>}, {transform_indices = @transform_6, window_bounds = array<i64: 1, 4, 8, 128>}]} {
    %c0 = arith.constant 0 : index
    %c0_0 = arith.constant 0 : index
    %c0_1 = arith.constant 0 : index
    %c0_2 = arith.constant 0 : index
    %0 = vector.load %arg2[%c0, %c0_0, %c0_1, %c0_2] : memref<1x8x9x64xbf16, #tpu.memory_space<vmem>>, vector<1x8x9x64xbf16>
    %1 = vector.shape_cast %0 : vector<1x8x9x64xbf16> to vector<8x9x64xbf16>
    %c0_3 = arith.constant 0 : index
    %c0_4 = arith.constant 0 : index
    %c0_5 = arith.constant 0 : index
    %c0_6 = arith.constant 0 : index
    %2 = vector.load %arg3[%c0_3, %c0_4, %c0_5, %c0_6] : memref<1x2x9x64xbf16, #tpu.memory_space<vmem>>, vector<1x2x9x64xbf16>
    %3 = vector.shape_cast %2 : vector<1x2x9x64xbf16> to vector<2x9x64xbf16>
    %4 = tpu.concatenate %1, %3 in 0 : vector<8x9x64xbf16>, vector<2x9x64xbf16> -> vector<10x9x64xbf16>
    %c0_7 = arith.constant 0 : index
    %c0_8 = arith.constant 0 : index
    %c0_9 = arith.constant 0 : index
    %c0_10 = arith.constant 0 : index
    %5 = vector.load %arg4[%c0_7, %c0_8, %c0_9, %c0_10] : memref<1x8x9x64xbf16, #tpu.memory_space<vmem>>, vector<1x8x9x64xbf16>
    %6 = vector.shape_cast %5 : vector<1x8x9x64xbf16> to vector<8x9x64xbf16>
    %c0_11 = arith.constant 0 : index
    %c0_12 = arith.constant 0 : index
    %c0_13 = arith.constant 0 : index
    %c0_14 = arith.constant 0 : index
    %7 = vector.load %arg5[%c0_11, %c0_12, %c0_13, %c0_14] : memref<1x2x9x64xbf16, #tpu.memory_space<vmem>>, vector<1x2x9x64xbf16>
    %8 = vector.shape_cast %7 : vector<1x2x9x64xbf16> to vector<2x9x64xbf16>
    %9 = tpu.concatenate %6, %8 in 0 : vector<8x9x64xbf16>, vector<2x9x64xbf16> -> vector<10x9x64xbf16>
    %cst = arith.constant 0.000000e+00 : f32
    %10 = vector.broadcast %cst : f32 to vector<64x128xf32>
    %cst_15 = arith.constant 0.000000e+00 : f32
    %11 = vector.broadcast %cst_15 : f32 to vector<64x128xf32>
    %12 = vector.extract_strided_slice %4 {offsets = [0, 0, 0], sizes = [8, 9, 64], strides = [1, 1, 1]} : vector<10x9x64xbf16> to vector<8x9x64xbf16>
    %13 = vector.extract_strided_slice %9 {offsets = [0, 0, 0], sizes = [8, 9, 64], strides = [1, 1, 1]} : vector<10x9x64xbf16> to vector<8x9x64xbf16>
    %14 = vector.extract_strided_slice %12 {offsets = [0, 0, 0], sizes = [8, 8, 64], strides = [1, 1, 1]} : vector<8x9x64xbf16> to vector<8x8x64xbf16>
    %15 = vector.shape_cast %14 : vector<8x8x64xbf16> to vector<64x64xbf16>
    %16 = vector.extract_strided_slice %12 {offsets = [0, 1, 0], sizes = [8, 8, 64], strides = [1, 1, 1]} : vector<8x9x64xbf16> to vector<8x8x64xbf16>
    %17 = vector.shape_cast %16 : vector<8x8x64xbf16> to vector<64x64xbf16>
    %18 = vector.extract_strided_slice %13 {offsets = [0, 0, 0], sizes = [8, 8, 64], strides = [1, 1, 1]} : vector<8x9x64xbf16> to vector<8x8x64xbf16>
    %19 = vector.shape_cast %18 : vector<8x8x64xbf16> to vector<64x64xbf16>
    %20 = vector.extract_strided_slice %13 {offsets = [0, 1, 0], sizes = [8, 8, 64], strides = [1, 1, 1]} : vector<8x9x64xbf16> to vector<8x8x64xbf16>
    %21 = vector.shape_cast %20 : vector<8x8x64xbf16> to vector<64x64xbf16>
    %c0_16 = arith.constant 0 : index
    %c0_17 = arith.constant 0 : index
    %c0_18 = arith.constant 0 : index
    %c0_19 = arith.constant 0 : index
    %22 = vector.load %arg6[%c0_16, %c0_17, %c0_18, %c0_19] : memref<3x3x64x128xbf16, #tpu.memory_space<vmem>>, vector<1x1x64x128xbf16>
    %23 = vector.shape_cast %22 : vector<1x1x64x128xbf16> to vector<64x128xbf16>
    %cst_20 = arith.constant dense<0.000000e+00> : vector<64x128xf32>
    %24 = tpu.matmul %15, %23, %cst_20 {dimension_numbers = #tpu.dot_dimension_numbers<[1], [0], [0], [1], [0, 0, 1, 1], [], []>} : vector<64x64xbf16>, vector<64x128xbf16>, vector<64x128xf32> -> vector<64x128xf32>
    %25 = arith.addf %10, %24 : vector<64x128xf32>
    %cst_21 = arith.constant dense<0.000000e+00> : vector<64x128xf32>
    %26 = tpu.matmul %19, %23, %cst_21 {dimension_numbers = #tpu.dot_dimension_numbers<[1], [0], [0], [1], [0, 0, 1, 1], [], []>} : vector<64x64xbf16>, vector<64x128xbf16>, vector<64x128xf32> -> vector<64x128xf32>
    %27 = arith.addf %11, %26 : vector<64x128xf32>
    %c0_22 = arith.constant 0 : index
    %c1 = arith.constant 1 : index
    %c0_23 = arith.constant 0 : index
    %c0_24 = arith.constant 0 : index
    %28 = vector.load %arg6[%c0_22, %c1, %c0_23, %c0_24] : memref<3x3x64x128xbf16, #tpu.memory_space<vmem>>, vector<1x1x64x128xbf16>
    %29 = vector.shape_cast %28 : vector<1x1x64x128xbf16> to vector<64x128xbf16>
    %cst_25 = arith.constant dense<0.000000e+00> : vector<64x128xf32>
    %30 = tpu.matmul %19, %29, %cst_25 {dimension_numbers = #tpu.dot_dimension_numbers<[1], [0], [0], [1], [0, 0, 1, 1], [], []>} : vector<64x64xbf16>, vector<64x128xbf16>, vector<64x128xf32> -> vector<64x128xf32>
    %31 = arith.addf %25, %30 : vector<64x128xf32>
    %cst_26 = arith.constant dense<0.000000e+00> : vector<64x128xf32>
    %32 = tpu.matmul %17, %29, %cst_26 {dimension_numbers = #tpu.dot_dimension_numbers<[1], [0], [0], [1], [0, 0, 1, 1], [], []>} : vector<64x64xbf16>, vector<64x128xbf16>, vector<64x128xf32> -> vector<64x128xf32>
    %33 = arith.addf %27, %32 : vector<64x128xf32>
    %c0_27 = arith.constant 0 : index
    %c2 = arith.constant 2 : index
    %c0_28 = arith.constant 0 : index
    %c0_29 = arith.constant 0 : index
    %34 = vector.load %arg6[%c0_27, %c2, %c0_28, %c0_29] : memref<3x3x64x128xbf16, #tpu.memory_space<vmem>>, vector<1x1x64x128xbf16>
    %35 = vector.shape_cast %34 : vector<1x1x64x128xbf16> to vector<64x128xbf16>
    %cst_30 = arith.constant dense<0.000000e+00> : vector<64x128xf32>
    %36 = tpu.matmul %17, %35, %cst_30 {dimension_numbers = #tpu.dot_dimension_numbers<[1], [0], [0], [1], [0, 0, 1, 1], [], []>} : vector<64x64xbf16>, vector<64x128xbf16>, vector<64x128xf32> -> vector<64x128xf32>
    %37 = arith.addf %31, %36 : vector<64x128xf32>
    %cst_31 = arith.constant dense<0.000000e+00> : vector<64x128xf32>
    %38 = tpu.matmul %21, %35, %cst_31 {dimension_numbers = #tpu.dot_dimension_numbers<[1], [0], [0], [1], [0, 0, 1, 1], [], []>} : vector<64x64xbf16>, vector<64x128xbf16>, vector<64x128xf32> -> vector<64x128xf32>
    %39 = arith.addf %33, %38 : vector<64x128xf32>
    %40 = vector.extract_strided_slice %4 {offsets = [1, 0, 0], sizes = [8, 9, 64], strides = [1, 1, 1]} : vector<10x9x64xbf16> to vector<8x9x64xbf16>
    %41 = vector.extract_strided_slice %9 {offsets = [1, 0, 0], sizes = [8, 9, 64], strides = [1, 1, 1]} : vector<10x9x64xbf16> to vector<8x9x64xbf16>
    %42 = vector.extract_strided_slice %40 {offsets = [0, 0, 0], sizes = [8, 8, 64], strides = [1, 1, 1]} : vector<8x9x64xbf16> to vector<8x8x64xbf16>
    %43 = vector.shape_cast %42 : vector<8x8x64xbf16> to vector<64x64xbf16>
    %44 = vector.extract_strided_slice %40 {offsets = [0, 1, 0], sizes = [8, 8, 64], strides = [1, 1, 1]} : vector<8x9x64xbf16> to vector<8x8x64xbf16>
    %45 = vector.shape_cast %44 : vector<8x8x64xbf16> to vector<64x64xbf16>
    %46 = vector.extract_strided_slice %41 {offsets = [0, 0, 0], sizes = [8, 8, 64], strides = [1, 1, 1]} : vector<8x9x64xbf16> to vector<8x8x64xbf16>
    %47 = vector.shape_cast %46 : vector<8x8x64xbf16> to vector<64x64xbf16>
    %48 = vector.extract_strided_slice %41 {offsets = [0, 1, 0], sizes = [8, 8, 64], strides = [1, 1, 1]} : vector<8x9x64xbf16> to vector<8x8x64xbf16>
    %49 = vector.shape_cast %48 : vector<8x8x64xbf16> to vector<64x64xbf16>
    %c1_32 = arith.constant 1 : index
    %c0_33 = arith.constant 0 : index
    %c0_34 = arith.constant 0 : index
    %c0_35 = arith.constant 0 : index
    %50 = vector.load %arg6[%c1_32, %c0_33, %c0_34, %c0_35] : memref<3x3x64x128xbf16, #tpu.memory_space<vmem>>, vector<1x1x64x128xbf16>
    %51 = vector.shape_cast %50 : vector<1x1x64x128xbf16> to vector<64x128xbf16>
    %cst_36 = arith.constant dense<0.000000e+00> : vector<64x128xf32>
    %52 = tpu.matmul %43, %51, %cst_36 {dimension_numbers = #tpu.dot_dimension_numbers<[1], [0], [0], [1], [0, 0, 1, 1], [], []>} : vector<64x64xbf16>, vector<64x128xbf16>, vector<64x128xf32> -> vector<64x128xf32>
    %53 = arith.addf %37, %52 : vector<64x128xf32>
    %cst_37 = arith.constant dense<0.000000e+00> : vector<64x128xf32>
    %54 = tpu.matmul %47, %51, %cst_37 {dimension_numbers = #tpu.dot_dimension_numbers<[1], [0], [0], [1], [0, 0, 1, 1], [], []>} : vector<64x64xbf16>, vector<64x128xbf16>, vector<64x128xf32> -> vector<64x128xf32>
    %55 = arith.addf %39, %54 : vector<64x128xf32>
    %c1_38 = arith.constant 1 : index
    %c1_39 = arith.constant 1 : index
    %c0_40 = arith.constant 0 : index
    %c0_41 = arith.constant 0 : index
    %56 = vector.load %arg6[%c1_38, %c1_39, %c0_40, %c0_41] : memref<3x3x64x128xbf16, #tpu.memory_space<vmem>>, vector<1x1x64x128xbf16>
    %57 = vector.shape_cast %56 : vector<1x1x64x128xbf16> to vector<64x128xbf16>
    %cst_42 = arith.constant dense<0.000000e+00> : vector<64x128xf32>
    %58 = tpu.matmul %47, %57, %cst_42 {dimension_numbers = #tpu.dot_dimension_numbers<[1], [0], [0], [1], [0, 0, 1, 1], [], []>} : vector<64x64xbf16>, vector<64x128xbf16>, vector<64x128xf32> -> vector<64x128xf32>
    %59 = arith.addf %53, %58 : vector<64x128xf32>
    %cst_43 = arith.constant dense<0.000000e+00> : vector<64x128xf32>
    %60 = tpu.matmul %45, %57, %cst_43 {dimension_numbers = #tpu.dot_dimension_numbers<[1], [0], [0], [1], [0, 0, 1, 1], [], []>} : vector<64x64xbf16>, vector<64x128xbf16>, vector<64x128xf32> -> vector<64x128xf32>
    %61 = arith.addf %55, %60 : vector<64x128xf32>
    %c1_44 = arith.constant 1 : index
    %c2_45 = arith.constant 2 : index
    %c0_46 = arith.constant 0 : index
    %c0_47 = arith.constant 0 : index
    %62 = vector.load %arg6[%c1_44, %c2_45, %c0_46, %c0_47] : memref<3x3x64x128xbf16, #tpu.memory_space<vmem>>, vector<1x1x64x128xbf16>
    %63 = vector.shape_cast %62 : vector<1x1x64x128xbf16> to vector<64x128xbf16>
    %cst_48 = arith.constant dense<0.000000e+00> : vector<64x128xf32>
    %64 = tpu.matmul %45, %63, %cst_48 {dimension_numbers = #tpu.dot_dimension_numbers<[1], [0], [0], [1], [0, 0, 1, 1], [], []>} : vector<64x64xbf16>, vector<64x128xbf16>, vector<64x128xf32> -> vector<64x128xf32>
    %65 = arith.addf %59, %64 : vector<64x128xf32>
    %cst_49 = arith.constant dense<0.000000e+00> : vector<64x128xf32>
    %66 = tpu.matmul %49, %63, %cst_49 {dimension_numbers = #tpu.dot_dimension_numbers<[1], [0], [0], [1], [0, 0, 1, 1], [], []>} : vector<64x64xbf16>, vector<64x128xbf16>, vector<64x128xf32> -> vector<64x128xf32>
    %67 = arith.addf %61, %66 : vector<64x128xf32>
    %68 = vector.extract_strided_slice %4 {offsets = [2, 0, 0], sizes = [8, 9, 64], strides = [1, 1, 1]} : vector<10x9x64xbf16> to vector<8x9x64xbf16>
    %69 = vector.extract_strided_slice %9 {offsets = [2, 0, 0], sizes = [8, 9, 64], strides = [1, 1, 1]} : vector<10x9x64xbf16> to vector<8x9x64xbf16>
    %70 = vector.extract_strided_slice %68 {offsets = [0, 0, 0], sizes = [8, 8, 64], strides = [1, 1, 1]} : vector<8x9x64xbf16> to vector<8x8x64xbf16>
    %71 = vector.shape_cast %70 : vector<8x8x64xbf16> to vector<64x64xbf16>
    %72 = vector.extract_strided_slice %68 {offsets = [0, 1, 0], sizes = [8, 8, 64], strides = [1, 1, 1]} : vector<8x9x64xbf16> to vector<8x8x64xbf16>
    %73 = vector.shape_cast %72 : vector<8x8x64xbf16> to vector<64x64xbf16>
    %74 = vector.extract_strided_slice %69 {offsets = [0, 0, 0], sizes = [8, 8, 64], strides = [1, 1, 1]} : vector<8x9x64xbf16> to vector<8x8x64xbf16>
    %75 = vector.shape_cast %74 : vector<8x8x64xbf16> to vector<64x64xbf16>
    %76 = vector.extract_strided_slice %69 {offsets = [0, 1, 0], sizes = [8, 8, 64], strides = [1, 1, 1]} : vector<8x9x64xbf16> to vector<8x8x64xbf16>
    %77 = vector.shape_cast %76 : vector<8x8x64xbf16> to vector<64x64xbf16>
    %c2_50 = arith.constant 2 : index
    %c0_51 = arith.constant 0 : index
    %c0_52 = arith.constant 0 : index
    %c0_53 = arith.constant 0 : index
    %78 = vector.load %arg6[%c2_50, %c0_51, %c0_52, %c0_53] : memref<3x3x64x128xbf16, #tpu.memory_space<vmem>>, vector<1x1x64x128xbf16>
    %79 = vector.shape_cast %78 : vector<1x1x64x128xbf16> to vector<64x128xbf16>
    %cst_54 = arith.constant dense<0.000000e+00> : vector<64x128xf32>
    %80 = tpu.matmul %71, %79, %cst_54 {dimension_numbers = #tpu.dot_dimension_numbers<[1], [0], [0], [1], [0, 0, 1, 1], [], []>} : vector<64x64xbf16>, vector<64x128xbf16>, vector<64x128xf32> -> vector<64x128xf32>
    %81 = arith.addf %65, %80 : vector<64x128xf32>
    %cst_55 = arith.constant dense<0.000000e+00> : vector<64x128xf32>
    %82 = tpu.matmul %75, %79, %cst_55 {dimension_numbers = #tpu.dot_dimension_numbers<[1], [0], [0], [1], [0, 0, 1, 1], [], []>} : vector<64x64xbf16>, vector<64x128xbf16>, vector<64x128xf32> -> vector<64x128xf32>
    %83 = arith.addf %67, %82 : vector<64x128xf32>
    %c2_56 = arith.constant 2 : index
    %c1_57 = arith.constant 1 : index
    %c0_58 = arith.constant 0 : index
    %c0_59 = arith.constant 0 : index
    %84 = vector.load %arg6[%c2_56, %c1_57, %c0_58, %c0_59] : memref<3x3x64x128xbf16, #tpu.memory_space<vmem>>, vector<1x1x64x128xbf16>
    %85 = vector.shape_cast %84 : vector<1x1x64x128xbf16> to vector<64x128xbf16>
    %cst_60 = arith.constant dense<0.000000e+00> : vector<64x128xf32>
    %86 = tpu.matmul %75, %85, %cst_60 {dimension_numbers = #tpu.dot_dimension_numbers<[1], [0], [0], [1], [0, 0, 1, 1], [], []>} : vector<64x64xbf16>, vector<64x128xbf16>, vector<64x128xf32> -> vector<64x128xf32>
    %87 = arith.addf %81, %86 : vector<64x128xf32>
    %cst_61 = arith.constant dense<0.000000e+00> : vector<64x128xf32>
    %88 = tpu.matmul %73, %85, %cst_61 {dimension_numbers = #tpu.dot_dimension_numbers<[1], [0], [0], [1], [0, 0, 1, 1], [], []>} : vector<64x64xbf16>, vector<64x128xbf16>, vector<64x128xf32> -> vector<64x128xf32>
    %89 = arith.addf %83, %88 : vector<64x128xf32>
    %c2_62 = arith.constant 2 : index
    %c2_63 = arith.constant 2 : index
    %c0_64 = arith.constant 0 : index
    %c0_65 = arith.constant 0 : index
    %90 = vector.load %arg6[%c2_62, %c2_63, %c0_64, %c0_65] : memref<3x3x64x128xbf16, #tpu.memory_space<vmem>>, vector<1x1x64x128xbf16>
    %91 = vector.shape_cast %90 : vector<1x1x64x128xbf16> to vector<64x128xbf16>
    %cst_66 = arith.constant dense<0.000000e+00> : vector<64x128xf32>
    %92 = tpu.matmul %73, %91, %cst_66 {dimension_numbers = #tpu.dot_dimension_numbers<[1], [0], [0], [1], [0, 0, 1, 1], [], []>} : vector<64x64xbf16>, vector<64x128xbf16>, vector<64x128xf32> -> vector<64x128xf32>
    %93 = arith.addf %87, %92 : vector<64x128xf32>
    %cst_67 = arith.constant dense<0.000000e+00> : vector<64x128xf32>
    %94 = tpu.matmul %77, %91, %cst_67 {dimension_numbers = #tpu.dot_dimension_numbers<[1], [0], [0], [1], [0, 0, 1, 1], [], []>} : vector<64x64xbf16>, vector<64x128xbf16>, vector<64x128xf32> -> vector<64x128xf32>
    %95 = arith.addf %89, %94 : vector<64x128xf32>
    %c0_68 = arith.constant 0 : index
    %c0_69 = arith.constant 0 : index
    %96 = vector.load %arg7[%c0_68, %c0_69] : memref<1x128xf32, #tpu.memory_space<vmem>>, vector<1x128xf32>
    %97 = arith.maximumf %93, %95 : vector<64x128xf32>
    %98 = vector.extract_strided_slice %97 {offsets = [0, 0], sizes = [8, 128], strides = [1, 1]} : vector<64x128xf32> to vector<8x128xf32>
    %99 = vector.extract_strided_slice %97 {offsets = [8, 0], sizes = [8, 128], strides = [1, 1]} : vector<64x128xf32> to vector<8x128xf32>
    %100 = arith.maximumf %98, %99 : vector<8x128xf32>
    %101 = vector.broadcast %96 : vector<1x128xf32> to vector<8x128xf32>
    %102 = arith.addf %100, %101 : vector<8x128xf32>
    %cst_70 = arith.constant 0.000000e+00 : f32
    %103 = vector.broadcast %cst_70 : f32 to vector<8x128xf32>
    %104 = arith.maximumf %102, %103 : vector<8x128xf32>
    %105 = arith.truncf %104 : vector<8x128xf32> to vector<8x128xbf16>
    %c0_71 = arith.constant 0 : index
    %c0_72 = arith.constant 0 : index
    %c0_73 = arith.constant 0 : index
    %c0_74 = arith.constant 0 : index
    %106 = vector.load %arg8[%c0_71, %c0_72, %c0_73, %c0_74] : memref<1x4x8x128xbf16, #tpu.memory_space<vmem>>, vector<1x1x8x128xbf16>
    %107 = vector.shape_cast %106 : vector<1x1x8x128xbf16> to vector<8x128xbf16>
    %108 = vector.shape_cast %105 : vector<8x128xbf16> to vector<1x1x8x128xbf16>
    tpu.vector_store %arg8[%c0_71, %c0_72, %c0_73, %c0_74], %108 {strides = array<i32>} : memref<1x4x8x128xbf16, #tpu.memory_space<vmem>>, vector<1x1x8x128xbf16>,
    %109 = vector.extract_strided_slice %97 {offsets = [16, 0], sizes = [8, 128], strides = [1, 1]} : vector<64x128xf32> to vector<8x128xf32>
    %110 = vector.extract_strided_slice %97 {offsets = [24, 0], sizes = [8, 128], strides = [1, 1]} : vector<64x128xf32> to vector<8x128xf32>
    %111 = arith.maximumf %109, %110 : vector<8x128xf32>
    %112 = vector.broadcast %96 : vector<1x128xf32> to vector<8x128xf32>
    %113 = arith.addf %111, %112 : vector<8x128xf32>
    %cst_75 = arith.constant 0.000000e+00 : f32
    %114 = vector.broadcast %cst_75 : f32 to vector<8x128xf32>
    %115 = arith.maximumf %113, %114 : vector<8x128xf32>
    %116 = arith.truncf %115 : vector<8x128xf32> to vector<8x128xbf16>
    %c0_76 = arith.constant 0 : index
    %c1_77 = arith.constant 1 : index
    %c0_78 = arith.constant 0 : index
    %c0_79 = arith.constant 0 : index
    %117 = vector.load %arg8[%c0_76, %c1_77, %c0_78, %c0_79] : memref<1x4x8x128xbf16, #tpu.memory_space<vmem>>, vector<1x1x8x128xbf16>
    %118 = vector.shape_cast %117 : vector<1x1x8x128xbf16> to vector<8x128xbf16>
    %119 = vector.shape_cast %116 : vector<8x128xbf16> to vector<1x1x8x128xbf16>
    tpu.vector_store %arg8[%c0_76, %c1_77, %c0_78, %c0_79], %119 {strides = array<i32>} : memref<1x4x8x128xbf16, #tpu.memory_space<vmem>>, vector<1x1x8x128xbf16>,
    %120 = vector.extract_strided_slice %97 {offsets = [32, 0], sizes = [8, 128], strides = [1, 1]} : vector<64x128xf32> to vector<8x128xf32>
    %121 = vector.extract_strided_slice %97 {offsets = [40, 0], sizes = [8, 128], strides = [1, 1]} : vector<64x128xf32> to vector<8x128xf32>
    %122 = arith.maximumf %120, %121 : vector<8x128xf32>
    %123 = vector.broadcast %96 : vector<1x128xf32> to vector<8x128xf32>
    %124 = arith.addf %122, %123 : vector<8x128xf32>
    %cst_80 = arith.constant 0.000000e+00 : f32
    %125 = vector.broadcast %cst_80 : f32 to vector<8x128xf32>
    %126 = arith.maximumf %124, %125 : vector<8x128xf32>
    %127 = arith.truncf %126 : vector<8x128xf32> to vector<8x128xbf16>
    %c0_81 = arith.constant 0 : index
    %c2_82 = arith.constant 2 : index
    %c0_83 = arith.constant 0 : index
    %c0_84 = arith.constant 0 : index
    %128 = vector.load %arg8[%c0_81, %c2_82, %c0_83, %c0_84] : memref<1x4x8x128xbf16, #tpu.memory_space<vmem>>, vector<1x1x8x128xbf16>
    %129 = vector.shape_cast %128 : vector<1x1x8x128xbf16> to vector<8x128xbf16>
    %130 = vector.shape_cast %127 : vector<8x128xbf16> to vector<1x1x8x128xbf16>
    tpu.vector_store %arg8[%c0_81, %c2_82, %c0_83, %c0_84], %130 {strides = array<i32>} : memref<1x4x8x128xbf16, #tpu.memory_space<vmem>>, vector<1x1x8x128xbf16>,
    %131 = vector.extract_strided_slice %97 {offsets = [48, 0], sizes = [8, 128], strides = [1, 1]} : vector<64x128xf32> to vector<8x128xf32>
    %132 = vector.extract_strided_slice %97 {offsets = [56, 0], sizes = [8, 128], strides = [1, 1]} : vector<64x128xf32> to vector<8x128xf32>
    %133 = arith.maximumf %131, %132 : vector<8x128xf32>
    %134 = vector.broadcast %96 : vector<1x128xf32> to vector<8x128xf32>
    %135 = arith.addf %133, %134 : vector<8x128xf32>
    %cst_85 = arith.constant 0.000000e+00 : f32
    %136 = vector.broadcast %cst_85 : f32 to vector<8x128xf32>
    %137 = arith.maximumf %135, %136 : vector<8x128xf32>
    %138 = arith.truncf %137 : vector<8x128xf32> to vector<8x128xbf16>
    %c0_86 = arith.constant 0 : index
    %c3 = arith.constant 3 : index
    %c0_87 = arith.constant 0 : index
    %c0_88 = arith.constant 0 : index
    %139 = vector.load %arg8[%c0_86, %c3, %c0_87, %c0_88] : memref<1x4x8x128xbf16, #tpu.memory_space<vmem>>, vector<1x1x8x128xbf16>
    %140 = vector.shape_cast %139 : vector<1x1x8x128xbf16> to vector<8x128xbf16>
    %141 = vector.shape_cast %138 : vector<8x128xbf16> to vector<1x1x8x128xbf16>
    tpu.vector_store %arg8[%c0_86, %c3, %c0_87, %c0_88], %141 {strides = array<i32>} : memref<1x4x8x128xbf16, #tpu.memory_space<vmem>>, vector<1x1x8x128xbf16>,
    return
  }
  func.func @transform_0(%arg0: i32, %arg1: i32) -> (i32, i32, i32, i32) {
    %c0_i32 = arith.constant 0 : i32
    %c0_i32_0 = arith.constant 0 : i32
    %c0_i32_1 = arith.constant 0 : i32
    return %arg0, %arg1, %c0_i32, %c0_i32_0 : i32, i32, i32, i32
  }
  func.func @transform_1(%arg0: i32, %arg1: i32) -> (i32, i32, i32, i32) {
    %c1_i32 = arith.constant 1 : i32
    %0 = arith.addi %arg1, %c1_i32 : i32
    %c4_i32 = arith.constant 4 : i32
    %1 = arith.muli %c4_i32, %0 : i32
    %c0_i32 = arith.constant 0 : i32
    %c0_i32_0 = arith.constant 0 : i32
    %c0_i32_1 = arith.constant 0 : i32
    return %arg0, %1, %c0_i32, %c0_i32_0 : i32, i32, i32, i32
  }
  func.func @transform_2(%arg0: i32, %arg1: i32) -> (i32, i32, i32, i32) {
    %c0_i32 = arith.constant 0 : i32
    %c0_i32_0 = arith.constant 0 : i32
    %c0_i32_1 = arith.constant 0 : i32
    return %arg0, %arg1, %c0_i32, %c0_i32_0 : i32, i32, i32, i32
  }
  func.func @transform_3(%arg0: i32, %arg1: i32) -> (i32, i32, i32, i32) {
    %c1_i32 = arith.constant 1 : i32
    %0 = arith.addi %arg1, %c1_i32 : i32
    %c4_i32 = arith.constant 4 : i32
    %1 = arith.muli %c4_i32, %0 : i32
    %c0_i32 = arith.constant 0 : i32
    %c0_i32_0 = arith.constant 0 : i32
    %c0_i32_1 = arith.constant 0 : i32
    return %arg0, %1, %c0_i32, %c0_i32_0 : i32, i32, i32, i32
  }
  func.func @transform_4(%arg0: i32, %arg1: i32) -> (i32, i32, i32, i32) {
    %c0_i32 = arith.constant 0 : i32
    %c0_i32_0 = arith.constant 0 : i32
    %c0_i32_1 = arith.constant 0 : i32
    %c0_i32_2 = arith.constant 0 : i32
    %c0_i32_3 = arith.constant 0 : i32
    return %c0_i32, %c0_i32_0, %c0_i32_1, %c0_i32_2 : i32, i32, i32, i32
  }
  func.func @transform_5(%arg0: i32, %arg1: i32) -> (i32, i32) {
    %c0_i32 = arith.constant 0 : i32
    %c0_i32_0 = arith.constant 0 : i32
    %c0_i32_1 = arith.constant 0 : i32
    return %c0_i32, %c0_i32_0 : i32, i32
  }
  func.func @transform_6(%arg0: i32, %arg1: i32) -> (i32, i32, i32, i32) {
    %c0_i32 = arith.constant 0 : i32
    %c0_i32_0 = arith.constant 0 : i32
    %c0_i32_1 = arith.constant 0 : i32
    return %arg0, %arg1, %c0_i32, %c0_i32_0 : i32, i32, i32, i32
  }
}

module attributes {stable_mosaic.version = 11 : i64} {
  func.func @_conv3x3_relu_pool_kernel(%arg0: i32, %arg1: i32, %arg2: memref<1x4x9x128xbf16, #tpu.memory_space<vmem>>, %arg3: memref<1x2x9x128xbf16, #tpu.memory_space<vmem>>, %arg4: memref<1x4x9x128xbf16, #tpu.memory_space<vmem>>, %arg5: memref<1x2x9x128xbf16, #tpu.memory_space<vmem>>, %arg6: memref<3x3x128x256xbf16, #tpu.memory_space<vmem>>, %arg7: memref<1x256xf32, #tpu.memory_space<vmem>>, %arg8: memref<1x2x8x256xbf16, #tpu.memory_space<vmem>>) attributes {dimension_semantics = [#tpu.dimension_semantics<parallel>, #tpu.dimension_semantics<parallel>], iteration_bounds = array<i64: 6, 1>, scalar_prefetch = 0 : i64, scratch_operands = 0 : i64, tpu.core_type = #tpu.core_type<tc>, window_params = [{transform_indices = @transform_0, window_bounds = array<i64: 1, 4, 9, 128>}, {transform_indices = @transform_1, window_bounds = array<i64: 1, 2, 9, 128>}, {transform_indices = @transform_2, window_bounds = array<i64: 1, 4, 9, 128>}, {transform_indices = @transform_3, window_bounds = array<i64: 1, 2, 9, 128>}, {pipeline_mode = #tpu.pipeline_mode<synchronous>, transform_indices = @transform_4, window_bounds = array<i64: 3, 3, 128, 256>}, {pipeline_mode = #tpu.pipeline_mode<synchronous>, transform_indices = @transform_5, window_bounds = array<i64: 1, 256>}, {transform_indices = @transform_6, window_bounds = array<i64: 1, 2, 8, 256>}]} {
    %c0 = arith.constant 0 : index
    %c0_0 = arith.constant 0 : index
    %c0_1 = arith.constant 0 : index
    %c0_2 = arith.constant 0 : index
    %0 = vector.load %arg2[%c0, %c0_0, %c0_1, %c0_2] : memref<1x4x9x128xbf16, #tpu.memory_space<vmem>>, vector<1x4x9x128xbf16>
    %1 = vector.shape_cast %0 : vector<1x4x9x128xbf16> to vector<4x9x128xbf16>
    %c0_3 = arith.constant 0 : index
    %c0_4 = arith.constant 0 : index
    %c0_5 = arith.constant 0 : index
    %c0_6 = arith.constant 0 : index
    %2 = vector.load %arg3[%c0_3, %c0_4, %c0_5, %c0_6] : memref<1x2x9x128xbf16, #tpu.memory_space<vmem>>, vector<1x2x9x128xbf16>
    %3 = vector.shape_cast %2 : vector<1x2x9x128xbf16> to vector<2x9x128xbf16>
    %4 = tpu.concatenate %1, %3 in 0 : vector<4x9x128xbf16>, vector<2x9x128xbf16> -> vector<6x9x128xbf16>
    %c0_7 = arith.constant 0 : index
    %c0_8 = arith.constant 0 : index
    %c0_9 = arith.constant 0 : index
    %c0_10 = arith.constant 0 : index
    %5 = vector.load %arg4[%c0_7, %c0_8, %c0_9, %c0_10] : memref<1x4x9x128xbf16, #tpu.memory_space<vmem>>, vector<1x4x9x128xbf16>
    %6 = vector.shape_cast %5 : vector<1x4x9x128xbf16> to vector<4x9x128xbf16>
    %c0_11 = arith.constant 0 : index
    %c0_12 = arith.constant 0 : index
    %c0_13 = arith.constant 0 : index
    %c0_14 = arith.constant 0 : index
    %7 = vector.load %arg5[%c0_11, %c0_12, %c0_13, %c0_14] : memref<1x2x9x128xbf16, #tpu.memory_space<vmem>>, vector<1x2x9x128xbf16>
    %8 = vector.shape_cast %7 : vector<1x2x9x128xbf16> to vector<2x9x128xbf16>
    %9 = tpu.concatenate %6, %8 in 0 : vector<4x9x128xbf16>, vector<2x9x128xbf16> -> vector<6x9x128xbf16>
    %cst = arith.constant 0.000000e+00 : f32
    %10 = vector.broadcast %cst : f32 to vector<32x256xf32>
    %cst_15 = arith.constant 0.000000e+00 : f32
    %11 = vector.broadcast %cst_15 : f32 to vector<32x256xf32>
    %12 = vector.extract_strided_slice %4 {offsets = [0, 0, 0], sizes = [4, 9, 128], strides = [1, 1, 1]} : vector<6x9x128xbf16> to vector<4x9x128xbf16>
    %13 = vector.extract_strided_slice %9 {offsets = [0, 0, 0], sizes = [4, 9, 128], strides = [1, 1, 1]} : vector<6x9x128xbf16> to vector<4x9x128xbf16>
    %14 = vector.extract_strided_slice %12 {offsets = [0, 0, 0], sizes = [4, 8, 128], strides = [1, 1, 1]} : vector<4x9x128xbf16> to vector<4x8x128xbf16>
    %15 = vector.shape_cast %14 : vector<4x8x128xbf16> to vector<32x128xbf16>
    %16 = vector.extract_strided_slice %12 {offsets = [0, 1, 0], sizes = [4, 8, 128], strides = [1, 1, 1]} : vector<4x9x128xbf16> to vector<4x8x128xbf16>
    %17 = vector.shape_cast %16 : vector<4x8x128xbf16> to vector<32x128xbf16>
    %18 = vector.extract_strided_slice %13 {offsets = [0, 0, 0], sizes = [4, 8, 128], strides = [1, 1, 1]} : vector<4x9x128xbf16> to vector<4x8x128xbf16>
    %19 = vector.shape_cast %18 : vector<4x8x128xbf16> to vector<32x128xbf16>
    %20 = vector.extract_strided_slice %13 {offsets = [0, 1, 0], sizes = [4, 8, 128], strides = [1, 1, 1]} : vector<4x9x128xbf16> to vector<4x8x128xbf16>
    %21 = vector.shape_cast %20 : vector<4x8x128xbf16> to vector<32x128xbf16>
    %c0_16 = arith.constant 0 : index
    %c0_17 = arith.constant 0 : index
    %c0_18 = arith.constant 0 : index
    %c0_19 = arith.constant 0 : index
    %22 = vector.load %arg6[%c0_16, %c0_17, %c0_18, %c0_19] : memref<3x3x128x256xbf16, #tpu.memory_space<vmem>>, vector<1x1x128x256xbf16>
    %23 = vector.shape_cast %22 : vector<1x1x128x256xbf16> to vector<128x256xbf16>
    %cst_20 = arith.constant dense<0.000000e+00> : vector<32x256xf32>
    %24 = tpu.matmul %15, %23, %cst_20 {dimension_numbers = #tpu.dot_dimension_numbers<[1], [0], [0], [1], [0, 0, 1, 1], [], []>} : vector<32x128xbf16>, vector<128x256xbf16>, vector<32x256xf32> -> vector<32x256xf32>
    %25 = arith.addf %10, %24 : vector<32x256xf32>
    %cst_21 = arith.constant dense<0.000000e+00> : vector<32x256xf32>
    %26 = tpu.matmul %19, %23, %cst_21 {dimension_numbers = #tpu.dot_dimension_numbers<[1], [0], [0], [1], [0, 0, 1, 1], [], []>} : vector<32x128xbf16>, vector<128x256xbf16>, vector<32x256xf32> -> vector<32x256xf32>
    %27 = arith.addf %11, %26 : vector<32x256xf32>
    %c0_22 = arith.constant 0 : index
    %c1 = arith.constant 1 : index
    %c0_23 = arith.constant 0 : index
    %c0_24 = arith.constant 0 : index
    %28 = vector.load %arg6[%c0_22, %c1, %c0_23, %c0_24] : memref<3x3x128x256xbf16, #tpu.memory_space<vmem>>, vector<1x1x128x256xbf16>
    %29 = vector.shape_cast %28 : vector<1x1x128x256xbf16> to vector<128x256xbf16>
    %cst_25 = arith.constant dense<0.000000e+00> : vector<32x256xf32>
    %30 = tpu.matmul %19, %29, %cst_25 {dimension_numbers = #tpu.dot_dimension_numbers<[1], [0], [0], [1], [0, 0, 1, 1], [], []>} : vector<32x128xbf16>, vector<128x256xbf16>, vector<32x256xf32> -> vector<32x256xf32>
    %31 = arith.addf %25, %30 : vector<32x256xf32>
    %cst_26 = arith.constant dense<0.000000e+00> : vector<32x256xf32>
    %32 = tpu.matmul %17, %29, %cst_26 {dimension_numbers = #tpu.dot_dimension_numbers<[1], [0], [0], [1], [0, 0, 1, 1], [], []>} : vector<32x128xbf16>, vector<128x256xbf16>, vector<32x256xf32> -> vector<32x256xf32>
    %33 = arith.addf %27, %32 : vector<32x256xf32>
    %c0_27 = arith.constant 0 : index
    %c2 = arith.constant 2 : index
    %c0_28 = arith.constant 0 : index
    %c0_29 = arith.constant 0 : index
    %34 = vector.load %arg6[%c0_27, %c2, %c0_28, %c0_29] : memref<3x3x128x256xbf16, #tpu.memory_space<vmem>>, vector<1x1x128x256xbf16>
    %35 = vector.shape_cast %34 : vector<1x1x128x256xbf16> to vector<128x256xbf16>
    %cst_30 = arith.constant dense<0.000000e+00> : vector<32x256xf32>
    %36 = tpu.matmul %17, %35, %cst_30 {dimension_numbers = #tpu.dot_dimension_numbers<[1], [0], [0], [1], [0, 0, 1, 1], [], []>} : vector<32x128xbf16>, vector<128x256xbf16>, vector<32x256xf32> -> vector<32x256xf32>
    %37 = arith.addf %31, %36 : vector<32x256xf32>
    %cst_31 = arith.constant dense<0.000000e+00> : vector<32x256xf32>
    %38 = tpu.matmul %21, %35, %cst_31 {dimension_numbers = #tpu.dot_dimension_numbers<[1], [0], [0], [1], [0, 0, 1, 1], [], []>} : vector<32x128xbf16>, vector<128x256xbf16>, vector<32x256xf32> -> vector<32x256xf32>
    %39 = arith.addf %33, %38 : vector<32x256xf32>
    %40 = vector.extract_strided_slice %4 {offsets = [1, 0, 0], sizes = [4, 9, 128], strides = [1, 1, 1]} : vector<6x9x128xbf16> to vector<4x9x128xbf16>
    %41 = vector.extract_strided_slice %9 {offsets = [1, 0, 0], sizes = [4, 9, 128], strides = [1, 1, 1]} : vector<6x9x128xbf16> to vector<4x9x128xbf16>
    %42 = vector.extract_strided_slice %40 {offsets = [0, 0, 0], sizes = [4, 8, 128], strides = [1, 1, 1]} : vector<4x9x128xbf16> to vector<4x8x128xbf16>
    %43 = vector.shape_cast %42 : vector<4x8x128xbf16> to vector<32x128xbf16>
    %44 = vector.extract_strided_slice %40 {offsets = [0, 1, 0], sizes = [4, 8, 128], strides = [1, 1, 1]} : vector<4x9x128xbf16> to vector<4x8x128xbf16>
    %45 = vector.shape_cast %44 : vector<4x8x128xbf16> to vector<32x128xbf16>
    %46 = vector.extract_strided_slice %41 {offsets = [0, 0, 0], sizes = [4, 8, 128], strides = [1, 1, 1]} : vector<4x9x128xbf16> to vector<4x8x128xbf16>
    %47 = vector.shape_cast %46 : vector<4x8x128xbf16> to vector<32x128xbf16>
    %48 = vector.extract_strided_slice %41 {offsets = [0, 1, 0], sizes = [4, 8, 128], strides = [1, 1, 1]} : vector<4x9x128xbf16> to vector<4x8x128xbf16>
    %49 = vector.shape_cast %48 : vector<4x8x128xbf16> to vector<32x128xbf16>
    %c1_32 = arith.constant 1 : index
    %c0_33 = arith.constant 0 : index
    %c0_34 = arith.constant 0 : index
    %c0_35 = arith.constant 0 : index
    %50 = vector.load %arg6[%c1_32, %c0_33, %c0_34, %c0_35] : memref<3x3x128x256xbf16, #tpu.memory_space<vmem>>, vector<1x1x128x256xbf16>
    %51 = vector.shape_cast %50 : vector<1x1x128x256xbf16> to vector<128x256xbf16>
    %cst_36 = arith.constant dense<0.000000e+00> : vector<32x256xf32>
    %52 = tpu.matmul %43, %51, %cst_36 {dimension_numbers = #tpu.dot_dimension_numbers<[1], [0], [0], [1], [0, 0, 1, 1], [], []>} : vector<32x128xbf16>, vector<128x256xbf16>, vector<32x256xf32> -> vector<32x256xf32>
    %53 = arith.addf %37, %52 : vector<32x256xf32>
    %cst_37 = arith.constant dense<0.000000e+00> : vector<32x256xf32>
    %54 = tpu.matmul %47, %51, %cst_37 {dimension_numbers = #tpu.dot_dimension_numbers<[1], [0], [0], [1], [0, 0, 1, 1], [], []>} : vector<32x128xbf16>, vector<128x256xbf16>, vector<32x256xf32> -> vector<32x256xf32>
    %55 = arith.addf %39, %54 : vector<32x256xf32>
    %c1_38 = arith.constant 1 : index
    %c1_39 = arith.constant 1 : index
    %c0_40 = arith.constant 0 : index
    %c0_41 = arith.constant 0 : index
    %56 = vector.load %arg6[%c1_38, %c1_39, %c0_40, %c0_41] : memref<3x3x128x256xbf16, #tpu.memory_space<vmem>>, vector<1x1x128x256xbf16>
    %57 = vector.shape_cast %56 : vector<1x1x128x256xbf16> to vector<128x256xbf16>
    %cst_42 = arith.constant dense<0.000000e+00> : vector<32x256xf32>
    %58 = tpu.matmul %47, %57, %cst_42 {dimension_numbers = #tpu.dot_dimension_numbers<[1], [0], [0], [1], [0, 0, 1, 1], [], []>} : vector<32x128xbf16>, vector<128x256xbf16>, vector<32x256xf32> -> vector<32x256xf32>
    %59 = arith.addf %53, %58 : vector<32x256xf32>
    %cst_43 = arith.constant dense<0.000000e+00> : vector<32x256xf32>
    %60 = tpu.matmul %45, %57, %cst_43 {dimension_numbers = #tpu.dot_dimension_numbers<[1], [0], [0], [1], [0, 0, 1, 1], [], []>} : vector<32x128xbf16>, vector<128x256xbf16>, vector<32x256xf32> -> vector<32x256xf32>
    %61 = arith.addf %55, %60 : vector<32x256xf32>
    %c1_44 = arith.constant 1 : index
    %c2_45 = arith.constant 2 : index
    %c0_46 = arith.constant 0 : index
    %c0_47 = arith.constant 0 : index
    %62 = vector.load %arg6[%c1_44, %c2_45, %c0_46, %c0_47] : memref<3x3x128x256xbf16, #tpu.memory_space<vmem>>, vector<1x1x128x256xbf16>
    %63 = vector.shape_cast %62 : vector<1x1x128x256xbf16> to vector<128x256xbf16>
    %cst_48 = arith.constant dense<0.000000e+00> : vector<32x256xf32>
    %64 = tpu.matmul %45, %63, %cst_48 {dimension_numbers = #tpu.dot_dimension_numbers<[1], [0], [0], [1], [0, 0, 1, 1], [], []>} : vector<32x128xbf16>, vector<128x256xbf16>, vector<32x256xf32> -> vector<32x256xf32>
    %65 = arith.addf %59, %64 : vector<32x256xf32>
    %cst_49 = arith.constant dense<0.000000e+00> : vector<32x256xf32>
    %66 = tpu.matmul %49, %63, %cst_49 {dimension_numbers = #tpu.dot_dimension_numbers<[1], [0], [0], [1], [0, 0, 1, 1], [], []>} : vector<32x128xbf16>, vector<128x256xbf16>, vector<32x256xf32> -> vector<32x256xf32>
    %67 = arith.addf %61, %66 : vector<32x256xf32>
    %68 = vector.extract_strided_slice %4 {offsets = [2, 0, 0], sizes = [4, 9, 128], strides = [1, 1, 1]} : vector<6x9x128xbf16> to vector<4x9x128xbf16>
    %69 = vector.extract_strided_slice %9 {offsets = [2, 0, 0], sizes = [4, 9, 128], strides = [1, 1, 1]} : vector<6x9x128xbf16> to vector<4x9x128xbf16>
    %70 = vector.extract_strided_slice %68 {offsets = [0, 0, 0], sizes = [4, 8, 128], strides = [1, 1, 1]} : vector<4x9x128xbf16> to vector<4x8x128xbf16>
    %71 = vector.shape_cast %70 : vector<4x8x128xbf16> to vector<32x128xbf16>
    %72 = vector.extract_strided_slice %68 {offsets = [0, 1, 0], sizes = [4, 8, 128], strides = [1, 1, 1]} : vector<4x9x128xbf16> to vector<4x8x128xbf16>
    %73 = vector.shape_cast %72 : vector<4x8x128xbf16> to vector<32x128xbf16>
    %74 = vector.extract_strided_slice %69 {offsets = [0, 0, 0], sizes = [4, 8, 128], strides = [1, 1, 1]} : vector<4x9x128xbf16> to vector<4x8x128xbf16>
    %75 = vector.shape_cast %74 : vector<4x8x128xbf16> to vector<32x128xbf16>
    %76 = vector.extract_strided_slice %69 {offsets = [0, 1, 0], sizes = [4, 8, 128], strides = [1, 1, 1]} : vector<4x9x128xbf16> to vector<4x8x128xbf16>
    %77 = vector.shape_cast %76 : vector<4x8x128xbf16> to vector<32x128xbf16>
    %c2_50 = arith.constant 2 : index
    %c0_51 = arith.constant 0 : index
    %c0_52 = arith.constant 0 : index
    %c0_53 = arith.constant 0 : index
    %78 = vector.load %arg6[%c2_50, %c0_51, %c0_52, %c0_53] : memref<3x3x128x256xbf16, #tpu.memory_space<vmem>>, vector<1x1x128x256xbf16>
    %79 = vector.shape_cast %78 : vector<1x1x128x256xbf16> to vector<128x256xbf16>
    %cst_54 = arith.constant dense<0.000000e+00> : vector<32x256xf32>
    %80 = tpu.matmul %71, %79, %cst_54 {dimension_numbers = #tpu.dot_dimension_numbers<[1], [0], [0], [1], [0, 0, 1, 1], [], []>} : vector<32x128xbf16>, vector<128x256xbf16>, vector<32x256xf32> -> vector<32x256xf32>
    %81 = arith.addf %65, %80 : vector<32x256xf32>
    %cst_55 = arith.constant dense<0.000000e+00> : vector<32x256xf32>
    %82 = tpu.matmul %75, %79, %cst_55 {dimension_numbers = #tpu.dot_dimension_numbers<[1], [0], [0], [1], [0, 0, 1, 1], [], []>} : vector<32x128xbf16>, vector<128x256xbf16>, vector<32x256xf32> -> vector<32x256xf32>
    %83 = arith.addf %67, %82 : vector<32x256xf32>
    %c2_56 = arith.constant 2 : index
    %c1_57 = arith.constant 1 : index
    %c0_58 = arith.constant 0 : index
    %c0_59 = arith.constant 0 : index
    %84 = vector.load %arg6[%c2_56, %c1_57, %c0_58, %c0_59] : memref<3x3x128x256xbf16, #tpu.memory_space<vmem>>, vector<1x1x128x256xbf16>
    %85 = vector.shape_cast %84 : vector<1x1x128x256xbf16> to vector<128x256xbf16>
    %cst_60 = arith.constant dense<0.000000e+00> : vector<32x256xf32>
    %86 = tpu.matmul %75, %85, %cst_60 {dimension_numbers = #tpu.dot_dimension_numbers<[1], [0], [0], [1], [0, 0, 1, 1], [], []>} : vector<32x128xbf16>, vector<128x256xbf16>, vector<32x256xf32> -> vector<32x256xf32>
    %87 = arith.addf %81, %86 : vector<32x256xf32>
    %cst_61 = arith.constant dense<0.000000e+00> : vector<32x256xf32>
    %88 = tpu.matmul %73, %85, %cst_61 {dimension_numbers = #tpu.dot_dimension_numbers<[1], [0], [0], [1], [0, 0, 1, 1], [], []>} : vector<32x128xbf16>, vector<128x256xbf16>, vector<32x256xf32> -> vector<32x256xf32>
    %89 = arith.addf %83, %88 : vector<32x256xf32>
    %c2_62 = arith.constant 2 : index
    %c2_63 = arith.constant 2 : index
    %c0_64 = arith.constant 0 : index
    %c0_65 = arith.constant 0 : index
    %90 = vector.load %arg6[%c2_62, %c2_63, %c0_64, %c0_65] : memref<3x3x128x256xbf16, #tpu.memory_space<vmem>>, vector<1x1x128x256xbf16>
    %91 = vector.shape_cast %90 : vector<1x1x128x256xbf16> to vector<128x256xbf16>
    %cst_66 = arith.constant dense<0.000000e+00> : vector<32x256xf32>
    %92 = tpu.matmul %73, %91, %cst_66 {dimension_numbers = #tpu.dot_dimension_numbers<[1], [0], [0], [1], [0, 0, 1, 1], [], []>} : vector<32x128xbf16>, vector<128x256xbf16>, vector<32x256xf32> -> vector<32x256xf32>
    %93 = arith.addf %87, %92 : vector<32x256xf32>
    %cst_67 = arith.constant dense<0.000000e+00> : vector<32x256xf32>
    %94 = tpu.matmul %77, %91, %cst_67 {dimension_numbers = #tpu.dot_dimension_numbers<[1], [0], [0], [1], [0, 0, 1, 1], [], []>} : vector<32x128xbf16>, vector<128x256xbf16>, vector<32x256xf32> -> vector<32x256xf32>
    %95 = arith.addf %89, %94 : vector<32x256xf32>
    %c0_68 = arith.constant 0 : index
    %c0_69 = arith.constant 0 : index
    %96 = vector.load %arg7[%c0_68, %c0_69] : memref<1x256xf32, #tpu.memory_space<vmem>>, vector<1x256xf32>
    %97 = arith.maximumf %93, %95 : vector<32x256xf32>
    %98 = vector.extract_strided_slice %97 {offsets = [0, 0], sizes = [8, 256], strides = [1, 1]} : vector<32x256xf32> to vector<8x256xf32>
    %99 = vector.extract_strided_slice %97 {offsets = [8, 0], sizes = [8, 256], strides = [1, 1]} : vector<32x256xf32> to vector<8x256xf32>
    %100 = arith.maximumf %98, %99 : vector<8x256xf32>
    %101 = vector.broadcast %96 : vector<1x256xf32> to vector<8x256xf32>
    %102 = arith.addf %100, %101 : vector<8x256xf32>
    %cst_70 = arith.constant 0.000000e+00 : f32
    %103 = vector.broadcast %cst_70 : f32 to vector<8x256xf32>
    %104 = arith.maximumf %102, %103 : vector<8x256xf32>
    %105 = arith.truncf %104 : vector<8x256xf32> to vector<8x256xbf16>
    %c0_71 = arith.constant 0 : index
    %c0_72 = arith.constant 0 : index
    %c0_73 = arith.constant 0 : index
    %c0_74 = arith.constant 0 : index
    %106 = vector.load %arg8[%c0_71, %c0_72, %c0_73, %c0_74] : memref<1x2x8x256xbf16, #tpu.memory_space<vmem>>, vector<1x1x8x256xbf16>
    %107 = vector.shape_cast %106 : vector<1x1x8x256xbf16> to vector<8x256xbf16>
    %108 = vector.shape_cast %105 : vector<8x256xbf16> to vector<1x1x8x256xbf16>
    tpu.vector_store %arg8[%c0_71, %c0_72, %c0_73, %c0_74], %108 {strides = array<i32>} : memref<1x2x8x256xbf16, #tpu.memory_space<vmem>>, vector<1x1x8x256xbf16>,
    %109 = vector.extract_strided_slice %97 {offsets = [16, 0], sizes = [8, 256], strides = [1, 1]} : vector<32x256xf32> to vector<8x256xf32>
    %110 = vector.extract_strided_slice %97 {offsets = [24, 0], sizes = [8, 256], strides = [1, 1]} : vector<32x256xf32> to vector<8x256xf32>
    %111 = arith.maximumf %109, %110 : vector<8x256xf32>
    %112 = vector.broadcast %96 : vector<1x256xf32> to vector<8x256xf32>
    %113 = arith.addf %111, %112 : vector<8x256xf32>
    %cst_75 = arith.constant 0.000000e+00 : f32
    %114 = vector.broadcast %cst_75 : f32 to vector<8x256xf32>
    %115 = arith.maximumf %113, %114 : vector<8x256xf32>
    %116 = arith.truncf %115 : vector<8x256xf32> to vector<8x256xbf16>
    %c0_76 = arith.constant 0 : index
    %c1_77 = arith.constant 1 : index
    %c0_78 = arith.constant 0 : index
    %c0_79 = arith.constant 0 : index
    %117 = vector.load %arg8[%c0_76, %c1_77, %c0_78, %c0_79] : memref<1x2x8x256xbf16, #tpu.memory_space<vmem>>, vector<1x1x8x256xbf16>
    %118 = vector.shape_cast %117 : vector<1x1x8x256xbf16> to vector<8x256xbf16>
    %119 = vector.shape_cast %116 : vector<8x256xbf16> to vector<1x1x8x256xbf16>
    tpu.vector_store %arg8[%c0_76, %c1_77, %c0_78, %c0_79], %119 {strides = array<i32>} : memref<1x2x8x256xbf16, #tpu.memory_space<vmem>>, vector<1x1x8x256xbf16>,
    return
  }
  func.func @transform_0(%arg0: i32, %arg1: i32) -> (i32, i32, i32, i32) {
    %c0_i32 = arith.constant 0 : i32
    %c0_i32_0 = arith.constant 0 : i32
    %c0_i32_1 = arith.constant 0 : i32
    return %arg0, %arg1, %c0_i32, %c0_i32_0 : i32, i32, i32, i32
  }
  func.func @transform_1(%arg0: i32, %arg1: i32) -> (i32, i32, i32, i32) {
    %c1_i32 = arith.constant 1 : i32
    %0 = arith.addi %arg1, %c1_i32 : i32
    %c2_i32 = arith.constant 2 : i32
    %1 = arith.muli %c2_i32, %0 : i32
    %c0_i32 = arith.constant 0 : i32
    %c0_i32_0 = arith.constant 0 : i32
    %c0_i32_1 = arith.constant 0 : i32
    return %arg0, %1, %c0_i32, %c0_i32_0 : i32, i32, i32, i32
  }
  func.func @transform_2(%arg0: i32, %arg1: i32) -> (i32, i32, i32, i32) {
    %c0_i32 = arith.constant 0 : i32
    %c0_i32_0 = arith.constant 0 : i32
    %c0_i32_1 = arith.constant 0 : i32
    return %arg0, %arg1, %c0_i32, %c0_i32_0 : i32, i32, i32, i32
  }
  func.func @transform_3(%arg0: i32, %arg1: i32) -> (i32, i32, i32, i32) {
    %c1_i32 = arith.constant 1 : i32
    %0 = arith.addi %arg1, %c1_i32 : i32
    %c2_i32 = arith.constant 2 : i32
    %1 = arith.muli %c2_i32, %0 : i32
    %c0_i32 = arith.constant 0 : i32
    %c0_i32_0 = arith.constant 0 : i32
    %c0_i32_1 = arith.constant 0 : i32
    return %arg0, %1, %c0_i32, %c0_i32_0 : i32, i32, i32, i32
  }
  func.func @transform_4(%arg0: i32, %arg1: i32) -> (i32, i32, i32, i32) {
    %c0_i32 = arith.constant 0 : i32
    %c0_i32_0 = arith.constant 0 : i32
    %c0_i32_1 = arith.constant 0 : i32
    %c0_i32_2 = arith.constant 0 : i32
    %c0_i32_3 = arith.constant 0 : i32
    return %c0_i32, %c0_i32_0, %c0_i32_1, %c0_i32_2 : i32, i32, i32, i32
  }
  func.func @transform_5(%arg0: i32, %arg1: i32) -> (i32, i32) {
    %c0_i32 = arith.constant 0 : i32
    %c0_i32_0 = arith.constant 0 : i32
    %c0_i32_1 = arith.constant 0 : i32
    return %c0_i32, %c0_i32_0 : i32, i32
  }
  func.func @transform_6(%arg0: i32, %arg1: i32) -> (i32, i32, i32, i32) {
    %c0_i32 = arith.constant 0 : i32
    %c0_i32_0 = arith.constant 0 : i32
    %c0_i32_1 = arith.constant 0 : i32
    return %arg0, %arg1, %c0_i32, %c0_i32_0 : i32, i32, i32, i32
  }
}

module attributes {stable_mosaic.version = 11 : i64} {
  func.func @_add3_kernel(%arg0: i32, %arg1: memref<8x256xbf16, #tpu.memory_space<vmem>>, %arg2: memref<8x256xbf16, #tpu.memory_space<vmem>>, %arg3: memref<8x256xbf16, #tpu.memory_space<vmem>>, %arg4: memref<8x256xbf16, #tpu.memory_space<vmem>>) attributes {dimension_semantics = [#tpu.dimension_semantics<parallel>], iteration_bounds = array<i64: 1>, scalar_prefetch = 0 : i64, scratch_operands = 0 : i64, tpu.core_type = #tpu.core_type<tc>, window_params = [{transform_indices = @transform_0, window_bounds = array<i64: 8, 256>}, {transform_indices = @transform_1, window_bounds = array<i64: 8, 256>}, {transform_indices = @transform_2, window_bounds = array<i64: 8, 256>}, {transform_indices = @transform_3, window_bounds = array<i64: 8, 256>}]} {
    %c0 = arith.constant 0 : index
    %c0_0 = arith.constant 0 : index
    %0 = vector.load %arg1[%c0, %c0_0] : memref<8x256xbf16, #tpu.memory_space<vmem>>, vector<8x256xbf16>
    %1 = arith.extf %0 : vector<8x256xbf16> to vector<8x256xf32>
    %c0_1 = arith.constant 0 : index
    %c0_2 = arith.constant 0 : index
    %2 = vector.load %arg2[%c0_1, %c0_2] : memref<8x256xbf16, #tpu.memory_space<vmem>>, vector<8x256xbf16>
    %3 = arith.extf %2 : vector<8x256xbf16> to vector<8x256xf32>
    %4 = arith.addf %1, %3 : vector<8x256xf32>
    %c0_3 = arith.constant 0 : index
    %c0_4 = arith.constant 0 : index
    %5 = vector.load %arg3[%c0_3, %c0_4] : memref<8x256xbf16, #tpu.memory_space<vmem>>, vector<8x256xbf16>
    %6 = arith.extf %5 : vector<8x256xbf16> to vector<8x256xf32>
    %7 = arith.addf %4, %6 : vector<8x256xf32>
    %8 = arith.truncf %7 : vector<8x256xf32> to vector<8x256xbf16>
    %c0_5 = arith.constant 0 : index
    %c0_6 = arith.constant 0 : index
    %9 = vector.load %arg4[%c0_5, %c0_6] : memref<8x256xbf16, #tpu.memory_space<vmem>>, vector<8x256xbf16>
    tpu.vector_store %arg4[%c0_5, %c0_6], %8 {strides = array<i32>} : memref<8x256xbf16, #tpu.memory_space<vmem>>, vector<8x256xbf16>,
    return
  }
  func.func @transform_0(%arg0: i32) -> (i32, i32) {
    %c0_i32 = arith.constant 0 : i32
    %c0_i32_0 = arith.constant 0 : i32
    return %arg0, %c0_i32 : i32, i32
  }
  func.func @transform_1(%arg0: i32) -> (i32, i32) {
    %c0_i32 = arith.constant 0 : i32
    %c0_i32_0 = arith.constant 0 : i32
    return %arg0, %c0_i32 : i32, i32
  }
  func.func @transform_2(%arg0: i32) -> (i32, i32) {
    %c0_i32 = arith.constant 0 : i32
    %c0_i32_0 = arith.constant 0 : i32
    return %arg0, %c0_i32 : i32, i32
  }
  func.func @transform_3(%arg0: i32) -> (i32, i32) {
    %c0_i32 = arith.constant 0 : i32
    %c0_i32_0 = arith.constant 0 : i32
    return %arg0, %c0_i32 : i32, i32
  }
}

module attributes {stable_mosaic.version = 11 : i64} {
  func.func @_conv3x3_relu_kernel(%arg0: i32, %arg1: i32, %arg2: memref<1x2x10x256xbf16, #tpu.memory_space<vmem>>, %arg3: memref<1x2x10x256xbf16, #tpu.memory_space<vmem>>, %arg4: memref<3x3x256x16xbf16, #tpu.memory_space<vmem>>, %arg5: memref<1x16xf32, #tpu.memory_space<vmem>>, %arg6: memref<1x2x8x16xbf16, #tpu.memory_space<vmem>>) attributes {dimension_semantics = [#tpu.dimension_semantics<parallel>, #tpu.dimension_semantics<parallel>], iteration_bounds = array<i64: 2, 1>, scalar_prefetch = 0 : i64, scratch_operands = 0 : i64, tpu.core_type = #tpu.core_type<tc>, window_params = [{transform_indices = @transform_0, window_bounds = array<i64: 1, 2, 10, 256>}, {transform_indices = @transform_1, window_bounds = array<i64: 1, 2, 10, 256>}, {pipeline_mode = #tpu.pipeline_mode<synchronous>, transform_indices = @transform_2, window_bounds = array<i64: 3, 3, 256, 16>}, {pipeline_mode = #tpu.pipeline_mode<synchronous>, transform_indices = @transform_3, window_bounds = array<i64: 1, 16>}, {transform_indices = @transform_4, window_bounds = array<i64: 1, 2, 8, 16>}]} {
    %c0 = arith.constant 0 : index
    %c0_0 = arith.constant 0 : index
    %c0_1 = arith.constant 0 : index
    %c0_2 = arith.constant 0 : index
    %0 = vector.load %arg2[%c0, %c0_0, %c0_1, %c0_2] : memref<1x2x10x256xbf16, #tpu.memory_space<vmem>>, vector<1x2x10x256xbf16>
    %1 = vector.shape_cast %0 : vector<1x2x10x256xbf16> to vector<2x10x256xbf16>
    %c0_3 = arith.constant 0 : index
    %c0_4 = arith.constant 0 : index
    %c0_5 = arith.constant 0 : index
    %c0_6 = arith.constant 0 : index
    %2 = vector.load %arg3[%c0_3, %c0_4, %c0_5, %c0_6] : memref<1x2x10x256xbf16, #tpu.memory_space<vmem>>, vector<1x2x10x256xbf16>
    %3 = vector.shape_cast %2 : vector<1x2x10x256xbf16> to vector<2x10x256xbf16>
    %4 = tpu.concatenate %1, %3 in 0 : vector<2x10x256xbf16>, vector<2x10x256xbf16> -> vector<4x10x256xbf16>
    %cst = arith.constant 0.000000e+00 : f32
    %5 = vector.broadcast %cst : f32 to vector<16x16xf32>
    %6 = vector.extract_strided_slice %4 {offsets = [0, 0, 0], sizes = [2, 10, 256], strides = [1, 1, 1]} : vector<4x10x256xbf16> to vector<2x10x256xbf16>
    %7 = vector.extract_strided_slice %6 {offsets = [0, 0, 0], sizes = [2, 8, 256], strides = [1, 1, 1]} : vector<2x10x256xbf16> to vector<2x8x256xbf16>
    %8 = vector.shape_cast %7 : vector<2x8x256xbf16> to vector<16x256xbf16>
    %c0_7 = arith.constant 0 : index
    %c0_8 = arith.constant 0 : index
    %c0_9 = arith.constant 0 : index
    %c0_10 = arith.constant 0 : index
    %9 = vector.load %arg4[%c0_7, %c0_8, %c0_9, %c0_10] : memref<3x3x256x16xbf16, #tpu.memory_space<vmem>>, vector<1x1x256x16xbf16>
    %10 = vector.shape_cast %9 : vector<1x1x256x16xbf16> to vector<256x16xbf16>
    %cst_11 = arith.constant dense<0.000000e+00> : vector<16x16xf32>
    %11 = tpu.matmul %8, %10, %cst_11 {dimension_numbers = #tpu.dot_dimension_numbers<[1], [0], [0], [1], [0, 0, 1, 1], [], []>} : vector<16x256xbf16>, vector<256x16xbf16>, vector<16x16xf32> -> vector<16x16xf32>
    %12 = arith.addf %5, %11 : vector<16x16xf32>
    %13 = vector.extract_strided_slice %6 {offsets = [0, 1, 0], sizes = [2, 8, 256], strides = [1, 1, 1]} : vector<2x10x256xbf16> to vector<2x8x256xbf16>
    %14 = vector.shape_cast %13 : vector<2x8x256xbf16> to vector<16x256xbf16>
    %c0_12 = arith.constant 0 : index
    %c1 = arith.constant 1 : index
    %c0_13 = arith.constant 0 : index
    %c0_14 = arith.constant 0 : index
    %15 = vector.load %arg4[%c0_12, %c1, %c0_13, %c0_14] : memref<3x3x256x16xbf16, #tpu.memory_space<vmem>>, vector<1x1x256x16xbf16>
    %16 = vector.shape_cast %15 : vector<1x1x256x16xbf16> to vector<256x16xbf16>
    %cst_15 = arith.constant dense<0.000000e+00> : vector<16x16xf32>
    %17 = tpu.matmul %14, %16, %cst_15 {dimension_numbers = #tpu.dot_dimension_numbers<[1], [0], [0], [1], [0, 0, 1, 1], [], []>} : vector<16x256xbf16>, vector<256x16xbf16>, vector<16x16xf32> -> vector<16x16xf32>
    %18 = arith.addf %12, %17 : vector<16x16xf32>
    %19 = vector.extract_strided_slice %6 {offsets = [0, 2, 0], sizes = [2, 8, 256], strides = [1, 1, 1]} : vector<2x10x256xbf16> to vector<2x8x256xbf16>
    %20 = vector.shape_cast %19 : vector<2x8x256xbf16> to vector<16x256xbf16>
    %c0_16 = arith.constant 0 : index
    %c2 = arith.constant 2 : index
    %c0_17 = arith.constant 0 : index
    %c0_18 = arith.constant 0 : index
    %21 = vector.load %arg4[%c0_16, %c2, %c0_17, %c0_18] : memref<3x3x256x16xbf16, #tpu.memory_space<vmem>>, vector<1x1x256x16xbf16>
    %22 = vector.shape_cast %21 : vector<1x1x256x16xbf16> to vector<256x16xbf16>
    %cst_19 = arith.constant dense<0.000000e+00> : vector<16x16xf32>
    %23 = tpu.matmul %20, %22, %cst_19 {dimension_numbers = #tpu.dot_dimension_numbers<[1], [0], [0], [1], [0, 0, 1, 1], [], []>} : vector<16x256xbf16>, vector<256x16xbf16>, vector<16x16xf32> -> vector<16x16xf32>
    %24 = arith.addf %18, %23 : vector<16x16xf32>
    %25 = vector.extract_strided_slice %4 {offsets = [1, 0, 0], sizes = [2, 10, 256], strides = [1, 1, 1]} : vector<4x10x256xbf16> to vector<2x10x256xbf16>
    %26 = vector.extract_strided_slice %25 {offsets = [0, 0, 0], sizes = [2, 8, 256], strides = [1, 1, 1]} : vector<2x10x256xbf16> to vector<2x8x256xbf16>
    %27 = vector.shape_cast %26 : vector<2x8x256xbf16> to vector<16x256xbf16>
    %c1_20 = arith.constant 1 : index
    %c0_21 = arith.constant 0 : index
    %c0_22 = arith.constant 0 : index
    %c0_23 = arith.constant 0 : index
    %28 = vector.load %arg4[%c1_20, %c0_21, %c0_22, %c0_23] : memref<3x3x256x16xbf16, #tpu.memory_space<vmem>>, vector<1x1x256x16xbf16>
    %29 = vector.shape_cast %28 : vector<1x1x256x16xbf16> to vector<256x16xbf16>
    %cst_24 = arith.constant dense<0.000000e+00> : vector<16x16xf32>
    %30 = tpu.matmul %27, %29, %cst_24 {dimension_numbers = #tpu.dot_dimension_numbers<[1], [0], [0], [1], [0, 0, 1, 1], [], []>} : vector<16x256xbf16>, vector<256x16xbf16>, vector<16x16xf32> -> vector<16x16xf32>
    %31 = arith.addf %24, %30 : vector<16x16xf32>
    %32 = vector.extract_strided_slice %25 {offsets = [0, 1, 0], sizes = [2, 8, 256], strides = [1, 1, 1]} : vector<2x10x256xbf16> to vector<2x8x256xbf16>
    %33 = vector.shape_cast %32 : vector<2x8x256xbf16> to vector<16x256xbf16>
    %c1_25 = arith.constant 1 : index
    %c1_26 = arith.constant 1 : index
    %c0_27 = arith.constant 0 : index
    %c0_28 = arith.constant 0 : index
    %34 = vector.load %arg4[%c1_25, %c1_26, %c0_27, %c0_28] : memref<3x3x256x16xbf16, #tpu.memory_space<vmem>>, vector<1x1x256x16xbf16>
    %35 = vector.shape_cast %34 : vector<1x1x256x16xbf16> to vector<256x16xbf16>
    %cst_29 = arith.constant dense<0.000000e+00> : vector<16x16xf32>
    %36 = tpu.matmul %33, %35, %cst_29 {dimension_numbers = #tpu.dot_dimension_numbers<[1], [0], [0], [1], [0, 0, 1, 1], [], []>} : vector<16x256xbf16>, vector<256x16xbf16>, vector<16x16xf32> -> vector<16x16xf32>
    %37 = arith.addf %31, %36 : vector<16x16xf32>
    %38 = vector.extract_strided_slice %25 {offsets = [0, 2, 0], sizes = [2, 8, 256], strides = [1, 1, 1]} : vector<2x10x256xbf16> to vector<2x8x256xbf16>
    %39 = vector.shape_cast %38 : vector<2x8x256xbf16> to vector<16x256xbf16>
    %c1_30 = arith.constant 1 : index
    %c2_31 = arith.constant 2 : index
    %c0_32 = arith.constant 0 : index
    %c0_33 = arith.constant 0 : index
    %40 = vector.load %arg4[%c1_30, %c2_31, %c0_32, %c0_33] : memref<3x3x256x16xbf16, #tpu.memory_space<vmem>>, vector<1x1x256x16xbf16>
    %41 = vector.shape_cast %40 : vector<1x1x256x16xbf16> to vector<256x16xbf16>
    %cst_34 = arith.constant dense<0.000000e+00> : vector<16x16xf32>
    %42 = tpu.matmul %39, %41, %cst_34 {dimension_numbers = #tpu.dot_dimension_numbers<[1], [0], [0], [1], [0, 0, 1, 1], [], []>} : vector<16x256xbf16>, vector<256x16xbf16>, vector<16x16xf32> -> vector<16x16xf32>
    %43 = arith.addf %37, %42 : vector<16x16xf32>
    %44 = vector.extract_strided_slice %4 {offsets = [2, 0, 0], sizes = [2, 10, 256], strides = [1, 1, 1]} : vector<4x10x256xbf16> to vector<2x10x256xbf16>
    %45 = vector.extract_strided_slice %44 {offsets = [0, 0, 0], sizes = [2, 8, 256], strides = [1, 1, 1]} : vector<2x10x256xbf16> to vector<2x8x256xbf16>
    %46 = vector.shape_cast %45 : vector<2x8x256xbf16> to vector<16x256xbf16>
    %c2_35 = arith.constant 2 : index
    %c0_36 = arith.constant 0 : index
    %c0_37 = arith.constant 0 : index
    %c0_38 = arith.constant 0 : index
    %47 = vector.load %arg4[%c2_35, %c0_36, %c0_37, %c0_38] : memref<3x3x256x16xbf16, #tpu.memory_space<vmem>>, vector<1x1x256x16xbf16>
    %48 = vector.shape_cast %47 : vector<1x1x256x16xbf16> to vector<256x16xbf16>
    %cst_39 = arith.constant dense<0.000000e+00> : vector<16x16xf32>
    %49 = tpu.matmul %46, %48, %cst_39 {dimension_numbers = #tpu.dot_dimension_numbers<[1], [0], [0], [1], [0, 0, 1, 1], [], []>} : vector<16x256xbf16>, vector<256x16xbf16>, vector<16x16xf32> -> vector<16x16xf32>
    %50 = arith.addf %43, %49 : vector<16x16xf32>
    %51 = vector.extract_strided_slice %44 {offsets = [0, 1, 0], sizes = [2, 8, 256], strides = [1, 1, 1]} : vector<2x10x256xbf16> to vector<2x8x256xbf16>
    %52 = vector.shape_cast %51 : vector<2x8x256xbf16> to vector<16x256xbf16>
    %c2_40 = arith.constant 2 : index
    %c1_41 = arith.constant 1 : index
    %c0_42 = arith.constant 0 : index
    %c0_43 = arith.constant 0 : index
    %53 = vector.load %arg4[%c2_40, %c1_41, %c0_42, %c0_43] : memref<3x3x256x16xbf16, #tpu.memory_space<vmem>>, vector<1x1x256x16xbf16>
    %54 = vector.shape_cast %53 : vector<1x1x256x16xbf16> to vector<256x16xbf16>
    %cst_44 = arith.constant dense<0.000000e+00> : vector<16x16xf32>
    %55 = tpu.matmul %52, %54, %cst_44 {dimension_numbers = #tpu.dot_dimension_numbers<[1], [0], [0], [1], [0, 0, 1, 1], [], []>} : vector<16x256xbf16>, vector<256x16xbf16>, vector<16x16xf32> -> vector<16x16xf32>
    %56 = arith.addf %50, %55 : vector<16x16xf32>
    %57 = vector.extract_strided_slice %44 {offsets = [0, 2, 0], sizes = [2, 8, 256], strides = [1, 1, 1]} : vector<2x10x256xbf16> to vector<2x8x256xbf16>
    %58 = vector.shape_cast %57 : vector<2x8x256xbf16> to vector<16x256xbf16>
    %c2_45 = arith.constant 2 : index
    %c2_46 = arith.constant 2 : index
    %c0_47 = arith.constant 0 : index
    %c0_48 = arith.constant 0 : index
    %59 = vector.load %arg4[%c2_45, %c2_46, %c0_47, %c0_48] : memref<3x3x256x16xbf16, #tpu.memory_space<vmem>>, vector<1x1x256x16xbf16>
    %60 = vector.shape_cast %59 : vector<1x1x256x16xbf16> to vector<256x16xbf16>
    %cst_49 = arith.constant dense<0.000000e+00> : vector<16x16xf32>
    %61 = tpu.matmul %58, %60, %cst_49 {dimension_numbers = #tpu.dot_dimension_numbers<[1], [0], [0], [1], [0, 0, 1, 1], [], []>} : vector<16x256xbf16>, vector<256x16xbf16>, vector<16x16xf32> -> vector<16x16xf32>
    %62 = arith.addf %56, %61 : vector<16x16xf32>
    %c0_50 = arith.constant 0 : index
    %c0_51 = arith.constant 0 : index
    %63 = vector.load %arg5[%c0_50, %c0_51] : memref<1x16xf32, #tpu.memory_space<vmem>>, vector<1x16xf32>
    %64 = vector.extract_strided_slice %62 {offsets = [0, 0], sizes = [8, 16], strides = [1, 1]} : vector<16x16xf32> to vector<8x16xf32>
    %65 = vector.broadcast %63 : vector<1x16xf32> to vector<8x16xf32>
    %66 = arith.addf %64, %65 : vector<8x16xf32>
    %cst_52 = arith.constant 0.000000e+00 : f32
    %67 = vector.broadcast %cst_52 : f32 to vector<8x16xf32>
    %68 = arith.maximumf %66, %67 : vector<8x16xf32>
    %69 = arith.truncf %68 : vector<8x16xf32> to vector<8x16xbf16>
    %c0_53 = arith.constant 0 : index
    %c0_54 = arith.constant 0 : index
    %c0_55 = arith.constant 0 : index
    %c0_56 = arith.constant 0 : index
    %70 = vector.load %arg6[%c0_53, %c0_54, %c0_55, %c0_56] : memref<1x2x8x16xbf16, #tpu.memory_space<vmem>>, vector<1x1x8x16xbf16>
    %71 = vector.shape_cast %70 : vector<1x1x8x16xbf16> to vector<8x16xbf16>
    %72 = vector.shape_cast %69 : vector<8x16xbf16> to vector<1x1x8x16xbf16>
    tpu.vector_store %arg6[%c0_53, %c0_54, %c0_55, %c0_56], %72 {strides = array<i32>} : memref<1x2x8x16xbf16, #tpu.memory_space<vmem>>, vector<1x1x8x16xbf16>,
    %73 = vector.extract_strided_slice %62 {offsets = [8, 0], sizes = [8, 16], strides = [1, 1]} : vector<16x16xf32> to vector<8x16xf32>
    %74 = vector.broadcast %63 : vector<1x16xf32> to vector<8x16xf32>
    %75 = arith.addf %73, %74 : vector<8x16xf32>
    %cst_57 = arith.constant 0.000000e+00 : f32
    %76 = vector.broadcast %cst_57 : f32 to vector<8x16xf32>
    %77 = arith.maximumf %75, %76 : vector<8x16xf32>
    %78 = arith.truncf %77 : vector<8x16xf32> to vector<8x16xbf16>
    %c0_58 = arith.constant 0 : index
    %c1_59 = arith.constant 1 : index
    %c0_60 = arith.constant 0 : index
    %c0_61 = arith.constant 0 : index
    %79 = vector.load %arg6[%c0_58, %c1_59, %c0_60, %c0_61] : memref<1x2x8x16xbf16, #tpu.memory_space<vmem>>, vector<1x1x8x16xbf16>
    %80 = vector.shape_cast %79 : vector<1x1x8x16xbf16> to vector<8x16xbf16>
    %81 = vector.shape_cast %78 : vector<8x16xbf16> to vector<1x1x8x16xbf16>
    tpu.vector_store %arg6[%c0_58, %c1_59, %c0_60, %c0_61], %81 {strides = array<i32>} : memref<1x2x8x16xbf16, #tpu.memory_space<vmem>>, vector<1x1x8x16xbf16>,
    return
  }
  func.func @transform_0(%arg0: i32, %arg1: i32) -> (i32, i32, i32, i32) {
    %c0_i32 = arith.constant 0 : i32
    %c0_i32_0 = arith.constant 0 : i32
    %c0_i32_1 = arith.constant 0 : i32
    return %arg0, %arg1, %c0_i32, %c0_i32_0 : i32, i32, i32, i32
  }
  func.func @transform_1(%arg0: i32, %arg1: i32) -> (i32, i32, i32, i32) {
    %c1_i32 = arith.constant 1 : i32
    %0 = arith.addi %arg1, %c1_i32 : i32
    %c1_i32_0 = arith.constant 1 : i32
    %1 = arith.muli %c1_i32_0, %0 : i32
    %c0_i32 = arith.constant 0 : i32
    %c0_i32_1 = arith.constant 0 : i32
    %c0_i32_2 = arith.constant 0 : i32
    return %arg0, %1, %c0_i32, %c0_i32_1 : i32, i32, i32, i32
  }
  func.func @transform_2(%arg0: i32, %arg1: i32) -> (i32, i32, i32, i32) {
    %c0_i32 = arith.constant 0 : i32
    %c0_i32_0 = arith.constant 0 : i32
    %c0_i32_1 = arith.constant 0 : i32
    %c0_i32_2 = arith.constant 0 : i32
    %c0_i32_3 = arith.constant 0 : i32
    return %c0_i32, %c0_i32_0, %c0_i32_1, %c0_i32_2 : i32, i32, i32, i32
  }
  func.func @transform_3(%arg0: i32, %arg1: i32) -> (i32, i32) {
    %c0_i32 = arith.constant 0 : i32
    %c0_i32_0 = arith.constant 0 : i32
    %c0_i32_1 = arith.constant 0 : i32
    return %c0_i32, %c0_i32_0 : i32, i32
  }
  func.func @transform_4(%arg0: i32, %arg1: i32) -> (i32, i32, i32, i32) {
    %c0_i32 = arith.constant 0 : i32
    %c0_i32_0 = arith.constant 0 : i32
    %c0_i32_1 = arith.constant 0 : i32
    return %arg0, %arg1, %c0_i32, %c0_i32_0 : i32, i32, i32, i32
  }
}

module attributes {stable_mosaic.version = 11 : i64} {
  func.func @_conv3x3_relu_kernel(%arg0: i32, %arg1: i32, %arg2: memref<1x2x10x16xbf16, #tpu.memory_space<vmem>>, %arg3: memref<1x2x10x16xbf16, #tpu.memory_space<vmem>>, %arg4: memref<3x3x16x256xbf16, #tpu.memory_space<vmem>>, %arg5: memref<1x256xf32, #tpu.memory_space<vmem>>, %arg6: memref<1x2x8x256xbf16, #tpu.memory_space<vmem>>) attributes {dimension_semantics = [#tpu.dimension_semantics<parallel>, #tpu.dimension_semantics<parallel>], iteration_bounds = array<i64: 2, 1>, scalar_prefetch = 0 : i64, scratch_operands = 0 : i64, tpu.core_type = #tpu.core_type<tc>, window_params = [{transform_indices = @transform_0, window_bounds = array<i64: 1, 2, 10, 16>}, {transform_indices = @transform_1, window_bounds = array<i64: 1, 2, 10, 16>}, {pipeline_mode = #tpu.pipeline_mode<synchronous>, transform_indices = @transform_2, window_bounds = array<i64: 3, 3, 16, 256>}, {pipeline_mode = #tpu.pipeline_mode<synchronous>, transform_indices = @transform_3, window_bounds = array<i64: 1, 256>}, {transform_indices = @transform_4, window_bounds = array<i64: 1, 2, 8, 256>}]} {
    %c0 = arith.constant 0 : index
    %c0_0 = arith.constant 0 : index
    %c0_1 = arith.constant 0 : index
    %c0_2 = arith.constant 0 : index
    %0 = vector.load %arg2[%c0, %c0_0, %c0_1, %c0_2] : memref<1x2x10x16xbf16, #tpu.memory_space<vmem>>, vector<1x2x10x16xbf16>
    %1 = vector.shape_cast %0 : vector<1x2x10x16xbf16> to vector<2x10x16xbf16>
    %c0_3 = arith.constant 0 : index
    %c0_4 = arith.constant 0 : index
    %c0_5 = arith.constant 0 : index
    %c0_6 = arith.constant 0 : index
    %2 = vector.load %arg3[%c0_3, %c0_4, %c0_5, %c0_6] : memref<1x2x10x16xbf16, #tpu.memory_space<vmem>>, vector<1x2x10x16xbf16>
    %3 = vector.shape_cast %2 : vector<1x2x10x16xbf16> to vector<2x10x16xbf16>
    %4 = tpu.concatenate %1, %3 in 0 : vector<2x10x16xbf16>, vector<2x10x16xbf16> -> vector<4x10x16xbf16>
    %cst = arith.constant 0.000000e+00 : f32
    %5 = vector.broadcast %cst : f32 to vector<16x256xf32>
    %6 = vector.extract_strided_slice %4 {offsets = [0, 0, 0], sizes = [2, 10, 16], strides = [1, 1, 1]} : vector<4x10x16xbf16> to vector<2x10x16xbf16>
    %7 = vector.extract_strided_slice %6 {offsets = [0, 0, 0], sizes = [2, 8, 16], strides = [1, 1, 1]} : vector<2x10x16xbf16> to vector<2x8x16xbf16>
    %8 = vector.shape_cast %7 : vector<2x8x16xbf16> to vector<16x16xbf16>
    %c0_7 = arith.constant 0 : index
    %c0_8 = arith.constant 0 : index
    %c0_9 = arith.constant 0 : index
    %c0_10 = arith.constant 0 : index
    %9 = vector.load %arg4[%c0_7, %c0_8, %c0_9, %c0_10] : memref<3x3x16x256xbf16, #tpu.memory_space<vmem>>, vector<1x1x16x256xbf16>
    %10 = vector.shape_cast %9 : vector<1x1x16x256xbf16> to vector<16x256xbf16>
    %cst_11 = arith.constant dense<0.000000e+00> : vector<16x256xf32>
    %11 = tpu.matmul %8, %10, %cst_11 {dimension_numbers = #tpu.dot_dimension_numbers<[1], [0], [0], [1], [0, 0, 1, 1], [], []>} : vector<16x16xbf16>, vector<16x256xbf16>, vector<16x256xf32> -> vector<16x256xf32>
    %12 = arith.addf %5, %11 : vector<16x256xf32>
    %13 = vector.extract_strided_slice %6 {offsets = [0, 1, 0], sizes = [2, 8, 16], strides = [1, 1, 1]} : vector<2x10x16xbf16> to vector<2x8x16xbf16>
    %14 = vector.shape_cast %13 : vector<2x8x16xbf16> to vector<16x16xbf16>
    %c0_12 = arith.constant 0 : index
    %c1 = arith.constant 1 : index
    %c0_13 = arith.constant 0 : index
    %c0_14 = arith.constant 0 : index
    %15 = vector.load %arg4[%c0_12, %c1, %c0_13, %c0_14] : memref<3x3x16x256xbf16, #tpu.memory_space<vmem>>, vector<1x1x16x256xbf16>
    %16 = vector.shape_cast %15 : vector<1x1x16x256xbf16> to vector<16x256xbf16>
    %cst_15 = arith.constant dense<0.000000e+00> : vector<16x256xf32>
    %17 = tpu.matmul %14, %16, %cst_15 {dimension_numbers = #tpu.dot_dimension_numbers<[1], [0], [0], [1], [0, 0, 1, 1], [], []>} : vector<16x16xbf16>, vector<16x256xbf16>, vector<16x256xf32> -> vector<16x256xf32>
    %18 = arith.addf %12, %17 : vector<16x256xf32>
    %19 = vector.extract_strided_slice %6 {offsets = [0, 2, 0], sizes = [2, 8, 16], strides = [1, 1, 1]} : vector<2x10x16xbf16> to vector<2x8x16xbf16>
    %20 = vector.shape_cast %19 : vector<2x8x16xbf16> to vector<16x16xbf16>
    %c0_16 = arith.constant 0 : index
    %c2 = arith.constant 2 : index
    %c0_17 = arith.constant 0 : index
    %c0_18 = arith.constant 0 : index
    %21 = vector.load %arg4[%c0_16, %c2, %c0_17, %c0_18] : memref<3x3x16x256xbf16, #tpu.memory_space<vmem>>, vector<1x1x16x256xbf16>
    %22 = vector.shape_cast %21 : vector<1x1x16x256xbf16> to vector<16x256xbf16>
    %cst_19 = arith.constant dense<0.000000e+00> : vector<16x256xf32>
    %23 = tpu.matmul %20, %22, %cst_19 {dimension_numbers = #tpu.dot_dimension_numbers<[1], [0], [0], [1], [0, 0, 1, 1], [], []>} : vector<16x16xbf16>, vector<16x256xbf16>, vector<16x256xf32> -> vector<16x256xf32>
    %24 = arith.addf %18, %23 : vector<16x256xf32>
    %25 = vector.extract_strided_slice %4 {offsets = [1, 0, 0], sizes = [2, 10, 16], strides = [1, 1, 1]} : vector<4x10x16xbf16> to vector<2x10x16xbf16>
    %26 = vector.extract_strided_slice %25 {offsets = [0, 0, 0], sizes = [2, 8, 16], strides = [1, 1, 1]} : vector<2x10x16xbf16> to vector<2x8x16xbf16>
    %27 = vector.shape_cast %26 : vector<2x8x16xbf16> to vector<16x16xbf16>
    %c1_20 = arith.constant 1 : index
    %c0_21 = arith.constant 0 : index
    %c0_22 = arith.constant 0 : index
    %c0_23 = arith.constant 0 : index
    %28 = vector.load %arg4[%c1_20, %c0_21, %c0_22, %c0_23] : memref<3x3x16x256xbf16, #tpu.memory_space<vmem>>, vector<1x1x16x256xbf16>
    %29 = vector.shape_cast %28 : vector<1x1x16x256xbf16> to vector<16x256xbf16>
    %cst_24 = arith.constant dense<0.000000e+00> : vector<16x256xf32>
    %30 = tpu.matmul %27, %29, %cst_24 {dimension_numbers = #tpu.dot_dimension_numbers<[1], [0], [0], [1], [0, 0, 1, 1], [], []>} : vector<16x16xbf16>, vector<16x256xbf16>, vector<16x256xf32> -> vector<16x256xf32>
    %31 = arith.addf %24, %30 : vector<16x256xf32>
    %32 = vector.extract_strided_slice %25 {offsets = [0, 1, 0], sizes = [2, 8, 16], strides = [1, 1, 1]} : vector<2x10x16xbf16> to vector<2x8x16xbf16>
    %33 = vector.shape_cast %32 : vector<2x8x16xbf16> to vector<16x16xbf16>
    %c1_25 = arith.constant 1 : index
    %c1_26 = arith.constant 1 : index
    %c0_27 = arith.constant 0 : index
    %c0_28 = arith.constant 0 : index
    %34 = vector.load %arg4[%c1_25, %c1_26, %c0_27, %c0_28] : memref<3x3x16x256xbf16, #tpu.memory_space<vmem>>, vector<1x1x16x256xbf16>
    %35 = vector.shape_cast %34 : vector<1x1x16x256xbf16> to vector<16x256xbf16>
    %cst_29 = arith.constant dense<0.000000e+00> : vector<16x256xf32>
    %36 = tpu.matmul %33, %35, %cst_29 {dimension_numbers = #tpu.dot_dimension_numbers<[1], [0], [0], [1], [0, 0, 1, 1], [], []>} : vector<16x16xbf16>, vector<16x256xbf16>, vector<16x256xf32> -> vector<16x256xf32>
    %37 = arith.addf %31, %36 : vector<16x256xf32>
    %38 = vector.extract_strided_slice %25 {offsets = [0, 2, 0], sizes = [2, 8, 16], strides = [1, 1, 1]} : vector<2x10x16xbf16> to vector<2x8x16xbf16>
    %39 = vector.shape_cast %38 : vector<2x8x16xbf16> to vector<16x16xbf16>
    %c1_30 = arith.constant 1 : index
    %c2_31 = arith.constant 2 : index
    %c0_32 = arith.constant 0 : index
    %c0_33 = arith.constant 0 : index
    %40 = vector.load %arg4[%c1_30, %c2_31, %c0_32, %c0_33] : memref<3x3x16x256xbf16, #tpu.memory_space<vmem>>, vector<1x1x16x256xbf16>
    %41 = vector.shape_cast %40 : vector<1x1x16x256xbf16> to vector<16x256xbf16>
    %cst_34 = arith.constant dense<0.000000e+00> : vector<16x256xf32>
    %42 = tpu.matmul %39, %41, %cst_34 {dimension_numbers = #tpu.dot_dimension_numbers<[1], [0], [0], [1], [0, 0, 1, 1], [], []>} : vector<16x16xbf16>, vector<16x256xbf16>, vector<16x256xf32> -> vector<16x256xf32>
    %43 = arith.addf %37, %42 : vector<16x256xf32>
    %44 = vector.extract_strided_slice %4 {offsets = [2, 0, 0], sizes = [2, 10, 16], strides = [1, 1, 1]} : vector<4x10x16xbf16> to vector<2x10x16xbf16>
    %45 = vector.extract_strided_slice %44 {offsets = [0, 0, 0], sizes = [2, 8, 16], strides = [1, 1, 1]} : vector<2x10x16xbf16> to vector<2x8x16xbf16>
    %46 = vector.shape_cast %45 : vector<2x8x16xbf16> to vector<16x16xbf16>
    %c2_35 = arith.constant 2 : index
    %c0_36 = arith.constant 0 : index
    %c0_37 = arith.constant 0 : index
    %c0_38 = arith.constant 0 : index
    %47 = vector.load %arg4[%c2_35, %c0_36, %c0_37, %c0_38] : memref<3x3x16x256xbf16, #tpu.memory_space<vmem>>, vector<1x1x16x256xbf16>
    %48 = vector.shape_cast %47 : vector<1x1x16x256xbf16> to vector<16x256xbf16>
    %cst_39 = arith.constant dense<0.000000e+00> : vector<16x256xf32>
    %49 = tpu.matmul %46, %48, %cst_39 {dimension_numbers = #tpu.dot_dimension_numbers<[1], [0], [0], [1], [0, 0, 1, 1], [], []>} : vector<16x16xbf16>, vector<16x256xbf16>, vector<16x256xf32> -> vector<16x256xf32>
    %50 = arith.addf %43, %49 : vector<16x256xf32>
    %51 = vector.extract_strided_slice %44 {offsets = [0, 1, 0], sizes = [2, 8, 16], strides = [1, 1, 1]} : vector<2x10x16xbf16> to vector<2x8x16xbf16>
    %52 = vector.shape_cast %51 : vector<2x8x16xbf16> to vector<16x16xbf16>
    %c2_40 = arith.constant 2 : index
    %c1_41 = arith.constant 1 : index
    %c0_42 = arith.constant 0 : index
    %c0_43 = arith.constant 0 : index
    %53 = vector.load %arg4[%c2_40, %c1_41, %c0_42, %c0_43] : memref<3x3x16x256xbf16, #tpu.memory_space<vmem>>, vector<1x1x16x256xbf16>
    %54 = vector.shape_cast %53 : vector<1x1x16x256xbf16> to vector<16x256xbf16>
    %cst_44 = arith.constant dense<0.000000e+00> : vector<16x256xf32>
    %55 = tpu.matmul %52, %54, %cst_44 {dimension_numbers = #tpu.dot_dimension_numbers<[1], [0], [0], [1], [0, 0, 1, 1], [], []>} : vector<16x16xbf16>, vector<16x256xbf16>, vector<16x256xf32> -> vector<16x256xf32>
    %56 = arith.addf %50, %55 : vector<16x256xf32>
    %57 = vector.extract_strided_slice %44 {offsets = [0, 2, 0], sizes = [2, 8, 16], strides = [1, 1, 1]} : vector<2x10x16xbf16> to vector<2x8x16xbf16>
    %58 = vector.shape_cast %57 : vector<2x8x16xbf16> to vector<16x16xbf16>
    %c2_45 = arith.constant 2 : index
    %c2_46 = arith.constant 2 : index
    %c0_47 = arith.constant 0 : index
    %c0_48 = arith.constant 0 : index
    %59 = vector.load %arg4[%c2_45, %c2_46, %c0_47, %c0_48] : memref<3x3x16x256xbf16, #tpu.memory_space<vmem>>, vector<1x1x16x256xbf16>
    %60 = vector.shape_cast %59 : vector<1x1x16x256xbf16> to vector<16x256xbf16>
    %cst_49 = arith.constant dense<0.000000e+00> : vector<16x256xf32>
    %61 = tpu.matmul %58, %60, %cst_49 {dimension_numbers = #tpu.dot_dimension_numbers<[1], [0], [0], [1], [0, 0, 1, 1], [], []>} : vector<16x16xbf16>, vector<16x256xbf16>, vector<16x256xf32> -> vector<16x256xf32>
    %62 = arith.addf %56, %61 : vector<16x256xf32>
    %c0_50 = arith.constant 0 : index
    %c0_51 = arith.constant 0 : index
    %63 = vector.load %arg5[%c0_50, %c0_51] : memref<1x256xf32, #tpu.memory_space<vmem>>, vector<1x256xf32>
    %64 = vector.extract_strided_slice %62 {offsets = [0, 0], sizes = [8, 256], strides = [1, 1]} : vector<16x256xf32> to vector<8x256xf32>
    %65 = vector.broadcast %63 : vector<1x256xf32> to vector<8x256xf32>
    %66 = arith.addf %64, %65 : vector<8x256xf32>
    %cst_52 = arith.constant 0.000000e+00 : f32
    %67 = vector.broadcast %cst_52 : f32 to vector<8x256xf32>
    %68 = arith.maximumf %66, %67 : vector<8x256xf32>
    %69 = arith.truncf %68 : vector<8x256xf32> to vector<8x256xbf16>
    %c0_53 = arith.constant 0 : index
    %c0_54 = arith.constant 0 : index
    %c0_55 = arith.constant 0 : index
    %c0_56 = arith.constant 0 : index
    %70 = vector.load %arg6[%c0_53, %c0_54, %c0_55, %c0_56] : memref<1x2x8x256xbf16, #tpu.memory_space<vmem>>, vector<1x1x8x256xbf16>
    %71 = vector.shape_cast %70 : vector<1x1x8x256xbf16> to vector<8x256xbf16>
    %72 = vector.shape_cast %69 : vector<8x256xbf16> to vector<1x1x8x256xbf16>
    tpu.vector_store %arg6[%c0_53, %c0_54, %c0_55, %c0_56], %72 {strides = array<i32>} : memref<1x2x8x256xbf16, #tpu.memory_space<vmem>>, vector<1x1x8x256xbf16>,
    %73 = vector.extract_strided_slice %62 {offsets = [8, 0], sizes = [8, 256], strides = [1, 1]} : vector<16x256xf32> to vector<8x256xf32>
    %74 = vector.broadcast %63 : vector<1x256xf32> to vector<8x256xf32>
    %75 = arith.addf %73, %74 : vector<8x256xf32>
    %cst_57 = arith.constant 0.000000e+00 : f32
    %76 = vector.broadcast %cst_57 : f32 to vector<8x256xf32>
    %77 = arith.maximumf %75, %76 : vector<8x256xf32>
    %78 = arith.truncf %77 : vector<8x256xf32> to vector<8x256xbf16>
    %c0_58 = arith.constant 0 : index
    %c1_59 = arith.constant 1 : index
    %c0_60 = arith.constant 0 : index
    %c0_61 = arith.constant 0 : index
    %79 = vector.load %arg6[%c0_58, %c1_59, %c0_60, %c0_61] : memref<1x2x8x256xbf16, #tpu.memory_space<vmem>>, vector<1x1x8x256xbf16>
    %80 = vector.shape_cast %79 : vector<1x1x8x256xbf16> to vector<8x256xbf16>
    %81 = vector.shape_cast %78 : vector<8x256xbf16> to vector<1x1x8x256xbf16>
    tpu.vector_store %arg6[%c0_58, %c1_59, %c0_60, %c0_61], %81 {strides = array<i32>} : memref<1x2x8x256xbf16, #tpu.memory_space<vmem>>, vector<1x1x8x256xbf16>,
    return
  }
  func.func @transform_0(%arg0: i32, %arg1: i32) -> (i32, i32, i32, i32) {
    %c0_i32 = arith.constant 0 : i32
    %c0_i32_0 = arith.constant 0 : i32
    %c0_i32_1 = arith.constant 0 : i32
    return %arg0, %arg1, %c0_i32, %c0_i32_0 : i32, i32, i32, i32
  }
  func.func @transform_1(%arg0: i32, %arg1: i32) -> (i32, i32, i32, i32) {
    %c1_i32 = arith.constant 1 : i32
    %0 = arith.addi %arg1, %c1_i32 : i32
    %c1_i32_0 = arith.constant 1 : i32
    %1 = arith.muli %c1_i32_0, %0 : i32
    %c0_i32 = arith.constant 0 : i32
    %c0_i32_1 = arith.constant 0 : i32
    %c0_i32_2 = arith.constant 0 : i32
    return %arg0, %1, %c0_i32, %c0_i32_1 : i32, i32, i32, i32
  }
  func.func @transform_2(%arg0: i32, %arg1: i32) -> (i32, i32, i32, i32) {
    %c0_i32 = arith.constant 0 : i32
    %c0_i32_0 = arith.constant 0 : i32
    %c0_i32_1 = arith.constant 0 : i32
    %c0_i32_2 = arith.constant 0 : i32
    %c0_i32_3 = arith.constant 0 : i32
    return %c0_i32, %c0_i32_0, %c0_i32_1, %c0_i32_2 : i32, i32, i32, i32
  }
  func.func @transform_3(%arg0: i32, %arg1: i32) -> (i32, i32) {
    %c0_i32 = arith.constant 0 : i32
    %c0_i32_0 = arith.constant 0 : i32
    %c0_i32_1 = arith.constant 0 : i32
    return %c0_i32, %c0_i32_0 : i32, i32
  }
  func.func @transform_4(%arg0: i32, %arg1: i32) -> (i32, i32, i32, i32) {
    %c0_i32 = arith.constant 0 : i32
    %c0_i32_0 = arith.constant 0 : i32
    %c0_i32_1 = arith.constant 0 : i32
    return %arg0, %arg1, %c0_i32, %c0_i32_0 : i32, i32, i32, i32
  }
}

module attributes {stable_mosaic.version = 11 : i64} {
  func.func @_matmul_bias_act_kernel(%arg0: i32, %arg1: memref<8x256xbf16, #tpu.memory_space<vmem>>, %arg2: memref<256x512xbf16, #tpu.memory_space<vmem>>, %arg3: memref<1x512xf32, #tpu.memory_space<vmem>>, %arg4: memref<8x512xbf16, #tpu.memory_space<vmem>>) attributes {dimension_semantics = [#tpu.dimension_semantics<parallel>], iteration_bounds = array<i64: 1>, scalar_prefetch = 0 : i64, scratch_operands = 0 : i64, tpu.core_type = #tpu.core_type<tc>, window_params = [{transform_indices = @transform_0, window_bounds = array<i64: 8, 256>}, {pipeline_mode = #tpu.pipeline_mode<synchronous>, transform_indices = @transform_1, window_bounds = array<i64: 256, 512>}, {pipeline_mode = #tpu.pipeline_mode<synchronous>, transform_indices = @transform_2, window_bounds = array<i64: 1, 512>}, {transform_indices = @transform_3, window_bounds = array<i64: 8, 512>}]} {
    %c0 = arith.constant 0 : index
    %c0_0 = arith.constant 0 : index
    %0 = vector.load %arg1[%c0, %c0_0] : memref<8x256xbf16, #tpu.memory_space<vmem>>, vector<8x256xbf16>
    %c0_1 = arith.constant 0 : index
    %c0_2 = arith.constant 0 : index
    %1 = vector.load %arg2[%c0_1, %c0_2] : memref<256x512xbf16, #tpu.memory_space<vmem>>, vector<256x512xbf16>
    %cst = arith.constant dense<0.000000e+00> : vector<8x512xf32>
    %2 = tpu.matmul %0, %1, %cst {dimension_numbers = #tpu.dot_dimension_numbers<[1], [0], [0], [1], [0, 0, 1, 1], [], []>} : vector<8x256xbf16>, vector<256x512xbf16>, vector<8x512xf32> -> vector<8x512xf32>
    %c0_3 = arith.constant 0 : index
    %c0_4 = arith.constant 0 : index
    %3 = vector.load %arg3[%c0_3, %c0_4] : memref<1x512xf32, #tpu.memory_space<vmem>>, vector<1x512xf32>
    %4 = vector.broadcast %3 : vector<1x512xf32> to vector<8x512xf32>
    %5 = arith.addf %2, %4 : vector<8x512xf32>
    %cst_5 = arith.constant 0.000000e+00 : f32
    %6 = vector.broadcast %cst_5 : f32 to vector<8x512xf32>
    %7 = arith.maximumf %5, %6 : vector<8x512xf32>
    %8 = arith.truncf %7 : vector<8x512xf32> to vector<8x512xbf16>
    %c0_6 = arith.constant 0 : index
    %c0_7 = arith.constant 0 : index
    %9 = vector.load %arg4[%c0_6, %c0_7] : memref<8x512xbf16, #tpu.memory_space<vmem>>, vector<8x512xbf16>
    tpu.vector_store %arg4[%c0_6, %c0_7], %8 {strides = array<i32>} : memref<8x512xbf16, #tpu.memory_space<vmem>>, vector<8x512xbf16>,
    return
  }
  func.func @transform_0(%arg0: i32) -> (i32, i32) {
    %c0_i32 = arith.constant 0 : i32
    %c0_i32_0 = arith.constant 0 : i32
    return %arg0, %c0_i32 : i32, i32
  }
  func.func @transform_1(%arg0: i32) -> (i32, i32) {
    %c0_i32 = arith.constant 0 : i32
    %c0_i32_0 = arith.constant 0 : i32
    %c0_i32_1 = arith.constant 0 : i32
    return %c0_i32, %c0_i32_0 : i32, i32
  }
  func.func @transform_2(%arg0: i32) -> (i32, i32) {
    %c0_i32 = arith.constant 0 : i32
    %c0_i32_0 = arith.constant 0 : i32
    %c0_i32_1 = arith.constant 0 : i32
    return %c0_i32, %c0_i32_0 : i32, i32
  }
  func.func @transform_3(%arg0: i32) -> (i32, i32) {
    %c0_i32 = arith.constant 0 : i32
    %c0_i32_0 = arith.constant 0 : i32
    return %arg0, %c0_i32 : i32, i32
  }
}

module attributes {stable_mosaic.version = 11 : i64} {
  func.func @_decoder_tail_kernel(%arg0: i32, %arg1: memref<32x128xbf16, #tpu.memory_space<vmem>>, %arg2: memref<128x256xbf16, #tpu.memory_space<vmem>>, %arg3: memref<1x256xf32, #tpu.memory_space<vmem>>, %arg4: memref<64x4xbf16, #tpu.memory_space<vmem>>, %arg5: memref<1x1xf32, #tpu.memory_space<vmem>>, %arg6: memref<32x16xf32, #tpu.memory_space<vmem>>) attributes {dimension_semantics = [#tpu.dimension_semantics<parallel>], iteration_bounds = array<i64: 1>, scalar_prefetch = 0 : i64, scratch_operands = 0 : i64, tpu.core_type = #tpu.core_type<tc>, window_params = [{transform_indices = @transform_0, window_bounds = array<i64: 32, 128>}, {pipeline_mode = #tpu.pipeline_mode<synchronous>, transform_indices = @transform_1, window_bounds = array<i64: 128, 256>}, {pipeline_mode = #tpu.pipeline_mode<synchronous>, transform_indices = @transform_2, window_bounds = array<i64: 1, 256>}, {pipeline_mode = #tpu.pipeline_mode<synchronous>, transform_indices = @transform_3, window_bounds = array<i64: 64, 4>}, {pipeline_mode = #tpu.pipeline_mode<synchronous>, transform_indices = @transform_4, window_bounds = array<i64: 1, 1>}, {transform_indices = @transform_5, window_bounds = array<i64: 32, 16>}]} {
    %c0 = arith.constant 0 : index
    %c0_0 = arith.constant 0 : index
    %0 = vector.load %arg1[%c0, %c0_0] : memref<32x128xbf16, #tpu.memory_space<vmem>>, vector<32x128xbf16>
    %c0_1 = arith.constant 0 : index
    %c0_2 = arith.constant 0 : index
    %1 = vector.load %arg2[%c0_1, %c0_2] : memref<128x256xbf16, #tpu.memory_space<vmem>>, vector<128x256xbf16>
    %cst = arith.constant dense<0.000000e+00> : vector<32x256xf32>
    %2 = tpu.matmul %0, %1, %cst {dimension_numbers = #tpu.dot_dimension_numbers<[1], [0], [0], [1], [0, 0, 1, 1], [], []>} : vector<32x128xbf16>, vector<128x256xbf16>, vector<32x256xf32> -> vector<32x256xf32>
    %c0_3 = arith.constant 0 : index
    %c0_4 = arith.constant 0 : index
    %3 = vector.load %arg3[%c0_3, %c0_4] : memref<1x256xf32, #tpu.memory_space<vmem>>, vector<1x256xf32>
    %4 = vector.broadcast %3 : vector<1x256xf32> to vector<32x256xf32>
    %5 = arith.addf %2, %4 : vector<32x256xf32>
    %cst_5 = arith.constant 0.000000e+00 : f32
    %6 = vector.broadcast %cst_5 : f32 to vector<32x256xf32>
    %7 = arith.maximumf %5, %6 : vector<32x256xf32>
    %8 = arith.truncf %7 : vector<32x256xf32> to vector<32x256xbf16>
    %c0_6 = arith.constant 0 : index
    %c0_7 = arith.constant 0 : index
    %9 = vector.load %arg4[%c0_6, %c0_7] : memref<64x4xbf16, #tpu.memory_space<vmem>>, vector<64x4xbf16>
    %10 = vector.extract_strided_slice %8 {offsets = [0, 0], sizes = [32, 64], strides = [1, 1]} : vector<32x256xbf16> to vector<32x64xbf16>
    %cst_8 = arith.constant dense<0.000000e+00> : vector<32x4xf32>
    %11 = tpu.matmul %10, %9, %cst_8 {dimension_numbers = #tpu.dot_dimension_numbers<[1], [0], [0], [1], [0, 0, 1, 1], [], []>} : vector<32x64xbf16>, vector<64x4xbf16>, vector<32x4xf32> -> vector<32x4xf32>
    %12 = vector.extract_strided_slice %8 {offsets = [0, 64], sizes = [32, 64], strides = [1, 1]} : vector<32x256xbf16> to vector<32x64xbf16>
    %cst_9 = arith.constant dense<0.000000e+00> : vector<32x4xf32>
    %13 = tpu.matmul %12, %9, %cst_9 {dimension_numbers = #tpu.dot_dimension_numbers<[1], [0], [0], [1], [0, 0, 1, 1], [], []>} : vector<32x64xbf16>, vector<64x4xbf16>, vector<32x4xf32> -> vector<32x4xf32>
    %14 = vector.extract_strided_slice %8 {offsets = [0, 128], sizes = [32, 64], strides = [1, 1]} : vector<32x256xbf16> to vector<32x64xbf16>
    %cst_10 = arith.constant dense<0.000000e+00> : vector<32x4xf32>
    %15 = tpu.matmul %14, %9, %cst_10 {dimension_numbers = #tpu.dot_dimension_numbers<[1], [0], [0], [1], [0, 0, 1, 1], [], []>} : vector<32x64xbf16>, vector<64x4xbf16>, vector<32x4xf32> -> vector<32x4xf32>
    %16 = vector.extract_strided_slice %8 {offsets = [0, 192], sizes = [32, 64], strides = [1, 1]} : vector<32x256xbf16> to vector<32x64xbf16>
    %cst_11 = arith.constant dense<0.000000e+00> : vector<32x4xf32>
    %17 = tpu.matmul %16, %9, %cst_11 {dimension_numbers = #tpu.dot_dimension_numbers<[1], [0], [0], [1], [0, 0, 1, 1], [], []>} : vector<32x64xbf16>, vector<64x4xbf16>, vector<32x4xf32> -> vector<32x4xf32>
    %18 = tpu.concatenate %11, %13, %15, %17 in 1 : vector<32x4xf32>, vector<32x4xf32>, vector<32x4xf32>, vector<32x4xf32> -> vector<32x16xf32>
    %c0_12 = arith.constant 0 : index
    %c0_13 = arith.constant 0 : index
    %19 = vector.load %arg5[%c0_12, %c0_13] : memref<1x1xf32, #tpu.memory_space<vmem>>, vector<1x1xf32>
    %20 = vector.broadcast %19 : vector<1x1xf32> to vector<32x16xf32>
    %21 = arith.addf %18, %20 : vector<32x16xf32>
    %c0_14 = arith.constant 0 : index
    %c0_15 = arith.constant 0 : index
    %22 = vector.load %arg6[%c0_14, %c0_15] : memref<32x16xf32, #tpu.memory_space<vmem>>, vector<32x16xf32>
    tpu.vector_store %arg6[%c0_14, %c0_15], %21 {strides = array<i32>} : memref<32x16xf32, #tpu.memory_space<vmem>>, vector<32x16xf32>,
    return
  }
  func.func @transform_0(%arg0: i32) -> (i32, i32) {
    %c0_i32 = arith.constant 0 : i32
    %c0_i32_0 = arith.constant 0 : i32
    return %arg0, %c0_i32 : i32, i32
  }
  func.func @transform_1(%arg0: i32) -> (i32, i32) {
    %c0_i32 = arith.constant 0 : i32
    %c0_i32_0 = arith.constant 0 : i32
    %c0_i32_1 = arith.constant 0 : i32
    return %c0_i32, %c0_i32_0 : i32, i32
  }
  func.func @transform_2(%arg0: i32) -> (i32, i32) {
    %c0_i32 = arith.constant 0 : i32
    %c0_i32_0 = arith.constant 0 : i32
    %c0_i32_1 = arith.constant 0 : i32
    return %c0_i32, %c0_i32_0 : i32, i32
  }
  func.func @transform_3(%arg0: i32) -> (i32, i32) {
    %c0_i32 = arith.constant 0 : i32
    %c0_i32_0 = arith.constant 0 : i32
    %c0_i32_1 = arith.constant 0 : i32
    return %c0_i32, %c0_i32_0 : i32, i32
  }
  func.func @transform_4(%arg0: i32) -> (i32, i32) {
    %c0_i32 = arith.constant 0 : i32
    %c0_i32_0 = arith.constant 0 : i32
    %c0_i32_1 = arith.constant 0 : i32
    return %c0_i32, %c0_i32_0 : i32, i32
  }
  func.func @transform_5(%arg0: i32) -> (i32, i32) {
    %c0_i32 = arith.constant 0 : i32
    %c0_i32_0 = arith.constant 0 : i32
    return %arg0, %c0_i32 : i32, i32
  }
}

</mosaic_0001>

<bundles_post_ra>
// kernel: denoising_cnn_512_forward.8
= control target key start
LH: loop header
LB: loop body
LE: loop exit
PB: predicated region body
PF: predicated region fallthrough
CT: control target
= control target key end

     0   :  { %s2697_s21 = smov 0   ;;  %s2699_s22 = smov 0   ;;  %s4226_s0 = inlined_call_operand.vmem [shape: bf16[6,18,9,1], index: 0, kind: input, shape index: {}, may-alias: {0,1}]   ;;  %s4227_s1 = inlined_call_operand.vmem [shape: bf16[6,18,9,1], index: 1, kind: input, shape index: {}, may-alias: {0,1}]   ;;  %s4228_s2 = inlined_call_operand.vmem [shape: bf16[6,18,9,1], index: 2, kind: input, shape index: {}, may-alias: {2,3}]   ;;  %s4229_s3 = inlined_call_operand.vmem [shape: bf16[6,18,9,1], index: 3, kind: input, shape index: {}, may-alias: {2,3}]   ;;  %s4230_s4 = inlined_call_operand.vmem [shape: bf16[3,3,1,64], index: 4, kind: input, shape index: {}]   ;;  %s4231_s5 = inlined_call_operand.vmem [shape: f32[1,64], index: 5, kind: input, shape index: {}]   ;;  %s4232_s6 = inlined_call_operand.vmem [shape: bf16[6,8,8,64], index: 6, kind: output, shape index: {}]  }
   0x1   :  { %s2701_s23 = smov 0  }
   0x2 LB: > { %s28_s24 = sadd.s32 1, %s2655_s22  ;;  %p2402_p0 = scmp.ge.s32.totalorder %s2659_s23, 1  ;;  %s2659_s23 = sphi %s2701_s23, %s16_s23   ;;  %s2655_s22 = sphi %s2699_s22, %s4481_s22   ;;  %s2651_s21 = sphi %s2697_s21, %s4480_s21  }
   0x3   : > { %p30_p1 = scmp.ge.s32.totalorder %s28_s24, 6  ;;  %p324_p2 = scmp.lt.s32.totalorder %s2659_s23, 7 }
   0x5   : > { %s4483_s24 = smov (%p30_p1, %s28_s24), 0  ;;  %p325_p3 = pnand %p2402_p0, %p324_p2 }
   0x7   : > { %328 = sbr.rel (%p325_p3) target bundleno = 347 (0x15b), region = 44 }
   0xe   : > { %p413_p4 = scmp.lt.s32.totalorder %s2651_s21, 5  ;;  %v2661_v0 = vmov 0   ;;  %vm561_vm0 = vsmask.f32 3328  ;;  %vm562_vm1 = vsmask.f32 7440 }
   0xf   : > { %2471 = vset.pattern.permute.xlu1 %v2661_v0  ;;  %2460 = vset.pattern.permute.xlu0 %v2661_v0  ;;  %vm2906_vm2 = vmor %vm561_vm0, %vm562_vm1  ;;  %vm2201_vm3 = vcmask 519168  }
  0x10   : > { %s4485_s21 = smov (!%p413_p4, %s2651_s21), 5 }
  0x11   : > { %s2718_s25 = smul.u32 144, %s4485_s21  ;;  %s2431_s15 = sshll.u32 %s4485_s21, 5 }
  0x12   : > { %s3940_s17 = scalar_lea.vmem %s4232_s6, %s2431_s15 }
  0x13   : > { %s2724_s28 = scalar_lea.vmem %s4226_s0, %s2718_s25  ;;  %s2800_s7 = scalar_lea.vmem %s4228_s2, %s2718_s25 }
  0x14   : > { %v497_v1 = vld [vmem:[%s2724_s28 + $0x20] sm:$0xf]  ;;  %v499_v2 = vld [vmem:[%s2724_s28 + $0x28] sm:$0xf]  ;;  %v501_v21 = vld [vmem:[%s2724_s28 + $0x30] sm:$0xf] }
  0x15   : > { %v489_v3 = vld [vmem:[%s2724_s28] sm:$0xf]  ;;  %v635_v4 = vshrl.u32 %v499_v2, 16  ;;  %v638_v5 = vshll.u32 %v499_v2, 16  ;;  %v1050_v6 = vunpack.c.l.bf16 %v497_v1  ;;  %v1051_v7 = vunpack.c.l.bf16 %v499_v2  ;;  %v491_v8 = vld [vmem:[%s2724_s28 + $0x8] sm:$0xf] }
  0x16   : > { %v621_v9 = vshrl.u32 %v497_v1, 16  ;;  %v624_v10 = vshll.u32 %v497_v1, 16  ;;  %v579_v11 = vshrl.u32 %v491_v8, 16  ;;  %v582_v12 = vshll.u32 %v491_v8, 16  ;;  %v503_v26 = vld [vmem:[%s2724_s28 + $0x38] sm:$0xf] }
  0x17   : > { %v2730_v13 = vrot.slane %v635_v4, 4  ;;  %v2732_v14 = vrot.slane %v638_v5, 5  ;;  %v2472_v15 = vpack.i.bf16 %v1051_v7, %v1050_v6  ;;  %v1046_v16 = vunpack.c.l.bf16 %v489_v3  ;;  %v493_v35 = vld [vmem:[%s2724_s28 + $0x10] sm:$0xf]  ;;  %v495_v36 = vld [vmem:[%s2724_s28 + $0x18] sm:$0xf] }
  0x18   : > { %v2734_v17 = vrot.slane %v621_v9, 4  ;;  %v2736_v18 = vrot.slane %v624_v10, 5  ;;  %v2738_v19 = vrot.slane %v579_v11, 4  ;;  %v2740_v20 = vrot.slane %v582_v12, 5  ;;  %v509_v49 = vld [vmem:[%s2724_s28 + $0x50] sm:$0xf] }
  0x19   : > { %2473 = vperm.xlu1 %2471, %v2472_v15   ;;  %v1047_v23 = vunpack.c.l.bf16 %v491_v8  ;;  %v565_v24 = vshrl.u32 %v489_v3, 16  ;;  %v568_v25 = vshll.u32 %v489_v3, 16  ;;  %v663_v29 = vshrl.u32 %v503_v26, 16  ;;  %v511_v50 = vld [vmem:[%s2724_s28 + $0x58] sm:$0xf]  ;;  %s2428_s8 = sadd.s32 128, %s2718_s25 }
  0x1a   : > { %v666_v30 = vshll.u32 %v503_v26, 16  ;;  %v1052_v34 = vunpack.c.l.bf16 %v501_v21  ;;  %v1053_v39 = vunpack.c.l.bf16 %v503_v26  ;;  %v649_v40 = vshrl.u32 %v501_v21, 16  ;;  %v505_v63 = vld [vmem:[%s2724_s28 + $0x40] sm:$0xf]  ;;  %v507_v0 = vld [vmem:[%s2724_s28 + $0x48] sm:$0xf]  ;;  %s3052_s11 = scalar_lea.vmem %s4227_s1, %s2428_s8  ;;  %s3069_s14 = scalar_lea.vmem %s4229_s3, %s2428_s8 }
  0x1b   : > { %v2461_v31 = vpack.i.bf16 %v1047_v23, %v1046_v16  ;;  %v2750_v32 = vrot.slane %v565_v24, 4  ;;  %v2752_v33 = vrot.slane %v568_v25, 5  ;;  %v2756_v37 = vrot.slane %v663_v29, 4  ;;  %v517_v9 = vld [vmem:[%s2724_s28 + $0x70] sm:$0xf] }
  0x1c   : > { %v2758_v38 = vrot.slane %v666_v30, 5  ;;  %v652_v42 = vshll.u32 %v501_v21, 16  ;;  %v607_v43 = vshrl.u32 %v495_v36, 16  ;;  %v610_v44 = vshll.u32 %v495_v36, 16  ;;  %v519_v16 = vld [vmem:[%s2724_s28 + $0x78] sm:$0xf] }
  0x1d   : > { %2462 = vperm.xlu0 %2460, %v2461_v31   ;;  %v2477_v45 = vpack.i.bf16 %v1053_v39, %v1052_v34  ;;  %v2762_v46 = vrot.slane %v649_v40, 4  ;;  %v1048_v47 = vunpack.c.l.bf16 %v493_v35  ;;  %v1049_v48 = vunpack.c.l.bf16 %v495_v36  ;;  %v513_v34 = vld [vmem:[%s2724_s28 + $0x60] sm:$0xf]  ;;  %v545_v22 = vld [vmem:[%s2800_s7 + $0x50] sm:$0xf] }
  0x1e   : > { %v2766_v51 = vrot.slane %v652_v42, 5  ;;  %v2768_v52 = vrot.slane %v607_v43, 4  ;;  %v2770_v53 = vrot.slane %v610_v44, 5  ;;  %v593_v54 = vshrl.u32 %v493_v35, 16 }
  0x1f   : > { %2478 = vperm.xlu1 %2471, %v2477_v45   ;;  %v2466_v55 = vpack.i.bf16 %v1049_v48, %v1048_v47  ;;  %v596_v56 = vshll.u32 %v493_v35, 16  ;;  %v719_v57 = vshrl.u32 %v511_v50, 16  ;;  %v722_v58 = vshll.u32 %v511_v50, 16  ;;  %v515_v35 = vld [vmem:[%s2724_s28 + $0x68] sm:$0xf] }
  0x20   : > { %v2772_v59 = vrot.slane %v593_v54, 4  ;;  %v1056_v60 = vunpack.c.l.bf16 %v509_v49  ;;  %v1057_v61 = vunpack.c.l.bf16 %v511_v50  ;;  %v705_v62 = vshrl.u32 %v509_v49, 16 }
  0x21   : > { %v2776_v1 = vrot.slane %v596_v56, 5  ;;  %2467 = vperm.xlu0 %2460, %v2466_v55   ;;  %v2778_v2 = vrot.slane %v719_v57, 4  ;;  %v2780_v3 = vrot.slane %v722_v58, 5  ;;  %v708_v4 = vshll.u32 %v509_v49, 16  ;;  %v529_v55 = vld [vmem:[%s2800_s7 + $0x10] sm:$0xf] }
  0x22   : > { %v2487_v5 = vpack.i.bf16 %v1057_v61, %v1056_v60  ;;  %v2782_v6 = vrot.slane %v705_v62, 4  ;;  %v691_v7 = vshrl.u32 %v507_v0, 16  ;;  %v694_v8 = vshll.u32 %v507_v0, 16  ;;  %v531_v56 = vld [vmem:[%s2800_s7 + $0x18] sm:$0xf] }
  0x23   : > { %v2785_v10 = vrot.slane %v708_v4, 5  ;;  %v1054_v11 = vunpack.c.l.bf16 %v505_v63  ;;  %v1055_v12 = vunpack.c.l.bf16 %v507_v0  ;;  %v677_v15 = vshrl.u32 %v505_v63, 16 }
  0x24   : > { %2488 = vperm.xlu1 %2471, %v2487_v5   ;;  %v2788_v21 = vrot.slane %v691_v7, 4  ;;  %v2790_v23 = vrot.slane %v694_v8, 5  ;;  %v680_v24 = vshll.u32 %v505_v63, 16  ;;  %v775_v25 = vshrl.u32 %v519_v16, 16 }
  0x25   : > { %v2482_v26 = vpack.i.bf16 %v1055_v12, %v1054_v11  ;;  %v2792_v29 = vrot.slane %v677_v15, 4  ;;  %v778_v30 = vshll.u32 %v519_v16, 16  ;;  %v1060_v31 = vunpack.c.l.bf16 %v517_v9  ;;  %v525_v11 = vld [vmem:[%s2800_s7] sm:$0xf]  ;;  %v527_v12 = vld [vmem:[%s2800_s7 + $0x8] sm:$0xf] }
  0x26   : > { %v2802_v36 = vrot.slane %v680_v24, 5  ;;  %v2804_v39 = vrot.slane %v775_v25, 4  ;;  %v1061_v40 = vunpack.c.l.bf16 %v519_v16  ;;  %v761_v42 = vshrl.u32 %v517_v9, 16 }
  0x27   : > { %2483 = vperm.xlu0 %2460, %v2482_v26   ;;  %v2806_v43 = vrot.slane %v778_v30, 5  ;;  %v764_v44 = vshll.u32 %v517_v9, 16  ;;  %v747_v45 = vshrl.u32 %v515_v35, 16  ;;  %v750_v47 = vshll.u32 %v515_v35, 16 }
  0x28   : > { %v2497_v48 = vpack.i.bf16 %v1061_v40, %v1060_v31  ;;  %v2808_v49 = vrot.slane %v761_v42, 4  ;;  %v1058_v50 = vunpack.c.l.bf16 %v513_v34  ;;  %v1059_v54 = vunpack.c.l.bf16 %v515_v35  ;;  %v537_v35 = vld [vmem:[%s2800_s7 + $0x30] sm:$0xf] }
  0x29   : > { %v2812_v57 = vrot.slane %v764_v44, 5  ;;  %v2814_v58 = vrot.slane %v747_v45, 4  ;;  %v2816_v60 = vrot.slane %v750_v47, 5  ;;  %v733_v61 = vshrl.u32 %v513_v34, 16  ;;  %v539_v47 = vld [vmem:[%s2800_s7 + $0x38] sm:$0xf] }
  0x2a   : > { %2498 = vperm.xlu1 %2471, %v2497_v48   ;;  %v2492_v62 = vpack.i.bf16 %v1059_v54, %v1058_v50  ;;  %v736_v63 = vshll.u32 %v513_v34, 16  ;;  %v847_v0 = vshrl.u32 %v531_v56, 16  ;;  %v850_v4 = vshll.u32 %v531_v56, 16 }
  0x2b   : > { %v2818_v5 = vrot.slane %v733_v61, 4  ;;  %v1180_v7 = vunpack.c.l.bf16 %v529_v55  ;;  %v1181_v8 = vunpack.c.l.bf16 %v531_v56  ;;  %v833_v9 = vshrl.u32 %v529_v55, 16 }
  0x2c   : > { %v2822_v15 = vrot.slane %v736_v63, 5  ;;  %2493 = vperm.xlu0 %2460, %v2492_v62   ;;  %v2824_v16 = vrot.slane %v847_v0, 4  ;;  %v2826_v24 = vrot.slane %v850_v4, 5  ;;  %v836_v25 = vshll.u32 %v529_v55, 16  ;;  %v533_v0 = vld [vmem:[%s2800_s7 + $0x20] sm:$0xf] }
  0x2d   : > { %v2507_v26 = vpack.i.bf16 %v1181_v8, %v1180_v7  ;;  %v2828_v30 = vrot.slane %v833_v9, 4  ;;  %v819_v31 = vshrl.u32 %v527_v12, 16  ;;  %v822_v34 = vshll.u32 %v527_v12, 16  ;;  %v535_v4 = vld [vmem:[%s2800_s7 + $0x28] sm:$0xf] }
  0x2e   : > { %v2831_v40 = vrot.slane %v836_v25, 5  ;;  %v1178_v42 = vunpack.c.l.bf16 %v525_v11  ;;  %v1179_v44 = vunpack.c.l.bf16 %v527_v12  ;;  %v805_v45 = vshrl.u32 %v525_v11, 16 }
  0x2f   : > { %2508 = vperm.xlu1 %2471, %v2507_v26   ;;  %v2834_v48 = vrot.slane %v819_v31, 4  ;;  %v2836_v50 = vrot.slane %v822_v34, 5  ;;  %v808_v54 = vshll.u32 %v525_v11, 16  ;;  %v903_v55 = vshrl.u32 %v539_v47, 16 }
  0x30   : > { %v2502_v56 = vpack.i.bf16 %v1179_v44, %v1178_v42  ;;  %v2838_v61 = vrot.slane %v805_v45, 4  ;;  %v906_v62 = vshll.u32 %v539_v47, 16  ;;  %v1184_v63 = vunpack.c.l.bf16 %v537_v35 }
  0x31   : > { %v2842_v7 = vrot.slane %v808_v54, 5  ;;  %v2844_v8 = vrot.slane %v903_v55, 4  ;;  %v1185_v9 = vunpack.c.l.bf16 %v539_v47  ;;  %v889_v12 = vshrl.u32 %v537_v35, 16  ;;  %v547_v54 = vld [vmem:[%s2800_s7 + $0x58] sm:$0xf] }
  0x32   : > { %2503 = vperm.xlu0 %2460, %v2502_v56   ;;  %v2846_v25 = vrot.slane %v906_v62, 5  ;;  %v892_v11 = vshll.u32 %v537_v35, 16  ;;  %v875_v26 = vshrl.u32 %v535_v4, 16  ;;  %v878_v31 = vshll.u32 %v535_v4, 16 }
  0x33   : > { %4254 = vst [vmem:[#allocation2_spill] sm:$0xff] %v2844_v8  ;;  %v2517_v34 = vpack.i.bf16 %v1185_v9, %v1184_v63  ;;  %v2848_v42 = vrot.slane %v889_v12, 4  ;;  %v1182_v44 = vunpack.c.l.bf16 %v533_v0  ;;  %v1183_v45 = vunpack.c.l.bf16 %v535_v4  ;;  %v543_v8 = vld [vmem:[%s2800_s7 + $0x48] sm:$0xf] }
  0x34   : > { %4255 = vst [vmem:[#allocation3_spill] sm:$0xff] %v2846_v25  ;;  %v2852_v27 = vrot.slane %v892_v11, 5  ;;  %v2854_v55 = vrot.slane %v875_v26, 4  ;;  %v2856_v47 = vrot.slane %v878_v31, 5  ;;  %v861_v56 = vshrl.u32 %v533_v0, 16 }
  0x35   : > { %2518 = vperm.xlu1 %2471, %v2517_v34   ;;  %v2512_v35 = vpack.i.bf16 %v1183_v45, %v1182_v44  ;;  %v864_v62 = vshll.u32 %v533_v0, 16  ;;  %v959_v28 = vshrl.u32 %v547_v54, 16  ;;  %v962_v63 = vshll.u32 %v547_v54, 16  ;;  %v541_v25 = vld [vmem:[%s2800_s7 + $0x40] sm:$0xf] }
  0x36   : > { %4256 = vst [vmem:[#allocation4_spill] sm:$0xff] %v2854_v55  ;;  %4257 = vst [vmem:[#allocation5_spill] sm:$0xff] %v2856_v47  ;;  %v2858_v9 = vrot.slane %v861_v56, 4  ;;  %v1188_v12 = vunpack.c.l.bf16 %v545_v22  ;;  %v1189_v4 = vunpack.c.l.bf16 %v547_v54  ;;  %v945_v41 = vshrl.u32 %v545_v22, 16  ;;  %v553_v54 = vld [vmem:[%s2800_s7 + $0x70] sm:$0xf] }
  0x37   : > { %v2862_v11 = vrot.slane %v864_v62, 5  ;;  %2513 = vperm.xlu0 %2460, %v2512_v35   ;;  %v2864_v26 = vrot.slane %v959_v28, 4  ;;  %v2866_v31 = vrot.slane %v962_v63, 5  ;;  %v948_v0 = vshll.u32 %v545_v22, 16 }
  0x38   : > { %4258 = vst [vmem:[#allocation6_spill] sm:$0xff] %v2858_v9  ;;  %v2527_v34 = vpack.i.bf16 %v1189_v4, %v1188_v12  ;;  %v2868_v44 = vrot.slane %v945_v41, 4  ;;  %v931_v45 = vshrl.u32 %v543_v8, 16  ;;  %v934_v56 = vshll.u32 %v543_v8, 16 }
  0x39   : > { %4259 = vst [vmem:[#allocation7_spill] sm:$0xff] %v2862_v11  ;;  %4260 = vst [vmem:[#allocation8_spill] sm:$0xff] %v2864_v26  ;;  %v2871_v47 = vrot.slane %v948_v0, 5  ;;  %v1186_v55 = vunpack.c.l.bf16 %v541_v25  ;;  %v1187_v9 = vunpack.c.l.bf16 %v543_v8  ;;  %v917_v62 = vshrl.u32 %v541_v25, 16  ;;  %v555_v11 = vld [vmem:[%s2800_s7 + $0x78] sm:$0xf] }
  0x3a   : > { %4261 = vst [vmem:[#allocation9_spill] sm:$0xff] %v2866_v31  ;;  %4262 = vst [vmem:[#allocation10_spill] sm:$0xff] %v2868_v44  ;;  %2528 = vperm.xlu1 %2471, %v2527_v34   ;;  %v2874_v28 = vrot.slane %v931_v45, 4  ;;  %v2876_v35 = vrot.slane %v934_v56, 5  ;;  %v920_v22 = vshll.u32 %v541_v25, 16  ;;  %v1015_v63 = vshrl.u32 %v555_v11, 16 }
  0x3b   : > { %4263 = vst [vmem:[#allocation11_spill] sm:$0xff] %v2871_v47  ;;  %v2522_v41 = vpack.i.bf16 %v1187_v9, %v1186_v55  ;;  %v2878_v12 = vrot.slane %v917_v62, 4  ;;  %v1018_v4 = vshll.u32 %v555_v11, 16  ;;  %v1192_v31 = vunpack.c.l.bf16 %v553_v54  ;;  %v549_v26 = vld [vmem:[%s2800_s7 + $0x60] sm:$0xf] }
  0x3c   : > { %4264 = vst [vmem:[#allocation12_spill] sm:$0xff] %v2874_v28  ;;  %4265 = vst [vmem:[#allocation13_spill] sm:$0xff] %v2876_v35  ;;  %v551_v0 = vld [vmem:[%s2800_s7 + $0x68] sm:$0xf]  ;;  %v2882_v47 = vrot.slane %v920_v22, 5  ;;  %v2884_v8 = vrot.slane %v1015_v63, 4  ;;  %v1193_v34 = vunpack.c.l.bf16 %v555_v11 }
  0x3d   : > { %4266 = vst [vmem:[#allocation14_spill] sm:$0xff] %v2878_v12  ;;  %v1001_v45 = vshrl.u32 %v553_v54, 16  ;;  %2523 = vperm.xlu0 %2460, %v2522_v41   ;;  %v2886_v56 = vrot.slane %v1018_v4, 5  ;;  %v1004_v25 = vshll.u32 %v553_v54, 16  ;;  %v987_v35 = vshrl.u32 %v551_v0, 16 }
  0x3e   : > { %4267 = vst [vmem:[#allocation15_spill] sm:$0xff] %v2882_v47  ;;  %4268 = vst [vmem:[#allocation16_spill] sm:$0xff] %v2884_v8  ;;  %v990_v55 = vshll.u32 %v551_v0, 16  ;;  %v494_v9 = vld [vmem:[%s2724_s28 + $0x14] sm:$0x1]  ;;  %v2537_v62 = vpack.i.bf16 %v1193_v34, %v1192_v31  ;;  %v1190_v12 = vunpack.c.l.bf16 %v549_v26  ;;  %v1191_v44 = vunpack.c.l.bf16 %v551_v0 }
  0x3f   : > { %4269 = vst [vmem:[#allocation17_spill] sm:$0xff] %v2886_v56  ;;  %v2889_v28 = vrot.slane %v1001_v45, 4  ;;  %v496_v22 = vld [vmem:[%s2724_s28 + $0x1c] sm:$0x1]  ;;  %v2892_v47 = vrot.slane %v1004_v25, 5  ;;  %v2894_v11 = vrot.slane %v987_v35, 4  ;;  %v599_v31 = vor.u32 %v2776_v1, %v2772_v59 }
  0x40   : > { %v2896_v63 = vrot.slane %v990_v55, 5  ;;  %v973_v41 = vshrl.u32 %v549_v26, 16  ;;  %v490_v4 = vld [vmem:[%s2724_s28 + $0x4] sm:$0x1]  ;;  %2538 = vperm.xlu1 %2471, %v2537_v62   ;;  %v2532_v54 = vpack.i.bf16 %v1191_v44, %v1190_v12  ;;  %v976_v56 = vshll.u32 %v549_v26, 16 }
  0x41   : > { %4270 = vst [vmem:[#allocation18_spill] sm:$0xff] %v2894_v11  ;;  %v602_v34 = vshll.u32 %v494_v9, 16  ;;  %v492_v45 = vld [vmem:[%s2724_s28 + $0xc] sm:$0x1]  ;;  %v613_v35 = vor.u32 %v2770_v53, %v2768_v52  ;;  %v616_v25 = vshll.u32 %v496_v22, 16  ;;  %v4274_v26 = vor.u32 %v2752_v33, %v2750_v32 }
  0x42   : > { %4271 = vst [vmem:[#allocation19_spill] sm:$0xff] %v2896_v63  ;;  %v2902_v8 = vrot.slane %v973_v41, 4  ;;  %v502_v59 = vld [vmem:[%s2724_s28 + $0x34] sm:$0x1]  ;;  %v2916_v1 = vrot.slane %v976_v56, 5  ;;  %2533 = vperm.xlu0 %2460, %v2532_v54   ;;  %v600_v12 = vrot.slane %v599_v31, 4  ;;  %v4275_v63 = vor.u32 %v2740_v20, %v2738_v19 }
  0x43   : > { %v572_v44 = vrot.slane %v4274_v26, 4  ;;  %v604_v55 = vrot.slane %v602_v34, 5  ;;  %v574_v9 = vshll.u32 %v490_v4, 16  ;;  %v614_v62 = vrot.slane %v613_v35, 4  ;;  %v504_v33 = vld [vmem:[%s2724_s28 + $0x3c] sm:$0x1] }
  0x44   : > { %v618_v41 = vrot.slane %v616_v25, 5  ;;  %v586_v11 = vrot.slane %v4275_v63, 4  ;;  %v588_v52 = vshll.u32 %v492_v45, 16  ;;  %v655_v56 = vor.u32 %v2766_v51, %v2762_v46  ;;  %v498_v35 = vld [vmem:[%s2724_s28 + $0x24] sm:$0x1] }
  0x45   : > { %v605_v53 = vsel %vm2906_vm2, %v600_v12, %v604_v55  ;;  %v576_v32 = vrot.slane %v574_v9, 5  ;;  %v658_v22 = vshll.u32 %v502_v59, 16  ;;  %v669_v19 = vor.u32 %v2758_v38, %v2756_v37  ;;  %v500_v59 = vld [vmem:[%s2724_s28 + $0x2c] sm:$0x1]  ;;  %v510_v12 = vld [vmem:[%s2724_s28 + $0x54] sm:$0x1] }
  0x46   : > { %v619_v4 = vsel %vm2906_vm2, %v614_v62, %v618_v41  ;;  %v1347_v54 = vunpack.c.l.bf16 %v605_v53  ;;  %v590_v31 = vrot.slane %v588_v52, 5  ;;  %v656_v34 = vrot.slane %v655_v56, 4  ;;  %v512_v62 = vld [vmem:[%s2724_s28 + $0x5c] sm:$0x1] }
  0x47   : > { %v1348_v20 = vunpack.c.l.bf16 %v619_v4  ;;  %v577_v63 = vsel %vm2906_vm2, %v572_v44, %v576_v32  ;;  %v660_v45 = vrot.slane %v658_v22, 5  ;;  %v670_v25 = vrot.slane %v669_v19, 4 }
  0x48   : > { %v591_v46 = vsel %vm2906_vm2, %v586_v11, %v590_v31  ;;  %v1345_v51 = vunpack.c.l.bf16 %v577_v63  ;;  %v672_v26 = vshll.u32 %v504_v33, 16  ;;  %v4276_v38 = vor.u32 %v2736_v18, %v2734_v17 }
  0x49   : > { %v2547_v55 = vpack.i.bf16 %v1348_v20, %v1347_v54  ;;  %v1346_v9 = vunpack.c.l.bf16 %v591_v46  ;;  %v661_v37 = vsel %vm2906_vm2, %v656_v34, %v660_v45  ;;  %v630_v53 = vshll.u32 %v498_v35, 16  ;;  %v508_v45 = vld [vmem:[%s2724_s28 + $0x4c] sm:$0x1] }
  0x4a   : > { %v628_v44 = vrot.slane %v4276_v38, 4  ;;  %v674_v41 = vrot.slane %v672_v26, 5  ;;  %v1351_v52 = vunpack.c.l.bf16 %v661_v37  ;;  %v4277_v11 = vor.u32 %v2732_v14, %v2730_v13  ;;  %v520_v38 = vld [vmem:[%s2724_s28 + $0x7c] sm:$0x1] }
  0x4b   : > { %2548 = vperm.xlu1 %2471, %v2547_v55   ;;  %v2542_v33 = vpack.i.bf16 %v1346_v9, %v1345_v51  ;;  %v644_v56 = vshll.u32 %v500_v59, 16  ;;  %v711_v22 = vor.u32 %v2785_v10, %v2782_v6  ;;  %v714_v4 = vshll.u32 %v510_v12, 16  ;;  %v506_v10 = vld [vmem:[%s2724_s28 + $0x44] sm:$0x1] }
  0x4c   : > { %v642_v32 = vrot.slane %v4277_v11, 4  ;;  %v675_v17 = vsel %vm2906_vm2, %v670_v25, %v674_v41  ;;  %v632_v18 = vrot.slane %v630_v53, 5  ;;  %v725_v54 = vor.u32 %v2780_v3, %v2778_v2  ;;  %v518_v25 = vld [vmem:[%s2724_s28 + $0x74] sm:$0x1]  ;;  %v514_v53 = vld [vmem:[%s2724_s28 + $0x64] sm:$0x1] }
  0x4d   : > { %v728_v31 = vshll.u32 %v512_v62, 16  ;;  %2543 = vperm.xlu0 %2460, %v2542_v33   ;;  %v1352_v13 = vunpack.c.l.bf16 %v675_v17  ;;  %v646_v14 = vrot.slane %v644_v56, 5  ;;  %v712_v19 = vrot.slane %v711_v22, 4 }
  0x4e   : > { %v716_v20 = vrot.slane %v714_v4, 5  ;;  %v633_v63 = vsel %vm2906_vm2, %v628_v44, %v632_v18  ;;  %v726_v34 = vrot.slane %v725_v54, 4  ;;  %v683_v35 = vor.u32 %v2802_v36, %v2792_v29 }
  0x4f   : > { %v730_v6 = vrot.slane %v728_v31, 5  ;;  %v2557_v46 = vpack.i.bf16 %v1352_v13, %v1351_v52  ;;  %v647_v2 = vsel %vm2906_vm2, %v642_v32, %v646_v14  ;;  %v1349_v3 = vunpack.c.l.bf16 %v633_v63  ;;  %v530_v14 = vld [vmem:[%s2800_s7 + $0x14] sm:$0x1] }
  0x50   : > { %v717_v51 = vsel %vm2906_vm2, %v712_v19, %v716_v20  ;;  %v1350_v26 = vunpack.c.l.bf16 %v647_v2  ;;  %v684_v55 = vrot.slane %v683_v35, 4  ;;  %v686_v37 = vshll.u32 %v506_v10, 16 }
  0x51   : > { %v731_v59 = vsel %vm2906_vm2, %v726_v34, %v730_v6  ;;  %v1355_v12 = vunpack.c.l.bf16 %v717_v51  ;;  %2558 = vperm.xlu1 %2471, %v2557_v46   ;;  %v697_v29 = vor.u32 %v2790_v23, %v2788_v21  ;;  %v700_v36 = vshll.u32 %v508_v45, 16  ;;  %v526_v51 = vld [vmem:[%s2800_s7 + $0x4] sm:$0x1] }
  0x52   : > { %v1356_v9 = vunpack.c.l.bf16 %v731_v59  ;;  %v2552_v44 = vpack.i.bf16 %v1350_v26, %v1349_v3  ;;  %v767_v62 = vor.u32 %v2812_v57, %v2808_v49  ;;  %v770_v41 = vshll.u32 %v518_v25, 16 }
  0x53   : > { %v781_v52 = vor.u32 %v2806_v43, %v2804_v39  ;;  %v688_v32 = vrot.slane %v686_v37, 5  ;;  %v698_v33 = vrot.slane %v697_v29, 4  ;;  %v702_v56 = vrot.slane %v700_v36, 5  ;;  %v516_v39 = vld [vmem:[%s2724_s28 + $0x6c] sm:$0x1] }
  0x54   : > { %v2567_v11 = vpack.i.bf16 %v1356_v9, %v1355_v12  ;;  %2553 = vperm.xlu0 %2460, %v2552_v44   ;;  %v768_v22 = vrot.slane %v767_v62, 4  ;;  %v772_v21 = vrot.slane %v770_v41, 5  ;;  %v784_v4 = vshll.u32 %v520_v38, 16  ;;  %v528_v9 = vld [vmem:[%s2800_s7 + $0xc] sm:$0x1] }
  0x55   : > { %v782_v23 = vrot.slane %v781_v52, 4  ;;  %v689_v49 = vsel %vm2906_vm2, %v684_v55, %v688_v32  ;;  %v703_v57 = vsel %vm2906_vm2, %v698_v33, %v702_v56  ;;  %v739_v43 = vor.u32 %v2822_v15, %v2818_v5  ;;  %v532_v15 = vld [vmem:[%s2800_s7 + $0x1c] sm:$0x1]  ;;  %v538_v38 = vld [vmem:[%s2800_s7 + $0x34] sm:$0x1] }
  0x56   : > { %2568 = vperm.xlu1 %2471, %v2567_v11   ;;  %v742_v17 = vshll.u32 %v514_v53, 16  ;;  %v1353_v18 = vunpack.c.l.bf16 %v689_v49  ;;  %v1354_v54 = vunpack.c.l.bf16 %v703_v57  ;;  %v773_v31 = vsel %vm2906_vm2, %v768_v22, %v772_v21  ;;  %v540_v53 = vld [vmem:[%s2800_s7 + $0x3c] sm:$0x1]  ;;  %v4278_v21 = vld [vmem:[#allocation2_spill] sm:$0xff] }
  0x57   : > { %v786_v13 = vrot.slane %v784_v4, 5  ;;  %v1359_v19 = vunpack.c.l.bf16 %v773_v31  ;;  %v740_v20 = vrot.slane %v739_v43, 4  ;;  %v753_v34 = vor.u32 %v2816_v60, %v2814_v58  ;;  %v534_v49 = vld [vmem:[%s2800_s7 + $0x24] sm:$0x1] }
  0x58   : > { %v744_v63 = vrot.slane %v742_v17, 5  ;;  %v2562_v6 = vpack.i.bf16 %v1354_v54, %v1353_v18  ;;  %v756_v5 = vshll.u32 %v516_v39, 16  ;;  %v839_v45 = vor.u32 %v2831_v40, %v2828_v30  ;;  %v536_v18 = vld [vmem:[%s2800_s7 + $0x2c] sm:$0x1]  ;;  %v4280_v31 = vld [vmem:[#allocation6_spill] sm:$0xff] }
  0x59   : > { %v787_v10 = vsel %vm2906_vm2, %v782_v23, %v786_v13  ;;  %v754_v2 = vrot.slane %v753_v34, 4  ;;  %v842_v3 = vshll.u32 %v530_v14, 16  ;;  %v853_v26 = vor.u32 %v2826_v24, %v2824_v16  ;;  %v4279_v23 = vld [vmem:[#allocation3_spill] sm:$0xff] }
  0x5a   : > { %v1360_v35 = vunpack.c.l.bf16 %v787_v10  ;;  %v745_v46 = vsel %vm2906_vm2, %v740_v20, %v744_v63  ;;  %2563 = vperm.xlu0 %2460, %v2562_v6   ;;  %v758_v58 = vrot.slane %v756_v5, 5  ;;  %v840_v25 = vrot.slane %v839_v45, 4  ;;  %v4281_v13 = vld [vmem:[#allocation7_spill] sm:$0xff]  ;;  %v546_v6 = vld [vmem:[%s2800_s7 + $0x54] sm:$0x1]  ;;  %v4283_v45 = vld [vmem:[#allocation5_spill] sm:$0xff] }
  0x5b   : > { %v1357_v60 = vunpack.c.l.bf16 %v745_v46  ;;  %v844_v12 = vrot.slane %v842_v3, 5  ;;  %v856_v55 = vshll.u32 %v532_v15, 16  ;;  %v811_v30 = vor.u32 %v2842_v7, %v2838_v61  ;;  %v4282_v15 = vld [vmem:[#allocation4_spill] sm:$0xff] }
  0x5c   : > { %v2577_v59 = vpack.i.bf16 %v1360_v35, %v1359_v19  ;;  %v759_v40 = vsel %vm2906_vm2, %v754_v2, %v758_v58  ;;  %v854_v37 = vrot.slane %v853_v26, 4  ;;  %v814_v29 = vshll.u32 %v526_v51, 16  ;;  %v548_v2 = vld [vmem:[%s2800_s7 + $0x5c] sm:$0x1] }
  0x5d   : > { %v825_v36 = vor.u32 %v2836_v50, %v2834_v48  ;;  %v1358_v44 = vunpack.c.l.bf16 %v759_v40  ;;  %v845_v16 = vsel %vm2906_vm2, %v840_v25, %v844_v12  ;;  %v858_v24 = vrot.slane %v856_v55, 5  ;;  %v4285_v25 = vld [vmem:[#allocation11_spill] sm:$0xff] }
  0x5e   : > { %2578 = vperm.xlu1 %2471, %v2577_v59   ;;  %v812_v62 = vrot.slane %v811_v30, 4  ;;  %v1514_v41 = vunpack.c.l.bf16 %v845_v16  ;;  %v816_v52 = vrot.slane %v814_v29, 5  ;;  %v828_v7 = vshll.u32 %v528_v9, 16  ;;  %v4287_v29 = vld [vmem:[#allocation9_spill] sm:$0xff]  ;;  %v544_v16 = vld [vmem:[%s2800_s7 + $0x4c] sm:$0x1] }
  0x5f   : > { %v826_v61 = vrot.slane %v825_v36, 4  ;;  %v2572_v11 = vpack.i.bf16 %v1358_v44, %v1357_v60  ;;  %v859_v32 = vsel %vm2906_vm2, %v854_v37, %v858_v24  ;;  %v895_v48 = vor.u32 %v2852_v27, %v2848_v42  ;;  %v4284_v60 = vld [vmem:[#allocation10_spill] sm:$0xff]  ;;  %v4286_v37 = vld [vmem:[#allocation8_spill] sm:$0xff] }
  0x60   : > { %v898_v50 = vshll.u32 %v538_v38, 16  ;;  %v1515_v33 = vunpack.c.l.bf16 %v859_v32  ;;  %v817_v56 = vsel %vm2906_vm2, %v812_v62, %v816_v52  ;;  %v830_v22 = vrot.slane %v828_v7, 5  ;;  %v542_v44 = vld [vmem:[%s2800_s7 + $0x44] sm:$0x1]  ;;  %v4289_v32 = vld [vmem:[#allocation15_spill] sm:$0xff] }
  0x61   : > { %v909_v4 = vor.u32 %v4279_v23, %v4278_v21  ;;  %2573 = vperm.xlu0 %2460, %v2572_v11   ;;  %v1512_v57 = vunpack.c.l.bf16 %v817_v56  ;;  %v896_v39 = vrot.slane %v895_v48, 4  ;;  %v912_v17 = vshll.u32 %v540_v53, 16  ;;  %v4288_v11 = vld [vmem:[#allocation14_spill] sm:$0xff]  ;;  %v4290_v56 = vld [vmem:[#allocation12_spill] sm:$0xff] }
  0x62   : > { %v900_v43 = vrot.slane %v898_v50, 5  ;;  %v2587_v54 = vpack.i.bf16 %v1515_v33, %v1514_v41  ;;  %v831_v27 = vsel %vm2906_vm2, %v826_v61, %v830_v22  ;;  %v867_v14 = vor.u32 %v4281_v13, %v4280_v31  ;;  %v4291_v22 = vld [vmem:[#allocation13_spill] sm:$0xff] }
  0x63   : > { %v910_v42 = vrot.slane %v909_v4, 4  ;;  %v1513_v19 = vunpack.c.l.bf16 %v831_v27  ;;  %v914_v63 = vrot.slane %v912_v17, 5  ;;  %v870_v34 = vshll.u32 %v534_v49, 16  ;;  %v554_v4 = vld [vmem:[%s2800_s7 + $0x74] sm:$0x1] }
  0x64   : > { %v901_v20 = vsel %vm2906_vm2, %v896_v39, %v900_v43  ;;  %2588 = vperm.xlu1 %2471, %v2587_v54   ;;  %v868_v5 = vrot.slane %v867_v14, 4  ;;  %v881_v35 = vor.u32 %v4283_v45, %v4282_v15  ;;  %v884_v46 = vshll.u32 %v536_v18, 16  ;;  %v556_v49 = vld [vmem:[%s2800_s7 + $0x7c] sm:$0x1]  ;;  %v4292_v14 = vld [vmem:[#allocation16_spill] sm:$0xff] }
  0x65   : > { %v1518_v10 = vunpack.c.l.bf16 %v901_v20  ;;  %v2582_v3 = vpack.i.bf16 %v1513_v19, %v1512_v57  ;;  %v915_v51 = vsel %vm2906_vm2, %v910_v42, %v914_v63  ;;  %v872_v58 = vrot.slane %v870_v34, 5  ;;  %v4293_v19 = vld [vmem:[#allocation17_spill] sm:$0xff]  ;;  %v550_v34 = vld [vmem:[%s2800_s7 + $0x64] sm:$0x1]  ;;  %v552_v15 = vld [vmem:[%s2800_s7 + $0x6c] sm:$0x1] }
  0x66   : > { %v951_v26 = vor.u32 %v4285_v25, %v4284_v60  ;;  %v1519_v59 = vunpack.c.l.bf16 %v915_v51  ;;  %v882_v12 = vrot.slane %v881_v35, 4  ;;  %v886_v55 = vrot.slane %v884_v46, 5 }
  0x67   : > { %v954_v9 = vshll.u32 %v546_v6, 16  ;;  %2583 = vperm.xlu0 %2460, %v2582_v3   ;;  %v873_v30 = vsel %vm2906_vm2, %v868_v5, %v872_v58  ;;  %v965_v36 = vor.u32 %v4287_v29, %v4286_v37  ;;  %v968_v38 = vshll.u32 %v548_v2, 16  ;;  %v521_v2 = vld [vmem:[%s3052_s11] sm:$0xf] }
  0x68   : > { %v952_v40 = vrot.slane %v951_v26, 4  ;;  %v2597_v24 = vpack.i.bf16 %v1519_v59, %v1518_v10  ;;  %v887_v62 = vsel %vm2906_vm2, %v882_v12, %v886_v55  ;;  %v1516_v41 = vunpack.c.l.bf16 %v873_v30  ;;  %v4295_v26 = vld [vmem:[#allocation19_spill] sm:$0xff]  ;;  %v522_v55 = vld [vmem:[%s3052_s11 + $0x4] sm:$0x1] }
  0x69   : > { %v956_v52 = vrot.slane %v954_v9, 5  ;;  %v1517_v61 = vunpack.c.l.bf16 %v887_v62  ;;  %v966_v7 = vrot.slane %v965_v36, 4  ;;  %v970_v53 = vrot.slane %v968_v38, 5  ;;  %v557_v9 = vld [vmem:[%s3069_s14] sm:$0xf] }
  0x6a   : > { %v923_v48 = vor.u32 %v4289_v32, %v4288_v11  ;;  %2598 = vperm.xlu1 %2471, %v2597_v24   ;;  %v926_v33 = vshll.u32 %v542_v44, 16  ;;  %v937_v21 = vor.u32 %v4291_v22, %v4290_v56  ;;  %v940_v23 = vshll.u32 %v544_v16, 16  ;;  %v558_v62 = vld [vmem:[%s3069_s14 + $0x4] sm:$0x1] }
  0x6b   : > { %v957_v50 = vsel %vm2906_vm2, %v952_v40, %v956_v52  ;;  %v2592_v57 = vpack.i.bf16 %v1517_v61, %v1516_v41  ;;  %v971_v39 = vsel %vm2906_vm2, %v966_v7, %v970_v53  ;;  %v1007_v31 = vor.u32 %v2892_v47, %v2889_v28 }
  0x6c   : > { %v1522_v43 = vunpack.c.l.bf16 %v957_v50  ;;  %v924_v17 = vrot.slane %v923_v48, 4  ;;  %v1523_v18 = vunpack.c.l.bf16 %v971_v39  ;;  %v928_v54 = vrot.slane %v926_v33, 5  ;;  %v523_v48 = vld [vmem:[%s3052_s11 + $0x8] sm:$0xf] }
  0x6d   : > { %v938_v27 = vrot.slane %v937_v21, 4  ;;  %v942_v42 = vrot.slane %v940_v23, 5  ;;  %2593 = vperm.xlu0 %2460, %v2592_v57   ;;  %v1010_v13 = vshll.u32 %v554_v4, 16  ;;  %v1021_v20 = vor.u32 %v4293_v19, %v4292_v14  ;;  %v524_v21 = vld [vmem:[%s3052_s11 + $0xc] sm:$0x1] }
  0x6e   : > { %v1024_v63 = vshll.u32 %v556_v49, 16  ;;  %v2607_v6 = vpack.i.bf16 %v1523_v18, %v1522_v43  ;;  %v929_v10 = vsel %vm2906_vm2, %v924_v17, %v928_v54  ;;  %v979_v45 = vor.u32 %v2916_v1, %v2902_v8  ;;  %v4294_v1 = vld [vmem:[#allocation18_spill] sm:$0xff]  ;;  %v559_v39 = vld [vmem:[%s3069_s14 + $0x8] sm:$0xf] }
  0x6f   : > { %v943_v5 = vsel %vm2906_vm2, %v938_v27, %v942_v42  ;;  %v1520_v47 = vunpack.c.l.bf16 %v929_v10  ;;  %v1008_v35 = vrot.slane %v1007_v31, 4  ;;  %v1012_v46 = vrot.slane %v1010_v13, 5 }
  0x70   : > { %v1521_v28 = vunpack.c.l.bf16 %v943_v5  ;;  %2608 = vperm.xlu1 %2471, %v2607_v6   ;;  %v1022_v3 = vrot.slane %v1021_v20, 4  ;;  %v1026_v51 = vrot.slane %v1024_v63, 5  ;;  %v980_v58 = vrot.slane %v979_v45, 4 }
  0x71   : > { %v982_v60 = vshll.u32 %v550_v34, 16  ;;  %v1013_v8 = vsel %vm2906_vm2, %v1008_v35, %v1012_v46  ;;  %v993_v59 = vor.u32 %v4295_v26, %v4294_v1  ;;  %v996_v12 = vshll.u32 %v552_v15, 16  ;;  %v560_v34 = vld [vmem:[%s3069_s14 + $0xc] sm:$0x1] }
  0x72   : > { %v2602_v25 = vpack.i.bf16 %v1521_v28, %v1520_v47  ;;  %v1027_v30 = vsel %vm2906_vm2, %v1022_v3, %v1026_v51  ;;  %v1526_v40 = vunpack.c.l.bf16 %v1013_v8  ;;  %v1641_v29 = vshrl.u32 %v521_v2, 16 }
  0x73   : > { %v984_v37 = vrot.slane %v982_v60, 5  ;;  %v1527_v36 = vunpack.c.l.bf16 %v1027_v30  ;;  %v994_v38 = vrot.slane %v993_v59, 4  ;;  %v998_v44 = vrot.slane %v996_v12, 5 }
  0x74   : > { %2603 = vperm.xlu0 %2460, %v2602_v25   ;;  %v1644_v16 = vshll.u32 %v521_v2, 16  ;;  %v1643_v41 = vrot.slane %v1641_v29, 4  ;;  %v1650_v52 = vshll.u32 %v522_v55, 16  ;;  %v1656_v61 = vshrl.u32 %v557_v9, 16 }
  0x75   : > { %v985_v24 = vsel %vm2906_vm2, %v980_v58, %v984_v37  ;;  %v2617_v7 = vpack.i.bf16 %v1527_v36, %v1526_v40  ;;  %v999_v53 = vsel %vm2906_vm2, %v994_v38, %v998_v44  ;;  %v1659_v22 = vshll.u32 %v557_v9, 16  ;;  %v2414_v36 = vld [vmem:[%s4230_s4 + $0x6] sm:$0x1]  ;;  %v1044_v38 = vld [vmem:[%s4230_s4] sm:$0x1] }
  0x76   : > { %v1524_v11 = vunpack.c.l.bf16 %v985_v24  ;;  %v1646_v32 = vrot.slane %v1644_v16, 5  ;;  %v1525_v50 = vunpack.c.l.bf16 %v999_v53  ;;  %v1652_v33 = vrot.slane %v1650_v52, 5  ;;  %v2411_v44 = vld [vmem:[%s4230_s4 + $0x3] sm:$0x1]  ;;  %v2409_v16 = vld [vmem:[%s4230_s4 + $0x1] sm:$0x1] }
  0x77   : > { %v1658_v56 = vrot.slane %v1656_v61, 4  ;;  %2618 = vperm.xlu1 %2471, %v2617_v7   ;;  %v1665_v4 = vshll.u32 %v558_v62, 16  ;;  %v1673_v49 = vunpack.c.l.bf16 %v521_v2  ;;  %v1715_v57 = vunpack.c.l.bf16 %v557_v9  ;;  %v2412_v24 = vld [vmem:[%s4230_s4 + $0x4] sm:$0x1]  ;;  %v2415_v62 = vld [vmem:[%s4230_s4 + $0x7] sm:$0x1] }
  0x78   : > { %v1647_v23 = vor.u32 %v1646_v32, %v1643_v41  ;;  %v2612_v43 = vpack.i.bf16 %v1525_v50, %v1524_v11  ;;  %v1661_v17 = vrot.slane %v1659_v22, 5  ;;  %v1908_v18 = vshrl.u32 %v523_v48, 16  ;;  %v2410_v52 = vld [vmem:[%s4230_s4 + $0x2] sm:$0x1]  ;;  %v2413_v61 = vld [vmem:[%s4230_s4 + $0x5] sm:$0x1] }
  0x79   : > { %v1911_v54 = vshll.u32 %v523_v48, 16  ;;  %v1667_v42 = vrot.slane %v1665_v4, 5  ;;  %v2622_v31 = vpack.i.bf16 %v1715_v57, %v1673_v49  ;;  %v1917_v13 = vshll.u32 %v524_v21, 16  ;;  %v2416_v7 = vld [vmem:[%s4230_s4 + $0x8] sm:$0x1] }
  0x7a   : > { %v1648_v27 = vrot.slane %v1647_v23, 4  ;;  %2613 = vperm.xlu0 %2460, %v2612_v43   ;;  %v1662_v14 = vor.u32 %v1661_v17, %v1658_v56  ;;  %v1910_v19 = vrot.slane %v1908_v18, 4  ;;  %v1923_v63 = vshrl.u32 %v559_v39, 16 }
  0x7b   : > { %v1913_v20 = vrot.slane %v1911_v54, 5  ;;  %v1926_v10 = vshll.u32 %v559_v39, 16  ;;  %v1940_v5 = vunpack.c.l.bf16 %v523_v48  ;;  %v1919_v47 = vrot.slane %v1917_v13, 5 }
  0x7c   : > { %v1653_v6 = vsel %vm2906_vm2, %v1648_v27, %v1652_v33  ;;  %v1663_v15 = vrot.slane %v1662_v14, 4  ;;  %v1925_v28 = vrot.slane %v1923_v63, 4  ;;  %v1982_v2 = vunpack.c.l.bf16 %v559_v39 }
  0x7d   : > { %v1914_v45 = vor.u32 %v1913_v20, %v1910_v19  ;;  %v1792_v35 = vunpack.c.l.bf16 %v1653_v6  ;;  %v1928_v46 = vrot.slane %v1926_v10, 5  ;;  %v1932_v3 = vshll.u32 %v560_v34, 16 }
  0x7e   : > { %v1668_v51 = vsel %vm2906_vm2, %v1663_v15, %v1667_v42  ;;  %2623 = vperm.xlu0 %2460, %v2622_v31   ;;  %v2632_v25 = vpack.i.bf16 %v1982_v2, %v1940_v5  ;;  %v1142_v40 = vlaneseq  ;;  %v1939_v41 = vunpack.c.l.bf16 %v2414_v36 }
  0x7f   : > { %v1915_v58 = vrot.slane %v1914_v45, 4  ;;  %v1869_v60 = vunpack.c.l.bf16 %v1668_v51  ;;  %v1929_v8 = vor.u32 %v1928_v46, %v1925_v28  ;;  %v1934_v1 = vrot.slane %v1932_v3, 5 }
  0x80   : > { %v1143_v29 = vshrl.u32 %v1142_v40, 7  ;;  %v1045_v53 = vunpack.c.l.bf16 %v1044_v38  ;;  %v1672_v32 = vunpack.c.l.bf16 %v2411_v44  ;;  %v1308_v50 = vunpack.c.l.bf16 %v2409_v16 }
  0x81   : > { %v1920_v26 = vsel %vm2906_vm2, %v1915_v58, %v1919_v47  ;;  %v2627_v59 = vpack.i.bf16 %v1869_v60, %v1792_v35  ;;  %v1930_v12 = vrot.slane %v1929_v8, 4  ;;  %v1755_v33 = vunpack.c.l.bf16 %v2412_v24 }
  0x82   : > { %2633 = vperm.xlu0 %2460, %v2632_v25   ;;  %v2059_v55 = vunpack.c.l.bf16 %v1920_v26  ;;  %v1144_v11 = vsub.s32 0, %v1143_v29  ;;  %v2022_v56 = vunpack.c.l.bf16 %v2415_v62  ;;  %v1475_v21 = vunpack.c.l.bf16 %v2410_v52 }
  0x83   : > { %2628 = vperm.xlu1 %2471, %v2627_v59   ;;  %v1935_v9 = vsel %vm2906_vm2, %v1930_v12, %v1934_v1  ;;  %v1832_v23 = vunpack.c.l.bf16 %v2413_v61  ;;  %v2099_v4 = vunpack.c.l.bf16 %v2416_v7 }
  0x84   : > { %v2136_v30 = vunpack.c.l.bf16 %v1935_v9  ;;  %v3124_v49 = vrot.slane %v1939_v41, %v1144_v11  ;;  %v3126_v39 = vrot.slane %v1045_v53, %v1144_v11  ;;  %v3128_v43 = vrot.slane %v1672_v32, %v1144_v11 }
  0x85   : > { %v3130_v18 = vrot.slane %v1308_v50, %v1144_v11  ;;  %v3132_v31 = vrot.slane %v1755_v33, %v1144_v11  ;;  %v3134_v13 = vrot.slane %v2022_v56, %v1144_v11  ;;  %v3136_v19 = vrot.slane %v1475_v21, %v1144_v11 }
  0x86   : > { %2139 = vperm.xlu0 %2460, %v2136_v30   ;;  %4296 = vst [vmem:[#allocation2_spill] sm:$0xff] %v3124_v49  ;;  %4297 = vst [vmem:[#allocation3_spill] sm:$0xff] %v3126_v39  ;;  %v3138_v20 = vrot.slane %v1832_v23, %v1144_v11  ;;  %v3140_v63 = vrot.slane %v2099_v4, %v1144_v11 }
  0x87   : > { %2062 = vperm.xlu1 %2471, %v2059_v55   ;;  %4298 = vst [vmem:[#allocation6_spill] sm:$0xff] %v3128_v43 }
  0x98   : > { %v2474_v37 = vpop.permute.xlu1 %2473 }
  0x99   : > { %v2476_v57 = vunpack.i.h.bf16 %v2474_v37  ;;  %v2475_v17 = vunpack.i.l.bf16 %v2474_v37 }
  0x9b   : > { %v3143_v34 = vmul.f32 %v2476_v57, %v3126_v39  ;;  %v3146_v6 = vmul.f32 %v2476_v57, %v3128_v43  ;;  %v3149_v10 = vmul.f32 %v2476_v57, %v3124_v49  ;;  %v3152_v15 = vmul.f32 %v2475_v17, %v3126_v39 }
  0x9c   : > { %v2463_v0 = vpop.permute.xlu0 %2462  ;;  %v3155_v45 = vmul.f32 %v2475_v17, %v3128_v43  ;;  %v3158_v47 = vmul.f32 %v2475_v17, %v3124_v49 }
  0x9d   : > { %v2465_v54 = vunpack.i.h.bf16 %v2463_v0  ;;  %v2464_v27 = vunpack.i.l.bf16 %v2463_v0  ;;  %4299 = vst [vmem:[#allocation7_spill] sm:$0xff] %v3149_v10 }
  0x9e   : > { %v2479_v48 = vpop.permute.xlu1 %2478  ;;  %4300 = vst [vmem:[#allocation4_spill] sm:$0xff] %v3155_v45  ;;  %4301 = vst [vmem:[#allocation5_spill] sm:$0xff] %v3158_v47 }
  0x9f   : > { %v2481_v14 = vunpack.i.h.bf16 %v2479_v48  ;;  %v2480_v5 = vunpack.i.l.bf16 %v2479_v48  ;;  %v3161_v46 = vmul.f32 %v2465_v54, %v3126_v39  ;;  %v3164_v2 = vmul.f32 %v2465_v54, %v3128_v43 }
  0xa0   : > { %v2468_v22 = vpop.permute.xlu0 %2467  ;;  %v3167_v3 = vmul.f32 %v2464_v27, %v3126_v39 }
  0xa1   : > { %v2470_v28 = vunpack.i.h.bf16 %v2468_v22  ;;  %v2469_v51 = vunpack.i.l.bf16 %v2468_v22  ;;  %v3170_v58 = vmul.f32 %v2481_v14, %v3126_v39  ;;  %v3173_v60 = vmul.f32 %v2481_v14, %v3128_v43 }
  0xa2   : > { %v3176_v25 = vmul.f32 %v2481_v14, %v3124_v49  ;;  %v3179_v1 = vmul.f32 %v2480_v5, %v3126_v39  ;;  %v3182_v26 = vmul.f32 %v2480_v5, %v3128_v43  ;;  %v3185_v59 = vmul.f32 %v2480_v5, %v3124_v49 }
  0xa3   : > { %v2489_v42 = vpop.permute.xlu1 %2488  ;;  %4302 = vst [vmem:[#allocation10_spill] sm:$0xff] %v3173_v60  ;;  %v1149_v9 = vmul.f32 %v2470_v28, %v3126_v39  ;;  %v3189_v30 = vmul.f32 %v2470_v28, %v3128_v43  ;;  %v3192_v40 = vmul.f32 %v2470_v28, %v3124_v49  ;;  %v1148_v29 = vmul.f32 %v2469_v51, %v3126_v39 }
  0xa4   : > { %4303 = vst [vmem:[#allocation11_spill] sm:$0xff] %v3176_v25  ;;  %v2491_v8 = vunpack.i.h.bf16 %v2489_v42  ;;  %4304 = vst [vmem:[#allocation8_spill] sm:$0xff] %v3185_v59  ;;  %v2490_v12 = vunpack.i.l.bf16 %v2489_v42  ;;  %v3196_v36 = vmul.f32 %v2469_v51, %v3128_v43  ;;  %v3199_v38 = vmul.f32 %v2469_v51, %v3124_v49 }
  0xa5   : > { %4305 = vst [vmem:[#allocation9_spill] sm:$0xff] %v3189_v30 }
  0xa6   : > { %v2484_v35 = vpop.permute.xlu0 %2483  ;;  %v3202_v16 = vmul.f32 %v2491_v8, %v3126_v39  ;;  %v3205_v24 = vmul.f32 %v2491_v8, %v3128_v43  ;;  %v3208_v62 = vmul.f32 %v2491_v8, %v3124_v49  ;;  %v3211_v52 = vmul.f32 %v2490_v12, %v3126_v39 }
  0xa7   : > { %v2486_v37 = vunpack.i.h.bf16 %v2484_v35  ;;  %v2485_v44 = vunpack.i.l.bf16 %v2484_v35  ;;  %v3214_v61 = vmul.f32 %v2490_v12, %v3128_v43  ;;  %v3217_v7 = vmul.f32 %v2490_v12, %v3124_v49 }
  0xa8   : > { %4306 = vst [vmem:[#allocation14_spill] sm:$0xff] %v3205_v24  ;;  %4307 = vst [vmem:[#allocation15_spill] sm:$0xff] %v3208_v62 }
  0xa9   : > { %v2499_v55 = vpop.permute.xlu1 %2498  ;;  %4308 = vst [vmem:[#allocation12_spill] sm:$0xff] %v3217_v7  ;;  %v3220_v11 = vmul.f32 %v2486_v37, %v3126_v39  ;;  %v3223_v32 = vmul.f32 %v2486_v37, %v3128_v43  ;;  %v3226_v48 = vmul.f32 %v2486_v37, %v3124_v49  ;;  %v3229_v56 = vmul.f32 %v2485_v44, %v3126_v39 }
  0xaa   : > { %v2501_v41 = vunpack.i.h.bf16 %v2499_v55  ;;  %v2500_v53 = vunpack.i.l.bf16 %v2499_v55  ;;  %v3232_v22 = vmul.f32 %v2485_v44, %v3128_v43  ;;  %v3235_v21 = vmul.f32 %v2485_v44, %v3124_v49 }
  0xab   : > { %v2494_v0 = vpop.permute.xlu0 %2493  ;;  %4309 = vst [vmem:[#allocation13_spill] sm:$0xff] %v3226_v48 }
  0xac   : > { %v2496_v50 = vunpack.i.h.bf16 %v2494_v0  ;;  %4310 = vst [vmem:[#allocation16_spill] sm:$0xff] %v3232_v22  ;;  %4311 = vst [vmem:[#allocation17_spill] sm:$0xff] %v3235_v21  ;;  %v2495_v23 = vunpack.i.l.bf16 %v2494_v0  ;;  %v3238_v4 = vmul.f32 %v2501_v41, %v3126_v39  ;;  %v3241_v57 = vmul.f32 %v2501_v41, %v3128_v43 }
  0xad   : > { %v3248_v27 = vmul.f32 %v2501_v41, %v3124_v49  ;;  %v3251_v42 = vmul.f32 %v2500_v53, %v3126_v39  ;;  %v3254_v14 = vmul.f32 %v2500_v53, %v3128_v43  ;;  %v3257_v5 = vmul.f32 %v2500_v53, %v3124_v49 }
  0xae   : > { %v2509_v33 = vpop.permute.xlu1 %2508  ;;  %4312 = vst [vmem:[#allocation18_spill] sm:$0xff] %v3238_v4  ;;  %4313 = vst [vmem:[#allocation19_spill] sm:$0xff] %v3241_v57  ;;  %v3260_v35 = vmul.f32 %v2496_v50, %v3126_v39  ;;  %v3263_v51 = vmul.f32 %v2496_v50, %v3128_v43  ;;  %v3270_v55 = vmul.f32 %v2496_v50, %v3124_v49 }
  0xaf   : > { %v3243_v17 = vunpack.i.h.bf16 %v2509_v33  ;;  %v3245_v54 = vunpack.i.l.bf16 %v2509_v33  ;;  %4314 = vst [vmem:[#allocation20_spill] sm:$0xff] %v3248_v27  ;;  %4315 = vst [vmem:[#allocation21_spill] sm:$0xff] %v3251_v42  ;;  %v3273_v37 = vmul.f32 %v2495_v23, %v3126_v39  ;;  %v3276_v41 = vmul.f32 %v2495_v23, %v3128_v43 }
  0xb0   : > { %4316 = vst [vmem:[#allocation22_spill] sm:$0xff] %v3257_v5  ;;  %4317 = vst [vmem:[#allocation23_spill] sm:$0xff] %v3263_v51  ;;  %v3279_v53 = vmul.f32 %v2495_v23, %v3124_v49 }
  0xb1   : > { %v2504_v28 = vpop.permute.xlu0 %2503  ;;  %v1316_v8 = vmul.f32 %v3243_v17, %v3130_v18  ;;  %v1315_v12 = vmul.f32 %v3245_v54, %v3130_v18  ;;  %4318 = vst [vmem:[#allocation24_spill] sm:$0xff] %v3270_v55  ;;  %4319 = vst [vmem:[#allocation25_spill] sm:$0xff] %v3276_v41  ;;  %v3283_v33 = vmul.f32 %v3243_v17, %v3132_v31 }
  0xb2   : > { %v2506_v44 = vunpack.i.h.bf16 %v2504_v28  ;;  %v2505_v0 = vunpack.i.l.bf16 %v2504_v28  ;;  %4320 = vst [vmem:[#allocation26_spill] sm:$0xff] %v3279_v53  ;;  %v3287_v57 = vmul.f32 %v3243_v17, %v3134_v13  ;;  %v3294_v28 = vmul.f32 %v3245_v54, %v3132_v31 }
  0xb3   : > { %4321 = vst [vmem:[#allocation27_spill] sm:$0xff] %v3283_v33  ;;  %v3289_v4 = vadd.f32 %v1315_v12, %v1148_v29  ;;  %v3298_v23 = vmul.f32 %v3245_v54, %v3134_v13  ;;  %v3300_v55 = vadd.f32 %v1316_v8, %v1149_v9  ;;  %v3313_v24 = vmul.f32 %v3245_v54, %v3126_v39 }
  0xb4   : > { %4322 = vst [vmem:[#allocation28_spill] sm:$0xff] %v3287_v57  ;;  %v2519_v50 = vpop.permute.xlu1 %2518  ;;  %v1313_v42 = vmul.f32 %v2505_v0, %v3130_v18  ;;  %v1314_v27 = vmul.f32 %v2506_v44, %v3130_v18  ;;  %v3317_v62 = vmul.f32 %v3243_v17, %v3126_v39  ;;  %v3320_v9 = vmul.f32 %v2506_v44, %v3132_v31 }
  0xb5   : > { %v3303_v5 = vunpack.i.h.bf16 %v2519_v50  ;;  %v3305_v53 = vunpack.i.l.bf16 %v2519_v50  ;;  %v3323_v8 = vmul.f32 %v2505_v0, %v3126_v39  ;;  %v3336_v22 = vmul.f32 %v3243_v17, %v3128_v43 }
  0xb6   : > { %v2514_v29 = vpop.permute.xlu0 %2513  ;;  %v3330_v7 = vadd.f32 %v1313_v42, %v3167_v3  ;;  %v3339_v0 = vmul.f32 %v2506_v44, %v3126_v39  ;;  %v3342_v60 = vadd.f32 %v1314_v27, %v3161_v46  ;;  %v3445_v51 = vmul.f32 %v3245_v54, %v3124_v49 }
  0xb7   : > { %v3307_v12 = vunpack.i.h.bf16 %v2514_v29  ;;  %v3309_v41 = vunpack.i.l.bf16 %v2514_v29  ;;  %v1320_v50 = vmul.f32 %v3303_v5, %v3130_v18  ;;  %v1319_v29 = vmul.f32 %v3305_v53, %v3130_v18  ;;  %4323 = vst [vmem:[#allocation29_spill] sm:$0xff] %v3336_v22 }
  0xb8   : > { %v3346_v25 = vmul.f32 %v3303_v5, %v3132_v31  ;;  %v3350_v3 = vmul.f32 %v3303_v5, %v3134_v13  ;;  %v3356_v10 = vmul.f32 %v3305_v53, %v3132_v31  ;;  %v3360_v59 = vmul.f32 %v3305_v53, %v3134_v13  ;;  %4340 = vst [vmem:[#allocation46_spill] sm:$0xff] %v3445_v51 }
  0xb9   : > { %v1318_v48 = vmul.f32 %v3307_v12, %v3130_v18  ;;  %v2529_v21 = vpop.permute.xlu1 %2528  ;;  %v1317_v42 = vmul.f32 %v3309_v41, %v3130_v18  ;;  %v3374_v47 = vmul.f32 %v3307_v12, %v3132_v31  ;;  %v3378_v33 = vmul.f32 %v3309_v41, %v3132_v31 }
  0xba   : > { %4324 = vst [vmem:[#allocation30_spill] sm:$0xff] %v3346_v25  ;;  %4325 = vst [vmem:[#allocation31_spill] sm:$0xff] %v3350_v3  ;;  %v3362_v46 = vunpack.i.h.bf16 %v2529_v21  ;;  %v3364_v27 = vunpack.i.l.bf16 %v2529_v21  ;;  %v3367_v25 = vadd.f32 %v1319_v29, %v3179_v1  ;;  %v3370_v3 = vadd.f32 %v1320_v50, %v3170_v58 }
  0xbb   : > { %4326 = vst [vmem:[#allocation32_spill] sm:$0xff] %v3360_v59  ;;  %4327 = vst [vmem:[#allocation33_spill] sm:$0xff] %v3378_v33  ;;  %v3381_v59 = vadd.f32 %v1318_v48, %v3143_v34  ;;  %v3389_v58 = vmul.f32 %v3309_v41, %v3128_v43  ;;  %v3392_v50 = vadd.f32 %v1317_v42, %v3152_v15 }
  0xbc   : > { %v2524_v45 = vpop.permute.xlu0 %2523  ;;  %v1324_v21 = vmul.f32 %v3362_v46, %v3130_v18  ;;  %v1323_v1 = vmul.f32 %v3364_v27, %v3130_v18  ;;  %v3400_v34 = vmul.f32 %v3309_v41, %v3124_v49  ;;  %v3404_v48 = vmul.f32 %v3362_v46, %v3132_v31 }
  0xbd   : > { %4328 = vst [vmem:[#allocation34_spill] sm:$0xff] %v3389_v58  ;;  %v3394_v29 = vunpack.i.h.bf16 %v2524_v45  ;;  %v3396_v33 = vunpack.i.l.bf16 %v2524_v45  ;;  %v3410_v58 = vmul.f32 %v2506_v44, %v3128_v43  ;;  %v3414_v15 = vmul.f32 %v3245_v54, %v3128_v43 }
  0xbe   : > { %4330 = vst [vmem:[#allocation36_spill] sm:$0xff] %v3400_v34  ;;  %4331 = vst [vmem:[#allocation37_spill] sm:$0xff] %v3404_v48  ;;  %v3407_v30 = vadd.f32 %v1324_v21, %v3202_v16  ;;  %v3418_v45 = vmul.f32 %v3362_v46, %v3134_v13  ;;  %v3422_v42 = vmul.f32 %v3364_v27, %v3132_v31 }
  0xbf   : > { %4329 = vst [vmem:[#allocation35_spill] sm:$0xff] %v3394_v29  ;;  %v2539_v57 = vpop.permute.xlu1 %2538  ;;  %4332 = vst [vmem:[#allocation38_spill] sm:$0xff] %v3410_v58  ;;  %v1322_v16 = vmul.f32 %v3394_v29, %v3130_v18  ;;  %v1321_v21 = vmul.f32 %v3396_v33, %v3130_v18  ;;  %v3429_v44 = vadd.f32 %v1323_v1, %v3211_v52 }
  0xc0   : > { %4333 = vst [vmem:[#allocation39_spill] sm:$0xff] %v3414_v15  ;;  %4334 = vst [vmem:[#allocation40_spill] sm:$0xff] %v3418_v45  ;;  %v3433_v48 = vmul.f32 %v3364_v27, %v3134_v13  ;;  %v3435_v34 = vunpack.i.h.bf16 %v2539_v57  ;;  %v3437_v45 = vunpack.i.l.bf16 %v2539_v57  ;;  %v3449_v52 = vmul.f32 %v3243_v17, %v3124_v49 }
  0xc1   : > { %v2534_v58 = vpop.permute.xlu0 %2533  ;;  %v3453_v1 = vmul.f32 %v3394_v29, %v3132_v31  ;;  %v3457_v57 = vmul.f32 %v3396_v33, %v3132_v31  ;;  %v3465_v54 = vmul.f32 %v3303_v5, %v3126_v39  ;;  %v3471_v17 = vadd.f32 %v1322_v16, %v3220_v11 }
  0xc2   : > { %4335 = vst [vmem:[#allocation41_spill] sm:$0xff] %v3433_v48  ;;  %4336 = vst [vmem:[#allocation42_spill] sm:$0xff] %v3435_v34  ;;  %v3439_v15 = vunpack.i.h.bf16 %v2534_v58  ;;  %v3441_v22 = vunpack.i.l.bf16 %v2534_v58  ;;  %v3461_v58 = vmul.f32 %v3305_v53, %v3126_v39  ;;  %v3468_v48 = vadd.f32 %v1321_v21, %v3229_v56 }
  0xc3   : > { %4337 = vst [vmem:[#allocation43_spill] sm:$0xff] %v3437_v45  ;;  %4341 = vst [vmem:[#allocation47_spill] sm:$0xff] %v3449_v52  ;;  %v3479_v52 = vmul.f32 %v3435_v34, %v3134_v13  ;;  %v3487_v56 = vmul.f32 %v3437_v45, %v3134_v13  ;;  %v3491_v11 = vmul.f32 %v3303_v5, %v3128_v43 }
  0xc4   : > { %4338 = vst [vmem:[#allocation44_spill] sm:$0xff] %v3439_v15  ;;  %4339 = vst [vmem:[#allocation45_spill] sm:$0xff] %v3441_v22  ;;  %v1326_v51 = vmul.f32 %v3439_v15, %v3130_v18  ;;  %v3495_v16 = vmul.f32 %v3439_v15, %v3132_v31  ;;  %v3505_v34 = vmul.f32 %v3441_v22, %v3132_v31 }
  0xc5   : > { %4342 = vst [vmem:[#allocation48_spill] sm:$0xff] %v3457_v57  ;;  %4343 = vst [vmem:[#allocation49_spill] sm:$0xff] %v3461_v58  ;;  %v1325_v57 = vmul.f32 %v3441_v22, %v3130_v18  ;;  %v3483_v58 = vmul.f32 %v3437_v45, %v3132_v31  ;;  %v3513_v45 = vmul.f32 %v3396_v33, %v3124_v49 }
  0xc6   : > { %4344 = vst [vmem:[#allocation50_spill] sm:$0xff] %v3465_v54  ;;  %4345 = vst [vmem:[#allocation51_spill] sm:$0xff] %v3479_v52  ;;  %v3501_v52 = vadd.f32 %v1326_v51, %v3260_v35  ;;  %v3517_v15 = vmul.f32 %v3309_v41, %v3126_v39  ;;  %v3521_v35 = vmul.f32 %v3307_v12, %v3126_v39 }
  0xc7   : > { %4346 = vst [vmem:[#allocation52_spill] sm:$0xff] %v3487_v56  ;;  %4347 = vst [vmem:[#allocation53_spill] sm:$0xff] %v3491_v11  ;;  %v3498_v21 = vadd.f32 %v1325_v57, %v3273_v37  ;;  %v3509_v56 = vmul.f32 %v3396_v33, %v3128_v43  ;;  %v3525_v51 = vmul.f32 %v3307_v12, %v3128_v43 }
  0xc8   : > { %4348 = vst [vmem:[#allocation54_spill] sm:$0xff] %v3505_v34  ;;  %4350 = vst [vmem:[#allocation56_spill] sm:$0xff] %v3513_v45  ;;  %v3529_v37 = vmul.f32 %v3305_v53, %v3128_v43  ;;  %v3533_v57 = vmul.f32 %v3307_v12, %v3124_v49  ;;  %v3537_v34 = vmul.f32 %v3305_v53, %v3124_v49 }
  0xc9   : > { %4349 = vst [vmem:[#allocation55_spill] sm:$0xff] %v3509_v56  ;;  %4351 = vst [vmem:[#allocation57_spill] sm:$0xff] %v3517_v15 }
  0xca   : > { %4352 = vst [vmem:[#allocation58_spill] sm:$0xff] %v3521_v35  ;;  %4353 = vst [vmem:[#allocation59_spill] sm:$0xff] %v3525_v51  ;;  %v2549_v45 = vpop.permute.xlu1 %2548  ;;  %v3541_v35 = vmul.f32 %v3303_v5, %v3124_v49  ;;  %v3545_v51 = vmul.f32 %v3309_v41, %v3134_v13  ;;  %v3561_v5 = vmul.f32 %v3362_v46, %v3126_v39 }
  0xcb   : > { %4354 = vst [vmem:[#allocation60_spill] sm:$0xff] %v3529_v37  ;;  %4355 = vst [vmem:[#allocation61_spill] sm:$0xff] %v3533_v57  ;;  %v3549_v37 = vmul.f32 %v3307_v12, %v3134_v13  ;;  %v3553_v57 = vmul.f32 %v3364_v27, %v3126_v39  ;;  %v3555_v15 = vunpack.i.h.bf16 %v2549_v45  ;;  %v3557_v53 = vunpack.i.l.bf16 %v2549_v45 }
  0xcc   : > { %4356 = vst [vmem:[#allocation62_spill] sm:$0xff] %v3537_v34  ;;  %4357 = vst [vmem:[#allocation63_spill] sm:$0xff] %v3541_v35  ;;  %v3565_v41 = vmul.f32 %v3362_v46, %v3128_v43  ;;  %v2544_v35 = vpop.permute.xlu0 %2543  ;;  %v3569_v12 = vmul.f32 %v3441_v22, %v3128_v43  ;;  %v3577_v45 = vmul.f32 %v3396_v33, %v3126_v39 }
  0xcd   : > { %4358 = vst [vmem:[#allocation64_spill] sm:$0xff] %v3545_v51  ;;  %4359 = vst [vmem:[#allocation65_spill] sm:$0xff] %v3549_v37  ;;  %v3589_v34 = vmul.f32 %v3364_v27, %v3128_v43 }
  0xce   : > { %4360 = vst [vmem:[#allocation66_spill] sm:$0xff] %v3553_v57  ;;  %4361 = vst [vmem:[#allocation67_spill] sm:$0xff] %v3561_v5  ;;  %v3573_v57 = vmul.f32 %v3441_v22, %v3124_v49  ;;  %v3581_v5 = vmul.f32 %v3394_v29, %v3126_v39  ;;  %v3593_v22 = vmul.f32 %v3394_v29, %v3124_v49 }
  0xcf   : > { %4362 = vst [vmem:[#allocation68_spill] sm:$0xff] %v3565_v41  ;;  %4363 = vst [vmem:[#allocation69_spill] sm:$0xff] %v3569_v12  ;;  %v3585_v41 = vmul.f32 %v3394_v29, %v3128_v43  ;;  %v1483_v39 = vmul.f32 %v3555_v15, %v3136_v19  ;;  %v1443_v43 = vmul.f32 %v3557_v53, %v3130_v18 }
  0xd0   : > { %4364 = vst [vmem:[#allocation70_spill] sm:$0xff] %v3573_v57  ;;  %4365 = vst [vmem:[#allocation71_spill] sm:$0xff] %v3577_v45  ;;  %v3597_v57 = vmul.f32 %v3364_v27, %v3124_v49  ;;  %v3603_v45 = vunpack.i.h.bf16 %v2544_v35  ;;  %v3615_v27 = vmul.f32 %v3396_v33, %v3134_v13  ;;  %v2559_v37 = vpop.permute.xlu1 %2558  ;;  %v1838_v33 = vmul.f32 %v3557_v53, %v3138_v20 }
  0xd1   : > { %4366 = vst [vmem:[#allocation72_spill] sm:$0xff] %v3581_v5  ;;  %4367 = vst [vmem:[#allocation73_spill] sm:$0xff] %v3585_v41  ;;  %v1482_v5 = vmul.f32 %v3557_v53, %v3136_v19  ;;  %v2545_v41 = vunpack.i.l.bf16 %v2544_v35  ;;  %v3639_v51 = vadd.f32 %v1483_v39, %v3300_v55  ;;  %v3646_v54 = vadd.f32 %v1443_v43, %v3313_v24 }
  0xd2   : > { %4368 = vst [vmem:[#allocation74_spill] sm:$0xff] %v3589_v34  ;;  %4369 = vst [vmem:[#allocation75_spill] sm:$0xff] %v3593_v22  ;;  %v1444_v34 = vmul.f32 %v3555_v15, %v3130_v18  ;;  %v3611_v22 = vmul.f32 %v3362_v46, %v3124_v49  ;;  %v1481_v35 = vmul.f32 %v3603_v45, %v3136_v19  ;;  %v3631_v49 = vunpack.i.h.bf16 %v2559_v37 }
  0xd3   : > { %4370 = vst [vmem:[#allocation76_spill] sm:$0xff] %v3597_v57  ;;  %4372 = vst [vmem:[#allocation78_spill] sm:$0xff] %v3615_v27  ;;  %v3619_v57 = vmul.f32 %v3555_v15, %v3138_v20  ;;  %v1441_v29 = vmul.f32 %v2545_v41, %v3130_v18  ;;  %v1480_v12 = vmul.f32 %v2545_v41, %v3136_v19  ;;  %v2554_v11 = vpop.permute.xlu0 %2553 }
  0xd4   : > { %4371 = vst [vmem:[#allocation77_spill] sm:$0xff] %v3611_v22  ;;  %v3627_v46 = vmul.f32 %v3555_v15, %v3140_v63  ;;  %v3633_v22 = vunpack.i.l.bf16 %v2559_v37  ;;  %v3636_v27 = vadd.f32 %v1482_v5, %v3289_v4  ;;  %4374 = vst [vmem:[#allocation80_spill] sm:$0xff] %v3639_v51  ;;  %v1497_v41 = vadd.f32 %v1481_v35, %v3342_v60 }
  0xd5   : > { %4373 = vst [vmem:[#allocation79_spill] sm:$0xff] %v3619_v57  ;;  %v1496_v56 = vadd.f32 %v1480_v12, %v3330_v7  ;;  %v1837_v57 = vmul.f32 %v3603_v45, %v3138_v20  ;;  %v3649_v37 = vadd.f32 %v1444_v34, %v3317_v62  ;;  %v3653_v4 = vmul.f32 %v3555_v15, %v3132_v31  ;;  %v2569_v5 = vpop.permute.xlu1 %2568 }
  0xd6   : > { %v1700_v39 = vadd.f32 %v3196_v36, %v1497_v41  ;;  %v3657_v60 = vadd.f32 %v1441_v29, %v3323_v8  ;;  %v1487_v55 = vmul.f32 %v3631_v49, %v3136_v19  ;;  %v1486_v43 = vmul.f32 %v3633_v22, %v3136_v19 }
  0xd7   : > { %v1699_v7 = vadd.f32 %v3164_v2, %v1496_v56  ;;  %v3664_v24 = vunpack.i.h.bf16 %v2554_v11  ;;  %v3666_v62 = vunpack.i.l.bf16 %v2554_v11  ;;  %v3670_v34 = vmul.f32 %v3557_v53, %v3132_v31 }
  0xd8   : > { %v1777_v36 = vadd.f32 %v3294_v28, %v1700_v39  ;;  %v3676_v2 = vmul.f32 %v3631_v49, %v3138_v20  ;;  %v3678_v29 = vunpack.i.h.bf16 %v2569_v5  ;;  %v3682_v56 = vmul.f32 %v3631_v49, %v3134_v13 }
  0xd9   : > { %v1776_v8 = vadd.f32 %v3320_v9, %v1699_v7  ;;  %v3686_v11 = vmul.f32 %v3631_v49, %v3140_v63  ;;  %v1485_v12 = vmul.f32 %v3664_v24, %v3136_v19  ;;  %v1484_v28 = vmul.f32 %v3666_v62, %v3136_v19  ;;  %v2564_v51 = vpop.permute.xlu0 %2563 }
  0xda   : > { %4375 = vst [vmem:[#allocation81_spill] sm:$0xff] %v3676_v2  ;;  %4376 = vst [vmem:[#allocation82_spill] sm:$0xff] %v3682_v56  ;;  %v3693_v35 = vadd.f32 %v1487_v55, %v3370_v3  ;;  %v1842_v41 = vmul.f32 %v3633_v22, %v3138_v20  ;;  %v3699_v39 = vmul.f32 %v3633_v22, %v3140_v63 }
  0xdb   : > { %4377 = vst [vmem:[#allocation83_spill] sm:$0xff] %v3686_v11  ;;  %v1853_v9 = vadd.f32 %v1837_v57, %v1776_v8  ;;  %v1854_v7 = vadd.f32 %v1838_v33, %v1777_v36  ;;  %v3702_v2 = vadd.f32 %v1486_v43, %v3367_v25  ;;  %v1501_v11 = vadd.f32 %v1485_v12, %v3381_v59 }
  0xdc   : > { %v1500_v56 = vadd.f32 %v1484_v28, %v3392_v50  ;;  %v1841_v3 = vmul.f32 %v3664_v24, %v3138_v20  ;;  %v1491_v55 = vmul.f32 %v3678_v29, %v3136_v19  ;;  %v3711_v8 = vunpack.i.l.bf16 %v2569_v5 }
  0xdd   : > { %v1966_v57 = vadd.f32 %v3199_v38, %v1853_v9  ;;  %v1704_v33 = vadd.f32 %v3182_v26, %v1501_v11  ;;  %v3715_v43 = vunpack.i.h.bf16 %v2564_v51  ;;  %v3717_v59 = vunpack.i.l.bf16 %v2564_v51 }
  0xde   : > { %v1703_v25 = vadd.f32 %v3146_v6, %v1500_v56  ;;  %v3721_v50 = vmul.f32 %v3666_v62, %v3138_v20  ;;  %v3725_v38 = vmul.f32 %v3678_v29, %v3138_v20  ;;  %v3729_v5 = vmul.f32 %v3678_v29, %v3134_v13  ;;  %v2579_v6 = vpop.permute.xlu1 %2578 }
  0xdf   : > { %v1490_v26 = vmul.f32 %v3711_v8, %v3136_v19  ;;  %v3734_v36 = vadd.f32 %v3192_v40, %v1854_v7  ;;  %v1781_v51 = vadd.f32 %v3356_v10, %v1704_v33  ;;  %v3739_v56 = vmul.f32 %v3678_v29, %v3140_v63 }
  0xe0   : > { %4378 = vst [vmem:[#allocation84_spill] sm:$0xff] %v3725_v38  ;;  %v1489_v11 = vmul.f32 %v3715_v43, %v3136_v19  ;;  %v1780_v12 = vadd.f32 %v3374_v47, %v1703_v25  ;;  %v3745_v28 = vadd.f32 %v1491_v55, %v3407_v30  ;;  %v1488_v9 = vmul.f32 %v3717_v59, %v3136_v19 }
  0xe1   : > { %4379 = vst [vmem:[#allocation85_spill] sm:$0xff] %v3739_v56  ;;  %v3749_v38 = vunpack.i.h.bf16 %v2579_v6  ;;  %v3752_v40 = vadd.f32 %v3298_v23, %v1966_v57  ;;  %v1846_v10 = vmul.f32 %v3711_v8, %v3138_v20  ;;  %v3758_v7 = vmul.f32 %v3711_v8, %v3140_v63  ;;  %v2574_v23 = vpop.permute.xlu0 %2573 }
  0xe2   : > { %4380 = vst [vmem:[#allocation86_spill] sm:$0xff] %v3745_v28  ;;  %v1505_v47 = vadd.f32 %v1489_v11, %v3471_v17  ;;  %v3762_v30 = vadd.f32 %v1490_v26, %v3429_v44  ;;  %v1845_v55 = vmul.f32 %v3715_v43, %v3138_v20  ;;  %v1504_v33 = vadd.f32 %v1488_v9, %v3468_v48 }
  0xe3   : > { %4381 = vst [vmem:[#allocation87_spill] sm:$0xff] %v3749_v38  ;;  %4382 = vst [vmem:[#allocation88_spill] sm:$0xff] %v3758_v7  ;;  %v3767_v25 = vunpack.i.l.bf16 %v2579_v6  ;;  %v3769_v57 = vadd.f32 %v1842_v41, %v1781_v51  ;;  %v3774_v56 = vmul.f32 %v3717_v59, %v3138_v20  ;;  %v3776_v17 = vunpack.i.h.bf16 %v2574_v23  ;;  %v2589_v51 = vpop.permute.xlu1 %2588 }
  0xe4   : > { %4383 = vst [vmem:[#allocation89_spill] sm:$0xff] %v3762_v30  ;;  %v1708_v28 = vadd.f32 %v3214_v61, %v1505_v47  ;;  %v3778_v44 = vadd.f32 %v1841_v3, %v1780_v12  ;;  %v1707_v26 = vadd.f32 %v3223_v32, %v1504_v33  ;;  %v3783_v48 = vmul.f32 %v3749_v38, %v3134_v13 }
  0xe5   : > { %4384 = vst [vmem:[#allocation90_spill] sm:$0xff] %v3776_v17  ;;  %v3785_v6 = vunpack.i.l.bf16 %v2574_v23  ;;  %v1493_v61 = vmul.f32 %v3776_v17, %v3136_v19  ;;  %v3792_v11 = vmul.f32 %v3557_v53, %v3134_v13  ;;  %v1442_v3 = vmul.f32 %v3603_v45, %v3130_v18 }
  0xe6   : > { %4385 = vst [vmem:[#allocation91_spill] sm:$0xff] %v3783_v48  ;;  %v1785_v41 = vadd.f32 %v3422_v42, %v1708_v28  ;;  %v1784_v32 = vadd.f32 %v3453_v1, %v1707_v26  ;;  %v1850_v12 = vmul.f32 %v3767_v25, %v3138_v20  ;;  %v2591_v42 = vunpack.i.h.bf16 %v2589_v51 }
  0xe7   : > { %4386 = vst [vmem:[#allocation92_spill] sm:$0xff] %v3785_v6  ;;  %v1492_v9 = vmul.f32 %v3785_v6, %v3136_v19  ;;  %v1509_v28 = vadd.f32 %v1493_v61, %v3501_v52  ;;  %v2590_v47 = vunpack.i.l.bf16 %v2589_v51  ;;  %v3804_v33 = vmul.f32 %v3555_v15, %v3134_v13  ;;  %v2584_v6 = vpop.permute.xlu0 %2583  ;;  %v4387_v51 = vld [vmem:[#allocation23_spill] sm:$0xff] }
  0xe8   : > { %v2104_v23 = vmul.f32 %v3557_v53, %v3140_v63  ;;  %v3808_v48 = vadd.f32 %v1846_v10, %v1785_v41  ;;  %v1849_v1 = vmul.f32 %v3776_v17, %v3138_v20  ;;  %v1611_v30 = vmul.f32 %v2591_v42, %v3136_v19 }
  0xe9   : > { %v1508_v26 = vadd.f32 %v1492_v9, %v3498_v21  ;;  %v3814_v7 = vadd.f32 %v1845_v55, %v1784_v32  ;;  %v1712_v52 = vadd.f32 %v3254_v14, %v1509_v28  ;;  %v1610_v15 = vmul.f32 %v2590_v47, %v3136_v19  ;;  %v2599_v14 = vpop.permute.xlu1 %2598 }
  0xea   : > { %v1458_v61 = vadd.f32 %v1442_v3, %v3339_v0  ;;  %v1877_v10 = vmul.f32 %v2591_v42, %v3138_v20  ;;  %v3822_v41 = vmul.f32 %v2591_v42, %v3140_v63  ;;  %v2586_v17 = vunpack.i.h.bf16 %v2584_v6  ;;  %v4389_v42 = vld [vmem:[#allocation29_spill] sm:$0xff] }
  0xeb   : > { %v1711_v53 = vadd.f32 %v4387_v51, %v1508_v26  ;;  %v1789_v21 = vadd.f32 %v3483_v58, %v1712_v52  ;;  %v1626_v9 = vadd.f32 %v1610_v15, %v3646_v54  ;;  %v1627_v55 = vadd.f32 %v1611_v30, %v3649_v37  ;;  %v4390_v54 = vld [vmem:[#allocation28_spill] sm:$0xff]  ;;  %v4391_v15 = vld [vmem:[#allocation34_spill] sm:$0xff] }
  0xec   : > { %v2585_v32 = vunpack.i.l.bf16 %v2584_v6  ;;  %v1876_v0 = vmul.f32 %v2590_v47, %v3138_v20  ;;  %v2142_v3 = vmul.f32 %v2590_v47, %v3140_v63  ;;  %v1609_v26 = vmul.f32 %v2586_v17, %v3136_v19 }
  0xed   : > { %v1788_v28 = vadd.f32 %v3495_v16, %v1711_v53  ;;  %v3831_v51 = vadd.f32 %v1850_v12, %v1789_v21  ;;  %v1739_v38 = vadd.f32 %v4389_v42, %v1626_v9  ;;  %v2044_v52 = vadd.f32 %v4390_v54, %v3734_v36  ;;  %v4395_v54 = vld [vmem:[#allocation50_spill] sm:$0xff] }
  0xee   : > { %v1608_v58 = vmul.f32 %v2585_v32, %v3136_v19  ;;  %v1625_v30 = vadd.f32 %v1609_v26, %v1458_v61  ;;  %v1798_v16 = vmul.f32 %v3603_v45, %v3132_v31  ;;  %v2601_v6 = vunpack.i.h.bf16 %v2599_v14  ;;  %v4392_v32 = vld [vmem:[#allocation39_spill] sm:$0xff] }
  0xef   : > { %4388 = vst [vmem:[#allocation23_spill] sm:$0xff] %v3831_v51  ;;  %v3837_v37 = vadd.f32 %v1849_v1, %v1788_v28  ;;  %v3842_v47 = vadd.f32 %v4391_v15, %v1627_v55  ;;  %v1816_v12 = vadd.f32 %v3653_v4, %v1739_v38  ;;  %v2600_v21 = vunpack.i.l.bf16 %v2599_v14  ;;  %v4393_v28 = vld [vmem:[#allocation38_spill] sm:$0xff] }
  0xf0   : > { %v1624_v53 = vadd.f32 %v1608_v58, %v3657_v60  ;;  %v1875_v9 = vmul.f32 %v2586_v17, %v3138_v20  ;;  %v1738_v42 = vadd.f32 %v4392_v32, %v1625_v30  ;;  %v2120_v36 = vadd.f32 %v2104_v23, %v3752_v40  ;;  %v4394_v23 = vld [vmem:[#allocation49_spill] sm:$0xff] }
  0xf1   : > { %v2121_v1 = vadd.f32 %v3627_v46, %v2044_v52  ;;  %v1893_v61 = vadd.f32 %v1877_v10, %v1816_v12  ;;  %v1447_v55 = vmul.f32 %v3633_v22, %v3130_v18  ;;  %v1448_v4 = vmul.f32 %v3631_v49, %v3130_v18  ;;  %v4396_v30 = vld [vmem:[#allocation9_spill] sm:$0xff]  ;;  %v2594_v12 = vpop.permute.xlu0 %2593 }
  0xf2   : > { %v1737_v45 = vadd.f32 %v4393_v28, %v1624_v53  ;;  %v1815_v60 = vadd.f32 %v3670_v34, %v1738_v42  ;;  %v1615_v38 = vmul.f32 %v2601_v6, %v3136_v19  ;;  %v1881_v17 = vmul.f32 %v2601_v6, %v3138_v20  ;;  %v4397_v53 = vld [vmem:[#allocation36_spill] sm:$0xff] }
  0xf3   : > { %v1614_v14 = vmul.f32 %v2600_v21, %v3136_v19  ;;  %v3860_v46 = vmul.f32 %v2601_v6, %v3140_v63  ;;  %v1463_v10 = vadd.f32 %v1447_v55, %v4394_v23  ;;  %v1804_v26 = vmul.f32 %v3631_v49, %v3132_v31  ;;  %v4398_v42 = vld [vmem:[#allocation80_spill] sm:$0xff]  ;;  %v4400_v55 = vld [vmem:[#allocation47_spill] sm:$0xff] }
  0xf4   : > { %v1814_v40 = vadd.f32 %v1798_v16, %v1737_v45  ;;  %v1892_v58 = vadd.f32 %v1876_v0, %v1815_v60  ;;  %v1464_v52 = vadd.f32 %v1448_v4, %v4395_v54  ;;  %v3867_v34 = vmul.f32 %v2600_v21, %v3138_v20  ;;  %v4399_v28 = vld [vmem:[#allocation4_spill] sm:$0xff]  ;;  %v4401_v60 = vld [vmem:[#allocation27_spill] sm:$0xff]  ;;  %v4402_v54 = vld [vmem:[#allocation46_spill] sm:$0xff] }
  0xf5   : > { %v1701_v15 = vadd.f32 %v4396_v30, %v3636_v27  ;;  %v3872_v16 = vadd.f32 %v4397_v53, %v1893_v61  ;;  %v1630_v32 = vadd.f32 %v1614_v14, %v1463_v10  ;;  %v1702_v45 = vadd.f32 %v4399_v28, %v4398_v42  ;;  %v4403_v27 = vld [vmem:[#allocation53_spill] sm:$0xff]  ;;  %v4406_v42 = vld [vmem:[#allocation55_spill] sm:$0xff] }
  0xf6   : > { %v1891_v6 = vadd.f32 %v1875_v9, %v1814_v40  ;;  %v2005_v49 = vadd.f32 %v4400_v55, %v1892_v58  ;;  %v1631_v0 = vadd.f32 %v1615_v38, %v1464_v52  ;;  %v3878_v4 = vmul.f32 %v2600_v21, %v3140_v63  ;;  %v4404_v40 = vld [vmem:[#allocation79_spill] sm:$0xff]  ;;  %v4405_v52 = vld [vmem:[#allocation33_spill] sm:$0xff] }
  0xf7   : > { %v1778_v23 = vadd.f32 %v4401_v60, %v1701_v15  ;;  %v1743_v30 = vadd.f32 %v4403_v27, %v1630_v32  ;;  %v1803_v61 = vmul.f32 %v3633_v22, %v3132_v31  ;;  %v2596_v9 = vunpack.i.h.bf16 %v2594_v12 }
  0xf8   : > { %v2004_v51 = vadd.f32 %v4402_v54, %v1891_v6  ;;  %v2082_v14 = vadd.f32 %v3804_v33, %v2005_v49  ;;  %v2595_v53 = vunpack.i.l.bf16 %v2594_v12  ;;  %v1445_v38 = vmul.f32 %v3666_v62, %v3130_v18 }
  0xf9   : > { %v1855_v10 = vadd.f32 %v4404_v40, %v1778_v23  ;;  %v1820_v58 = vadd.f32 %v1804_v26, %v1743_v30  ;;  %v1779_v15 = vadd.f32 %v4405_v52, %v1702_v45  ;;  %v2069_v6 = vmul.f32 %v3633_v22, %v3134_v13  ;;  %v4408_v22 = vld [vmem:[#allocation5_spill] sm:$0xff]  ;;  %v4410_v52 = vld [vmem:[#allocation59_spill] sm:$0xff] }
  0xfa   : > { %v2081_v21 = vadd.f32 %v3792_v11, %v2004_v51  ;;  %v2159_v32 = vadd.f32 %v3822_v41, %v2082_v14  ;;  %v3895_v28 = vadd.f32 %v4406_v42, %v1631_v0  ;;  %v1613_v33 = vmul.f32 %v2596_v9, %v3136_v19  ;;  %v4407_v11 = vld [vmem:[#allocation57_spill] sm:$0xff]  ;;  %v4409_v41 = vld [vmem:[#allocation58_spill] sm:$0xff] }
  0xfb   : > { %v1446_v12 = vmul.f32 %v3664_v24, %v3130_v18  ;;  %v1879_v49 = vmul.f32 %v2596_v9, %v3138_v20  ;;  %v1461_v51 = vadd.f32 %v1445_v38, %v4407_v11  ;;  %v1612_v26 = vmul.f32 %v2595_v53, %v3136_v19  ;;  %v3911_v14 = vld [vmem:[%s4231_s5] ss:$0 sm:$0xff]  ;;  %v4414_v11 = vld [vmem:[#allocation7_spill] sm:$0xff] }
  0xfc   : > { %v2158_v55 = vadd.f32 %v2142_v3, %v2081_v21  ;;  %v2176_v45 = vmax.f32 %v2121_v1, %v2159_v32  ;;  %v1968_v60 = vadd.f32 %v4408_v22, %v1855_v10  ;;  %v1801_v0 = vmul.f32 %v3666_v62, %v3132_v31  ;;  %v4412_v32 = vld [vmem:[#allocation64_spill] sm:$0xff] }
  0xfd   : > { %v1462_v23 = vadd.f32 %v1446_v12, %v4409_v41  ;;  %v1897_v27 = vadd.f32 %v1881_v17, %v1820_v58  ;;  %v2145_v3 = vmul.f32 %v2596_v9, %v3140_v63  ;;  %v1628_v30 = vadd.f32 %v1612_v26, %v1461_v51  ;;  %v4411_v9 = vld [vmem:[#allocation8_spill] sm:$0xff]  ;;  %v4415_v51 = vld [vmem:[#allocation11_spill] sm:$0xff]  ;;  %v4416_v41 = vld [vmem:[#allocation61_spill] sm:$0xff] }
  0xfe   : > { %v2175_v54 = vmax.f32 %v2120_v36, %v2158_v55  ;;  %v1817_v1 = vadd.f32 %v1801_v0, %v3842_v47  ;;  %v1856_v10 = vadd.f32 %v3721_v50, %v1779_v15  ;;  %v1878_v38 = vmul.f32 %v2595_v53, %v3138_v20  ;;  %v4413_v12 = vld [vmem:[#allocation60_spill] sm:$0xff] }
  0xff   : > { %v1629_v40 = vadd.f32 %v1613_v33, %v1462_v23  ;;  %v1741_v36 = vadd.f32 %v4410_v52, %v1628_v30  ;;  %v1802_v17 = vmul.f32 %v3664_v24, %v3132_v31  ;;  %v1970_v58 = vadd.f32 %v4411_v9, %v3778_v44  ;;  %v4417_v23 = vld [vmem:[#allocation65_spill] sm:$0xff]  ;;  %v4420_v9 = vld [vmem:[#allocation31_spill] sm:$0xff] }
 0x100   : > { %v2191_v21 = vmax.f32 %v2175_v54, %v2176_v45  ;;  %v2045_v42 = vadd.f32 %v4412_v32, %v1968_v60  ;;  %v1894_v33 = vadd.f32 %v1878_v38, %v1817_v1  ;;  %v1969_v47 = vadd.f32 %v4414_v11, %v1856_v10  ;;  %v4421_v32 = vld [vmem:[#allocation63_spill] sm:$0xff] }
 0x101   : > { %v1742_v55 = vadd.f32 %v4413_v12, %v1629_v40  ;;  %v1818_v15 = vadd.f32 %v1802_v17, %v1741_v36  ;;  %v1971_v26 = vadd.f32 %v4415_v51, %v3769_v57  ;;  %v2067_v45 = vmul.f32 %v3666_v62, %v3134_v13  ;;  %v4418_v40 = vld [vmem:[#allocation32_spill] sm:$0xff]  ;;  %v4419_v36 = vld [vmem:[#allocation62_spill] sm:$0xff] }
 0x102   : > { %v2198_v50 = vadd.f32 %v3911_v14, %v2191_v21  ;;  %v2007_v44 = vadd.f32 %v4416_v41, %v1894_v33  ;;  %v2046_v60 = vadd.f32 %v4417_v23, %v1969_v47  ;;  %v2068_v0 = vmul.f32 %v3664_v24, %v3134_v13  ;;  %v4424_v41 = vld [vmem:[#allocation83_spill] sm:$0xff] }
 0x103   : > { %v1819_v22 = vadd.f32 %v1803_v61, %v1742_v55  ;;  %v1895_v30 = vadd.f32 %v1879_v49, %v1818_v15  ;;  %v2047_v1 = vadd.f32 %v4418_v40, %v1970_v58  ;;  %v2106_v10 = vmul.f32 %v3666_v62, %v3140_v63  ;;  %v2609_v49 = vpop.permute.xlu1 %2608 }
 0x104   : > { %v2199_v54 = vmax.f32 %v2198_v50, 0.0  ;;  %v2083_v61 = vadd.f32 %v2067_v45, %v3872_v16  ;;  %v2084_v38 = vadd.f32 %v2068_v0, %v2007_v44  ;;  %v2107_v21 = vmul.f32 %v3664_v24, %v3140_v63  ;;  %v4422_v50 = vld [vmem:[#allocation82_spill] sm:$0xff]  ;;  %v4425_v0 = vld [vmem:[#allocation67_spill] sm:$0xff] }
 0x105   : > { %v1896_v57 = vadd.f32 %v3867_v34, %v1819_v22  ;;  %v2008_v17 = vadd.f32 %v4419_v36, %v1895_v30  ;;  %v2048_v62 = vadd.f32 %v4420_v9, %v1971_v26  ;;  %v2122_v58 = vadd.f32 %v2106_v10, %v2045_v42  ;;  %v4423_v26 = vld [vmem:[#allocation56_spill] sm:$0xff]  ;;  %v4426_v10 = vld [vmem:[#allocation66_spill] sm:$0xff] }
 0x106   : > { %v2200_v52 = vpack.c.bf16 %v2199_v54, %v2199_v54  ;;  %v2123_v55 = vadd.f32 %v2107_v21, %v2046_v60  ;;  %v2144_v33 = vmul.f32 %v2595_v53, %v3140_v63  ;;  %v2161_v11 = vadd.f32 %v2145_v3, %v2084_v38  ;;  %v4427_v21 = vld [vmem:[#allocation10_spill] sm:$0xff] }
 0x107   : > { %v2009_v12 = vadd.f32 %v4421_v32, %v1896_v57  ;;  %v2085_v34 = vadd.f32 %v2069_v6, %v2008_v17  ;;  %v2611_v16 = vunpack.i.h.bf16 %v2609_v49  ;;  %v2610_v47 = vunpack.i.l.bf16 %v2609_v49  ;;  %v2604_v17 = vpop.permute.xlu0 %2603 }
 0x108   : > { %2202 = vst.msk [vmem:[%s3940_s17] sm:$0xf] %vm2201_vm3, %v2200_v52  ;;  %v1451_v24 = vmul.f32 %v3711_v8, %v3130_v18  ;;  %v2160_v51 = vadd.f32 %v2144_v33, %v2083_v61  ;;  %v2178_v45 = vmax.f32 %v2123_v55, %v2161_v11  ;;  %v1452_v42 = vmul.f32 %v3678_v29, %v3130_v18  ;;  %v4428_v52 = vld [vmem:[#allocation16_spill] sm:$0xff] }
 0x109   : > { %v2086_v15 = vadd.f32 %v4422_v50, %v2009_v12  ;;  %v3958_v22 = vadd.f32 %v4423_v26, %v1897_v27  ;;  %v2124_v53 = vadd.f32 %v3699_v39, %v2047_v1  ;;  %v2162_v3 = vadd.f32 %v3878_v4, %v2085_v34  ;;  %v4430_v55 = vld [vmem:[#allocation68_spill] sm:$0xff] }
 0x10a   : > { %v1619_v6 = vmul.f32 %v2611_v16, %v3136_v19  ;;  %v2125_v44 = vadd.f32 %v4424_v41, %v2048_v62  ;;  %v2177_v60 = vmax.f32 %v2122_v58, %v2160_v51  ;;  %v1468_v54 = vadd.f32 %v1452_v42, %v4425_v0  ;;  %v4429_v58 = vld [vmem:[#allocation69_spill] sm:$0xff] }
 0x10b   : > { %v2163_v23 = vadd.f32 %v3860_v46, %v2086_v15  ;;  %v2179_v30 = vmax.f32 %v2124_v53, %v2162_v3  ;;  %v1885_v40 = vmul.f32 %v2611_v16, %v3138_v20  ;;  %v1467_v57 = vadd.f32 %v1451_v24, %v4426_v10 }
 0x10c   : > { %v1618_v27 = vmul.f32 %v2610_v47, %v3136_v19  ;;  %v2203_v39 = vmax.f32 %v2177_v60, %v2178_v45  ;;  %v3970_v4 = vmul.f32 %v2611_v16, %v3140_v63  ;;  %v1635_v1 = vadd.f32 %v1619_v6, %v1468_v54  ;;  %v4433_v45 = vld [vmem:[#allocation81_spill] sm:$0xff]  ;;  %v4435_v54 = vld [vmem:[#allocation71_spill] sm:$0xff] }
 0x10d   : > { %v2180_v61 = vmax.f32 %v2125_v44, %v2163_v23  ;;  %v1808_v46 = vmul.f32 %v3678_v29, %v3132_v31  ;;  %v1705_v49 = vadd.f32 %v4427_v21, %v3702_v2  ;;  %v1706_v36 = vadd.f32 %v4428_v52, %v3693_v35  ;;  %v4431_v29 = vld [vmem:[#allocation30_spill] sm:$0xff]  ;;  %v4432_v2 = vld [vmem:[#allocation48_spill] sm:$0xff]  ;;  %v4434_v23 = vld [vmem:[#allocation35_spill] sm:$0xff] }
 0x10e   : > { %v1634_v38 = vadd.f32 %v1618_v27, %v1467_v57  ;;  %v2204_v9 = vadd.f32 %v3911_v14, %v2203_v39  ;;  %v3980_v32 = vadd.f32 %v4429_v58, %v1635_v1  ;;  %v1884_v12 = vmul.f32 %v2610_v47, %v3138_v20  ;;  %v4436_v57 = vld [vmem:[#allocation72_spill] sm:$0xff]  ;;  %v4437_v1 = vld [vmem:[#allocation70_spill] sm:$0xff] }
 0x10f   : > { %v2209_v62 = vmax.f32 %v2179_v30, %v2180_v61  ;;  %v3985_v11 = vmul.f32 %v2610_v47, %v3140_v63  ;;  %v1782_v34 = vadd.f32 %v4431_v29, %v1705_v49  ;;  %v1783_v16 = vadd.f32 %v4432_v2, %v1706_v36  ;;  %v4440_v58 = vld [vmem:[#allocation12_spill] sm:$0xff] }
 0x110   : > { %v1747_v33 = vadd.f32 %v4430_v55, %v1634_v38  ;;  %v2205_v24 = vmax.f32 %v2204_v9, 0.0  ;;  %v2606_v50 = vunpack.i.h.bf16 %v2604_v17  ;;  %v2605_v15 = vunpack.i.l.bf16 %v2604_v17  ;;  %v4438_v38 = vld [vmem:[#allocation17_spill] sm:$0xff] }
 0x111   : > { %v2210_v35 = vadd.f32 %v3911_v14, %v2209_v62  ;;  %v1859_v42 = vadd.f32 %v4433_v45, %v1782_v34  ;;  %v1449_v26 = vmul.f32 %v3717_v59, %v3130_v18  ;;  %v1450_v47 = vmul.f32 %v3715_v43, %v3130_v18  ;;  %v4439_v9 = vld [vmem:[#allocation13_spill] sm:$0xff] }
 0x112   : > { %v1824_v51 = vadd.f32 %v1808_v46, %v1747_v33  ;;  %v2206_v53 = vpack.c.bf16 %v2205_v24, %v2205_v24  ;;  %v1807_v6 = vmul.f32 %v3711_v8, %v3132_v31  ;;  %v1617_v41 = vmul.f32 %v2606_v50, %v3136_v19  ;;  %v4441_v33 = vld [vmem:[#allocation15_spill] sm:$0xff] }
 0x113   : > { %v2211_v3 = vmax.f32 %v2210_v35, 0.0  ;;  %v2034_v60 = vmul.f32 %v4434_v23, %v3134_v13  ;;  %v2073_v0 = vmul.f32 %v3711_v8, %v3134_v13  ;;  %v1465_v30 = vadd.f32 %v1449_v26, %v4435_v54  ;;  %v4445_v26 = vld [vmem:[#allocation40_spill] sm:$0xff] }
 0x114   : > { %v1901_v44 = vadd.f32 %v1885_v40, %v1824_v51  ;;  %2418 = vst.msk [vmem:[%s3940_s17 + $0x4] sm:$0xf] %vm2201_vm3, %v2206_v53  ;;  %v1466_v27 = vadd.f32 %v1450_v47, %v4436_v57  ;;  %v1616_v61 = vmul.f32 %v2605_v15, %v3136_v19  ;;  %v1805_v39 = vmul.f32 %v3717_v59, %v3132_v31  ;;  %v4444_v51 = vld [vmem:[#allocation78_spill] sm:$0xff] }
 0x115   : > { %v2212_v10 = vpack.c.bf16 %v2211_v3, %v2211_v3  ;;  %v1972_v46 = vadd.f32 %v4438_v38, %v1859_v42  ;;  %v1883_v21 = vmul.f32 %v2606_v50, %v3138_v20  ;;  %v1860_v8 = vadd.f32 %v3774_v56, %v1783_v16  ;;  %v4442_v56 = vld [vmem:[#allocation73_spill] sm:$0xff]  ;;  %v4443_v16 = vld [vmem:[#allocation74_spill] sm:$0xff]  ;;  %v4446_v3 = vld [vmem:[#allocation75_spill] sm:$0xff] }
 0x116   : > { %v4010_v40 = vadd.f32 %v4437_v1, %v1901_v44  ;;  %v1632_v49 = vadd.f32 %v1616_v61, %v1465_v30  ;;  %v1633_v52 = vadd.f32 %v1617_v41, %v1466_v27  ;;  %v1821_v36 = vadd.f32 %v1805_v39, %v3895_v28  ;;  %v2619_v61 = vpop.permute.xlu1 %2618 }
 0x117   : > { %2419 = vst.msk [vmem:[%s3940_s17 + $0x8] sm:$0xf] %vm2201_vm3, %v2212_v10  ;;  %v1882_v17 = vmul.f32 %v2605_v15, %v3138_v20  ;;  %v1973_v62 = vadd.f32 %v4439_v9, %v1860_v8  ;;  %v1974_v55 = vadd.f32 %v4440_v58, %v3814_v7  ;;  %v1975_v29 = vadd.f32 %v4441_v33, %v3808_v48  ;;  %v4449_v8 = vld [vmem:[#allocation43_spill] sm:$0xff] }
 0x118   : > { %v2071_v34 = vmul.f32 %v3717_v59, %v3134_v13  ;;  %v1745_v2 = vadd.f32 %v4442_v56, %v1632_v49  ;;  %v1746_v24 = vadd.f32 %v4443_v16, %v1633_v52  ;;  %v1806_v28 = vmul.f32 %v3715_v43, %v3132_v31  ;;  %v4450_v49 = vld [vmem:[#allocation76_spill] sm:$0xff] }
 0x119   : > { %v1898_v35 = vadd.f32 %v1882_v17, %v1821_v36  ;;  %v2049_v45 = vadd.f32 %v4444_v51, %v1972_v46  ;;  %v2050_v42 = vadd.f32 %v2034_v60, %v1973_v62  ;;  %v2052_v47 = vadd.f32 %v4445_v26, %v1975_v29  ;;  %v4448_v46 = vld [vmem:[#allocation3_spill] sm:$0xff]  ;;  %v4456_v26 = vld [vmem:[#allocation92_spill] sm:$0xff] }
 0x11a   : > { %v2087_v7 = vadd.f32 %v2071_v34, %v3958_v22  ;;  %v1822_v53 = vadd.f32 %v1806_v28, %v1745_v2  ;;  %v1823_v48 = vadd.f32 %v1807_v6, %v1746_v24  ;;  %v2072_v44 = vmul.f32 %v3715_v43, %v3134_v13  ;;  %v4447_v22 = vld [vmem:[#allocation41_spill] sm:$0xff]  ;;  %v4453_v29 = vld [vmem:[#allocation87_spill] sm:$0xff]  ;;  %v4454_v2 = vld [vmem:[#allocation88_spill] sm:$0xff] }
 0x11b   : > { %v2011_v41 = vadd.f32 %v4446_v3, %v1898_v35  ;;  %v2149_v23 = vmul.f32 %v2606_v50, %v3140_v63  ;;  %v2110_v54 = vmul.f32 %v3717_v59, %v3140_v63  ;;  %v2111_v30 = vmul.f32 %v3715_v43, %v3140_v63  ;;  %v4451_v59 = vld [vmem:[#allocation77_spill] sm:$0xff]  ;;  %v4452_v43 = vld [vmem:[#allocation42_spill] sm:$0xff] }
 0x11c   : > { %v2148_v60 = vmul.f32 %v2605_v15, %v3140_v63  ;;  %v1899_v10 = vadd.f32 %v1883_v21, %v1822_v53  ;;  %v1900_v57 = vadd.f32 %v1884_v12, %v1823_v48  ;;  %v2051_v27 = vadd.f32 %v4447_v22, %v1974_v55  ;;  %v4455_v24 = vld [vmem:[#allocation85_spill] sm:$0xff]  ;;  %v4457_v53 = vld [vmem:[#allocation6_spill] sm:$0xff] }
 0x11d   : > { %v2088_v6 = vadd.f32 %v2072_v44, %v2011_v41  ;;  %v2126_v39 = vadd.f32 %v2110_v54, %v2049_v45  ;;  %v2127_v1 = vadd.f32 %v2111_v30, %v2050_v42  ;;  %v1288_v50 = vmul.f32 %v4449_v8, %v4448_v46  ;;  %v4458_v30 = vld [vmem:[#allocation89_spill] sm:$0xff] }
 0x11e   : > { %v2164_v38 = vadd.f32 %v2148_v60, %v2087_v7  ;;  %v2012_v52 = vadd.f32 %v4450_v49, %v1899_v10  ;;  %v2013_v36 = vadd.f32 %v4451_v59, %v1900_v57  ;;  %v1289_v15 = vmul.f32 %v4452_v43, %v4448_v46  ;;  %v4459_v60 = vld [vmem:[#allocation14_spill] sm:$0xff] }
 0x11f   : > { %v2165_v17 = vadd.f32 %v2149_v23, %v2088_v6  ;;  %v2621_v12 = vunpack.i.h.bf16 %v2619_v61  ;;  %v4049_v9 = vunpack.i.l.bf16 %v2619_v61  ;;  %v1455_v62 = vmul.f32 %v3767_v25, %v3130_v18  ;;  %v4460_v6 = vld [vmem:[#allocation86_spill] sm:$0xff]  ;;  %v4461_v61 = vld [vmem:[#allocation25_spill] sm:$0xff] }
 0x120   : > { %v2181_v21 = vmax.f32 %v2126_v39, %v2164_v38  ;;  %v2089_v58 = vadd.f32 %v2073_v0, %v2012_v52  ;;  %v2090_v55 = vadd.f32 %v3729_v5, %v2013_v36  ;;  %v1456_v34 = vmul.f32 %v4453_v29, %v3130_v18  ;;  %v4463_v52 = vld [vmem:[#allocation37_spill] sm:$0xff] }
 0x121   : > { %v2182_v33 = vmax.f32 %v2127_v1, %v2165_v17  ;;  %v4058_v56 = vmul.f32 %v4453_v29, %v3140_v63  ;;  %v2128_v16 = vadd.f32 %v4454_v2, %v2051_v27  ;;  %v2129_v28 = vadd.f32 %v4455_v24, %v2052_v47  ;;  %v4466_v2 = vld [vmem:[#allocation84_spill] sm:$0xff] }
 0x122   : > { %v1471_v35 = vadd.f32 %v1455_v62, %v1288_v50  ;;  %v2166_v51 = vadd.f32 %v3985_v11, %v2089_v58  ;;  %v2167_v45 = vadd.f32 %v3970_v4, %v2090_v55  ;;  %v4064_v42 = vadd.f32 %v1456_v34, %v1289_v15  ;;  %v4462_v50 = vld [vmem:[#allocation45_spill] sm:$0xff]  ;;  %v4464_v15 = vld [vmem:[#allocation44_spill] sm:$0xff]  ;;  %v2614_v58 = vpop.permute.xlu0 %2613 }
 0x123   : > { %v2215_v0 = vmax.f32 %v2181_v21, %v2182_v33  ;;  %v4068_v5 = vmul.f32 %v3767_v25, %v3140_v63  ;;  %v1848_v7 = vmul.f32 %v4456_v26, %v3138_v20  ;;  %v1735_v48 = vmul.f32 %v4452_v43, %v4457_v53 }
 0x124   : > { %v1622_v47 = vmul.f32 %v4049_v9, %v3136_v19  ;;  %v2183_v3 = vmax.f32 %v2128_v16, %v2166_v51  ;;  %v2184_v11 = vmax.f32 %v2129_v28, %v2167_v45  ;;  %v4078_v41 = vmul.f32 %v2621_v12, %v3136_v19  ;;  %v4467_v28 = vld [vmem:[#allocation2_spill] sm:$0xff] }
 0x125   : > { %v2216_v4 = vadd.f32 %v3911_v14, %v2215_v0  ;;  %v4081_v44 = vmul.f32 %v2621_v12, %v3138_v20  ;;  %v4084_v23 = vmul.f32 %v2621_v12, %v3140_v63  ;;  %v1709_v10 = vadd.f32 %v4459_v60, %v4458_v30  ;;  %v4465_v12 = vld [vmem:[#allocation54_spill] sm:$0xff] }
 0x126   : > { %v1638_v54 = vadd.f32 %v1622_v47, %v1471_v35  ;;  %v2221_v22 = vmax.f32 %v2183_v3, %v2184_v11  ;;  %v1812_v27 = vmul.f32 %v4453_v29, %v3132_v31  ;;  %v1710_v39 = vadd.f32 %v4461_v61, %v4460_v6  ;;  %v4468_v45 = vld [vmem:[#allocation26_spill] sm:$0xff] }
 0x127   : > { %v2217_v57 = vmax.f32 %v2216_v4, 0.0  ;;  %v4094_v38 = vmul.f32 %v4049_v9, %v3138_v20  ;;  %v1286_v49 = vmul.f32 %v4462_v50, %v4448_v46  ;;  %v1786_v59 = vadd.f32 %v4463_v52, %v1709_v10 }
 0x128   : > { %v1751_v1 = vadd.f32 %v1735_v48, %v1638_v54  ;;  %v2222_v17 = vadd.f32 %v3911_v14, %v2221_v22  ;;  %v1287_v21 = vmul.f32 %v4464_v15, %v4448_v46  ;;  %v1787_v62 = vadd.f32 %v4465_v12, %v1710_v39  ;;  %v4469_v54 = vld [vmem:[#allocation90_spill] sm:$0xff] }
 0x129   : > { %v2218_v36 = vpack.c.bf16 %v2217_v57, %v2217_v57  ;;  %v1733_v33 = vmul.f32 %v4464_v15, %v4457_v53  ;;  %v1734_v34 = vmul.f32 %v4449_v8, %v4457_v53  ;;  %v1863_v16 = vadd.f32 %v4466_v2, %v1786_v59  ;;  %v4472_v2 = vld [vmem:[#allocation20_spill] sm:$0xff] }
 0x12a   : > { %v4103_v55 = vadd.f32 %v1812_v27, %v1751_v1  ;;  %v2223_v24 = vmax.f32 %v2222_v17, 0.0  ;;  %v1811_v46 = vmul.f32 %v3767_v25, %v3132_v31  ;;  %v1999_v35 = vmul.f32 %v4464_v15, %v4467_v28 }
 0x12b   : > { %2420 = vst.msk [vmem:[%s3940_s17 + $0xc] sm:$0xf] %vm2201_vm3, %v2218_v36  ;;  %v2037_v51 = vmul.f32 %v4462_v50, %v3134_v13  ;;  %v1976_v0 = vadd.f32 %v4468_v45, %v1863_v16  ;;  %v2038_v48 = vmul.f32 %v4464_v15, %v3134_v13  ;;  %v2616_v47 = vunpack.i.h.bf16 %v2614_v58  ;;  %v4470_v36 = vld [vmem:[#allocation22_spill] sm:$0xff]  ;;  %v4474_v45 = vld [vmem:[#allocation52_spill] sm:$0xff] }
 0x12c   : > { %v2615_v3 = vunpack.i.l.bf16 %v2614_v58  ;;  %v2224_v11 = vpack.c.bf16 %v2223_v24, %v2223_v24  ;;  %v1453_v4 = vmul.f32 %v4456_v26, %v3130_v18  ;;  %v1454_v30 = vmul.f32 %v4469_v54, %v3130_v18  ;;  %v4471_v58 = vld [vmem:[#allocation23_spill] sm:$0xff]  ;;  %v4473_v24 = vld [vmem:[#allocation24_spill] sm:$0xff] }
 0x12d   : > { %v1809_v60 = vmul.f32 %v4456_v26, %v3132_v31  ;;  %v2053_v10 = vadd.f32 %v2037_v51, %v1976_v0  ;;  %v1621_v57 = vmul.f32 %v2616_v47, %v3136_v19  ;;  %v1887_v22 = vmul.f32 %v2616_v47, %v3138_v20 }
 0x12e   : > { %v2153_v27 = vmul.f32 %v2616_v47, %v3140_v63  ;;  %2421 = vst.msk [vmem:[%s3940_s17 + $0x10] sm:$0xf] %vm2201_vm3, %v2224_v11  ;;  %v1469_v6 = vadd.f32 %v1453_v4, %v1286_v49  ;;  %v1470_v61 = vadd.f32 %v1454_v30, %v1287_v21  ;;  %v1620_v39 = vmul.f32 %v2615_v3, %v3136_v19  ;;  %v4475_v47 = vld [vmem:[#allocation51_spill] sm:$0xff] }
 0x12f   : > { %v1810_v1 = vmul.f32 %v4469_v54, %v3132_v31  ;;  %v1825_v50 = vadd.f32 %v1809_v60, %v3980_v32  ;;  %v1864_v52 = vadd.f32 %v1848_v7, %v1787_v62  ;;  %v1886_v59 = vmul.f32 %v2615_v3, %v3138_v20 }
 0x130   : > { %v1978_v17 = vadd.f32 %v4470_v36, %v3837_v37  ;;  %v1636_v15 = vadd.f32 %v1620_v39, %v1469_v6  ;;  %v1637_v12 = vadd.f32 %v1621_v57, %v1470_v61  ;;  %v1979_v16 = vadd.f32 %v4472_v2, %v4471_v58  ;;  %v4477_v2 = vld [vmem:[#allocation21_spill] sm:$0xff] }
 0x131   : > { %v2075_v49 = vmul.f32 %v4456_v26, %v3134_v13  ;;  %v1902_v21 = vadd.f32 %v1886_v59, %v1825_v50  ;;  %v1977_v51 = vadd.f32 %v4473_v24, %v1864_v52  ;;  %v2076_v32 = vmul.f32 %v4469_v54, %v3134_v13  ;;  %v4478_v24 = vld [vmem:[#allocation18_spill] sm:$0xff] }
 0x132   : > { %v2055_v0 = vadd.f32 %v4474_v45, %v1978_v17  ;;  %v1749_v7 = vadd.f32 %v1733_v33, %v1636_v15  ;;  %v1750_v62 = vadd.f32 %v1734_v34, %v1637_v12  ;;  %v2056_v37 = vadd.f32 %v4475_v47, %v1979_v16 }
 0x133   : > { %v2091_v11 = vadd.f32 %v2075_v49, %v4010_v40  ;;  %v2015_v4 = vadd.f32 %v1999_v35, %v1902_v21  ;;  %v2054_v30 = vadd.f32 %v2038_v48, %v1977_v51  ;;  %v2114_v60 = vmul.f32 %v4456_v26, %v3140_v63  ;;  %v4156_v40 = vpop.permute.xlu1 %2628  ;;  %v2624_v49 = vpop.permute.xlu0 %2623 }
 0x134   : > { %v2115_v57 = vmul.f32 %v4469_v54, %v3140_v63  ;;  %v1826_v6 = vadd.f32 %v1810_v1, %v1749_v7  ;;  %v1827_v61 = vadd.f32 %v1811_v46, %v1750_v62  ;;  %v2132_v39 = vadd.f32 %v4068_v5, %v2055_v0 }
 0x135   : > { %v2133_v50 = vadd.f32 %v4058_v56, %v2056_v37  ;;  %v2092_v33 = vadd.f32 %v2076_v32, %v2015_v4  ;;  %v2130_v34 = vadd.f32 %v2114_v60, %v2053_v10  ;;  %v2152_v59 = vmul.f32 %v2615_v3, %v3140_v63 }
 0x136   : > { %v2131_v52 = vadd.f32 %v2115_v57, %v2054_v30  ;;  %v2000_v35 = vmul.f32 %v4449_v8, %v4467_v28  ;;  %v2001_v26 = vmul.f32 %v4452_v43, %v4467_v28  ;;  %v1903_v48 = vadd.f32 %v1887_v22, %v1826_v6 }
 0x137   : > { %v1904_v46 = vadd.f32 %v4094_v38, %v1827_v61  ;;  %v2168_v54 = vadd.f32 %v2152_v59, %v2091_v11  ;;  %v2169_v5 = vadd.f32 %v2153_v27, %v2092_v33  ;;  %v1327_v56 = vmul.f32 %v4449_v8, %v3130_v18  ;;  %v4476_v8 = vld [vmem:[#allocation91_spill] sm:$0xff] }
 0x138   : > { %v1328_v10 = vmul.f32 %v4452_v43, %v3130_v18  ;;  %v2077_v3 = vmul.f32 %v3767_v25, %v3134_v13  ;;  %v2016_v1 = vadd.f32 %v2000_v35, %v1903_v48  ;;  %v2631_v17 = vunpack.i.h.bf16 %v4156_v40 }
 0x139   : > { %v2017_v36 = vadd.f32 %v2001_v26, %v1904_v46  ;;  %v1639_v22 = vadd.f32 %v4078_v41, %v4064_v42  ;;  %v2154_v38 = vmul.f32 %v4049_v9, %v3140_v63  ;;  %v2185_v27 = vmax.f32 %v2130_v34, %v2168_v54 }
 0x13a   : > { %v2186_v15 = vmax.f32 %v2131_v52, %v2169_v5  ;;  %v2093_v12 = vadd.f32 %v2077_v3, %v2016_v1  ;;  %v2630_v18 = vunpack.i.l.bf16 %v4156_v40  ;;  %v1343_v16 = vadd.f32 %v1327_v56, %v4477_v2 }
 0x13b   : > { %v2094_v58 = vadd.f32 %v4476_v8, %v2017_v36  ;;  %v1344_v51 = vadd.f32 %v1328_v10, %v4478_v24  ;;  %v1494_v45 = vmul.f32 %v3767_v25, %v3136_v19  ;;  %v1495_v42 = vmul.f32 %v4453_v29, %v3136_v19  ;;  %v4479_v19 = vld [vmem:[#allocation19_spill] sm:$0xff] }
 0x13c   : > { %v2227_v21 = vmax.f32 %v2185_v27, %v2186_v15  ;;  %v1905_v9 = vadd.f32 %v4081_v44, %v4103_v55  ;;  %v2170_v41 = vadd.f32 %v2154_v38, %v2093_v12  ;;  %v1890_v32 = vmul.f32 %v2631_v17, %v3138_v20  ;;  %v2063_v15 = vpop.permute.xlu1 %2062 }
 0x13d   : > { %v2171_v0 = vadd.f32 %v4084_v23, %v2094_v58  ;;  %v1510_v62 = vadd.f32 %v1494_v45, %v1343_v16  ;;  %v1511_v47 = vadd.f32 %v1495_v42, %v1344_v51  ;;  %v2626_v37 = vunpack.i.h.bf16 %v2624_v49 }
 0x13e   : > { %v2228_v7 = vadd.f32 %v3911_v14, %v2227_v21  ;;  %v2187_v11 = vmax.f32 %v2132_v39, %v2170_v41  ;;  %v1813_v25 = vmul.f32 %v2630_v18, %v3132_v31  ;;  %v2625_v30 = vunpack.i.l.bf16 %v2624_v49 }
 0x13f   : > { %v2188_v4 = vmax.f32 %v2133_v50, %v2171_v0  ;;  %v1713_v57 = vadd.f32 %v4479_v19, %v1510_v62  ;;  %v1774_v44 = vmul.f32 %v4452_v43, %v3132_v31  ;;  %v1736_v23 = vmul.f32 %v2626_v37, %v4457_v53  ;;  %v2634_v50 = vpop.permute.xlu0 %2633 }
 0x140   : > { %v2229_v60 = vmax.f32 %v2228_v7, 0.0  ;;  %v2079_v6 = vmul.f32 %v2630_v18, %v3134_v13  ;;  %v2002_v61 = vmul.f32 %v2626_v37, %v4467_v28  ;;  %v1698_v39 = vmul.f32 %v2625_v30, %v4457_v53 }
 0x141   : > { %v2233_v55 = vmax.f32 %v2187_v11, %v2188_v4  ;;  %v1790_v34 = vadd.f32 %v1774_v44, %v1713_v57  ;;  %v1851_v52 = vmul.f32 %v4453_v29, %v3138_v20  ;;  %v1964_v59 = vmul.f32 %v2625_v30, %v4467_v28 }
 0x142   : > { %v2230_v33 = vpack.c.bf16 %v2229_v60, %v2229_v60  ;;  %v1775_v43 = vmul.f32 %v2626_v37, %v3132_v31  ;;  %v2018_v35 = vadd.f32 %v2002_v61, %v1905_v9  ;;  %v1714_v26 = vadd.f32 %v1698_v39, %v1511_v47 }
 0x143   : > { %v2234_v40 = vadd.f32 %v3911_v14, %v2233_v55  ;;  %v1867_v48 = vadd.f32 %v1851_v52, %v1790_v34  ;;  %v2636_v46 = vunpack.i.h.bf16 %v2634_v50  ;;  %v2635_v54 = vunpack.i.l.bf16 %v2634_v50  ;;  %v2140_v49 = vpop.permute.xlu0 %2139 }
 0x144   : > { %2422 = vst.msk [vmem:[%s3940_s17 + $0x14] sm:$0xf] %vm2201_vm3, %v2230_v33  ;;  %v1752_v53 = vadd.f32 %v1736_v23, %v1639_v22  ;;  %v1791_v56 = vadd.f32 %v1775_v43, %v1714_v26  ;;  %v1852_v10 = vmul.f32 %v2630_v18, %v3138_v20  ;;  %v2095_v29 = vadd.f32 %v2079_v6, %v2018_v35 }
 0x145   : > { %v2235_v5 = vmax.f32 %v2234_v40, 0.0  ;;  %v2156_v3 = vmul.f32 %v2631_v17, %v3140_v63  ;;  %v2041_v1 = vmul.f32 %v2626_v37, %v3134_v13  ;;  %v1980_v36 = vadd.f32 %v1964_v59, %v1867_v48 }
 0x146   : > { %v1829_v31 = vadd.f32 %v1813_v25, %v1752_v53  ;;  %v2118_v27 = vmul.f32 %v2630_v18, %v3140_v63  ;;  %v1868_v12 = vadd.f32 %v1852_v10, %v1791_v56  ;;  %v1965_v8 = vmul.f32 %v2635_v54, %v4467_v28 }
 0x147   : > { %v2236_v38 = vpack.c.bf16 %v2235_v5, %v2235_v5  ;;  %v2057_v22 = vadd.f32 %v2041_v1, %v1980_v36  ;;  %v2003_v58 = vmul.f32 %v2636_v46, %v4467_v28  ;;  %v2172_v16 = vadd.f32 %v2156_v3, %v2095_v29 }
 0x148   : > { %v1906_v2 = vadd.f32 %v1890_v32, %v1829_v31  ;;  %v2042_v20 = vmul.f32 %v2636_v46, %v3134_v13  ;;  %v1981_v17 = vadd.f32 %v1965_v8, %v1868_v12  ;;  %v2080_v24 = vmul.f32 %v2063_v15, %v3134_v13 }
 0x149   : > { %2423 = vst.msk [vmem:[%s3940_s17 + $0x18] sm:$0xf] %vm2201_vm3, %v2236_v38  ;;  %v2134_v21 = vadd.f32 %v2118_v27, %v2057_v22  ;;  %v2119_v51 = vmul.f32 %v3140_v63, %v2063_v15  ;;  %v2157_v9 = vmul.f32 %v2140_v49, %v3140_v63 }
 0x14a   : > { %v2019_v18 = vadd.f32 %v2003_v58, %v1906_v2  ;;  %v2058_v45 = vadd.f32 %v2042_v20, %v1981_v17 }
 0x14b   : > { %v2189_v28 = vmax.f32 %v2134_v21, %v2172_v16 }
 0x14c   : > { %v2096_v42 = vadd.f32 %v2080_v24, %v2019_v18  ;;  %v2135_v41 = vadd.f32 %v2119_v51, %v2058_v45 }
 0x14e   : > { %v2173_v0 = vadd.f32 %v2157_v9, %v2096_v42 }
 0x150   : > { %v2190_v32 = vmax.f32 %v2135_v41, %v2173_v0 }
 0x152   : > { %v2239_v7 = vmax.f32 %v2189_v28, %v2190_v32 }
 0x154   : > { %v2240_v62 = vadd.f32 %v3911_v14, %v2239_v7 }
 0x156   : > { %v2241_v47 = vmax.f32 %v2240_v62, 0.0 }
 0x158   : > { %v2242_v37 = vpack.c.bf16 %v2241_v47, %v2241_v47 }
 0x15a   : > { %2424 = vst.msk [vmem:[%s3940_s17 + $0x1c] sm:$0xf] %vm2201_vm3, %v2242_v37 }
 0x15b PF: > { %s16_s23 = sadd.s32 1, %s2659_s23   ;;  %s4480_s21 = smov %s2655_s22 }
 0x15c   : > { %p13_p5 = scmp.ge.s32.totalorder %s16_s23, 8   ;;  %s4481_s22 = smov %s4483_s24 }
 0x15e   :  { %15 = sbr.rel (!%p13_p5) target bundleno = 2 (0x2), region = 98 }

// kernel: denoising_cnn_512_forward.9
= control target key start
LH: loop header
LB: loop body
LE: loop exit
PB: predicated region body
PF: predicated region fallthrough
CT: control target
= control target key end

     0   :  { %s3715_s21 = smov 0   ;;  %s3717_s22 = smov 0   ;;  %s4429_s0 = inlined_call_operand.vmem [shape: bf16[6,10,9,64], index: 0, kind: input, shape index: {}, may-alias: {0,1}]   ;;  %s4430_s1 = inlined_call_operand.vmem [shape: bf16[6,10,9,64], index: 1, kind: input, shape index: {}, may-alias: {0,1}]   ;;  %s4431_s2 = inlined_call_operand.vmem [shape: bf16[6,10,9,64], index: 2, kind: input, shape index: {}, may-alias: {2,3}]   ;;  %s4432_s3 = inlined_call_operand.vmem [shape: bf16[6,10,9,64], index: 3, kind: input, shape index: {}, may-alias: {2,3}]   ;;  %s4433_s4 = inlined_call_operand.vmem [shape: bf16[3,3,64,128], index: 4, kind: input, shape index: {}]   ;;  %s4434_s5 = inlined_call_operand.vmem [shape: f32[1,128], index: 5, kind: input, shape index: {}]   ;;  %s4435_s6 = inlined_call_operand.vmem [shape: bf16[6,4,8,128], index: 6, kind: output, shape index: {}]  }
   0x1   :  { %s3719_s23 = smov 0  }
   0x2 LB: > { %s28_s24 = sadd.s32 1, %s3674_s22  ;;  %p2791_p0 = scmp.ge.s32.totalorder %s3678_s23, 1  ;;  %s3678_s23 = sphi %s3719_s23, %s16_s23   ;;  %s3674_s22 = sphi %s3717_s22, %s4455_s22   ;;  %s3670_s21 = sphi %s3715_s21, %s4454_s21  }
   0x3   : > { %p30_p1 = scmp.ge.s32.totalorder %s28_s24, 6  ;;  %p324_p2 = scmp.lt.s32.totalorder %s3678_s23, 7 }
   0x5   : > { %s4457_s24 = smov (%p30_p1, %s28_s24), 0  ;;  %p325_p3 = pnand %p2791_p0, %p324_p2 }
   0x7   : > { %328 = sbr.rel (%p325_p3) target bundleno = 409 (0x199), region = 44 }
   0xe   : > { %v3604_v0 = vld [vmem:[%s4433_s4 + $0x20] sm:$0xff]   ;;  %p413_p4 = scmp.lt.s32.totalorder %s3670_s21, 5  ;;  %v3605_v1 = vld [vmem:[%s4433_s4 + $0x28] sm:$0xff]   ;;  %v3606_v2 = vld [vmem:[%s4433_s4 + $0x30] sm:$0xff]   ;;  %vm818_vm0 = vcmask 523264  }
   0xf   : > { %3161 = vmatprep.subr.bf16.mxu0 %v3604_v0  ;;  %3193 = vmatprep.subr.bf16.mxu1 %v3604_v0  ;;  %v3607_v5 = vld [vmem:[%s4433_s4 + $0x38] sm:$0xff]   ;;  %vm530_vm1 = vsmask.f32 3328  ;;  %v3785_v16 = vld [vmem:[%s4433_s4] sm:$0xff]   ;;  %vm531_vm2 = vsmask.f32 7440 }
  0x10   : > { %s4459_s21 = smov (!%p413_p4, %s3670_s21), 5  ;;  %3162 = vmatpush3.bf16.msra.mxu0 %v3604_v0  ;;  %3194 = vmatpush3.bf16.msra.mxu1 %v3604_v0  ;;  %v3812_v27 = vld [vmem:[%s4433_s4 + $0x8] sm:$0xff]   ;;  %vm3840_vm3 = vmor %vm530_vm1, %vm531_vm2  ;;  %v3850_v57 = vld [vmem:[%s4433_s4 + $0x10] sm:$0xff]  }
  0x11   : > { %3163 = vmatprep.subr.bf16.mxu0 %v3605_v1  ;;  %3195 = vmatprep.subr.bf16.mxu1 %v3605_v1  ;;  %s3745_s7 = smul.u32 80, %s4459_s21  ;;  %v3637_v52 = vld [vmem:[%s4433_s4 + $0x98] sm:$0xff]   ;;  %s3016_s11 = sshll.u32 %s4459_s21, 4 }
  0x13   : > { %s3751_s10 = scalar_lea.vmem %s4431_s2, %s3745_s7  ;;  %s3761_s13 = scalar_lea.vmem %s4429_s0, %s3745_s7 }
  0x14   : > { %3164 = vmatpush3.bf16.msra.mxu0 %v3605_v1  ;;  %3196 = vmatpush3.bf16.msra.mxu1 %v3605_v1  ;;  %v510_v3 = vld [vmem:[%s3751_s10] sm:$0xf]  ;;  %v3755_v4 = vld [vmem:[%s3751_s10 + $0x8] sm:$0xf]  ;;  %v3770_v7 = vld [vmem:[%s3751_s10 + $0x10] sm:$0xf] }
  0x15   : > { %3165 = vmatprep.subr.bf16.mxu0 %v3606_v2  ;;  %3197 = vmatprep.subr.bf16.mxu1 %v3606_v2  ;;  %v3767_v6 = vcombine.low %v510_v3, %v3755_v4  ;;  %v646_v8 = vshrl.u32 %v510_v3, 16  ;;  %v649_v9 = vshll.u32 %v510_v3, 16  ;;  %v660_v10 = vshrl.u32 %v3755_v4, 16  ;;  %v3774_v11 = vld [vmem:[%s3761_s13] sm:$0xf]  ;;  %s3013_s14 = sadd.s32 64, %s3745_s7 }
  0x16   : > { %v663_v12 = vshll.u32 %v3755_v4, 16  ;;  %v3778_v13 = vld [vmem:[%s3751_s10 + $0x18] sm:$0xf]  ;;  %v674_v14 = vshrl.u32 %v3770_v7, 16  ;;  %v677_v15 = vshll.u32 %v3770_v7, 16  ;;  %v534_v21 = vshrl.u32 %v3774_v11, 16  ;;  %s4048_s17 = scalar_lea.vmem %s4430_s1, %s3013_s14  ;;  %s4067_s25 = scalar_lea.vmem %s4432_s3, %s3013_s14 }
  0x17   : > { %v491_v17 = vld [vmem:[%s3761_s13 + $0x4] sm:$0x1]  ;;  %3169 = vmatprep.mubr.msk.bf16.mxu0 %vm818_vm0, %v3767_v6  ;;  %v688_v18 = vshrl.u32 %v3778_v13, 16  ;;  %v3792_v19 = vld [vmem:[%s3761_s13 + $0x8] sm:$0xf]  ;;  %v3796_v22 = vrot.slane %v646_v8, 4  ;;  %v3804_v25 = vcombine.low %v3770_v7, %v3778_v13  ;;  %s487_s14 = scalar_lea.vmem %s4435_s6, %s3016_s11 }
  0x18   : > { %3166 = vmatpush3.bf16.msra.mxu0 %v3606_v2  ;;  %3198 = vmatpush3.bf16.msra.mxu1 %v3606_v2  ;;  %v493_v20 = vld [vmem:[%s3761_s13 + $0xc] sm:$0x1]  ;;  %v3798_v23 = vrot.slane %v649_v9, 5  ;;  %v3800_v24 = vrot.slane %v660_v10, 4  ;;  %v3807_v26 = vld [vmem:[%s3761_s13 + $0x10] sm:$0xf] }
  0x19   : > { %3167 = vmatprep.subr.bf16.mxu0 %v3607_v5  ;;  %3199 = vmatprep.subr.bf16.mxu1 %v3607_v5  ;;  %v3814_v28 = vrot.slane %v663_v12, 5  ;;  %v3816_v29 = vrot.slane %v674_v14, 4  ;;  %v495_v30 = vld [vmem:[%s3761_s13 + $0x14] sm:$0x1]  ;;  %v536_v31 = vrot.slane %v534_v21, 4  ;;  %v537_v32 = vshll.u32 %v3774_v11, 16 }
  0x1a   : > { %v3822_v33 = vld [vmem:[%s3761_s13 + $0x18] sm:$0xf]  ;;  %v543_v34 = vshll.u32 %v491_v17, 16  ;;  %v548_v35 = vshrl.u32 %v3792_v19, 16  ;;  %v551_v36 = vshll.u32 %v3792_v19, 16  ;;  %v557_v37 = vshll.u32 %v493_v20, 16 }
  0x1b   : > { %v3827_v38 = vrot.slane %v677_v15, 5  ;;  %v497_v39 = vld [vmem:[%s3761_s13 + $0x1c] sm:$0x1]  ;;  %v539_v40 = vrot.slane %v537_v32, 5  ;;  %v562_v41 = vshrl.u32 %v3807_v26, 16  ;;  %v565_v42 = vshll.u32 %v3807_v26, 16 }
  0x1c   : > { %3168 = vmatpush3.bf16.msra.mxu0 %v3607_v5  ;;  %3200 = vmatpush3.bf16.msra.mxu1 %v3607_v5  ;;  %v3835_v43 = vld [vmem:[%s3761_s13 + $0x20] sm:$0xf]  ;;  %v545_v44 = vrot.slane %v543_v34, 5  ;;  %v550_v45 = vrot.slane %v548_v35, 4  ;;  %v553_v46 = vrot.slane %v551_v36, 5  ;;  %v559_v47 = vrot.slane %v557_v37, 5 }
  0x1d   : > { %3177 = vmatprep.subr.bf16.mxu0 %v3785_v16  ;;  %3209 = vmatprep.subr.bf16.mxu1 %v3785_v16  ;;  %v540_v48 = vor.u32 %v539_v40, %v536_v31  ;;  %v564_v49 = vrot.slane %v562_v41, 4  ;;  %v567_v50 = vrot.slane %v565_v42, 5  ;;  %v571_v51 = vshll.u32 %v495_v30, 16  ;;  %v499_v62 = vld [vmem:[%s3761_s13 + $0x24] sm:$0x1]  ;;  %v3870_v14 = vld [vmem:[%s4433_s4 + $0x18] sm:$0xff]  }
  0x1e   : > { %v554_v53 = vor.u32 %v553_v46, %v550_v45  ;;  %v576_v54 = vshrl.u32 %v3822_v33, 16  ;;  %v579_v55 = vshll.u32 %v3822_v33, 16  ;;  %v585_v56 = vshll.u32 %v497_v39, 16  ;;  %v3856_v3 = vld [vmem:[%s3751_s10 + $0x20] sm:$0xf] }
  0x1f   : > { %3170 = vmatmul.mubr.msk.bf16.vlgmr.msra.gmra.mrb[0].mxu0 %vm818_vm0, %v3804_v25  ;;  %v691_v58 = vshll.u32 %v3778_v13, 16  ;;  %v541_v59 = vrot.slane %v540_v48, 4  ;;  %v568_v60 = vor.u32 %v567_v50, %v564_v49  ;;  %v590_v61 = vshrl.u32 %v3835_v43, 16  ;;  %v3865_v12 = vld [vmem:[%s3751_s10 + $0x28] sm:$0xf]  ;;  %v3922_v49 = vld [vmem:[%s4433_s4 + $0x40] sm:$0xff]  }
  0x20   : > { %3178 = vmatpush3.bf16.msra.mxu0 %v3785_v16  ;;  %v555_v63 = vrot.slane %v554_v53, 4  ;;  %v573_v0 = vrot.slane %v571_v51, 5  ;;  %v578_v1 = vrot.slane %v576_v54, 4  ;;  %v581_v2 = vrot.slane %v579_v55, 5  ;;  %v3889_v34 = vld [vmem:[%s3761_s13 + $0x28] sm:$0xf] }
  0x21   : > { %3179 = vmatprep.subr.bf16.mxu0 %v3812_v27  ;;  %v652_v5 = vor.u32 %v3798_v23, %v3796_v22  ;;  %v546_v8 = vsel %vm3840_vm3, %v541_v59, %v545_v44  ;;  %v569_v9 = vrot.slane %v568_v60, 4  ;;  %v593_v10 = vshll.u32 %v3835_v43, 16  ;;  %v3877_v22 = vld [vmem:[%s3751_s10 + $0x30] sm:$0xf]  ;;  %v3880_v23 = vld [vmem:[%s3751_s10 + $0x38] sm:$0xf] }
  0x22   : > { %v3874_v15 = vsel %vm3840_vm3, %v555_v63, %v559_v47  ;;  %v582_v17 = vor.u32 %v581_v2, %v578_v1  ;;  %v587_v20 = vrot.slane %v585_v56, 5  ;;  %v592_v21 = vrot.slane %v590_v61, 4  ;;  %v501_v35 = vld [vmem:[%s3761_s13 + $0x2c] sm:$0x1]  ;;  %v3897_v40 = vld [vmem:[%s3761_s13 + $0x30] sm:$0xf] }
  0x23   : > { %v690_v30 = vrot.slane %v688_v18, 4  ;;  %v595_v31 = vrot.slane %v593_v10, 5  ;;  %v3886_v32 = vcombine.low %v546_v8, %v3874_v15  ;;  %v693_v36 = vrot.slane %v691_v58, 5  ;;  %v503_v47 = vld [vmem:[%s3761_s13 + $0x34] sm:$0x1] }
  0x24   : > { %3180 = vmatpush3.bf16.msra.mxu0 %v3812_v27  ;;  %v3894_v37 = vsel %vm3840_vm3, %v569_v9, %v573_v0  ;;  %v583_v39 = vrot.slane %v582_v17, 4  ;;  %v3899_v41 = vrot.slane %v652_v5, 4  ;;  %v599_v18 = vshll.u32 %v499_v62, 16  ;;  %v3916_v48 = vld [vmem:[%s3761_s13 + $0x38] sm:$0xf] }
  0x25   : > { %3181 = vmatprep.subr.bf16.mxu0 %v3850_v57  ;;  %3201 = vmatprep.mubr.msk.bf16.mxu1 %vm818_vm0, %v3886_v32  ;;  %v3905_v42 = vcombine.low %v3856_v3, %v3865_v12  ;;  %v666_v44 = vor.u32 %v3814_v28, %v3800_v24  ;;  %v596_v46 = vor.u32 %v595_v31, %v592_v21  ;;  %v505_v51 = vld [vmem:[%s3761_s13 + $0x3c] sm:$0x1]  ;;  %v604_v54 = vshrl.u32 %v3889_v34, 16 }
  0x26   : > { %v3912_v45 = vsel %vm3840_vm3, %v583_v39, %v587_v20  ;;  %v680_v50 = vor.u32 %v3827_v38, %v3816_v29  ;;  %v3934_v28 = vcombine.low %v3877_v22, %v3880_v23  ;;  %v2818_v53 = vcombine.low %v3774_v11, %v3792_v19 }
  0x27   : > { %v3928_v24 = vcombine.low %v3894_v37, %v3912_v45  ;;  %3173 = vmatprep.mubr.msk.bf16.mxu0 %vm818_vm0, %v3905_v42  ;;  %v607_v55 = vshll.u32 %v3889_v34, 16  ;;  %v613_v29 = vshll.u32 %v501_v35, 16  ;;  %v618_v38 = vshrl.u32 %v3897_v40, 16 }
  0x28   : > { %3182 = vmatpush3.bf16.msra.mxu0 %v3850_v57  ;;  %v694_v56 = vor.u32 %v693_v36, %v690_v30  ;;  %v601_v58 = vrot.slane %v599_v18, 5  ;;  %v621_v59 = vshll.u32 %v3897_v40, 16  ;;  %v632_v60 = vshrl.u32 %v3916_v48, 16  ;;  %v511_v18 = vld [vmem:[%s3751_s10 + $0x4] sm:$0x1] }
  0x29   : > { %3183 = vmatprep.subr.bf16.mxu0 %v3870_v14  ;;  %4444 = vst [vmem:[#allocation2_spill] sm:$0xff] %v3928_v24  ;;  %3202 = vmatmul.mubr.msk.bf16.vlgmr.msra.gmra.mrb[0].mxu1 %vm818_vm0, %v3928_v24  ;;  %v597_v11 = vrot.slane %v596_v46, 4  ;;  %v606_v61 = vrot.slane %v604_v54, 4  ;;  %v609_v62 = vrot.slane %v607_v55, 5  ;;  %v627_v63 = vshll.u32 %v503_v47, 16 }
  0x2a   : > { %3174 = vmatmul.mubr.msk.bf16.gmra.mrb[4].mxu0 %vm818_vm0, %v3934_v28  ;;  %3210 = vmatpush3.bf16.msra.mxu1 %v3785_v16  ;;  %v3950_v0 = vrot.slane %v666_v44, 4  ;;  %v615_v1 = vrot.slane %v613_v29, 5  ;;  %v620_v2 = vrot.slane %v618_v38, 4  ;;  %v623_v5 = vrot.slane %v621_v59, 5  ;;  %v513_v47 = vld [vmem:[%s3751_s10 + $0xc] sm:$0x1] }
  0x2b   : > { %3211 = vmatprep.subr.bf16.mxu1 %v3812_v27  ;;  %3185 = vmatprep.mubr.msk.bf16.mxu0 %vm818_vm0, %v2818_v53  ;;  %v610_v8 = vor.u32 %v609_v62, %v606_v61  ;;  %v634_v9 = vrot.slane %v632_v60, 4  ;;  %v635_v10 = vshll.u32 %v3916_v48, 16  ;;  %v641_v16 = vshll.u32 %v505_v51, 16  ;;  %v515_v55 = vld [vmem:[%s3751_s10 + $0x14] sm:$0x1] }
  0x2c   : > { %3184 = vmatpush3.bf16.msra.mxu0 %v3870_v14  ;;  %v3956_v17 = vrot.slane %v680_v50, 4  ;;  %v3958_v20 = vrot.slane %v694_v56, 4  ;;  %v624_v21 = vor.u32 %v623_v5, %v620_v2  ;;  %v3962_v30 = vcombine.low %v3807_v26, %v3822_v33  ;;  %v517_v62 = vld [vmem:[%s3751_s10 + $0x1c] sm:$0x1]  ;;  %v519_v2 = vld [vmem:[%s3751_s10 + $0x24] sm:$0x1] }
  0x2d   : > { %3225 = vmatprep.subr.bf16.mxu0 %v3922_v49  ;;  %v3966_v31 = vsel %vm3840_vm3, %v597_v11, %v601_v58  ;;  %v611_v35 = vrot.slane %v610_v8, 4  ;;  %v629_v36 = vrot.slane %v627_v63, 5  ;;  %v637_v39 = vrot.slane %v635_v10, 5  ;;  %v4005_v11 = vld [vmem:[%s4433_s4 + $0x50] sm:$0xff]   ;;  %v521_v5 = vld [vmem:[%s3751_s10 + $0x2c] sm:$0x1] }
  0x2e   : > { %3212 = vmatpush3.bf16.msra.mxu1 %v3812_v27  ;;  %v702_v44 = vshrl.u32 %v3856_v3, 16  ;;  %v625_v46 = vrot.slane %v624_v21, 4  ;;  %v643_v53 = vrot.slane %v641_v16, 5  ;;  %v3980_v27 = vld [vmem:[%s4433_s4 + $0x48] sm:$0xff]   ;;  %v3984_v54 = vcombine.low %v3835_v43, %v3889_v34 }
  0x2f   : > { %3213 = vmatprep.subr.bf16.mxu1 %v3850_v57  ;;  %v3975_v50 = vsel %vm3840_vm3, %v611_v35, %v615_v1  ;;  %v638_v51 = vor.u32 %v637_v39, %v634_v9  ;;  %v705_v29 = vshll.u32 %v3856_v3, 16  ;;  %v716_v38 = vshrl.u32 %v3865_v12, 16 }
  0x30   : > { %4445 = vst [vmem:[#allocation3_spill] sm:$0xff] %v3984_v54  ;;  %v3991_v56 = vcombine.low %v3966_v31, %v3975_v50  ;;  %v719_v58 = vshll.u32 %v3865_v12, 16  ;;  %v3998_v59 = vsel %vm3840_vm3, %v625_v46, %v629_v36  ;;  %v655_v61 = vshll.u32 %v511_v18, 16  ;;  %v4036_v36 = vld [vmem:[%s4433_s4 + $0x58] sm:$0xff]  }
  0x31   : > { %v639_v60 = vrot.slane %v638_v51, 4  ;;  %v669_v63 = vshll.u32 %v513_v47, 16  ;;  %v683_v1 = vshll.u32 %v515_v55, 16  ;;  %v730_v8 = vshrl.u32 %v3877_v22, 16 }
  0x32   : > { %4446 = vst [vmem:[#allocation4_spill] sm:$0xff] %v3991_v56  ;;  %3186 = vmatmul.mubr.msk.bf16.vlgmr.msra.gmra.mrb[0].mxu0 %vm818_vm0, %v3962_v30  ;;  %3214 = vmatpush3.bf16.msra.mxu1 %v3850_v57  ;;  %v4027_v10 = vcombine.low %v3897_v40, %v3916_v48  ;;  %v697_v16 = vshll.u32 %v517_v62, 16  ;;  %v733_v21 = vshll.u32 %v3877_v22, 16  ;;  %v4043_v18 = vrot.slane %v655_v61, 5 }
  0x33   : > { %3226 = vmatpush3.bf16.msra.mxu0 %v3922_v49  ;;  %3205 = vmatprep.mubr.msk.bf16.mxu1 %vm818_vm0, %v3991_v56  ;;  %v4014_v57 = vsel %vm3840_vm3, %v639_v60, %v643_v53  ;;  %v711_v46 = vshll.u32 %v519_v2, 16  ;;  %v725_v47 = vshll.u32 %v521_v5, 16  ;;  %v4053_v51 = vrot.slane %v683_v1, 5  ;;  %v4060_v60 = vld [vmem:[%s4433_s4 + $0x60] sm:$0xff]  }
  0x34   : > { %3215 = vmatprep.subr.bf16.mxu1 %v3870_v14  ;;  %3227 = vmatprep.subr.bf16.mxu0 %v3980_v27  ;;  %v4023_v9 = vcombine.low %v3998_v59, %v4014_v57  ;;  %4447 = vst [vmem:[#allocation5_spill] sm:$0xff] %v4027_v10  ;;  %v704_v53 = vrot.slane %v702_v44, 4  ;;  %v707_v55 = vrot.slane %v705_v29, 5  ;;  %v699_v61 = vrot.slane %v697_v16, 5  ;;  %v4073_v44 = vld [vmem:[%s4048_s17] sm:$0xf] }
  0x35   : > { %3189 = vmatprep.mubr.msk.bf16.mxu0 %vm818_vm0, %v3984_v54  ;;  %v718_v62 = vrot.slane %v716_v38, 4  ;;  %v721_v2 = vrot.slane %v719_v58, 5  ;;  %v4076_v29 = vrot.slane %v711_v46, 5  ;;  %v4078_v38 = vrot.slane %v725_v47, 5  ;;  %v523_v58 = vld [vmem:[%s3751_s10 + $0x34] sm:$0x1] }
  0x36   : > { %3216 = vmatpush3.bf16.msra.mxu1 %v3870_v14  ;;  %v671_v14 = vrot.slane %v669_v63, 5  ;;  %v1375_v63 = vshrl.u32 %v4073_v44, 16  ;;  %v1378_v1 = vshll.u32 %v4073_v44, 16  ;;  %v708_v5 = vor.u32 %v707_v55, %v704_v53  ;;  %v507_v47 = vld [vmem:[%s4048_s17 + $0x4] sm:$0x1] }
  0x37   : > { %3228 = vmatpush3.bf16.msra.mxu0 %v3980_v27  ;;  %3206 = vmatmul.mubr.msk.bf16.gmra.mrb[4].mxu1 %vm818_vm0, %v4023_v9  ;;  %v4091_v16 = vrot.slane %v733_v21, 5  ;;  %v1384_v55 = vshll.u32 %v507_v47, 16  ;;  %v739_v54 = vshll.u32 %v523_v58, 16 }
  0x38   : > { %3241 = vmatprep.subr.bf16.mxu1 %v3922_v49  ;;  %3217 = vmatprep.mubr.msk.bf16.mxu1 %vm818_vm0, %v3767_v6  ;;  %v4062_v6 = vrot.slane %v730_v8, 4  ;;  %v4084_v8 = vld [vmem:[%s4067_s25] sm:$0xf]  ;;  %v1377_v39 = vrot.slane %v1375_v63, 4  ;;  %v1380_v35 = vrot.slane %v1378_v1, 5  ;;  %v709_v21 = vrot.slane %v708_v5, 4 }
  0x39   : > { %3229 = vmatprep.subr.bf16.mxu0 %v4005_v11  ;;  %v1389_v46 = vshrl.u32 %v4084_v8, 16  ;;  %v1392_v53 = vshll.u32 %v4084_v8, 16  ;;  %v658_v1 = vsel %vm3840_vm3, %v3899_v41, %v4043_v18  ;;  %v4448_v41 = vshrl.u32 %v3880_v23, 16  ;;  %v527_v5 = vld [vmem:[%s4067_s25 + $0x4] sm:$0x1] }
  0x3a   : > { %3190 = vmatmul.mubr.msk.bf16.gmra.mrb[4].mxu0 %vm818_vm0, %v4027_v10  ;;  %v722_v10 = vor.u32 %v721_v2, %v718_v62  ;;  %v1381_v63 = vor.u32 %v1380_v35, %v1377_v39  ;;  %v4118_v62 = vld [vmem:[%s4433_s4 + $0x70] sm:$0xff]   ;;  %v525_v35 = vld [vmem:[%s3751_s10 + $0x3c] sm:$0x1]  ;;  %v1386_v39 = vrot.slane %v1384_v55, 5  ;;  %v4449_v55 = vshll.u32 %v3880_v23, 16 }
  0x3b   : > { %3230 = vmatpush3.bf16.msra.mxu0 %v4005_v11  ;;  %3233 = vmatprep.mubr.msk.bf16.mxu0 %vm818_vm0, %v3886_v32  ;;  %v4089_v32 = vld [vmem:[%s4433_s4 + $0x68] sm:$0xff]   ;;  %v1391_v2 = vrot.slane %v1389_v46, 4  ;;  %v746_v18 = vrot.slane %v4448_v41, 4 }
  0x3c   : > { %3231 = vmatprep.subr.bf16.mxu0 %v4036_v36  ;;  %v1382_v58 = vrot.slane %v1381_v63, 4  ;;  %v723_v46 = vrot.slane %v722_v10, 4  ;;  %v2874_v63 = vcombine.low %v3792_v19, %v3807_v26  ;;  %v4147_v10 = vsel %vm3840_vm3, %v3956_v17, %v4053_v51 }
  0x3d   : > { %v736_v19 = vor.u32 %v4091_v16, %v4062_v6  ;;  %v753_v26 = vshll.u32 %v525_v35, 16  ;;  %v741_v17 = vrot.slane %v739_v54, 5  ;;  %v4175_v6 = vsel %vm3840_vm3, %v709_v21, %v4076_v29  ;;  %v4183_v35 = vld [vmem:[%s4067_s25 + $0x8] sm:$0xf] }
  0x3e   : > { %v4180_v16 = vsel %vm3840_vm3, %v723_v46, %v4078_v38 }
  0x3f   : > { %3232 = vmatpush3.bf16.msra.mxu0 %v4036_v36  ;;  %3218 = vmatmul.mubr.msk.bf16.vlgmr.msra.gmra.mrb[0].mxu1 %vm818_vm0, %v3804_v25 }
  0x40   : > { %3257 = vmatprep.subr.bf16.mxu0 %v4060_v60  ;;  %3242 = vmatpush3.bf16.msra.mxu1 %v3922_v49  ;;  %v4113_v49 = vsel %vm3840_vm3, %v3950_v0, %v671_v14  ;;  %v1394_v0 = vrot.slane %v1392_v53, 5  ;;  %v1398_v14 = vshll.u32 %v527_v5, 16  ;;  %v737_v5 = vrot.slane %v736_v19, 4 }
  0x41   : > { %3221 = vmatprep.mubr.msk.bf16.mxu1 %vm818_vm0, %v3905_v42  ;;  %3243 = vmatprep.subr.bf16.mxu1 %v3980_v27  ;;  %v2858_v47 = vcombine.low %v658_v1, %v4113_v49  ;;  %v4152_v1 = vsel %vm3840_vm3, %v3958_v20, %v699_v61 }
  0x42   : > { %3234 = vmatmul.mubr.msk.bf16.vlgmr.msra.gmra.mrb[0].mxu0 %vm818_vm0, %v3928_v24  ;;  %v749_v24 = vrot.slane %v4449_v55, 5  ;;  %v1400_v41 = vrot.slane %v1398_v14, 5 }
  0x43   : > { %3258 = vmatpush3.bf16.msra.mxu0 %v4060_v60  ;;  %3237 = vmatprep.mubr.msk.bf16.mxu0 %vm818_vm0, %v3991_v56  ;;  %v4134_v56 = vsel %vm3840_vm3, %v1382_v58, %v1386_v39  ;;  %v4163_v39 = vld [vmem:[%s4048_s17 + $0x8] sm:$0xf]  ;;  %v4203_v58 = vcombine.low %v4147_v10, %v4152_v1 }
  0x44   : > { %3259 = vmatprep.subr.bf16.mxu0 %v4089_v32  ;;  %3244 = vmatpush3.bf16.msra.mxu1 %v3980_v27  ;;  %v4141_v53 = vcombine.low %v4014_v57, %v4134_v56  ;;  %v1395_v27 = vor.u32 %v1394_v0, %v1391_v2  ;;  %v4160_v57 = vld [vmem:[%s4433_s4 + $0x78] sm:$0xff]   ;;  %v2010_v51 = vshrl.u32 %v4163_v39, 16  ;;  %v2013_v61 = vshll.u32 %v4163_v39, 16 }
  0x45   : > { %3245 = vmatprep.subr.bf16.mxu1 %v4005_v11  ;;  %v750_v54 = vor.u32 %v749_v24, %v746_v18  ;;  %v2024_v24 = vshrl.u32 %v4183_v35, 16  ;;  %v755_v2 = vrot.slane %v753_v26, 5  ;;  %v2027_v18 = vshll.u32 %v4183_v35, 16 }
  0x46   : > { %v1396_v20 = vrot.slane %v1395_v27, 4  ;;  %v2012_v21 = vrot.slane %v2010_v51, 4  ;;  %v2015_v38 = vrot.slane %v2013_v61, 5  ;;  %v2875_v27 = vcombine.low %v3822_v33, %v3835_v43  ;;  %v3633_v51 = vld [vmem:[%s4433_s4 + $0x88] sm:$0xff]  }
  0x47   : > { %3260 = vmatpush3.bf16.msra.mxu0 %v4089_v32  ;;  %3222 = vmatmul.mubr.msk.bf16.gmra.mrb[4].mxu1 %vm818_vm0, %v3934_v28  ;;  %v2026_v0 = vrot.slane %v2024_v24, 4  ;;  %v751_v46 = vrot.slane %v750_v54, 4  ;;  %v2029_v55 = vrot.slane %v2027_v18, 5  ;;  %v2876_v26 = vcombine.low %v3889_v34, %v3897_v40 }
  0x48   : > { %3261 = vmatprep.subr.bf16.mxu0 %v4118_v62  ;;  %3246 = vmatpush3.bf16.msra.mxu1 %v4005_v11  ;;  %v4191_v11 = vld [vmem:[%s4433_s4 + $0x80] sm:$0xff]   ;;  %v4195_v29 = vsel %vm3840_vm3, %v1396_v20, %v1400_v41  ;;  %v2016_v14 = vor.u32 %v2015_v38, %v2012_v21  ;;  %v4230_v43 = vsel %vm3840_vm3, %v737_v5, %v741_v17  ;;  %v3636_v38 = vld [vmem:[%s4433_s4 + $0x90] sm:$0xff]  }
  0x49   : > { %3249 = vmatprep.mubr.msk.bf16.mxu1 %vm818_vm0, %v2858_v47  ;;  %3247 = vmatprep.subr.bf16.mxu1 %v4036_v36  ;;  %v4209_v47 = vcombine.low %v4175_v6, %v4180_v16  ;;  %v2030_v20 = vor.u32 %v2029_v55, %v2026_v0  ;;  %v4234_v34 = vsel %vm3840_vm3, %v751_v46, %v755_v2 }
  0x4a   : > { %3238 = vmatmul.mubr.msk.bf16.gmra.mrb[4].mxu0 %vm818_vm0, %v4023_v9  ;;  %v2017_v41 = vrot.slane %v2016_v14, 4  ;;  %v4247_v21 = vcombine.low %v4230_v43, %v4234_v34  ;;  %v2886_v2 = vcombine.low %v3755_v4, %v3770_v7  ;;  %v2877_v18 = vcombine.low %v3916_v48, %v4073_v44  ;;  %v3638_v7 = vld [vmem:[%s4433_s4 + $0xa0] sm:$0xff]  }
  0x4b   : > { %3262 = vmatpush3.bf16.msra.mxu0 %v4118_v62  ;;  %3265 = vmatprep.mubr.msk.bf16.mxu0 %vm818_vm0, %v2874_v63  ;;  %v509_v63 = vld [vmem:[%s4048_s17 + $0xc] sm:$0x1]  ;;  %v2031_v40 = vrot.slane %v2030_v20, 4  ;;  %v2887_v4 = vcombine.low %v3778_v13, %v3856_v3  ;;  %v2888_v48 = vcombine.low %v3865_v12, %v3877_v22  ;;  %v2889_v3 = vcombine.low %v3880_v23, %v4084_v8  ;;  %v3640_v12 = vld [vmem:[%s4433_s4 + $0xb0] sm:$0xff]   ;;  %v3642_v23 = vld [vmem:[%s4433_s4 + $0xc0] sm:$0xff]  }
  0x4c   : > { %3263 = vmatprep.subr.bf16.mxu0 %v4160_v57  ;;  %3248 = vmatpush3.bf16.msra.mxu1 %v4036_v36  ;;  %v2019_v19 = vshll.u32 %v509_v63, 16  ;;  %v529_v36 = vld [vmem:[%s4067_s25 + $0xc] sm:$0x1]  ;;  %v2910_v22 = vcombine.low %v3874_v15, %v3894_v37  ;;  %v2911_v15 = vcombine.low %v3912_v45, %v3966_v31  ;;  %v2912_v37 = vcombine.low %v3975_v50, %v3998_v59  ;;  %v3644_v45 = vld [vmem:[%s4433_s4 + $0xd0] sm:$0xff]   ;;  %v3645_v50 = vld [vmem:[%s4433_s4 + $0xd8] sm:$0xff]  }
  0x4d   : > { %3273 = vmatprep.subr.bf16.mxu1 %v4060_v60  ;;  %v2033_v33 = vshll.u32 %v529_v36, 16  ;;  %v3639_v13 = vld [vmem:[%s4433_s4 + $0xa8] sm:$0xff]   ;;  %v2934_v31 = vcombine.low %v4113_v49, %v4147_v10  ;;  %v2935_v59 = vcombine.low %v4152_v1, %v4175_v6  ;;  %v3646_v49 = vld [vmem:[%s4433_s4 + $0xe0] sm:$0xff]   ;;  %v2936_v10 = vcombine.low %v4180_v16, %v4230_v43  ;;  %v4451_v1 = vld [vmem:[#allocation5_spill] sm:$0xff] }
  0x4e   : > { %v2021_v61 = vrot.slane %v2019_v19, 5  ;;  %v3649_v6 = vld [vmem:[%s4433_s4 + $0xf0] sm:$0xff]   ;;  %v2950_v16 = vcombine.low %v4073_v44, %v4163_v39  ;;  %v3652_v44 = vld [vmem:[%s4433_s4 + $0x100] sm:$0xff]   ;;  %v3653_v39 = vld [vmem:[%s4433_s4 + $0x108] sm:$0xff]  }
  0x4f   : > { %3264 = vmatpush3.bf16.msra.mxu0 %v4160_v57  ;;  %3250 = vmatmul.mubr.msk.bf16.vlgmr.msra.gmra.mrb[0].mxu1 %vm818_vm0, %v4203_v58  ;;  %v3006_v20 = vld [vmem:[%s4434_s5] ss:$0 sm:$0xff] }
  0x50   : > { %3289 = vmatprep.subr.bf16.mxu0 %v4191_v11  ;;  %3274 = vmatpush3.bf16.msra.mxu1 %v4060_v60  ;;  %v2022_v54 = vsel %vm3840_vm3, %v2017_v41, %v2021_v61  ;;  %v2035_v60 = vrot.slane %v2033_v33, 5 }
  0x51   : > { %3253 = vmatprep.mubr.msk.bf16.mxu1 %vm818_vm0, %v4209_v47  ;;  %3275 = vmatprep.subr.bf16.mxu1 %v4089_v32  ;;  %v4243_v17 = vcombine.low %v4134_v56, %v2022_v54 }
  0x52   : > { %3266 = vmatmul.mubr.msk.bf16.vlgmr.msra.gmra.mrb[0].mxu0 %vm818_vm0, %v2875_v27  ;;  %v2036_v24 = vsel %vm3840_vm3, %v2031_v40, %v2035_v60 }
  0x53   : > { %3290 = vmatpush3.bf16.msra.mxu0 %v4191_v11  ;;  %3269 = vmatprep.mubr.msk.bf16.mxu0 %vm818_vm0, %v2876_v26  ;;  %v4258_v56 = vcombine.low %v4195_v29, %v2036_v24 }
  0x54   : > { %3291 = vmatprep.subr.bf16.mxu0 %v3633_v51  ;;  %3276 = vmatpush3.bf16.msra.mxu1 %v4089_v32  ;;  %v3641_v32 = vld [vmem:[%s4433_s4 + $0xb8] sm:$0xff]  }
  0x55   : > { %3277 = vmatprep.subr.bf16.mxu1 %v4118_v62 }
  0x57   : > { %3292 = vmatpush3.bf16.msra.mxu0 %v3633_v51  ;;  %3254 = vmatmul.mubr.msk.bf16.gmra.mrb[4].mxu1 %vm818_vm0, %v4247_v21 }
  0x58   : > { %3293 = vmatprep.subr.bf16.mxu0 %v3636_v38  ;;  %3278 = vmatpush3.bf16.msra.mxu1 %v4118_v62  ;;  %v3643_v62 = vld [vmem:[%s4433_s4 + $0xc8] sm:$0xff]  }
  0x59   : > { %3281 = vmatprep.mubr.msk.bf16.mxu1 %vm818_vm0, %v2886_v2  ;;  %3279 = vmatprep.subr.bf16.mxu1 %v4160_v57 }
  0x5a   : > { %3270 = vmatmul.mubr.msk.bf16.gmra.mrb[4].mxu0 %vm818_vm0, %v2877_v18 }
  0x5b   : > { %3294 = vmatpush3.bf16.msra.mxu0 %v3636_v38  ;;  %3297 = vmatprep.mubr.msk.bf16.mxu0 %vm818_vm0, %v2886_v2 }
  0x5c   : > { %3295 = vmatprep.subr.bf16.mxu0 %v3637_v52  ;;  %3280 = vmatpush3.bf16.msra.mxu1 %v4160_v57  ;;  %v2937_v57 = vcombine.low %v4234_v34, %v4195_v29  ;;  %v3654_v29 = vld [vmem:[%s4433_s4 + $0x110] sm:$0xff]  }
  0x5d   : > { %3305 = vmatprep.subr.bf16.mxu1 %v4191_v11 }
  0x5f   : > { %3296 = vmatpush3.bf16.msra.mxu0 %v3637_v52  ;;  %3282 = vmatmul.mubr.msk.bf16.vlgmr.msra.gmra.mrb[0].mxu1 %vm818_vm0, %v2887_v4 }
  0x60   : > { %3321 = vmatprep.subr.bf16.mxu0 %v3638_v7  ;;  %3306 = vmatpush3.bf16.msra.mxu1 %v4191_v11  ;;  %v3651_v11 = vld [vmem:[%s4433_s4 + $0xf8] sm:$0xff]  }
  0x61   : > { %3285 = vmatprep.mubr.msk.bf16.mxu1 %vm818_vm0, %v2888_v48  ;;  %3307 = vmatprep.subr.bf16.mxu1 %v3633_v51 }
  0x62   : > { %3298 = vmatmul.mubr.msk.bf16.vlgmr.msra.gmra.mrb[0].mxu0 %vm818_vm0, %v2887_v4 }
  0x63   : > { %3322 = vmatpush3.bf16.msra.mxu0 %v3638_v7  ;;  %3301 = vmatprep.mubr.msk.bf16.mxu0 %vm818_vm0, %v2888_v48 }
  0x64   : > { %3323 = vmatprep.subr.bf16.mxu0 %v3639_v13  ;;  %3308 = vmatpush3.bf16.msra.mxu1 %v3633_v51 }
  0x65   : > { %3309 = vmatprep.subr.bf16.mxu1 %v3636_v38 }
  0x67   : > { %3324 = vmatpush3.bf16.msra.mxu0 %v3639_v13  ;;  %3286 = vmatmul.mubr.msk.bf16.gmra.mrb[4].mxu1 %vm818_vm0, %v2889_v3 }
  0x68   : > { %3325 = vmatprep.subr.bf16.mxu0 %v3640_v12  ;;  %3310 = vmatpush3.bf16.msra.mxu1 %v3636_v38 }
  0x69   : > { %3313 = vmatprep.mubr.msk.bf16.mxu1 %vm818_vm0, %v2910_v22  ;;  %3311 = vmatprep.subr.bf16.mxu1 %v3637_v52 }
  0x6a   : > { %3302 = vmatmul.mubr.msk.bf16.gmra.mrb[4].mxu0 %vm818_vm0, %v2889_v3 }
  0x6b   : > { %3326 = vmatpush3.bf16.msra.mxu0 %v3640_v12  ;;  %3329 = vmatprep.mubr.msk.bf16.mxu0 %vm818_vm0, %v2910_v22 }
  0x6c   : > { %3327 = vmatprep.subr.bf16.mxu0 %v3641_v32  ;;  %3312 = vmatpush3.bf16.msra.mxu1 %v3637_v52 }
  0x6d   : > { %3337 = vmatprep.subr.bf16.mxu1 %v3638_v7 }
  0x6f   : > { %3328 = vmatpush3.bf16.msra.mxu0 %v3641_v32  ;;  %3314 = vmatmul.mubr.msk.bf16.vlgmr.msra.gmra.mrb[0].mxu1 %vm818_vm0, %v2911_v15 }
  0x70   : > { %3353 = vmatprep.subr.bf16.mxu0 %v3642_v23  ;;  %3338 = vmatpush3.bf16.msra.mxu1 %v3638_v7 }
  0x71   : > { %3317 = vmatprep.mubr.msk.bf16.mxu1 %vm818_vm0, %v2912_v37  ;;  %3339 = vmatprep.subr.bf16.mxu1 %v3639_v13 }
  0x72   : > { %3330 = vmatmul.mubr.msk.bf16.vlgmr.msra.gmra.mrb[0].mxu0 %vm818_vm0, %v2911_v15 }
  0x73   : > { %3354 = vmatpush3.bf16.msra.mxu0 %v3642_v23  ;;  %3333 = vmatprep.mubr.msk.bf16.mxu0 %vm818_vm0, %v2912_v37 }
  0x74   : > { %3355 = vmatprep.subr.bf16.mxu0 %v3643_v62  ;;  %3340 = vmatpush3.bf16.msra.mxu1 %v3639_v13 }
  0x75   : > { %3341 = vmatprep.subr.bf16.mxu1 %v3640_v12 }
  0x77   : > { %3356 = vmatpush3.bf16.msra.mxu0 %v3643_v62  ;;  %3318 = vmatmul.mubr.msk.bf16.gmra.mrb[4].mxu1 %vm818_vm0, %v4141_v53 }
  0x78   : > { %3357 = vmatprep.subr.bf16.mxu0 %v3644_v45  ;;  %3342 = vmatpush3.bf16.msra.mxu1 %v3640_v12 }
  0x79   : > { %3345 = vmatprep.mubr.msk.bf16.mxu1 %vm818_vm0, %v2934_v31  ;;  %3343 = vmatprep.subr.bf16.mxu1 %v3641_v32 }
  0x7a   : > { %3334 = vmatmul.mubr.msk.bf16.gmra.mrb[4].mxu0 %vm818_vm0, %v4141_v53  ;;  %v4450_v53 = vld [vmem:[#allocation3_spill] sm:$0xff] }
  0x7b   : > { %3358 = vmatpush3.bf16.msra.mxu0 %v3644_v45  ;;  %3361 = vmatprep.mubr.msk.bf16.mxu0 %vm818_vm0, %v3962_v30  ;;  %v3647_v30 = vld [vmem:[%s4433_s4 + $0xe8] sm:$0xff]  }
  0x7c   : > { %3359 = vmatprep.subr.bf16.mxu0 %v3645_v50  ;;  %3344 = vmatpush3.bf16.msra.mxu1 %v3641_v32 }
  0x7d   : > { %3369 = vmatprep.subr.bf16.mxu1 %v3642_v23 }
  0x7f   : > { %3360 = vmatpush3.bf16.msra.mxu0 %v3645_v50  ;;  %3346 = vmatmul.mubr.msk.bf16.vlgmr.msra.gmra.mrb[0].mxu1 %vm818_vm0, %v2935_v59 }
  0x80   : > { %3385 = vmatprep.subr.bf16.mxu0 %v3646_v49  ;;  %3370 = vmatpush3.bf16.msra.mxu1 %v3642_v23 }
  0x81   : > { %3349 = vmatprep.mubr.msk.bf16.mxu1 %vm818_vm0, %v2936_v10  ;;  %3371 = vmatprep.subr.bf16.mxu1 %v3643_v62 }
  0x82   : > { %3362 = vmatmul.mubr.msk.bf16.vlgmr.msra.gmra.mrb[0].mxu0 %vm818_vm0, %v4450_v53 }
  0x83   : > { %3386 = vmatpush3.bf16.msra.mxu0 %v3646_v49  ;;  %3365 = vmatprep.mubr.msk.bf16.mxu0 %vm818_vm0, %v4451_v1 }
  0x84   : > { %3387 = vmatprep.subr.bf16.mxu0 %v3647_v30  ;;  %3372 = vmatpush3.bf16.msra.mxu1 %v3643_v62 }
  0x85   : > { %3373 = vmatprep.subr.bf16.mxu1 %v3644_v45 }
  0x87   : > { %3388 = vmatpush3.bf16.msra.mxu0 %v3647_v30  ;;  %3350 = vmatmul.mubr.msk.bf16.gmra.mrb[4].mxu1 %vm818_vm0, %v2937_v57 }
  0x88   : > { %3389 = vmatprep.subr.bf16.mxu0 %v3649_v6  ;;  %3374 = vmatpush3.bf16.msra.mxu1 %v3644_v45 }
  0x89   : > { %3377 = vmatprep.mubr.msk.bf16.mxu1 %vm818_vm0, %v3804_v25  ;;  %3375 = vmatprep.subr.bf16.mxu1 %v3645_v50 }
  0x8a   : > { %3366 = vmatmul.mubr.msk.bf16.gmra.mrb[4].mxu0 %vm818_vm0, %v2950_v16 }
  0x8b   : > { %3390 = vmatpush3.bf16.msra.mxu0 %v3649_v6  ;;  %3393 = vmatprep.mubr.msk.bf16.mxu0 %vm818_vm0, %v3804_v25  ;;  %v2959_v25 = vcombine.low %v4084_v8, %v4183_v35  ;;  %v4453_v8 = vld [vmem:[#allocation4_spill] sm:$0xff] }
  0x8c   : > { %3391 = vmatprep.subr.bf16.mxu0 %v3651_v11  ;;  %3376 = vmatpush3.bf16.msra.mxu1 %v3645_v50 }
  0x8d   : > { %3401 = vmatprep.subr.bf16.mxu1 %v3646_v49 }
  0x8f   : > { %3392 = vmatpush3.bf16.msra.mxu0 %v3651_v11  ;;  %3378 = vmatmul.mubr.msk.bf16.vlgmr.msra.gmra.mrb[0].mxu1 %vm818_vm0, %v3905_v42 }
  0x90   : > { %3417 = vmatprep.subr.bf16.mxu0 %v3652_v44  ;;  %3402 = vmatpush3.bf16.msra.mxu1 %v3646_v49 }
  0x91   : > { %3381 = vmatprep.mubr.msk.bf16.mxu1 %vm818_vm0, %v3934_v28  ;;  %3403 = vmatprep.subr.bf16.mxu1 %v3647_v30 }
  0x92   : > { %3394 = vmatmul.mubr.msk.bf16.vlgmr.msra.gmra.mrb[0].mxu0 %vm818_vm0, %v3905_v42  ;;  %v3655_v42 = vld [vmem:[%s4433_s4 + $0x118] sm:$0xff]  }
  0x93   : > { %3418 = vmatpush3.bf16.msra.mxu0 %v3652_v44  ;;  %3397 = vmatprep.mubr.msk.bf16.mxu0 %vm818_vm0, %v3934_v28  ;;  %v4452_v28 = vld [vmem:[#allocation2_spill] sm:$0xff] }
  0x94   : > { %3419 = vmatprep.subr.bf16.mxu0 %v3653_v39  ;;  %3404 = vmatpush3.bf16.msra.mxu1 %v3647_v30 }
  0x95   : > { %3405 = vmatprep.subr.bf16.mxu1 %v3649_v6 }
  0x97   : > { %3420 = vmatpush3.bf16.msra.mxu0 %v3653_v39  ;;  %3382 = vmatmul.mubr.msk.bf16.gmra.mrb[4].mxu1 %vm818_vm0, %v2959_v25 }
  0x98   : > { %3421 = vmatprep.subr.bf16.mxu0 %v3654_v29  ;;  %3406 = vmatpush3.bf16.msra.mxu1 %v3649_v6 }
  0x99   : > { %3409 = vmatprep.mubr.msk.bf16.mxu1 %vm818_vm0, %v4452_v28  ;;  %3407 = vmatprep.subr.bf16.mxu1 %v3651_v11 }
  0x9a   : > { %3398 = vmatmul.mubr.msk.bf16.gmra.mrb[4].mxu0 %vm818_vm0, %v2959_v25 }
  0x9b   : > { %3422 = vmatpush3.bf16.msra.mxu0 %v3654_v29  ;;  %3425 = vmatprep.mubr.msk.bf16.mxu0 %vm818_vm0, %v4452_v28 }
  0x9c   : > { %3423 = vmatprep.subr.bf16.mxu0 %v3655_v42  ;;  %3408 = vmatpush3.bf16.msra.mxu1 %v3651_v11 }
  0x9d   : > { %3433 = vmatprep.subr.bf16.mxu1 %v3652_v44 }
  0x9f   : > { %3424 = vmatpush3.bf16.msra.mxu0 %v3655_v42  ;;  %3410 = vmatmul.mubr.msk.bf16.vlgmr.msra.gmra.mrb[0].mxu1 %vm818_vm0, %v4453_v8 }
  0xa0   : > { %3434 = vmatpush3.bf16.msra.mxu1 %v3652_v44  ;;  %3413 = vmatprep.mubr.msk.bf16.mxu1 %vm818_vm0, %v4023_v9 }
  0xa1   : > { %3435 = vmatprep.subr.bf16.mxu1 %v3653_v39 }
  0xa2   : > { %3426 = vmatmul.mubr.msk.bf16.vlgmr.msra.gmra.mrb[0].mxu0 %vm818_vm0, %v4453_v8 }
  0xa3   : > { %3429 = vmatprep.mubr.msk.bf16.mxu0 %vm818_vm0, %v4023_v9 }
  0xa4   : > { %3436 = vmatpush3.bf16.msra.mxu1 %v3653_v39 }
  0xa5   : > { %3437 = vmatprep.subr.bf16.mxu1 %v3654_v29 }
  0xa7   : > { %3414 = vmatmul.mubr.msk.bf16.gmra.mrb[4].mxu1 %vm818_vm0, %v4243_v17 }
  0xa8   : > { %3438 = vmatpush3.bf16.msra.mxu1 %v3654_v29  ;;  %3441 = vmatprep.mubr.msk.bf16.mxu1 %vm818_vm0, %v4203_v58 }
  0xa9   : > { %3439 = vmatprep.subr.bf16.mxu1 %v3655_v42 }
  0xaa   : > { %3430 = vmatmul.mubr.msk.bf16.gmra.mrb[4].mxu0 %vm818_vm0, %v4243_v17 }
  0xac   : > { %3440 = vmatpush3.bf16.msra.mxu1 %v3655_v42 }
  0xaf   : > { %3442 = vmatmul.mubr.msk.bf16.vlgmr.msra.gmra.mrb[0].mxu1 %vm818_vm0, %v4209_v47 }
  0xb0   : > { %3445 = vmatprep.mubr.msk.bf16.mxu1 %vm818_vm0, %v4247_v21 }
  0xb7   : > { %3446 = vmatmul.mubr.msk.bf16.gmra.mrb[4].mxu1 %vm818_vm0, %v4258_v56 }
 0x175   : > { %v3427_v9 = vpop.f32.mrb[0].mxu0 }
 0x176   : > { %v2479_v35 = vpop.f32.mrb[1].mxu0 }
 0x177   : > { %v3428_v5 = vpop.f32.mrb[2].mxu0 }
 0x178   : > { %v2482_v0 = vpop.f32.mrb[3].mxu0 }
 0x17d   : > { %v3431_v58 = vpop.f32.mrb[4].mxu0 }
 0x17e   : > { %v2495_v14 = vpop.f32.mrb[5].mxu0 }
 0x17f   : > { %v3432_v46 = vpop.f32.mrb[6].mxu0 }
 0x180   : > { %v2498_v55 = vpop.f32.mrb[7].mxu0 }
 0x182   : > { %v3443_v63 = vpop.f32.mrb[0].mxu1 }
 0x183   : > { %v2599_v27 = vmax.f32 %v3427_v9, %v3443_v63  ;;  %v2557_v41 = vpop.f32.mrb[1].mxu1 }
 0x184   : > { %v2597_v19 = vmax.f32 %v2479_v35, %v2557_v41  ;;  %v3444_v47 = vpop.f32.mrb[2].mxu1 }
 0x185   : > { %v2600_v26 = vmax.f32 %v3428_v5, %v3444_v47  ;;  %v2560_v36 = vpop.f32.mrb[3].mxu1 }
 0x186   : > { %v2598_v51 = vmax.f32 %v2482_v0, %v2560_v36 }
 0x187   : > { %v2616_v61 = vmax.f32 %v2599_v27, %v2600_v26 }
 0x188   : > { %v2605_v33 = vmax.f32 %v2597_v19, %v2598_v51 }
 0x189   : > { %v2617_v43 = vadd.f32 %v3006_v20, %v2616_v61 }
 0x18a   : > { %v2612_v34 = vadd.f32 %v3006_v20, %v2605_v33  ;;  %v3447_v40 = vpop.f32.mrb[4].mxu1 }
 0x18b   : > { %v2618_v54 = vmax.f32 %v2617_v43, 0.0  ;;  %v2603_v60 = vmax.f32 %v3431_v58, %v3447_v40  ;;  %v2573_v17 = vpop.f32.mrb[5].mxu1 }
 0x18c   : > { %v2613_v21 = vmax.f32 %v2612_v34, 0.0  ;;  %v2601_v38 = vmax.f32 %v2495_v14, %v2573_v17  ;;  %v3448_v24 = vpop.f32.mrb[6].mxu1 }
 0x18d   : > { %v2619_v2 = vpack.c.bf16 %v2618_v54, %v2618_v54  ;;  %v2604_v56 = vmax.f32 %v3432_v46, %v3448_v24  ;;  %v2576_v18 = vpop.f32.mrb[7].mxu1 }
 0x18e   : > { %v2614_v52 = vpack.c.bf16 %v2613_v21, %v2613_v21  ;;  %v2602_v4 = vmax.f32 %v2498_v55, %v2576_v18 }
 0x18f   : > { %3007 = vst [vmem:[%s487_s14 + $0x4] sm:$0xf] %v2619_v2  ;;  %v2628_v7 = vmax.f32 %v2603_v60, %v2604_v56 }
 0x190   : > { %2615 = vst [vmem:[%s487_s14] sm:$0xf] %v2614_v52  ;;  %v2622_v48 = vmax.f32 %v2601_v38, %v2602_v4 }
 0x191   : > { %v2629_v13 = vadd.f32 %v3006_v20, %v2628_v7 }
 0x192   : > { %v2623_v3 = vadd.f32 %v3006_v20, %v2622_v48 }
 0x193   : > { %v2630_v12 = vmax.f32 %v2629_v13, 0.0 }
 0x194   : > { %v2624_v22 = vmax.f32 %v2623_v3, 0.0 }
 0x195   : > { %v2631_v32 = vpack.c.bf16 %v2630_v12, %v2630_v12 }
 0x196   : > { %v2625_v15 = vpack.c.bf16 %v2624_v22, %v2624_v22 }
 0x197   : > { %3009 = vst [vmem:[%s487_s14 + $0xc] sm:$0xf] %v2631_v32 }
 0x198   : > { %3008 = vst [vmem:[%s487_s14 + $0x8] sm:$0xf] %v2625_v15 }
 0x199 PF: > { %s16_s23 = sadd.s32 1, %s3678_s23   ;;  %s4454_s21 = smov %s3674_s22 }
 0x19a   : > { %p13_p5 = scmp.ge.s32.totalorder %s16_s23, 8   ;;  %s4455_s22 = smov %s4457_s24 }
 0x19c   :  { %15 = sbr.rel (!%p13_p5) target bundleno = 2 (0x2), region = 94 }

// kernel: squeeze.15
= control target key start
LH: loop header
LB: loop body
LE: loop exit
PB: predicated region body
PF: predicated region fallthrough
CT: control target
= control target key end

     0   :  { %s229_s0 = inlined_call_operand.vmem [shape: bf16[2,2,2,256], index: 0, kind: input, shape index: {}]   ;;  %s230_s1 = inlined_call_operand.vmem [shape: bf16[8,256], index: 1, kind: output, shape index: {}]  }
   0x1   :  { %v179_v0 = vld [vmem:[%s229_s0 + $0x7] sm:$0x1]  ;;  %v180_v1 = vld [vmem:[%s229_s0 + $0x6] sm:$0x1]  ;;  %v181_v2 = vld [vmem:[%s229_s0 + $0x5] sm:$0x1] }
   0x2   :  { %v17_v3 = vunpack.c.l.bf16 %v179_v0  ;;  %v33_v4 = vunpack.c.l.bf16 %v180_v1  ;;  %v49_v5 = vunpack.c.l.bf16 %v181_v2  ;;  %v182_v6 = vld [vmem:[%s229_s0 + $0x4] sm:$0x1]  ;;  %v183_v7 = vld [vmem:[%s229_s0 + $0x3] sm:$0x1]  ;;  %v184_v8 = vld [vmem:[%s229_s0 + $0x2] sm:$0x1] }
   0x3   :  { %v65_v9 = vunpack.c.l.bf16 %v182_v6  ;;  %v81_v10 = vunpack.c.l.bf16 %v183_v7  ;;  %v97_v11 = vunpack.c.l.bf16 %v184_v8  ;;  %v185_v12 = vld [vmem:[%s229_s0 + $0x1] sm:$0x1]  ;;  %v125_v13 = vld [vmem:[%s229_s0] sm:$0x1] }
   0x4   :  { %20 = vst [vmem:[#allocation1 + $0x38] sm:$0x3] %v17_v3  ;;  %36 = vst [vmem:[#allocation1 + $0x30] sm:$0x3] %v33_v4  ;;  %v112_v14 = vunpack.c.l.bf16 %v185_v12  ;;  %v126_v15 = vunpack.c.l.bf16 %v125_v13 }
   0x5   :  { %52 = vst [vmem:[#allocation1 + $0x28] sm:$0x3] %v49_v5  ;;  %68 = vst [vmem:[#allocation1 + $0x20] sm:$0x3] %v65_v9 }
   0x6   :  { %84 = vst [vmem:[#allocation1 + $0x18] sm:$0x3] %v81_v10  ;;  %100 = vst [vmem:[#allocation1 + $0x10] sm:$0x3] %v97_v11 }
   0x7   :  { %115 = vst [vmem:[#allocation1 + $0x8] sm:$0x3] %v112_v14  ;;  %128 = vst [vmem:[#allocation1] sm:$0x3] %v126_v15 }
   0xb   :  { %v152_v17 = vld [vmem:[#allocation1 + $0x30] sm:$0x3]   ;;  %v156_v18 = vld [vmem:[#allocation1 + $0x38] sm:$0x3]  }
   0xc   :  { %v148_v16 = vld [vmem:[#allocation1 + $0x28] sm:$0x3]   ;;  %v144_v21 = vld [vmem:[#allocation1 + $0x20] sm:$0x3]   ;;  %154 = vst [vmem:[#allocation0 + $0x6] sm:$0x3] %v152_v17  }
   0xd   :  { %v136_v19 = vld [vmem:[#allocation1 + $0x10] sm:$0x3]   ;;  %v140_v20 = vld [vmem:[#allocation1 + $0x18] sm:$0x3]   ;;  %150 = vst [vmem:[#allocation0 + $0xc] sm:$0x3] %v148_v16  }
   0xe   :  { %158 = vst [vmem:[#allocation0 + $0xe] sm:$0x3] %v156_v18   ;;  %v129_v22 = vld [vmem:[#allocation1] sm:$0x3]   ;;  %v132_v23 = vld [vmem:[#allocation1 + $0x8] sm:$0x3]  }
   0xf   :  { %138 = vst [vmem:[#allocation0 + $0x2] sm:$0x3] %v136_v19   ;;  %142 = vst [vmem:[#allocation0 + $0xa] sm:$0x3] %v140_v20  }
  0x10   :  { %146 = vst [vmem:[#allocation0 + $0x4] sm:$0x3] %v144_v21   ;;  %130 = vst [vmem:[#allocation0] sm:$0x3] %v129_v22  }
  0x11   :  { %134 = vst [vmem:[#allocation0 + $0x8] sm:$0x3] %v132_v23  }
  0x17   :  { %v163_v24 = vld [vmem:[#allocation0] sm:$0xff] }
  0x18   :  { %v168_v25 = vld [vmem:[#allocation0 + $0x8] sm:$0xff] }
  0x19   :  { %v190_v26 = vpack.c.bf16 %v168_v25, %v163_v24 }
  0x1b   :  { %191 = vst [vmem:[%s230_s1] sm:$0xff] %v190_v26  }

// kernel: denoising_cnn_512_forward.11
= control target key start
LH: loop header
LB: loop body
LE: loop exit
PB: predicated region body
PF: predicated region fallthrough
CT: control target
= control target key end

     0   :  { %s74_s0 = inlined_call_operand.vmem [shape: bf16[8,256], index: 0, kind: input, shape index: {}]   ;;  %s75_s1 = inlined_call_operand.vmem [shape: bf16[8,256], index: 1, kind: input, shape index: {}]   ;;  %s76_s2 = inlined_call_operand.vmem [shape: bf16[8,256], index: 2, kind: input, shape index: {}]   ;;  %s77_s3 = inlined_call_operand.vmem [shape: bf16[8,256], index: 3, kind: output, shape index: {}]  }
   0x1   :  { %v14_v0 = vld [vmem:[%s74_s0] sm:$0xff] }
   0x2   :  { %v17_v1 = vld [vmem:[%s75_s1] sm:$0xff]  ;;  %v15_v3 = vunpack.c.l.bf16 %v14_v0  ;;  %v16_v4 = vunpack.c.h.bf16 %v14_v0 }
   0x3   :  { %v22_v2 = vld [vmem:[%s76_s2] sm:$0xff]  ;;  %v18_v5 = vunpack.c.l.bf16 %v17_v1  ;;  %v19_v6 = vunpack.c.h.bf16 %v17_v1 }
   0x4   :  { %v23_v7 = vunpack.c.l.bf16 %v22_v2  ;;  %v24_v8 = vunpack.c.h.bf16 %v22_v2 }
   0x5   :  { %v20_v9 = vadd.f32 %v18_v5, %v15_v3  ;;  %v21_v10 = vadd.f32 %v19_v6, %v16_v4 }
   0x7   :  { %v25_v11 = vadd.f32 %v23_v7, %v20_v9  ;;  %v26_v12 = vadd.f32 %v24_v8, %v21_v10 }
   0x9   :  { %v41_v13 = vpack.c.bf16 %v26_v12, %v25_v11 }
   0xb   :  { %35 = vst [vmem:[%s77_s3] sm:$0xff] %v41_v13 }

// kernel: denoising_cnn_512_forward.10
= control target key start
LH: loop header
LB: loop body
LE: loop exit
PB: predicated region body
PF: predicated region fallthrough
CT: control target
= control target key end

     0   :  { %s3666_s21 = smov 0   ;;  %s3668_s22 = smov 0   ;;  %s4379_s0 = inlined_call_operand.vmem [shape: bf16[6,6,9,128], index: 0, kind: input, shape index: {}, may-alias: {0,1}]   ;;  %s4380_s1 = inlined_call_operand.vmem [shape: bf16[6,6,9,128], index: 1, kind: input, shape index: {}, may-alias: {0,1}]   ;;  %s4381_s2 = inlined_call_operand.vmem [shape: bf16[6,6,9,128], index: 2, kind: input, shape index: {}, may-alias: {2,3}]   ;;  %s4382_s3 = inlined_call_operand.vmem [shape: bf16[6,6,9,128], index: 3, kind: input, shape index: {}, may-alias: {2,3}]   ;;  %s4383_s4 = inlined_call_operand.vmem [shape: bf16[3,3,128,256], index: 4, kind: input, shape index: {}]   ;;  %s4384_s5 = inlined_call_operand.vmem [shape: f32[1,256], index: 5, kind: input, shape index: {}]   ;;  %s4385_s6 = inlined_call_operand.vmem [shape: bf16[6,2,8,256], index: 6, kind: output, shape index: {}]  }
   0x1   :  { %s3670_s23 = smov 0  }
   0x2 LB: > { %s28_s24 = sadd.s32 1, %s3624_s22  ;;  %p2915_p0 = scmp.ge.s32.totalorder %s3628_s23, 1  ;;  %s3628_s23 = sphi %s3670_s23, %s16_s23   ;;  %s3624_s22 = sphi %s3668_s22, %s4389_s22   ;;  %s3620_s21 = sphi %s3666_s21, %s4388_s21  }
   0x3   : > { %p30_p1 = scmp.ge.s32.totalorder %s28_s24, 6  ;;  %p324_p2 = scmp.lt.s32.totalorder %s3628_s23, 7 }
   0x5   : > { %s4391_s24 = smov (%p30_p1, %s28_s24), 0  ;;  %p325_p3 = pnand %p2915_p0, %p324_p2 }
   0x6   : > { %v3382_v0 = vld [vmem:[%s4383_s4 + $0x84] ss:$8 sps:$4 sm:$0xff] (!%p325_p3)   ;;  %p414_p4 = scmp.lt.s32.totalorder (!%p325_p3), %s3620_s21, 5  ;;  %v3384_v1 = vld [vmem:[%s4383_s4 + $0x80] ss:$8 sps:$4 sm:$0xff] (!%p325_p3)   ;;  %v3630_v2 = vmov (!%p325_p3), 0  }
   0x7   : > { %328 = sbr.rel (%p325_p3) target bundleno = 530 (0x212), region = 44  ;;  %788 = vmatprep.mubr.bf16.mxu0 (!%p325_p3), %v3630_v2  ;;  %994 = vmatprep.mubr.bf16.mxu1 (!%p325_p3), %v3630_v2  ;;  %v3385_v3 = vld [vmem:[%s4383_s4 + $0x94] ss:$8 sps:$4 sm:$0xff] (!%p325_p3)   ;;  %v3387_v4 = vld [vmem:[%s4383_s4 + $0x90] ss:$8 sps:$4 sm:$0xff] (!%p325_p3)  }
   0x8   : > { %756 = vmatprep.subr.bf16.mxu0 (!%p325_p3), %v3382_v0  ;;  %962 = vmatprep.subr.bf16.mxu1 (!%p325_p3), %v3382_v0  ;;  %v3388_v5 = vld [vmem:[%s4383_s4 + $0xa4] ss:$8 sps:$4 sm:$0xff] (!%p325_p3)   ;;  %v3390_v6 = vld [vmem:[%s4383_s4 + $0xa0] ss:$8 sps:$4 sm:$0xff] (!%p325_p3)   ;;  %v3391_v7 = vld [vmem:[%s4383_s4 + $0xb4] ss:$8 sps:$4 sm:$0xff] (!%p325_p3)  }
   0x9   : > { %757 = vmatpush1.bf16.msra.mxu0 (!%p325_p3), %v3384_v1  ;;  %963 = vmatpush1.bf16.msra.mxu1 (!%p325_p3), %v3384_v1  ;;  %v3393_v8 = vld [vmem:[%s4383_s4 + $0xb0] ss:$8 sps:$4 sm:$0xff] (!%p325_p3)   ;;  %v3394_v9 = vld [vmem:[%s4383_s4 + $0xc4] ss:$8 sps:$4 sm:$0xff] (!%p325_p3)   ;;  %v3396_v11 = vld [vmem:[%s4383_s4 + $0xc0] ss:$8 sps:$4 sm:$0xff] (!%p325_p3)  }
   0xa   : > { %758 = vmatprep.subr.bf16.mxu0 (!%p325_p3), %v3385_v3  ;;  %964 = vmatprep.subr.bf16.mxu1 (!%p325_p3), %v3385_v3  ;;  %v3397_v13 = vld [vmem:[%s4383_s4 + $0xd4] ss:$8 sps:$4 sm:$0xff] (!%p325_p3)   ;;  %v3399_v25 = vld [vmem:[%s4383_s4 + $0xd0] ss:$8 sps:$4 sm:$0xff] (!%p325_p3)   ;;  %v3400_v29 = vld [vmem:[%s4383_s4 + $0xe4] ss:$8 sps:$4 sm:$0xff] (!%p325_p3)  }
   0xb   : > { %vm516_vm0 = vsmask.f32 (!%p325_p3), 3328  ;;  %vm517_vm1 = vsmask.f32 (!%p325_p3), 7440  ;;  %v3402_v36 = vld [vmem:[%s4383_s4 + $0xe0] ss:$8 sps:$4 sm:$0xff] (!%p325_p3)  }
   0xc   : > { %v3403_v43 = vld [vmem:[%s4383_s4 + $0xf4] ss:$8 sps:$4 sm:$0xff] (!%p325_p3)   ;;  %vm3770_vm2 = vmor (!%p325_p3), %vm516_vm0, %vm517_vm1  ;;  %v3405_v47 = vld [vmem:[%s4383_s4 + $0xf0] ss:$8 sps:$4 sm:$0xff] (!%p325_p3)  }
   0xd   : > { %759 = vmatpush1.bf16.msra.mxu0 (!%p325_p3), %v3387_v4  ;;  %965 = vmatpush1.bf16.msra.mxu1 (!%p325_p3), %v3387_v4  ;;  %v3408_v57 = vld [vmem:[%s4383_s4 + $0x4] ss:$8 sps:$4 sm:$0xff] (!%p325_p3)   ;;  %v3406_v4 = vld [vmem:[%s4383_s4] ss:$8 sps:$4 sm:$0xff] (!%p325_p3)  }
   0xe   : > { %s4393_s21 = smov (!%p414_p4, %s3620_s21), 5  ;;  %760 = vmatprep.subr.bf16.mxu0 %v3388_v5  ;;  %966 = vmatprep.subr.bf16.mxu1 %v3388_v5  ;;  %v3412_v5 = vld [vmem:[%s4383_s4 + $0x14] ss:$8 sps:$4 sm:$0xff]  }
   0xf   : > { %s3704_s11 = smul.u32 48, %s4393_s21 }
  0x11   : > { %s3716_s18 = scalar_lea.vmem %s4379_s0, %s3704_s11  ;;  %761 = vmatpush1.bf16.msra.mxu0 %v3390_v6  ;;  %967 = vmatpush1.bf16.msra.mxu1 %v3390_v6  ;;  %s3763_s16 = scalar_lea.vmem %s4381_s2, %s3704_s11 }
  0x12   : > { %762 = vmatprep.subr.bf16.mxu0 %v3391_v7  ;;  %968 = vmatprep.subr.bf16.mxu1 %v3391_v7  ;;  %v3725_v10 = vld [vmem:[%s3716_s18] sm:$0xf]  ;;  %v3731_v12 = vld [vmem:[%s3716_s18 + $0x8] sm:$0xf]  ;;  %v493_v14 = vld [vmem:[%s3716_s18 + $0x4] sm:$0x1] }
  0x13   : > { %v495_v15 = vld [vmem:[%s3716_s18 + $0xc] sm:$0x1]  ;;  %v520_v16 = vshrl.u32 %v3725_v10, 16  ;;  %v523_v17 = vshll.u32 %v3725_v10, 16  ;;  %v534_v18 = vshrl.u32 %v3731_v12, 16  ;;  %v537_v21 = vshll.u32 %v3731_v12, 16 }
  0x14   : > { %v3742_v19 = vld [vmem:[%s3716_s18 + $0x10] sm:$0xf]  ;;  %v497_v20 = vld [vmem:[%s3716_s18 + $0x14] sm:$0x1]  ;;  %v529_v26 = vshll.u32 %v493_v14, 16  ;;  %v543_v28 = vshll.u32 %v495_v15, 16 }
  0x15   : > { %763 = vmatpush1.bf16.msra.mxu0 %v3393_v8  ;;  %969 = vmatpush1.bf16.msra.mxu1 %v3393_v8  ;;  %v522_v22 = vrot.slane %v520_v16, 4  ;;  %v525_v23 = vrot.slane %v523_v17, 5  ;;  %v536_v24 = vrot.slane %v534_v18, 4  ;;  %v539_v27 = vrot.slane %v537_v21, 5  ;;  %v506_v48 = vld [vmem:[%s3763_s16 + $0x8] sm:$0xf] }
  0x16   : > { %764 = vmatprep.subr.bf16.mxu0 %v3394_v9  ;;  %970 = vmatprep.subr.bf16.mxu1 %v3394_v9  ;;  %v548_v31 = vshrl.u32 %v3742_v19, 16  ;;  %v551_v32 = vshll.u32 %v3742_v19, 16  ;;  %v557_v33 = vshll.u32 %v497_v20, 16  ;;  %v3026_v35 = vcombine.low %v3731_v12, %v3742_v19  ;;  %v508_v50 = vld [vmem:[%s3763_s16 + $0x10] sm:$0xf]  ;;  %s3220_s7 = sadd.s32 32, %s3704_s11 }
  0x17   : > { %v526_v30 = vor.u32 %v525_v23, %v522_v22  ;;  %v540_v34 = vor.u32 %v539_v27, %v536_v24  ;;  %v531_v40 = vrot.slane %v529_v26, 5  ;;  %v545_v42 = vrot.slane %v543_v28, 5  ;;  %v3780_v51 = vld [vmem:[%s3763_s16] sm:$0xf]  ;;  %v3787_v54 = vld [vmem:[%s3716_s18 + $0x18] sm:$0xf]  ;;  %s4030_s14 = scalar_lea.vmem %s4380_s1, %s3220_s7  ;;  %s4035_s11 = scalar_lea.vmem %s4382_s3, %s3220_s7 }
  0x18   : > { %v550_v37 = vrot.slane %v548_v31, 4  ;;  %v553_v38 = vrot.slane %v551_v32, 5  ;;  %v559_v46 = vrot.slane %v557_v33, 5  ;;  %v499_v55 = vld [vmem:[%s3716_s18 + $0x1c] sm:$0x1]  ;;  %v3790_v56 = vcombine.low %v506_v48, %v508_v50  ;;  %s3223_s7 = sshll.u32 %s4393_s21, 4 }
  0x19   : > { %765 = vmatpush1.bf16.msra.mxu0 %v3396_v11  ;;  %971 = vmatpush1.bf16.msra.mxu1 %v3396_v11  ;;  %v527_v39 = vrot.slane %v526_v30, 4  ;;  %v541_v41 = vrot.slane %v540_v34, 4  ;;  %v562_v59 = vshrl.u32 %v3787_v54, 16  ;;  %v565_v60 = vshll.u32 %v3787_v54, 16  ;;  %v3410_v9 = vld [vmem:[%s4383_s4 + $0x10] ss:$8 sps:$4 sm:$0xff]   ;;  %s489_s10 = scalar_lea.vmem %s4385_s6, %s3223_s7 }
  0x1a   : > { %766 = vmatprep.subr.bf16.mxu0 %v3397_v13  ;;  %972 = vmatprep.subr.bf16.mxu1 %v3397_v13  ;;  %v554_v45 = vor.u32 %v553_v38, %v550_v37  ;;  %v571_v62 = vshll.u32 %v499_v55, 16  ;;  %v3802_v63 = vcombine.low %v3780_v51, %v506_v48  ;;  %v3818_v11 = vld [vmem:[%s3763_s16 + $0x18] sm:$0xf]  ;;  %v3415_v13 = vld [vmem:[%s4383_s4 + $0x24] ss:$8 sps:$4 sm:$0xff]   ;;  %v590_v15 = vshrl.u32 %v506_v48, 16 }
  0x1b   : > { %v532_v52 = vsel %vm3770_vm2, %v527_v39, %v531_v40  ;;  %v546_v53 = vsel %vm3770_vm2, %v541_v41, %v545_v42  ;;  %v564_v1 = vrot.slane %v562_v59, 4  ;;  %v567_v3 = vrot.slane %v565_v60, 5  ;;  %v3413_v22 = vld [vmem:[%s4383_s4 + $0x20] ss:$8 sps:$4 sm:$0xff]   ;;  %v3418_v23 = vld [vmem:[%s4383_s4 + $0x34] ss:$8 sps:$4 sm:$0xff]  }
  0x1c   : > { %v555_v49 = vrot.slane %v554_v45, 4  ;;  %v3804_v0 = vcombine.low %v532_v52, %v546_v53  ;;  %v573_v7 = vrot.slane %v571_v62, 5  ;;  %v593_v16 = vshll.u32 %v506_v48, 16  ;;  %v3416_v28 = vld [vmem:[%s4383_s4 + $0x30] ss:$8 sps:$4 sm:$0xff]  }
  0x1d   : > { %767 = vmatpush1.bf16.msra.mxu0 %v3399_v25  ;;  %973 = vmatpush1.bf16.msra.mxu1 %v3399_v25  ;;  %v568_v6 = vor.u32 %v567_v3, %v564_v1  ;;  %v3830_v17 = vcombine.low %v508_v50, %v3818_v11  ;;  %v604_v20 = vshrl.u32 %v508_v50, 16  ;;  %v607_v21 = vshll.u32 %v508_v50, 16  ;;  %v3421_v30 = vld [vmem:[%s4383_s4 + $0x44] ss:$8 sps:$4 sm:$0xff]   ;;  %v3419_v34 = vld [vmem:[%s4383_s4 + $0x40] ss:$8 sps:$4 sm:$0xff]  }
  0x1e   : > { %768 = vmatprep.subr.bf16.mxu0 %v3400_v29  ;;  %974 = vmatprep.subr.bf16.mxu1 %v3400_v29  ;;  %v560_v58 = vsel %vm3770_vm2, %v555_v49, %v559_v46  ;;  %v592_v24 = vrot.slane %v590_v15, 4  ;;  %v595_v25 = vrot.slane %v593_v16, 5  ;;  %v507_v29 = vld [vmem:[%s3763_s16 + $0xc] sm:$0x1]  ;;  %v509_v37 = vld [vmem:[%s3763_s16 + $0x14] sm:$0x1]  ;;  %v2956_v55 = vcombine.low %v3725_v10, %v3731_v12 }
  0x1f   : > { %v3799_v61 = vcombine.low %v546_v53, %v560_v58  ;;  %v569_v8 = vrot.slane %v568_v6, 4  ;;  %v606_v26 = vrot.slane %v604_v20, 4  ;;  %v609_v27 = vrot.slane %v607_v21, 5  ;;  %v3422_v42 = vld [vmem:[%s4383_s4 + $0x50] ss:$8 sps:$4 sm:$0xff]  }
  0x20   : > { %v596_v31 = vor.u32 %v595_v25, %v592_v24  ;;  %v599_v32 = vshll.u32 %v507_v29, 16  ;;  %v613_v41 = vshll.u32 %v509_v37, 16  ;;  %v3425_v48 = vld [vmem:[%s4383_s4 + $0x60] ss:$8 sps:$4 sm:$0xff]   ;;  %v3431_v50 = vld [vmem:[%s4383_s4 + $0x74] ss:$8 sps:$4 sm:$0xff]   ;;  %v3906_v60 = vcombine.low %v3742_v19, %v3787_v54 }
  0x21   : > { %769 = vmatpush1.bf16.msra.mxu0 %v3402_v36  ;;  %975 = vmatpush1.bf16.msra.mxu1 %v3402_v36  ;;  %v3825_v14 = vsel %vm3770_vm2, %v569_v8, %v573_v7  ;;  %v610_v33 = vor.u32 %v609_v27, %v606_v26  ;;  %v3424_v36 = vld [vmem:[%s4383_s4 + $0x54] ss:$8 sps:$4 sm:$0xff]   ;;  %v3429_v52 = vld [vmem:[%s4383_s4 + $0x70] ss:$8 sps:$4 sm:$0xff]   ;;  %v3434_v53 = vld [vmem:[%s4383_s4 + $0x104] ss:$8 sps:$4 sm:$0xff]  }
  0x22   : > { %770 = vmatprep.subr.bf16.mxu0 %v3403_v43  ;;  %976 = vmatprep.subr.bf16.mxu1 %v3403_v43  ;;  %v3833_v18 = vcombine.low %v560_v58, %v3825_v14  ;;  %v597_v38 = vrot.slane %v596_v31, 4  ;;  %v601_v39 = vrot.slane %v599_v32, 5  ;;  %v3427_v43 = vld [vmem:[%s4383_s4 + $0x64] ss:$8 sps:$4 sm:$0xff]   ;;  %v615_v45 = vrot.slane %v613_v41, 5 }
  0x23   : > { %v611_v40 = vrot.slane %v610_v33, 4  ;;  %v3438_v58 = vld [vmem:[%s4383_s4 + $0x114] ss:$8 sps:$4 sm:$0xff]   ;;  %v3436_v10 = vld [vmem:[%s4383_s4 + $0x110] ss:$8 sps:$4 sm:$0xff]   ;;  %v576_v1 = vshrl.u32 %v3780_v51, 16 }
  0x24   : > { %v3867_v46 = vsel %vm3770_vm2, %v597_v38, %v601_v39  ;;  %v3441_v59 = vld [vmem:[%s4383_s4 + $0x124] ss:$8 sps:$4 sm:$0xff]   ;;  %v3439_v62 = vld [vmem:[%s4383_s4 + $0x120] ss:$8 sps:$4 sm:$0xff]   ;;  %v579_v3 = vshll.u32 %v3780_v51, 16  ;;  %v618_v15 = vshrl.u32 %v3818_v11, 16 }
  0x25   : > { %771 = vmatpush1.bf16.msra.mxu0 %v3405_v47  ;;  %977 = vmatpush1.bf16.msra.mxu1 %v3405_v47  ;;  %v3871_v47 = vsel %vm3770_vm2, %v611_v40, %v615_v45  ;;  %v578_v51 = vrot.slane %v576_v1, 4  ;;  %v3445_v7 = vld [vmem:[%s4383_s4 + $0x140] ss:$8 sps:$4 sm:$0xff]   ;;  %v3450_v8 = vld [vmem:[%s4383_s4 + $0x154] ss:$8 sps:$4 sm:$0xff]  }
  0x26   : > { %901 = vmatprep.subr.bf16.mxu0 %v3408_v57  ;;  %1015 = vmatprep.subr.bf16.mxu1 %v3408_v57  ;;  %v3112_v49 = vcombine.low %v3867_v46, %v3871_v47  ;;  %v3432_v57 = vld [vmem:[%s4383_s4 + $0x100] ss:$8 sps:$4 sm:$0xff]   ;;  %v581_v6 = vrot.slane %v579_v3, 5  ;;  %v3448_v16 = vld [vmem:[%s4383_s4 + $0x150] ss:$8 sps:$4 sm:$0xff]  }
  0x27   : > { %v3453_v20 = vld [vmem:[%s4383_s4 + $0x164] ss:$8 sps:$4 sm:$0xff]   ;;  %v3457_v25 = vld [vmem:[%s4383_s4 + $0x174] ss:$8 sps:$4 sm:$0xff]   ;;  %v3458_v37 = vld [vmem:[%s4383_s4 + $0x180] ss:$8 sps:$4 sm:$0xff]  }
  0x28   : > { %789 = vmatmul.mubr.bf16.vlgmr.msra.gmra.mrb[0].mxu0 %v3802_v63  ;;  %995 = vmatmul.mubr.bf16.vlgmr.msra.gmra.mrb[0].mxu1 %v3804_v0  ;;  %v511_v27 = vld [vmem:[%s3763_s16 + $0x1c] sm:$0x1]  ;;  %v3460_v31 = vld [vmem:[%s4383_s4 + $0x184] ss:$8 sps:$4 sm:$0xff]   ;;  %v3461_v41 = vld [vmem:[%s4383_s4 + $0x190] ss:$8 sps:$4 sm:$0xff]  }
  0x29   : > { %902 = vmatpush1.bf16.msra.mxu0 %v3406_v4  ;;  %1016 = vmatpush1.bf16.msra.mxu1 %v3406_v4  ;;  %v3442_v4 = vld [vmem:[%s4383_s4 + $0x130] ss:$8 sps:$4 sm:$0xff]   ;;  %v3463_v40 = vld [vmem:[%s4383_s4 + $0x194] ss:$8 sps:$4 sm:$0xff]   ;;  %v3464_v45 = vld [vmem:[%s4383_s4 + $0x1a0] ss:$8 sps:$4 sm:$0xff]  }
  0x2a   : > { %903 = vmatprep.subr.bf16.mxu0 %v3412_v5  ;;  %1017 = vmatprep.subr.bf16.mxu1 %v3412_v5  ;;  %v3447_v5 = vld [vmem:[%s4383_s4 + $0x144] ss:$8 sps:$4 sm:$0xff]   ;;  %v3482_v1 = vld [vmem:[%s4383_s4 + $0x200] ss:$8 sps:$4 sm:$0xff]   ;;  %v3489_v3 = vld [vmem:[%s4383_s4 + $0x214] ss:$8 sps:$4 sm:$0xff]  }
  0x2b   : > { %798 = vmatprep.mubr.bf16.mxu0 %v3630_v2  ;;  %1004 = vmatprep.mubr.bf16.mxu1 %v3630_v2  ;;  %v3492_v12 = vld [vmem:[%s4383_s4 + $0x224] ss:$8 sps:$4 sm:$0xff]  }
  0x2d   : > { %904 = vmatpush1.bf16.msra.mxu0 %v3410_v9  ;;  %1018 = vmatpush1.bf16.msra.mxu1 %v3410_v9  ;;  %v505_v9 = vld [vmem:[%s3763_s16 + $0x4] sm:$0x1] }
  0x2e   : > { %905 = vmatprep.subr.bf16.mxu0 %v3415_v13  ;;  %1019 = vmatprep.subr.bf16.mxu1 %v3415_v13  ;;  %v582_v13 = vor.u32 %v581_v6, %v578_v51  ;;  %v585_v21 = vshll.u32 %v505_v9, 16  ;;  %v4048_v51 = vld [vmem:[%s4035_s11] sm:$0xf]  ;;  %v3501_v9 = vld [vmem:[%s4383_s4 + $0x254] ss:$8 sps:$4 sm:$0xff]  }
  0x2f   : > { %v3490_v6 = vld [vmem:[%s4383_s4 + $0x220] ss:$8 sps:$4 sm:$0xff]  }
  0x30   : > { %799 = vmatmul.mubr.bf16.gmra.mrb[4].mxu0 %v3830_v17  ;;  %1005 = vmatmul.mubr.bf16.gmra.mrb[4].mxu1 %v3833_v18  ;;  %v583_v24 = vrot.slane %v582_v13, 4  ;;  %v587_v26 = vrot.slane %v585_v21, 5  ;;  %v3499_v13 = vld [vmem:[%s4383_s4 + $0x250] ss:$8 sps:$4 sm:$0xff]   ;;  %v3502_v21 = vld [vmem:[%s4383_s4 + $0x260] ss:$8 sps:$4 sm:$0xff]  }
  0x31   : > { %906 = vmatpush1.bf16.msra.mxu0 %v3413_v22  ;;  %1020 = vmatpush1.bf16.msra.mxu1 %v3413_v22  ;;  %v621_v22 = vshll.u32 %v3818_v11, 16 }
  0x32   : > { %907 = vmatprep.subr.bf16.mxu0 %v3418_v23  ;;  %1021 = vmatprep.subr.bf16.mxu1 %v3418_v23  ;;  %v3451_v23 = vld [vmem:[%s4383_s4 + $0x160] ss:$8 sps:$4 sm:$0xff]   ;;  %v588_v32 = vsel %vm3770_vm2, %v583_v24, %v587_v26  ;;  %v3507_v24 = vld [vmem:[%s4383_s4 + $0x274] ss:$8 sps:$4 sm:$0xff]   ;;  %v3505_v26 = vld [vmem:[%s4383_s4 + $0x270] ss:$8 sps:$4 sm:$0xff]  }
  0x33   : > { %933 = vmatprep.mubr.bf16.mxu0 %v3630_v2  ;;  %1047 = vmatprep.mubr.bf16.mxu1 %v3630_v2  ;;  %v623_v29 = vrot.slane %v621_v22, 5 }
  0x35   : > { %908 = vmatpush1.bf16.msra.mxu0 %v3416_v28  ;;  %1022 = vmatpush1.bf16.msra.mxu1 %v3416_v28  ;;  %v620_v28 = vrot.slane %v618_v15, 4 }
  0x36   : > { %909 = vmatprep.subr.bf16.mxu0 %v3421_v30  ;;  %1023 = vmatprep.subr.bf16.mxu1 %v3421_v30  ;;  %v3455_v30 = vld [vmem:[%s4383_s4 + $0x170] ss:$8 sps:$4 sm:$0xff]  }
  0x37   : > { %v624_v33 = vor.u32 %v623_v29, %v620_v28  ;;  %v3510_v29 = vld [vmem:[%s4383_s4 + $0x284] ss:$8 sps:$4 sm:$0xff]  }
  0x39   : > { %910 = vmatpush1.bf16.msra.mxu0 %v3419_v34  ;;  %1024 = vmatpush1.bf16.msra.mxu1 %v3419_v34  ;;  %v627_v34 = vshll.u32 %v511_v27, 16  ;;  %v625_v38 = vrot.slane %v624_v33, 4  ;;  %v3513_v33 = vld [vmem:[%s4383_s4 + $0x294] ss:$8 sps:$4 sm:$0xff]  }
  0x3a   : > { %911 = vmatprep.subr.bf16.mxu0 %v3424_v36  ;;  %1025 = vmatprep.subr.bf16.mxu1 %v3424_v36  ;;  %v3008_v36 = vcombine.low %v588_v32, %v3867_v46 }
  0x3b   : > { %v629_v39 = vrot.slane %v627_v34, 5  ;;  %v3511_v34 = vld [vmem:[%s4383_s4 + $0x290] ss:$8 sps:$4 sm:$0xff]  }
  0x3d   : > { %912 = vmatpush1.bf16.msra.mxu0 %v3422_v42  ;;  %1026 = vmatpush1.bf16.msra.mxu1 %v3422_v42  ;;  %v3969_v42 = vsel %vm3770_vm2, %v625_v38, %v629_v39  ;;  %v3514_v38 = vld [vmem:[%s4383_s4 + $0x2a0] ss:$8 sps:$4 sm:$0xff]   ;;  %v3519_v39 = vld [vmem:[%s4383_s4 + $0x2b4] ss:$8 sps:$4 sm:$0xff]  }
  0x3e   : > { %913 = vmatprep.subr.bf16.mxu0 %v3427_v43  ;;  %1027 = vmatprep.subr.bf16.mxu1 %v3427_v43  ;;  %v3466_v43 = vld [vmem:[%s4383_s4 + $0x1a4] ss:$8 sps:$4 sm:$0xff]  }
  0x41   : > { %914 = vmatpush1.bf16.msra.mxu0 %v3425_v48  ;;  %1028 = vmatpush1.bf16.msra.mxu1 %v3425_v48  ;;  %v3469_v48 = vld [vmem:[%s4383_s4 + $0x1b4] ss:$8 sps:$4 sm:$0xff]  }
  0x42   : > { %915 = vmatprep.subr.bf16.mxu0 %v3431_v50  ;;  %1029 = vmatprep.subr.bf16.mxu1 %v3431_v50  ;;  %v3467_v50 = vld [vmem:[%s4383_s4 + $0x1b0] ss:$8 sps:$4 sm:$0xff]  }
  0x45   : > { %916 = vmatpush1.bf16.msra.mxu0 %v3429_v52  ;;  %1030 = vmatpush1.bf16.msra.mxu1 %v3429_v52  ;;  %v3472_v52 = vld [vmem:[%s4383_s4 + $0x1c4] ss:$8 sps:$4 sm:$0xff]  }
  0x46   : > { %1165 = vmatprep.subr.bf16.mxu0 %v3434_v53  ;;  %1234 = vmatprep.subr.bf16.mxu1 %v3434_v53  ;;  %v3470_v53 = vld [vmem:[%s4383_s4 + $0x1c0] ss:$8 sps:$4 sm:$0xff]  }
  0x48   : > { %934 = vmatmul.mubr.bf16.vlgmr.msra.gmra.mrb[0].mxu0 %v2956_v55  ;;  %1048 = vmatmul.mubr.bf16.vlgmr.msra.gmra.mrb[0].mxu1 %v3802_v63  ;;  %v3444_v63 = vld [vmem:[%s4383_s4 + $0x134] ss:$8 sps:$4 sm:$0xff]  }
  0x49   : > { %1166 = vmatpush1.bf16.msra.mxu0 %v3432_v57  ;;  %1235 = vmatpush1.bf16.msra.mxu1 %v3432_v57  ;;  %v3475_v55 = vld [vmem:[%s4383_s4 + $0x1d4] ss:$8 sps:$4 sm:$0xff]   ;;  %v3473_v57 = vld [vmem:[%s4383_s4 + $0x1d0] ss:$8 sps:$4 sm:$0xff]  }
  0x4a   : > { %1167 = vmatprep.subr.bf16.mxu0 %v3438_v58  ;;  %1236 = vmatprep.subr.bf16.mxu1 %v3438_v58  ;;  %v3478_v58 = vld [vmem:[%s4383_s4 + $0x1e4] ss:$8 sps:$4 sm:$0xff]  }
  0x4b   : > { %943 = vmatprep.mubr.bf16.mxu0 %v3630_v2  ;;  %1057 = vmatprep.mubr.bf16.mxu1 %v3630_v2 }
  0x4d   : > { %1168 = vmatpush1.bf16.msra.mxu0 %v3436_v10  ;;  %1237 = vmatpush1.bf16.msra.mxu1 %v3436_v10  ;;  %v3476_v10 = vld [vmem:[%s4383_s4 + $0x1e0] ss:$8 sps:$4 sm:$0xff]  }
  0x4e   : > { %1169 = vmatprep.subr.bf16.mxu0 %v3441_v59  ;;  %1238 = vmatprep.subr.bf16.mxu1 %v3441_v59  ;;  %v3481_v59 = vld [vmem:[%s4383_s4 + $0x1f4] ss:$8 sps:$4 sm:$0xff]  }
  0x50   : > { %944 = vmatmul.mubr.bf16.gmra.mrb[4].mxu0 %v3906_v60  ;;  %1058 = vmatmul.mubr.bf16.gmra.mrb[4].mxu1 %v3830_v17 }
  0x51   : > { %1170 = vmatpush1.bf16.msra.mxu0 %v3439_v62  ;;  %1239 = vmatpush1.bf16.msra.mxu1 %v3439_v62  ;;  %v3479_v62 = vld [vmem:[%s4383_s4 + $0x1f0] ss:$8 sps:$4 sm:$0xff]  }
  0x52   : > { %1171 = vmatprep.subr.bf16.mxu0 %v3444_v63  ;;  %1240 = vmatprep.subr.bf16.mxu1 %v3444_v63  ;;  %v3484_v63 = vld [vmem:[%s4383_s4 + $0x204] ss:$8 sps:$4 sm:$0xff]  }
  0x53   : > { %1197 = vmatprep.mubr.bf16.mxu0 %v3630_v2  ;;  %1266 = vmatprep.mubr.bf16.mxu1 %v3630_v2 }
  0x55   : > { %1172 = vmatpush1.bf16.msra.mxu0 %v3442_v4  ;;  %1241 = vmatpush1.bf16.msra.mxu1 %v3442_v4  ;;  %v3487_v4 = vld [vmem:[%s4383_s4 + $0x210] ss:$8 sps:$4 sm:$0xff]  }
  0x56   : > { %1173 = vmatprep.subr.bf16.mxu0 %v3447_v5  ;;  %1242 = vmatprep.subr.bf16.mxu1 %v3447_v5  ;;  %v4045_v5 = vld [vmem:[%s4030_s14] sm:$0xf] }
  0x57   : > { %v3027_v19 = vcombine.low %v3787_v54, %v4045_v5  ;;  %v3493_v54 = vld [vmem:[%s4383_s4 + $0x230] ss:$8 sps:$4 sm:$0xff]   ;;  %v1296_v15 = vshrl.u32 %v4045_v5, 16 }
  0x59   : > { %1174 = vmatpush1.bf16.msra.mxu0 %v3445_v7  ;;  %1243 = vmatpush1.bf16.msra.mxu1 %v3445_v7  ;;  %v3495_v7 = vld [vmem:[%s4383_s4 + $0x234] ss:$8 sps:$4 sm:$0xff]   ;;  %v1298_v22 = vrot.slane %v1296_v15, 4 }
  0x5a   : > { %1175 = vmatprep.subr.bf16.mxu0 %v3450_v8  ;;  %1244 = vmatprep.subr.bf16.mxu1 %v3450_v8  ;;  %v3496_v8 = vld [vmem:[%s4383_s4 + $0x240] ss:$8 sps:$4 sm:$0xff]   ;;  %v3555_v15 = vld [vmem:[%s4383_s4 + $0x374] ss:$8 sps:$4 sm:$0xff]  }
  0x5d   : > { %1176 = vmatpush1.bf16.msra.mxu0 %v3448_v16  ;;  %1245 = vmatpush1.bf16.msra.mxu1 %v3448_v16  ;;  %v1299_v16 = vshll.u32 %v4045_v5, 16 }
  0x5e   : > { %1177 = vmatprep.subr.bf16.mxu0 %v3453_v20  ;;  %1246 = vmatprep.subr.bf16.mxu1 %v3453_v20  ;;  %v3504_v20 = vld [vmem:[%s4383_s4 + $0x264] ss:$8 sps:$4 sm:$0xff]  }
  0x61   : > { %1178 = vmatpush1.bf16.msra.mxu0 %v3451_v23  ;;  %1247 = vmatpush1.bf16.msra.mxu1 %v3451_v23  ;;  %v1301_v23 = vrot.slane %v1299_v16, 5  ;;  %v3553_v16 = vld [vmem:[%s4383_s4 + $0x370] ss:$8 sps:$4 sm:$0xff]  }
  0x62   : > { %1179 = vmatprep.subr.bf16.mxu0 %v3457_v25  ;;  %1248 = vmatprep.subr.bf16.mxu1 %v3457_v25  ;;  %v501_v25 = vld [vmem:[%s4030_s14 + $0x4] sm:$0x1] }
  0x63   : > { %v1302_v27 = vor.u32 %v1301_v23, %v1298_v22  ;;  %v1305_v28 = vshll.u32 %v501_v25, 16  ;;  %v3561_v22 = vld [vmem:[%s4383_s4 + $0x394] ss:$8 sps:$4 sm:$0xff]   ;;  %v3559_v23 = vld [vmem:[%s4383_s4 + $0x390] ss:$8 sps:$4 sm:$0xff]  }
  0x64   : > { %v4246_v25 = vld [vmem:[%s4035_s11 + $0x8] sm:$0xf] }
  0x65   : > { %1180 = vmatpush1.bf16.msra.mxu0 %v3455_v30  ;;  %1249 = vmatpush1.bf16.msra.mxu1 %v3455_v30  ;;  %v3508_v30 = vld [vmem:[%s4383_s4 + $0x280] ss:$8 sps:$4 sm:$0xff]   ;;  %v1307_v32 = vrot.slane %v1305_v28, 5 }
  0x66   : > { %1426 = vmatprep.subr.bf16.mxu0 %v3460_v31  ;;  %1493 = vmatprep.subr.bf16.mxu1 %v3460_v31  ;;  %v1303_v31 = vrot.slane %v1302_v27, 4  ;;  %v4256_v27 = vcombine.low %v4048_v51, %v4246_v25  ;;  %v3562_v28 = vld [vmem:[%s4383_s4 + $0x3a0] ss:$8 sps:$4 sm:$0xff]  }
  0x68   : > { %1198 = vmatmul.mubr.bf16.vlgmr.msra.gmra.mrb[0].mxu0 %v3804_v0  ;;  %1267 = vmatmul.mubr.bf16.vlgmr.msra.gmra.mrb[0].mxu1 %v3008_v36  ;;  %v3978_v0 = vcombine.low %v3871_v47, %v3969_v42  ;;  %v4116_v36 = vsel %vm3770_vm2, %v1303_v31, %v1307_v32  ;;  %v3538_v47 = vld [vmem:[%s4383_s4 + $0x320] ss:$8 sps:$4 sm:$0xff]   ;;  %v3573_v31 = vld [vmem:[%s4383_s4 + $0x3d4] ss:$8 sps:$4 sm:$0xff]   ;;  %v3571_v32 = vld [vmem:[%s4383_s4 + $0x3d0] ss:$8 sps:$4 sm:$0xff]  }
  0x69   : > { %1427 = vmatpush1.bf16.msra.mxu0 %v3458_v37  ;;  %1494 = vmatpush1.bf16.msra.mxu1 %v3458_v37  ;;  %v3516_v37 = vld [vmem:[%s4383_s4 + $0x2a4] ss:$8 sps:$4 sm:$0xff]  }
  0x6a   : > { %1428 = vmatprep.subr.bf16.mxu0 %v3463_v40  ;;  %1495 = vmatprep.subr.bf16.mxu1 %v3463_v40  ;;  %v3522_v40 = vld [vmem:[%s4383_s4 + $0x2c4] ss:$8 sps:$4 sm:$0xff]  }
  0x6b   : > { %1207 = vmatprep.mubr.bf16.mxu0 %v3630_v2  ;;  %1276 = vmatprep.mubr.bf16.mxu1 %v3630_v2 }
  0x6d   : > { %1429 = vmatpush1.bf16.msra.mxu0 %v3461_v41  ;;  %1496 = vmatpush1.bf16.msra.mxu1 %v3461_v41  ;;  %v3520_v41 = vld [vmem:[%s4383_s4 + $0x2c0] ss:$8 sps:$4 sm:$0xff]  }
  0x6e   : > { %1430 = vmatprep.subr.bf16.mxu0 %v3466_v43  ;;  %1497 = vmatprep.subr.bf16.mxu1 %v3466_v43  ;;  %v3525_v43 = vld [vmem:[%s4383_s4 + $0x2d4] ss:$8 sps:$4 sm:$0xff]  }
  0x70   : > { %1208 = vmatmul.mubr.bf16.gmra.mrb[4].mxu0 %v3833_v18  ;;  %1277 = vmatmul.mubr.bf16.gmra.mrb[4].mxu1 %v3978_v0 }
  0x71   : > { %1431 = vmatpush1.bf16.msra.mxu0 %v3464_v45  ;;  %1498 = vmatpush1.bf16.msra.mxu1 %v3464_v45  ;;  %v1310_v45 = vshrl.u32 %v4048_v51, 16 }
  0x72   : > { %1432 = vmatprep.subr.bf16.mxu0 %v3469_v48  ;;  %1499 = vmatprep.subr.bf16.mxu1 %v3469_v48  ;;  %v1313_v48 = vshll.u32 %v4048_v51, 16 }
  0x73   : > { %1458 = vmatprep.mubr.bf16.mxu0 %v3630_v2  ;;  %1525 = vmatprep.mubr.bf16.mxu1 %v3630_v2 }
  0x75   : > { %1433 = vmatpush1.bf16.msra.mxu0 %v3467_v50  ;;  %1500 = vmatpush1.bf16.msra.mxu1 %v3467_v50  ;;  %v3523_v50 = vld [vmem:[%s4383_s4 + $0x2d0] ss:$8 sps:$4 sm:$0xff]  }
  0x76   : > { %1434 = vmatprep.subr.bf16.mxu0 %v3472_v52  ;;  %1501 = vmatprep.subr.bf16.mxu1 %v3472_v52  ;;  %v3528_v52 = vld [vmem:[%s4383_s4 + $0x2e4] ss:$8 sps:$4 sm:$0xff]  }
  0x79   : > { %1435 = vmatpush1.bf16.msra.mxu0 %v3470_v53  ;;  %1502 = vmatpush1.bf16.msra.mxu1 %v3470_v53  ;;  %v3526_v53 = vld [vmem:[%s4383_s4 + $0x2e0] ss:$8 sps:$4 sm:$0xff]  }
  0x7a   : > { %1436 = vmatprep.subr.bf16.mxu0 %v3475_v55  ;;  %1503 = vmatprep.subr.bf16.mxu1 %v3475_v55  ;;  %v1312_v55 = vrot.slane %v1310_v45, 4 }
  0x7d   : > { %1437 = vmatpush1.bf16.msra.mxu0 %v3473_v57  ;;  %1504 = vmatpush1.bf16.msra.mxu1 %v3473_v57  ;;  %v1315_v57 = vrot.slane %v1313_v48, 5  ;;  %v3584_v48 = vld [vmem:[%s4383_s4 + $0x404] ss:$8 sps:$4 sm:$0xff]  }
  0x7e   : > { %1438 = vmatprep.subr.bf16.mxu0 %v3478_v58  ;;  %1505 = vmatprep.subr.bf16.mxu1 %v3478_v58  ;;  %v3531_v58 = vld [vmem:[%s4383_s4 + $0x2f4] ss:$8 sps:$4 sm:$0xff]  }
  0x81   : > { %1439 = vmatpush1.bf16.msra.mxu0 %v3476_v10  ;;  %1506 = vmatpush1.bf16.msra.mxu1 %v3476_v10  ;;  %v513_v10 = vld [vmem:[%s4035_s11 + $0x4] sm:$0x1] }
  0x82   : > { %1440 = vmatprep.subr.bf16.mxu0 %v3481_v59  ;;  %1507 = vmatprep.subr.bf16.mxu1 %v3481_v59  ;;  %v3529_v59 = vld [vmem:[%s4383_s4 + $0x2f0] ss:$8 sps:$4 sm:$0xff]  }
  0x85   : > { %1441 = vmatpush1.bf16.msra.mxu0 %v3479_v62  ;;  %1508 = vmatpush1.bf16.msra.mxu1 %v3479_v62  ;;  %v1316_v62 = vor.u32 %v1315_v57, %v1312_v55  ;;  %v3587_v55 = vld [vmem:[%s4383_s4 + $0x414] ss:$8 sps:$4 sm:$0xff]   ;;  %v3585_v57 = vld [vmem:[%s4383_s4 + $0x410] ss:$8 sps:$4 sm:$0xff]  }
  0x86   : > { %1651 = vmatprep.subr.bf16.mxu0 %v3484_v63  ;;  %1717 = vmatprep.subr.bf16.mxu1 %v3484_v63  ;;  %v1319_v63 = vshll.u32 %v513_v10, 16  ;;  %v3590_v10 = vld [vmem:[%s4383_s4 + $0x424] ss:$8 sps:$4 sm:$0xff]  }
  0x88   : > { %1459 = vmatmul.mubr.bf16.vlgmr.msra.gmra.mrb[0].mxu0 %v3026_v35  ;;  %1526 = vmatmul.mubr.bf16.vlgmr.msra.gmra.mrb[0].mxu1 %v3790_v56  ;;  %v4059_v35 = vcombine.low %v3818_v11, %v4048_v51  ;;  %v3498_v11 = vld [vmem:[%s4383_s4 + $0x244] ss:$8 sps:$4 sm:$0xff]  }
  0x89   : > { %1652 = vmatpush1.bf16.msra.mxu0 %v3482_v1  ;;  %1718 = vmatpush1.bf16.msra.mxu1 %v3482_v1  ;;  %v3534_v1 = vld [vmem:[%s4383_s4 + $0x304] ss:$8 sps:$4 sm:$0xff]  }
  0x8a   : > { %1653 = vmatprep.subr.bf16.mxu0 %v3489_v3  ;;  %1719 = vmatprep.subr.bf16.mxu1 %v3489_v3  ;;  %v3532_v3 = vld [vmem:[%s4383_s4 + $0x300] ss:$8 sps:$4 sm:$0xff]   ;;  %v3570_v51 = vld [vmem:[%s4383_s4 + $0x3c4] ss:$8 sps:$4 sm:$0xff]  }
  0x8b   : > { %1468 = vmatprep.mubr.bf16.mxu0 %v3630_v2  ;;  %1535 = vmatprep.mubr.bf16.mxu1 %v3630_v2 }
  0x8d   : > { %1654 = vmatpush1.bf16.msra.mxu0 %v3487_v4  ;;  %1720 = vmatpush1.bf16.msra.mxu1 %v3487_v4  ;;  %v1317_v4 = vrot.slane %v1316_v62, 4  ;;  %v3593_v62 = vld [vmem:[%s4383_s4 + $0x434] ss:$8 sps:$4 sm:$0xff]  }
  0x8e   : > { %1655 = vmatprep.subr.bf16.mxu0 %v3492_v12  ;;  %1721 = vmatprep.subr.bf16.mxu1 %v3492_v12  ;;  %v1321_v12 = vrot.slane %v1319_v63, 5  ;;  %v3596_v63 = vld [vmem:[%s4383_s4 + $0x444] ss:$8 sps:$4 sm:$0xff]  }
  0x90   : > { %1469 = vmatmul.mubr.bf16.gmra.mrb[4].mxu0 %v3027_v19  ;;  %1536 = vmatmul.mubr.bf16.gmra.mrb[4].mxu1 %v4059_v35  ;;  %v3537_v19 = vld [vmem:[%s4383_s4 + $0x314] ss:$8 sps:$4 sm:$0xff]  }
  0x91   : > { %1656 = vmatpush1.bf16.msra.mxu0 %v3490_v6  ;;  %1722 = vmatpush1.bf16.msra.mxu1 %v3490_v6  ;;  %v4185_v6 = vsel %vm3770_vm2, %v1317_v4, %v1321_v12  ;;  %v2017_v4 = vshrl.u32 %v4246_v25, 16  ;;  %v2020_v12 = vshll.u32 %v4246_v25, 16 }
  0x92   : > { %1657 = vmatprep.subr.bf16.mxu0 %v3495_v7  ;;  %1723 = vmatprep.subr.bf16.mxu1 %v3495_v7  ;;  %v3113_v46 = vcombine.low %v3969_v42, %v4185_v6  ;;  %v3541_v42 = vld [vmem:[%s4383_s4 + $0x330] ss:$8 sps:$4 sm:$0xff]   ;;  %v3546_v7 = vld [vmem:[%s4383_s4 + $0x344] ss:$8 sps:$4 sm:$0xff]  }
  0x93   : > { %1683 = vmatprep.mubr.bf16.mxu0 %v3630_v2  ;;  %1749 = vmatprep.mubr.bf16.mxu1 %v3630_v2 }
  0x95   : > { %1658 = vmatpush1.bf16.msra.mxu0 %v3493_v54  ;;  %1724 = vmatpush1.bf16.msra.mxu1 %v3493_v54  ;;  %v3544_v54 = vld [vmem:[%s4383_s4 + $0x340] ss:$8 sps:$4 sm:$0xff]  }
  0x96   : > { %1659 = vmatprep.subr.bf16.mxu0 %v3498_v11  ;;  %1725 = vmatprep.subr.bf16.mxu1 %v3498_v11  ;;  %v3549_v11 = vld [vmem:[%s4383_s4 + $0x354] ss:$8 sps:$4 sm:$0xff]  }
  0x99   : > { %1660 = vmatpush1.bf16.msra.mxu0 %v3496_v8  ;;  %1726 = vmatpush1.bf16.msra.mxu1 %v3496_v8  ;;  %v3547_v8 = vld [vmem:[%s4383_s4 + $0x350] ss:$8 sps:$4 sm:$0xff]  }
  0x9a   : > { %1661 = vmatprep.subr.bf16.mxu0 %v3501_v9  ;;  %1727 = vmatprep.subr.bf16.mxu1 %v3501_v9  ;;  %v3552_v9 = vld [vmem:[%s4383_s4 + $0x364] ss:$8 sps:$4 sm:$0xff]  }
  0x9d   : > { %1662 = vmatpush1.bf16.msra.mxu0 %v3499_v13  ;;  %1728 = vmatpush1.bf16.msra.mxu1 %v3499_v13  ;;  %v3550_v13 = vld [vmem:[%s4383_s4 + $0x360] ss:$8 sps:$4 sm:$0xff]  }
  0x9e   : > { %1663 = vmatprep.subr.bf16.mxu0 %v3504_v20  ;;  %1729 = vmatprep.subr.bf16.mxu1 %v3504_v20  ;;  %v3558_v20 = vld [vmem:[%s4383_s4 + $0x384] ss:$8 sps:$4 sm:$0xff]  }
  0xa1   : > { %1664 = vmatpush1.bf16.msra.mxu0 %v3502_v21  ;;  %1730 = vmatpush1.bf16.msra.mxu1 %v3502_v21  ;;  %v3556_v21 = vld [vmem:[%s4383_s4 + $0x380] ss:$8 sps:$4 sm:$0xff]  }
  0xa2   : > { %1665 = vmatprep.subr.bf16.mxu0 %v3507_v24  ;;  %1731 = vmatprep.subr.bf16.mxu1 %v3507_v24  ;;  %v502_v24 = vld [vmem:[%s4030_s14 + $0x8] sm:$0xf] }
  0xa5   : > { %1666 = vmatpush1.bf16.msra.mxu0 %v3505_v26  ;;  %1732 = vmatpush1.bf16.msra.mxu1 %v3505_v26  ;;  %v3564_v26 = vld [vmem:[%s4383_s4 + $0x3a4] ss:$8 sps:$4 sm:$0xff]  }
  0xa6   : > { %1875 = vmatprep.subr.bf16.mxu0 %v3510_v29  ;;  %1941 = vmatprep.subr.bf16.mxu1 %v3510_v29  ;;  %v3567_v29 = vld [vmem:[%s4383_s4 + $0x3b4] ss:$8 sps:$4 sm:$0xff]  }
  0xa8   : > { %1684 = vmatmul.mubr.bf16.vlgmr.msra.gmra.mrb[0].mxu0 %v3790_v56  ;;  %1750 = vmatmul.mubr.bf16.vlgmr.msra.gmra.mrb[0].mxu1 %v3799_v61  ;;  %v4125_v56 = vcombine.low %v3825_v14, %v4116_v36  ;;  %v3517_v14 = vld [vmem:[%s4383_s4 + $0x2b0] ss:$8 sps:$4 sm:$0xff]  }
  0xa9   : > { %1876 = vmatpush1.bf16.msra.mxu0 %v3508_v30  ;;  %1942 = vmatpush1.bf16.msra.mxu1 %v3508_v30  ;;  %v3568_v30 = vld [vmem:[%s4383_s4 + $0x3c0] ss:$8 sps:$4 sm:$0xff]  }
  0xaa   : > { %1877 = vmatprep.subr.bf16.mxu0 %v3513_v33  ;;  %1943 = vmatprep.subr.bf16.mxu1 %v3513_v33  ;;  %v2003_v33 = vshrl.u32 %v502_v24, 16 }
  0xab   : > { %1693 = vmatprep.mubr.bf16.mxu0 %v3630_v2  ;;  %1759 = vmatprep.mubr.bf16.mxu1 %v3630_v2 }
  0xad   : > { %1878 = vmatpush1.bf16.msra.mxu0 %v3511_v34  ;;  %1944 = vmatpush1.bf16.msra.mxu1 %v3511_v34  ;;  %v2006_v34 = vshll.u32 %v502_v24, 16 }
  0xae   : > { %1879 = vmatprep.subr.bf16.mxu0 %v3516_v37  ;;  %1945 = vmatprep.subr.bf16.mxu1 %v3516_v37  ;;  %v3576_v37 = vld [vmem:[%s4383_s4 + $0x3e4] ss:$8 sps:$4 sm:$0xff]  }
  0xb0   : > { %1694 = vmatmul.mubr.bf16.gmra.mrb[4].mxu0 %v4059_v35  ;;  %1760 = vmatmul.mubr.bf16.gmra.mrb[4].mxu1 %v4125_v56  ;;  %v3535_v35 = vld [vmem:[%s4383_s4 + $0x310] ss:$8 sps:$4 sm:$0xff]  }
  0xb1   : > { %1880 = vmatpush1.bf16.msra.mxu0 %v3514_v38  ;;  %1946 = vmatpush1.bf16.msra.mxu1 %v3514_v38  ;;  %v2005_v38 = vrot.slane %v2003_v33, 4 }
  0xb2   : > { %1881 = vmatprep.subr.bf16.mxu0 %v3519_v39  ;;  %1947 = vmatprep.subr.bf16.mxu1 %v3519_v39  ;;  %v2008_v39 = vrot.slane %v2006_v34, 5 }
  0xb3   : > { %1907 = vmatprep.mubr.bf16.mxu0 %v3630_v2  ;;  %1973 = vmatprep.mubr.bf16.mxu1 %v3630_v2 }
  0xb5   : > { %1882 = vmatpush1.bf16.msra.mxu0 %v3517_v14  ;;  %1948 = vmatpush1.bf16.msra.mxu1 %v3517_v14  ;;  %v3581_v14 = vld [vmem:[%s4383_s4 + $0x3f4] ss:$8 sps:$4 sm:$0xff]  }
  0xb6   : > { %1883 = vmatprep.subr.bf16.mxu0 %v3522_v40  ;;  %1949 = vmatprep.subr.bf16.mxu1 %v3522_v40  ;;  %v503_v40 = vld [vmem:[%s4030_s14 + $0xc] sm:$0x1] }
  0xb7   : > { %v2012_v45 = vshll.u32 %v503_v40, 16 }
  0xb9   : > { %1884 = vmatpush1.bf16.msra.mxu0 %v3520_v41  ;;  %1950 = vmatpush1.bf16.msra.mxu1 %v3520_v41  ;;  %v3579_v41 = vld [vmem:[%s4383_s4 + $0x3f0] ss:$8 sps:$4 sm:$0xff]  }
  0xba   : > { %1885 = vmatprep.subr.bf16.mxu0 %v3525_v43  ;;  %1951 = vmatprep.subr.bf16.mxu1 %v3525_v43  ;;  %v2009_v43 = vor.u32 %v2008_v39, %v2005_v38 }
  0xbd   : > { %1886 = vmatpush1.bf16.msra.mxu0 %v3523_v50  ;;  %1952 = vmatpush1.bf16.msra.mxu1 %v3523_v50  ;;  %v3582_v50 = vld [vmem:[%s4383_s4 + $0x400] ss:$8 sps:$4 sm:$0xff]  }
  0xbe   : > { %1887 = vmatprep.subr.bf16.mxu0 %v3528_v52  ;;  %1953 = vmatprep.subr.bf16.mxu1 %v3528_v52  ;;  %v2010_v52 = vrot.slane %v2009_v43, 4 }
  0xc1   : > { %1888 = vmatpush1.bf16.msra.mxu0 %v3526_v53  ;;  %1954 = vmatpush1.bf16.msra.mxu1 %v3526_v53  ;;  %v2014_v53 = vrot.slane %v2012_v45, 5 }
  0xc2   : > { %1889 = vmatprep.subr.bf16.mxu0 %v3531_v58  ;;  %1955 = vmatprep.subr.bf16.mxu1 %v3531_v58 }
  0xc3   : > { %v2015_v58 = vsel %vm3770_vm2, %v2010_v52, %v2014_v53 }
  0xc5   : > { %1890 = vmatpush1.bf16.msra.mxu0 %v3529_v59  ;;  %1956 = vmatpush1.bf16.msra.mxu1 %v3529_v59  ;;  %v3588_v59 = vld [vmem:[%s4383_s4 + $0x420] ss:$8 sps:$4 sm:$0xff]  }
  0xc6   : > { %2131 = vmatprep.subr.bf16.mxu0 %v3534_v1  ;;  %2196 = vmatprep.subr.bf16.mxu1 %v3534_v1  ;;  %v3594_v1 = vld [vmem:[%s4383_s4 + $0x440] ss:$8 sps:$4 sm:$0xff]  }
  0xc8   : > { %1908 = vmatmul.mubr.bf16.vlgmr.msra.gmra.mrb[0].mxu0 %v3799_v61  ;;  %1974 = vmatmul.mubr.bf16.vlgmr.msra.gmra.mrb[0].mxu1 %v3112_v49  ;;  %v3540_v61 = vld [vmem:[%s4383_s4 + $0x324] ss:$8 sps:$4 sm:$0xff]   ;;  %v3543_v49 = vld [vmem:[%s4383_s4 + $0x334] ss:$8 sps:$4 sm:$0xff]  }
  0xc9   : > { %2132 = vmatpush1.bf16.msra.mxu0 %v3532_v3  ;;  %2197 = vmatpush1.bf16.msra.mxu1 %v3532_v3  ;;  %v3599_v3 = vld [vmem:[%s4383_s4 + $0x454] ss:$8 sps:$4 sm:$0xff]  }
  0xca   : > { %2133 = vmatprep.subr.bf16.mxu0 %v3537_v19  ;;  %2198 = vmatprep.subr.bf16.mxu1 %v3537_v19  ;;  %v3597_v19 = vld [vmem:[%s4383_s4 + $0x450] ss:$8 sps:$4 sm:$0xff]  }
  0xcb   : > { %1917 = vmatprep.mubr.bf16.mxu0 %v3630_v2  ;;  %1983 = vmatprep.mubr.bf16.mxu1 %v3630_v2 }
  0xcd   : > { %2134 = vmatpush1.bf16.msra.mxu0 %v3535_v35  ;;  %2199 = vmatpush1.bf16.msra.mxu1 %v3535_v35  ;;  %v3602_v35 = vld [vmem:[%s4383_s4 + $0x464] ss:$8 sps:$4 sm:$0xff]  }
  0xce   : > { %2135 = vmatprep.subr.bf16.mxu0 %v3540_v61  ;;  %2200 = vmatprep.subr.bf16.mxu1 %v3540_v61  ;;  %v2019_v61 = vrot.slane %v2017_v4, 4 }
  0xd0   : > { %1918 = vmatmul.mubr.bf16.gmra.mrb[4].mxu0 %v4125_v56  ;;  %1984 = vmatmul.mubr.bf16.gmra.mrb[4].mxu1 %v3113_v46  ;;  %v3574_v56 = vld [vmem:[%s4383_s4 + $0x3e0] ss:$8 sps:$4 sm:$0xff]   ;;  %v2022_v46 = vrot.slane %v2020_v12, 5 }
  0xd1   : > { %2136 = vmatpush1.bf16.msra.mxu0 %v3538_v47  ;;  %2201 = vmatpush1.bf16.msra.mxu1 %v3538_v47  ;;  %v3600_v47 = vld [vmem:[%s4383_s4 + $0x460] ss:$8 sps:$4 sm:$0xff]  }
  0xd2   : > { %2137 = vmatprep.subr.bf16.mxu0 %v3543_v49  ;;  %2202 = vmatprep.subr.bf16.mxu1 %v3543_v49  ;;  %v3605_v49 = vld [vmem:[%s4383_s4 + $0x474] ss:$8 sps:$4 sm:$0xff]  }
  0xd3   : > { %2163 = vmatprep.mubr.bf16.mxu0 %v3630_v2  ;;  %2228 = vmatprep.mubr.bf16.mxu1 %v3630_v2 }
  0xd5   : > { %2138 = vmatpush1.bf16.msra.mxu0 %v3541_v42  ;;  %2203 = vmatpush1.bf16.msra.mxu1 %v3541_v42  ;;  %v515_v42 = vld [vmem:[%s4035_s11 + $0xc] sm:$0x1] }
  0xd6   : > { %2139 = vmatprep.subr.bf16.mxu0 %v3546_v7  ;;  %2204 = vmatprep.subr.bf16.mxu1 %v3546_v7  ;;  %v3603_v7 = vld [vmem:[%s4383_s4 + $0x470] ss:$8 sps:$4 sm:$0xff]  }
  0xd9   : > { %2140 = vmatpush1.bf16.msra.mxu0 %v3544_v54  ;;  %2205 = vmatpush1.bf16.msra.mxu1 %v3544_v54  ;;  %v2023_v54 = vor.u32 %v2022_v46, %v2019_v61 }
  0xda   : > { %2141 = vmatprep.subr.bf16.mxu0 %v3549_v11  ;;  %2206 = vmatprep.subr.bf16.mxu1 %v3549_v11  ;;  %v2026_v11 = vshll.u32 %v515_v42, 16 }
  0xdd   : > { %2142 = vmatpush1.bf16.msra.mxu0 %v3547_v8  ;;  %2207 = vmatpush1.bf16.msra.mxu1 %v3547_v8  ;;  %v2024_v8 = vrot.slane %v2023_v54, 4 }
  0xde   : > { %2143 = vmatprep.subr.bf16.mxu0 %v3552_v9  ;;  %2208 = vmatprep.subr.bf16.mxu1 %v3552_v9  ;;  %v2028_v9 = vrot.slane %v2026_v11, 5 }
  0xe1   : > { %2144 = vmatpush1.bf16.msra.mxu0 %v3550_v13  ;;  %2209 = vmatpush1.bf16.msra.mxu1 %v3550_v13  ;;  %v2029_v13 = vsel %vm3770_vm2, %v2024_v8, %v2028_v9 }
  0xe2   : > { %2145 = vmatprep.subr.bf16.mxu0 %v3555_v15  ;;  %2210 = vmatprep.subr.bf16.mxu1 %v3555_v15  ;;  %v3213_v15 = vcombine.low %v4185_v6, %v2029_v13 }
  0xe5   : > { %2146 = vmatpush1.bf16.msra.mxu0 %v3553_v16  ;;  %2211 = vmatpush1.bf16.msra.mxu1 %v3553_v16  ;;  %v2713_v16 = vlaneseq }
  0xe6   : > { %2354 = vmatprep.subr.bf16.mxu0 %v3558_v20  ;;  %2418 = vmatprep.subr.bf16.mxu1 %v3558_v20 }
  0xe7   : > { %v2714_v20 = vshrl.u32 %v2713_v16, 7 }
  0xe8   : > { %2164 = vmatmul.mubr.bf16.vlgmr.msra.gmra.mrb[0].mxu0 %v3906_v60  ;;  %2229 = vmatmul.mubr.bf16.vlgmr.msra.gmra.mrb[0].mxu1 %v3830_v17  ;;  %v3130_v60 = vcombine.low %v4045_v5, %v502_v24  ;;  %v3565_v5 = vld [vmem:[%s4383_s4 + $0x3b0] ss:$8 sps:$4 sm:$0xff]  }
  0xe9   : > { %2355 = vmatpush1.bf16.msra.mxu0 %v3556_v21  ;;  %2419 = vmatpush1.bf16.msra.mxu1 %v3556_v21  ;;  %v2715_v21 = vsub.s32 0, %v2714_v20 }
  0xea   : > { %2356 = vmatprep.subr.bf16.mxu0 %v3561_v22  ;;  %2420 = vmatprep.subr.bf16.mxu1 %v3561_v22 }
  0xeb   : > { %2173 = vmatprep.mubr.bf16.mxu0 %v3630_v2  ;;  %2238 = vmatprep.mubr.bf16.mxu1 %v3630_v2 }
  0xed   : > { %2357 = vmatpush1.bf16.msra.mxu0 %v3559_v23  ;;  %2421 = vmatpush1.bf16.msra.mxu1 %v3559_v23 }
  0xee   : > { %2358 = vmatprep.subr.bf16.mxu0 %v3564_v26  ;;  %2422 = vmatprep.subr.bf16.mxu1 %v3564_v26 }
  0xf0   : > { %2174 = vmatmul.mubr.bf16.gmra.mrb[4].mxu0 %v3130_v60  ;;  %2239 = vmatmul.mubr.bf16.gmra.mrb[4].mxu1 %v4256_v27 }
  0xf1   : > { %2359 = vmatpush1.bf16.msra.mxu0 %v3562_v28  ;;  %2423 = vmatpush1.bf16.msra.mxu1 %v3562_v28 }
  0xf2   : > { %2360 = vmatprep.subr.bf16.mxu0 %v3567_v29  ;;  %2424 = vmatprep.subr.bf16.mxu1 %v3567_v29 }
  0xf3   : > { %2386 = vmatprep.mubr.bf16.mxu0 %v3630_v2  ;;  %2450 = vmatprep.mubr.bf16.mxu1 %v3630_v2 }
  0xf5   : > { %2361 = vmatpush1.bf16.msra.mxu0 %v3565_v5  ;;  %2425 = vmatpush1.bf16.msra.mxu1 %v3565_v5 }
  0xf6   : > { %2362 = vmatprep.subr.bf16.mxu0 %v3570_v51  ;;  %2426 = vmatprep.subr.bf16.mxu1 %v3570_v51 }
  0xf9   : > { %2363 = vmatpush1.bf16.msra.mxu0 %v3568_v30  ;;  %2427 = vmatpush1.bf16.msra.mxu1 %v3568_v30 }
  0xfa   : > { %2364 = vmatprep.subr.bf16.mxu0 %v3573_v31  ;;  %2428 = vmatprep.subr.bf16.mxu1 %v3573_v31 }
  0xfd   : > { %2365 = vmatpush1.bf16.msra.mxu0 %v3571_v32  ;;  %2429 = vmatpush1.bf16.msra.mxu1 %v3571_v32 }
  0xfe   : > { %2366 = vmatprep.subr.bf16.mxu0 %v3576_v37  ;;  %2430 = vmatprep.subr.bf16.mxu1 %v3576_v37 }
 0x101   : > { %2367 = vmatpush1.bf16.msra.mxu0 %v3574_v56  ;;  %2431 = vmatpush1.bf16.msra.mxu1 %v3574_v56 }
 0x102   : > { %2368 = vmatprep.subr.bf16.mxu0 %v3581_v14  ;;  %2432 = vmatprep.subr.bf16.mxu1 %v3581_v14 }
 0x105   : > { %2369 = vmatpush1.bf16.msra.mxu0 %v3579_v41  ;;  %2433 = vmatpush1.bf16.msra.mxu1 %v3579_v41 }
 0x106   : > { %2576 = vmatprep.subr.bf16.mxu0 %v3584_v48  ;;  %2640 = vmatprep.subr.bf16.mxu1 %v3584_v48 }
 0x108   : > { %2387 = vmatmul.mubr.bf16.vlgmr.msra.gmra.mrb[0].mxu0 %v3830_v17  ;;  %2451 = vmatmul.mubr.bf16.vlgmr.msra.gmra.mrb[0].mxu1 %v3833_v18  ;;  %v3180_v17 = vcombine.low %v4116_v36, %v2015_v58  ;;  %v3591_v36 = vld [vmem:[%s4383_s4 + $0x430] ss:$8 sps:$4 sm:$0xff]  }
 0x109   : > { %2577 = vmatpush1.bf16.msra.mxu0 %v3582_v50  ;;  %2641 = vmatpush1.bf16.msra.mxu1 %v3582_v50 }
 0x10a   : > { %2578 = vmatprep.subr.bf16.mxu0 %v3587_v55  ;;  %2642 = vmatprep.subr.bf16.mxu1 %v3587_v55 }
 0x10b   : > { %2396 = vmatprep.mubr.bf16.mxu0 %v3630_v2  ;;  %2460 = vmatprep.mubr.bf16.mxu1 %v3630_v2 }
 0x10d   : > { %2579 = vmatpush1.bf16.msra.mxu0 %v3585_v57  ;;  %2643 = vmatpush1.bf16.msra.mxu1 %v3585_v57 }
 0x10e   : > { %2580 = vmatprep.subr.bf16.mxu0 %v3590_v10  ;;  %2644 = vmatprep.subr.bf16.mxu1 %v3590_v10 }
 0x110   : > { %2397 = vmatmul.mubr.bf16.gmra.mrb[4].mxu0 %v4256_v27  ;;  %2461 = vmatmul.mubr.bf16.gmra.mrb[4].mxu1 %v3180_v17 }
 0x111   : > { %2581 = vmatpush1.bf16.msra.mxu0 %v3588_v59  ;;  %2645 = vmatpush1.bf16.msra.mxu1 %v3588_v59 }
 0x112   : > { %2582 = vmatprep.subr.bf16.mxu0 %v3593_v62  ;;  %2646 = vmatprep.subr.bf16.mxu1 %v3593_v62 }
 0x113   : > { %2608 = vmatprep.mubr.bf16.mxu0 %v3630_v2  ;;  %2672 = vmatprep.mubr.bf16.mxu1 %v3630_v2 }
 0x115   : > { %2583 = vmatpush1.bf16.msra.mxu0 %v3591_v36  ;;  %2647 = vmatpush1.bf16.msra.mxu1 %v3591_v36 }
 0x116   : > { %2584 = vmatprep.subr.bf16.mxu0 %v3596_v63  ;;  %2648 = vmatprep.subr.bf16.mxu1 %v3596_v63 }
 0x119   : > { %2585 = vmatpush1.bf16.msra.mxu0 %v3594_v1  ;;  %2649 = vmatpush1.bf16.msra.mxu1 %v3594_v1 }
 0x11a   : > { %2586 = vmatprep.subr.bf16.mxu0 %v3599_v3  ;;  %2650 = vmatprep.subr.bf16.mxu1 %v3599_v3 }
 0x11d   : > { %2587 = vmatpush1.bf16.msra.mxu0 %v3597_v19  ;;  %2651 = vmatpush1.bf16.msra.mxu1 %v3597_v19 }
 0x11e   : > { %2588 = vmatprep.subr.bf16.mxu0 %v3602_v35  ;;  %2652 = vmatprep.subr.bf16.mxu1 %v3602_v35 }
 0x121   : > { %2589 = vmatpush1.bf16.msra.mxu0 %v3600_v47  ;;  %2653 = vmatpush1.bf16.msra.mxu1 %v3600_v47 }
 0x122   : > { %2590 = vmatprep.subr.bf16.mxu0 %v3605_v49  ;;  %2654 = vmatprep.subr.bf16.mxu1 %v3605_v49 }
 0x125   : > { %2591 = vmatpush1.bf16.msra.mxu0 %v3603_v7  ;;  %2655 = vmatpush1.bf16.msra.mxu1 %v3603_v7 }
 0x128   : > { %2609 = vmatmul.mubr.bf16.vlgmr.msra.gmra.mrb[0].mxu0 %v3833_v18  ;;  %2673 = vmatmul.mubr.bf16.vlgmr.msra.gmra.mrb[0].mxu1 %v3978_v0  ;;  %v2701_v18 = vld [vmem:[%s4384_s5] sm:$0x3]  ;;  %v2719_v0 = vsub.s32 1, %v2714_v20 }
 0x129   : > { %2618 = vmatprep.mubr.bf16.mxu0 %v3630_v2  ;;  %2682 = vmatprep.mubr.bf16.mxu1 %v3630_v2  ;;  %v2716_v27 = vrot.slane %v2701_v18, %v2715_v21 }
 0x12a   : > { %v2720_v51 = vrot.slane %v2701_v18, %v2719_v0 }
 0x130   : > { %2619 = vmatmul.mubr.bf16.gmra.mrb[4].mxu0 %v3180_v17  ;;  %2683 = vmatmul.mubr.bf16.gmra.mrb[4].mxu1 %v3213_v15 }
 0x1fb   : > { %v2610_v22 = vpop.f32.mrb[0].mxu0  ;;  %v2674_v23 = vpop.f32.mrb[0].mxu1 }
 0x1fc   : > { %v2702_v24 = vmax.f32 %v2610_v22, %v2674_v23  ;;  %v2612_v2 = vpop.f32.mrb[1].mxu0  ;;  %v2676_v25 = vpop.f32.mrb[1].mxu1 }
 0x1fd   : > { %v2703_v44 = vmax.f32 %v2612_v2, %v2676_v25  ;;  %v2614_v26 = vpop.f32.mrb[2].mxu0  ;;  %v2678_v60 = vpop.f32.mrb[2].mxu1 }
 0x1fe   : > { %v2704_v6 = vmax.f32 %v2614_v26, %v2678_v60  ;;  %v2616_v28 = vpop.f32.mrb[3].mxu0  ;;  %v2680_v29 = vpop.f32.mrb[3].mxu1 }
 0x1ff   : > { %v2705_v5 = vmax.f32 %v2616_v28, %v2680_v29 }
 0x200   : > { %v2710_v30 = vmax.f32 %v2702_v24, %v2704_v6 }
 0x201   : > { %v2711_v31 = vmax.f32 %v2703_v44, %v2705_v5 }
 0x202   : > { %v2723_v32 = vadd.f32 %v2716_v27, %v2710_v30 }
 0x203   : > { %v2724_v33 = vadd.f32 %v2720_v51, %v2711_v31  ;;  %v2620_v34 = vpop.f32.mrb[4].mxu0  ;;  %v2684_v37 = vpop.f32.mrb[4].mxu1 }
 0x204   : > { %v2725_v56 = vmax.f32 %v2723_v32, 0.0  ;;  %v2706_v38 = vmax.f32 %v2620_v34, %v2684_v37  ;;  %v2622_v39 = vpop.f32.mrb[5].mxu0  ;;  %v2686_v14 = vpop.f32.mrb[5].mxu1 }
 0x205   : > { %v2726_v40 = vmax.f32 %v2724_v33, 0.0  ;;  %v2707_v41 = vmax.f32 %v2622_v39, %v2686_v14  ;;  %v2624_v43 = vpop.f32.mrb[6].mxu0  ;;  %v2688_v45 = vpop.f32.mrb[6].mxu1 }
 0x206   : > { %v2708_v48 = vmax.f32 %v2624_v43, %v2688_v45  ;;  %v2626_v50 = vpop.f32.mrb[7].mxu0  ;;  %v2690_v52 = vpop.f32.mrb[7].mxu1 }
 0x207   : > { %v3224_v53 = vpack.c.bf16 %v2726_v40, %v2725_v56  ;;  %v2709_v55 = vmax.f32 %v2626_v50, %v2690_v52 }
 0x208   : > { %v2736_v57 = vmax.f32 %v2706_v38, %v2708_v48 }
 0x209   : > { %2735 = vst [vmem:[%s489_s10] sm:$0xff] %v3224_v53  ;;  %v2737_v58 = vmax.f32 %v2707_v41, %v2709_v55 }
 0x20a   : > { %v2738_v10 = vadd.f32 %v2736_v57, %v2716_v27 }
 0x20b   : > { %v2739_v17 = vadd.f32 %v2737_v58, %v2720_v51 }
 0x20c   : > { %v2740_v59 = vmax.f32 %v2738_v10, 0.0 }
 0x20d   : > { %v2741_v62 = vmax.f32 %v2739_v17, 0.0 }
 0x20f   : > { %v3225_v36 = vpack.c.bf16 %v2741_v62, %v2740_v59 }
 0x211   : > { %3216 = vst [vmem:[%s489_s10 + $0x8] sm:$0xff] %v3225_v36 }
 0x212 PF: > { %s16_s23 = sadd.s32 1, %s3628_s23   ;;  %s4388_s21 = smov %s3624_s22 }
 0x213   : > { %p13_p5 = scmp.ge.s32.totalorder %s16_s23, 8   ;;  %s4389_s22 = smov %s4391_s24 }
 0x215   :  { %15 = sbr.rel (!%p13_p5) target bundleno = 2 (0x2), region = 92 }

// kernel: denoising_cnn_512_forward.13
= control target key start
LH: loop header
LB: loop body
LE: loop exit
PB: predicated region body
PF: predicated region fallthrough
CT: control target
= control target key end

     0   :  { %s1334_s15 = smov 0   ;;  %s1336_s16 = smov 0   ;;  %s1504_s0 = inlined_call_operand.vmem [shape: bf16[2,4,10,16], index: 0, kind: input, shape index: {}, may-alias: {0,1}]   ;;  %s1505_s1 = inlined_call_operand.vmem [shape: bf16[2,4,10,16], index: 1, kind: input, shape index: {}, may-alias: {0,1}]   ;;  %s1506_s2 = inlined_call_operand.vmem [shape: bf16[3,3,16,256], index: 2, kind: input, shape index: {}]   ;;  %s1507_s3 = inlined_call_operand.vmem [shape: f32[1,256], index: 3, kind: input, shape index: {}]   ;;  %s1508_s4 = inlined_call_operand.vmem [shape: bf16[2,2,8,256], index: 4, kind: output, shape index: {}]  }
   0x1   :  { %s1338_s17 = smov 0  }
   0x2 LB: > { %s26_s18 = sadd.s32 1, %s1302_s16  ;;  %p1123_p0 = scmp.ge.s32.totalorder %s1306_s17, 1  ;;  %s1306_s17 = sphi %s1338_s17, %s14_s17   ;;  %s1302_s16 = sphi %s1336_s16, %s1514_s16   ;;  %s1298_s15 = sphi %s1334_s15, %s1513_s15  }
   0x3   : > { %p28_p1 = scmp.ge.s32.totalorder %s26_s18, 2  ;;  %p206_p2 = scmp.lt.s32.totalorder %s1306_s17, 3 }
   0x5   : > { %s1516_s18 = smov (%p28_p1, %s26_s18), 0  ;;  %p207_p3 = pnand %p1123_p0, %p206_p2 }
   0x6   : > { %v1255_v0 = vld [vmem:[%s1506_s2 + $0x14] ss:$8 sps:$4 sm:$0xff] (!%p207_p3)   ;;  %p254_p4 = scmp.lt.s32.totalorder (!%p207_p3), %s1298_s15, 1  ;;  %v1257_v1 = vld [vmem:[%s1506_s2 + $0x44] ss:$8 sps:$4 sm:$0xff] (!%p207_p3)   ;;  %v1308_v2 = vmov (!%p207_p3), 0  }
   0x7   : > { %210 = sbr.rel (%p207_p3) target bundleno = 304 (0x130), region = 36  ;;  %382 = vmatprep.mubr.bf16.mxu1 (!%p207_p3), %v1308_v2  ;;  %663 = vmatprep.mubr.bf16.mxu0 (!%p207_p3), %v1308_v2  ;;  %v1259_v3 = vld [vmem:[%s1506_s2 + $0x10] ss:$8 sps:$4 sm:$0xff] (!%p207_p3)   ;;  %v1260_v4 = vld [vmem:[%s1506_s2 + $0x40] ss:$8 sps:$4 sm:$0xff] (!%p207_p3)   ;;  %vm346_vm3 = vcmask (!%p207_p3), 130048  }
   0x8   : > { %350 = vmatprep.subr.bf16.mxu1 (!%p207_p3), %v1255_v0  ;;  %631 = vmatprep.subr.bf16.mxu0 (!%p207_p3), %v1257_v1  ;;  %v1263_v5 = vld [vmem:[%s1506_s2 + $0x54] ss:$8 sps:$4 sm:$0xff] (!%p207_p3)   ;;  %vm299_vm0 = vsmask.f32 (!%p207_p3), 3328  ;;  %v1266_v6 = vld [vmem:[%s1506_s2 + $0x4] ss:$8 sps:$4 sm:$0xff] (!%p207_p3)  }
   0x9   : > { %351 = vmatpush1.bf16.msra.mxu1 (!%p207_p3), %v1259_v3  ;;  %632 = vmatpush1.bf16.msra.mxu0 (!%p207_p3), %v1260_v4  ;;  %vm300_vm1 = vsmask.f32 (!%p207_p3), 7440  ;;  %v1264_v39 = vld [vmem:[%s1506_s2] ss:$8 sps:$4 sm:$0xff] (!%p207_p3)   ;;  %v1273_v42 = vld [vmem:[%s1506_s2 + $0x24] ss:$8 sps:$4 sm:$0xff] (!%p207_p3)  }
   0xa   : > { %701 = vmatprep.subr.bf16.mxu0 (!%p207_p3), %v1263_v5  ;;  %411 = vmatprep.subr.bf16.mxu1 (!%p207_p3), %v1266_v6  ;;  %vm1401_vm2 = vmor (!%p207_p3), %vm299_vm0, %vm300_vm1  ;;  %v1261_v43 = vld [vmem:[%s1506_s2 + $0x50] ss:$8 sps:$4 sm:$0xff] (!%p207_p3)   ;;  %v1270_v46 = vld [vmem:[%s1506_s2 + $0x64] ss:$8 sps:$4 sm:$0xff] (!%p207_p3)   ;;  %vm456_vm4 = vcmask (!%p207_p3), 1042432   ;;  %vm457_vm5 = vcmask (!%p207_p3), 1046532  }
   0xb   : > { %vm1429_vm6 = vmor (!%p207_p3), %vm456_vm4, %vm457_vm5  ;;  %v1271_v55 = vld [vmem:[%s1506_s2 + $0x20] ss:$8 sps:$4 sm:$0xff] (!%p207_p3)   ;;  %v1280_v56 = vld [vmem:[%s1506_s2 + $0x34] ss:$8 sps:$4 sm:$0xff] (!%p207_p3)  }
   0xc   : > { %v1268_v58 = vld [vmem:[%s1506_s2 + $0x60] ss:$8 sps:$4 sm:$0xff] (!%p207_p3)   ;;  %v1276_v61 = vld [vmem:[%s1506_s2 + $0x74] ss:$8 sps:$4 sm:$0xff] (!%p207_p3)  }
   0xe   : > { %s1518_s15 = smov (!%p254_p4, %s1298_s15), 1 }
   0xf   : > { %s1191_s27 = sshll.u32 %s1518_s15, 5  ;;  %s1194_s21 = sshll.u32 %s1518_s15, 4 }
  0x10   : > { %s262_s6 = scalar_lea.vmem %s1504_s0, %s1191_s27  ;;  %s1193_s7 = sadd.s32 16, %s1191_s27 }
  0x11   : > { %v1378_v7 = vld [vmem:[%s262_s6] sm:$0xf]  ;;  %v1380_v8 = vld [vmem:[%s262_s6 + $0x4] sm:$0x1]  ;;  %v1382_v9 = vld [vmem:[%s262_s6 + $0x8] sm:$0xf]  ;;  %s1387_s12 = scalar_lea.vmem %s1505_s1, %s1193_s7  ;;  %s286_s24 = scalar_lea.vmem %s1508_s4, %s1194_s21 }
  0x12   : > { %v292_v10 = vld [vmem:[%s262_s6 + $0xc] sm:$0x1]  ;;  %v303_v11 = vshrl.u32 %v1378_v7, 16  ;;  %v306_v12 = vshll.u32 %v1378_v7, 16  ;;  %v312_v13 = vshll.u32 %v1380_v8, 16  ;;  %v317_v14 = vshrl.u32 %v1382_v9, 16 }
  0x13   : > { %v320_v15 = vshll.u32 %v1382_v9, 16  ;;  %v326_v16 = vshll.u32 %v292_v10, 16  ;;  %v1395_v17 = vld [vmem:[%s1387_s12] sm:$0xf]  ;;  %v294_v21 = vld [vmem:[%s1387_s12 + $0x4] sm:$0x1]  ;;  %v1136_v52 = vcombine.low %v1378_v7, %v1382_v9 }
  0x14   : > { %v305_v18 = vrot.slane %v303_v11, 4  ;;  %v308_v19 = vrot.slane %v306_v12, 5  ;;  %v319_v20 = vrot.slane %v317_v14, 4  ;;  %v314_v22 = vrot.slane %v312_v13, 5  ;;  %v295_v62 = vld [vmem:[%s1387_s12 + $0x8] sm:$0xf] }
  0x15   : > { %v322_v23 = vrot.slane %v320_v15, 5  ;;  %v600_v25 = vshrl.u32 %v1395_v17, 16  ;;  %v603_v26 = vshll.u32 %v1395_v17, 16  ;;  %v609_v27 = vshll.u32 %v294_v21, 16  ;;  %v296_v6 = vld [vmem:[%s1387_s12 + $0xc] sm:$0x1] }
  0x16   : > { %v309_v24 = vor.u32 %v308_v19, %v305_v18  ;;  %v328_v30 = vrot.slane %v326_v16, 5  ;;  %v465_v47 = vrot.slane %v292_v10, 5  ;;  %v681_v48 = vrot.slane %v294_v21, 5  ;;  %v1274_v12 = vld [vmem:[%s1506_s2 + $0x70] ss:$8 sps:$4 sm:$0xff]  }
  0x17   : > { %v323_v29 = vor.u32 %v322_v23, %v319_v20  ;;  %v602_v32 = vrot.slane %v600_v25, 4  ;;  %v605_v33 = vrot.slane %v603_v26, 5  ;;  %v611_v37 = vrot.slane %v609_v27, 5  ;;  %v1283_v13 = vld [vmem:[%s1506_s2 + $0x84] ss:$8 sps:$4 sm:$0xff]  }
  0x18   : > { %v310_v31 = vrot.slane %v309_v24, 4  ;;  %v1141_v49 = vrot.slane %v1382_v9, 9  ;;  %v1160_v50 = vrot.slane %v1395_v17, 9  ;;  %v461_v59 = vrot.slane %v1380_v8, 5  ;;  %v1281_v20 = vld [vmem:[%s1506_s2 + $0x80] ss:$8 sps:$4 sm:$0xff]  }
  0x19   : > { %v324_v34 = vrot.slane %v323_v29, 4  ;;  %v606_v36 = vor.u32 %v605_v33, %v602_v32  ;;  %v1140_v60 = vrot.slane %v1378_v7, 9  ;;  %v815_v63 = vshrl.u32 %v295_v62, 16  ;;  %v1278_v7 = vld [vmem:[%s1506_s2 + $0x30] ss:$8 sps:$4 sm:$0xff]  }
  0x1a   : > { %v315_v35 = vsel %vm1401_vm2, %v310_v31, %v314_v22  ;;  %v466_v53 = vsel %vm1429_vm6, %v1141_v49, %v465_v47  ;;  %v682_v54 = vsel %vm1429_vm6, %v1160_v50, %v681_v48  ;;  %v818_v0 = vshll.u32 %v295_v62, 16 }
  0x1b   : > { %v329_v38 = vsel %vm1401_vm2, %v324_v34, %v328_v30  ;;  %v607_v41 = vrot.slane %v606_v36, 4  ;;  %v1163_v57 = vcombine.low %v466_v53, %v682_v54  ;;  %v462_v1 = vsel %vm1429_vm6, %v1140_v60, %v461_v59 }
  0x1c   : > { %v1132_v40 = vcombine.low %v315_v35, %v329_v38  ;;  %v817_v3 = vrot.slane %v815_v63, 4  ;;  %v820_v4 = vrot.slane %v818_v0, 5  ;;  %v1144_v5 = vcombine.low %v462_v1, %v466_v53 }
  0x1d   : > { %v612_v44 = vsel %vm1401_vm2, %v607_v41, %v611_v37  ;;  %v1169_v8 = vcombine.low %v1395_v17, %v295_v62  ;;  %v824_v11 = vshll.u32 %v296_v6, 16  ;;  %v1150_v18 = vcombine.low %v1382_v9, %v1395_v17 }
  0x1e   : > { %1135 = vmatmul.mubr.msk.bf16.vlgmr.msra.gmra.mrb[0].mxu1 %vm346_vm3, %v1132_v40  ;;  %v1156_v45 = vcombine.low %v329_v38, %v612_v44  ;;  %v821_v10 = vor.u32 %v820_v4, %v817_v3  ;;  %v1179_v21 = vrot.slane %v295_v62, 9  ;;  %v896_v22 = vrot.slane %v296_v6, 5 }
  0x1f   : > { %412 = vmatpush1.bf16.msra.mxu1 %v1264_v39  ;;  %443 = vmatprep.mubr.bf16.mxu1 %v1308_v2  ;;  %v826_v15 = vrot.slane %v824_v11, 5  ;;  %v965_v26 = vlaneseq }
  0x20   : > { %486 = vmatprep.subr.bf16.mxu1 %v1273_v42  ;;  %1159 = vmatmul.mubr.msk.bf16.vlgmr.msra.gmra.mrb[0].mxu0 %vm346_vm3, %v1156_v45  ;;  %v822_v14 = vrot.slane %v821_v10, 4  ;;  %v897_v23 = vsel %vm1429_vm6, %v1179_v21, %v896_v22 }
  0x21   : > { %702 = vmatpush1.bf16.msra.mxu0 %v1261_v43  ;;  %733 = vmatprep.mubr.bf16.mxu0 %v1308_v2  ;;  %v1182_v24 = vcombine.low %v682_v54, %v897_v23  ;;  %v966_v28 = vshrl.u32 %v965_v26, 7 }
  0x22   : > { %767 = vmatprep.subr.bf16.mxu0 %v1270_v46  ;;  %v827_v16 = vsel %vm1401_vm2, %v822_v14, %v826_v15 }
  0x23   : > { %v1175_v19 = vcombine.low %v612_v44, %v827_v16  ;;  %v967_v29 = vsub.s32 0, %v966_v28  ;;  %v971_v30 = vsub.s32 1, %v966_v28 }
  0x2a   : > { %1139 = vmatmul.mubr.msk.bf16.vlgmr.msra.gmra.mrb[0].mxu1 %vm346_vm3, %v1136_v52 }
  0x2b   : > { %487 = vmatpush1.bf16.msra.mxu1 %v1271_v55  ;;  %518 = vmatprep.mubr.bf16.mxu1 %v1308_v2 }
  0x2c   : > { %552 = vmatprep.subr.bf16.mxu1 %v1280_v56  ;;  %1166 = vmatmul.mubr.msk.bf16.vlgmr.msra.gmra.mrb[0].mxu0 %vm346_vm3, %v1163_v57 }
  0x2d   : > { %768 = vmatpush1.bf16.msra.mxu0 %v1268_v58  ;;  %799 = vmatprep.mubr.bf16.mxu0 %v1308_v2 }
  0x2e   : > { %846 = vmatprep.subr.bf16.mxu0 %v1276_v61 }
  0x36   : > { %1147 = vmatmul.mubr.msk.bf16.vlgmr.msra.gmra.mrb[0].mxu1 %vm346_vm3, %v1144_v5 }
  0x37   : > { %553 = vmatpush1.bf16.msra.mxu1 %v1278_v7  ;;  %584 = vmatprep.mubr.bf16.mxu1 %v1308_v2 }
  0x38   : > { %1172 = vmatmul.mubr.msk.bf16.vlgmr.msra.gmra.mrb[0].mxu0 %vm346_vm3, %v1169_v8 }
  0x39   : > { %847 = vmatpush1.bf16.msra.mxu0 %v1274_v12  ;;  %878 = vmatprep.mubr.bf16.mxu0 %v1308_v2 }
  0x3a   : > { %916 = vmatprep.subr.bf16.mxu0 %v1283_v13 }
  0x42   : > { %1153 = vmatmul.mubr.msk.bf16.vlgmr.msra.gmra.mrb[0].mxu1 %vm346_vm3, %v1150_v18 }
  0x44   : > { %1178 = vmatmul.mubr.msk.bf16.vlgmr.msra.gmra.mrb[0].mxu0 %vm346_vm3, %v1175_v19 }
  0x45   : > { %917 = vmatpush1.bf16.msra.mxu0 %v1281_v20  ;;  %948 = vmatprep.mubr.bf16.mxu0 %v1308_v2  ;;  %v963_v2 = vld [vmem:[%s1507_s3] sm:$0x3] }
  0x46   : > { %v968_v31 = vrot.slane %v963_v2, %v967_v29  ;;  %v972_v33 = vrot.slane %v963_v2, %v971_v30 }
  0x50   : > { %1185 = vmatmul.mubr.msk.bf16.vlgmr.msra.gmra.mrb[0].mxu0 %vm346_vm3, %v1182_v24 }
 0x115   : > { %v586_v9 = vpop.f32.mrb[0].mxu1 }
 0x116   : > { %v588_v17 = vpop.f32.mrb[1].mxu1 }
 0x117   : > { %v590_v25 = vpop.f32.mrb[2].mxu1 }
 0x118   : > { %v592_v27 = vpop.f32.mrb[3].mxu1 }
 0x123   : > { %v950_v32 = vpop.f32.mrb[0].mxu0 }
 0x124   : > { %v1198_v34 = vadd.f32 %v950_v32, %v586_v9  ;;  %v952_v35 = vpop.f32.mrb[1].mxu0 }
 0x125   : > { %v1199_v36 = vadd.f32 %v952_v35, %v588_v17  ;;  %v954_v37 = vpop.f32.mrb[2].mxu0 }
 0x126   : > { %v975_v38 = vadd.f32 %v1198_v34, %v968_v31  ;;  %v1200_v39 = vadd.f32 %v954_v37, %v590_v25  ;;  %v956_v40 = vpop.f32.mrb[3].mxu0 }
 0x127   : > { %v976_v41 = vadd.f32 %v1199_v36, %v972_v33  ;;  %v1201_v42 = vadd.f32 %v956_v40, %v592_v27 }
 0x128   : > { %v977_v43 = vmax.f32 %v975_v38, 0.0  ;;  %v988_v44 = vadd.f32 %v1200_v39, %v968_v31 }
 0x129   : > { %v978_v45 = vmax.f32 %v976_v41, 0.0  ;;  %v989_v46 = vadd.f32 %v1201_v42, %v972_v33 }
 0x12a   : > { %v990_v47 = vmax.f32 %v988_v44, 0.0 }
 0x12b   : > { %v1195_v48 = vpack.c.bf16 %v978_v45, %v977_v43  ;;  %v991_v49 = vmax.f32 %v989_v46, 0.0 }
 0x12d   : > { %987 = vst [vmem:[%s286_s24] sm:$0xff] %v1195_v48  ;;  %v1196_v50 = vpack.c.bf16 %v991_v49, %v990_v47 }
 0x12f   : > { %1188 = vst [vmem:[%s286_s24 + $0x8] sm:$0xff] %v1196_v50 }
 0x130 PF: > { %s14_s17 = sadd.s32 1, %s1306_s17   ;;  %s1513_s15 = smov %s1302_s16 }
 0x131   : > { %p11_p5 = scmp.ge.s32.totalorder %s14_s17, 4   ;;  %s1514_s16 = smov %s1516_s18 }
 0x133   :  { %13 = sbr.rel (!%p11_p5) target bundleno = 2 (0x2), region = 78 }

// kernel: tile.13
= control target key start
LH: loop header
LB: loop body
LE: loop exit
PB: predicated region body
PF: predicated region fallthrough
CT: control target
= control target key end

     0   :  { %s22_s0 = inlined_call_operand.vmem [shape: f32[128], index: 0, kind: input, shape index: {}]   ;;  %s23_s1 = inlined_call_operand.vmem [shape: f32[4,128], index: 1, kind: output, shape index: {}]  }
   0x1   :  { %v4_v0 = vld [vmem:[%s22_s0] ss:$0 sm:$0xff] }
   0x2   :  { %5 = vst [vmem:[%s23_s1] sm:$0xf] %v4_v0 }

// kernel: denoising_cnn_512_forward.12
= control target key start
LH: loop header
LB: loop body
LE: loop exit
PB: predicated region body
PF: predicated region fallthrough
CT: control target
= control target key end

     0   :  { %s2973_s15 = smov 0   ;;  %s2975_s16 = smov 0   ;;  %s3535_s0 = inlined_call_operand.vmem [shape: bf16[2,4,10,256], index: 0, kind: input, shape index: {}, may-alias: {0,1}]   ;;  %s3536_s1 = inlined_call_operand.vmem [shape: bf16[2,4,10,256], index: 1, kind: input, shape index: {}, may-alias: {0,1}]   ;;  %s3537_s2 = inlined_call_operand.vmem [shape: bf16[3,3,256,16], index: 2, kind: input, shape index: {}]   ;;  %s3538_s3 = inlined_call_operand.vmem [shape: f32[1,16], index: 3, kind: input, shape index: {}]   ;;  %s3539_s4 = inlined_call_operand.vmem [shape: bf16[2,2,8,16], index: 4, kind: output, shape index: {}]  }
   0x1   :  { %s2977_s17 = smov 0  }
   0x2 LB: > { %s26_s18 = sadd.s32 1, %s2942_s16  ;;  %p2116_p0 = scmp.ge.s32.totalorder %s2946_s17, 1  ;;  %s2946_s17 = sphi %s2977_s17, %s14_s17   ;;  %s2942_s16 = sphi %s2975_s16, %s3545_s16   ;;  %s2938_s15 = sphi %s2973_s15, %s3544_s15  }
   0x3   : > { %p28_p1 = scmp.ge.s32.totalorder %s26_s18, 2  ;;  %p206_p2 = scmp.lt.s32.totalorder %s2946_s17, 3 }
   0x5   : > { %s3547_s18 = smov (%p28_p1, %s26_s18), 0  ;;  %p207_p3 = pnand %p2116_p0, %p206_p2 }
   0x6   : > { %v2776_v0 = vld [vmem:[%s3537_s2 + $0xc0] sm:$0xff] (!%p207_p3)   ;;  %v2780_v4 = vld [vmem:[%s3537_s2 + $0xc8] sm:$0xff] (!%p207_p3)   ;;  %v2784_v8 = vld [vmem:[%s3537_s2 + $0xd0] sm:$0xff] (!%p207_p3)   ;;  %p253_p4 = scmp.lt.s32.totalorder (!%p207_p3), %s2938_s15, 1  ;;  %vm685_vm0 = vcmask (!%p207_p3), 1042432   ;;  %vm686_vm1 = vcmask (!%p207_p3), 1046532  }
   0x7   : > { %210 = sbr.rel (%p207_p3) target bundleno = 394 (0x18a), region = 36  ;;  %v2777_v1 = vld [vmem:[%s3537_s2 + $0x40] sm:$0xff] (!%p207_p3)   ;;  %2554 = vmatprep.subr.bf16.mxu0 (!%p207_p3), %v2776_v0  ;;  %v2781_v5 = vld [vmem:[%s3537_s2 + $0x48] sm:$0xff] (!%p207_p3)   ;;  %v2785_v9 = vld [vmem:[%s3537_s2 + $0x50] sm:$0xff] (!%p207_p3)   ;;  %vm327_vm2 = vsmask.f32 (!%p207_p3), 3328 }
   0x8   : > { %v2778_v2 = vld [vmem:[%s3537_s2 + $0x80] sm:$0xff] (!%p207_p3)   ;;  %2576 = vmatprep.subr.bf16.mxu1 (!%p207_p3), %v2777_v1  ;;  %v2782_v6 = vld [vmem:[%s3537_s2 + $0x88] sm:$0xff] (!%p207_p3)   ;;  %v2786_v10 = vld [vmem:[%s3537_s2 + $0x90] sm:$0xff] (!%p207_p3)   ;;  %vm328_vm3 = vsmask.f32 (!%p207_p3), 7440  ;;  %vm1994_vm6 = vcmask (!%p207_p3), 125952  }
   0x9   : > { %v2779_v3 = vld [vmem:[%s3537_s2] sm:$0xff] (!%p207_p3)   ;;  %2555 = vmatpush3.bf16.msra.mxu0 (!%p207_p3), %v2778_v2  ;;  %v2783_v7 = vld [vmem:[%s3537_s2 + $0x8] sm:$0xff] (!%p207_p3)   ;;  %v2787_v11 = vld [vmem:[%s3537_s2 + $0x10] sm:$0xff] (!%p207_p3)  }
   0xa   : > { %2577 = vmatpush3.bf16.msra.mxu1 (!%p207_p3), %v2779_v3  ;;  %2556 = vmatprep.subr.bf16.mxu0 (!%p207_p3), %v2780_v4  ;;  %v2788_v12 = vld [vmem:[%s3537_s2 + $0xd8] sm:$0xff] (!%p207_p3)   ;;  %v2792_v16 = vld [vmem:[%s3537_s2 + $0xe0] sm:$0xff] (!%p207_p3)   ;;  %v2796_v20 = vld [vmem:[%s3537_s2 + $0xe8] sm:$0xff] (!%p207_p3)  }
   0xb   : > { %2578 = vmatprep.subr.bf16.mxu1 (!%p207_p3), %v2781_v5  ;;  %v2789_v13 = vld [vmem:[%s3537_s2 + $0x58] sm:$0xff] (!%p207_p3)   ;;  %v2793_v17 = vld [vmem:[%s3537_s2 + $0x60] sm:$0xff] (!%p207_p3)   ;;  %v2797_v21 = vld [vmem:[%s3537_s2 + $0x68] sm:$0xff] (!%p207_p3)  }
   0xc   : > { %v2790_v14 = vld [vmem:[%s3537_s2 + $0x98] sm:$0xff] (!%p207_p3)   ;;  %v2794_v18 = vld [vmem:[%s3537_s2 + $0xa0] sm:$0xff] (!%p207_p3)   ;;  %v2798_v22 = vld [vmem:[%s3537_s2 + $0xa8] sm:$0xff] (!%p207_p3)  }
   0xd   : > { %2557 = vmatpush3.bf16.msra.mxu0 (!%p207_p3), %v2782_v6  ;;  %v2791_v15 = vld [vmem:[%s3537_s2 + $0x18] sm:$0xff] (!%p207_p3)   ;;  %v2795_v19 = vld [vmem:[%s3537_s2 + $0x20] sm:$0xff] (!%p207_p3)   ;;  %v2799_v23 = vld [vmem:[%s3537_s2 + $0x28] sm:$0xff] (!%p207_p3)  }
   0xe   : > { %2579 = vmatpush3.bf16.msra.mxu1 %v2783_v7  ;;  %2558 = vmatprep.subr.bf16.mxu0 %v2784_v8  ;;  %s3549_s15 = smov (!%p253_p4, %s2938_s15), 1  ;;  %v2800_v24 = vld [vmem:[%s3537_s2 + $0xf0] sm:$0xff]   ;;  %v2804_v28 = vld [vmem:[%s3537_s2 + $0xf8] sm:$0xff]   ;;  %vm3106_vm4 = vmor %vm685_vm0, %vm686_vm1 }
   0xf   : > { %2580 = vmatprep.subr.bf16.mxu1 %v2785_v9  ;;  %v2801_v25 = vld [vmem:[%s3537_s2 + $0x70] sm:$0xff]   ;;  %s2549_s29 = sshll.u32 %s3549_s15, 6  ;;  %v2805_v29 = vld [vmem:[%s3537_s2 + $0x78] sm:$0xff]   ;;  %vm3111_vm5 = vmor %vm327_vm2, %vm328_vm3  ;;  %s2552_s13 = sshll.u32 %s3549_s15, 3 }
  0x10   : > { %v2802_v26 = vld [vmem:[%s3537_s2 + $0xb0] sm:$0xff]   ;;  %s261_s12 = scalar_lea.vmem %s3535_s0, %s2549_s29  ;;  %v2806_v30 = vld [vmem:[%s3537_s2 + $0xb8] sm:$0xff]   ;;  %v2810_v53 = vld [vmem:[%s3537_s2 + $0x140] sm:$0xff]   ;;  %s2551_s27 = sadd.s32 32, %s2549_s29 }
  0x11   : > { %2559 = vmatpush3.bf16.msra.mxu0 %v2786_v10  ;;  %v2803_v27 = vld [vmem:[%s3537_s2 + $0x30] sm:$0xff]   ;;  %v2807_v31 = vld [vmem:[%s3537_s2 + $0x38] sm:$0xff]   ;;  %v287_v32 = vld [vmem:[%s261_s12] sm:$0xff]  ;;  %s3221_s11 = scalar_lea.vmem %s3536_s1, %s2551_s27  ;;  %s284_s20 = scalar_lea.vmem %s3539_s4, %s2552_s13 }
  0x12   : > { %2581 = vmatpush3.bf16.msra.mxu1 %v2787_v11  ;;  %2560 = vmatprep.subr.bf16.mxu0 %v2788_v12  ;;  %v288_v33 = vld [vmem:[%s261_s12 + $0x8] sm:$0x11]  ;;  %v3099_v34 = vld [vmem:[%s261_s12 + $0x10] sm:$0xff]  ;;  %v290_v35 = vld [vmem:[%s261_s12 + $0x18] sm:$0x11]  ;;  %v331_v36 = vshrl.u32 %v287_v32, 16 }
  0x13   : > { %2582 = vmatprep.subr.bf16.mxu1 %v2789_v13  ;;  %v334_v37 = vshll.u32 %v287_v32, 16  ;;  %v2174_v38 = vcombine.high %v287_v32, %v3099_v34  ;;  %v340_v39 = vshll.u32 %v288_v33, 16  ;;  %v345_v40 = vshrl.u32 %v3099_v34, 16  ;;  %v2812_v57 = vld [vmem:[%s3537_s2 + $0x1c0] sm:$0xff]   ;;  %v2816_v3 = vld [vmem:[%s3537_s2 + $0x1c8] sm:$0xff]   ;;  %v2820_v11 = vld [vmem:[%s3537_s2 + $0x1d0] sm:$0xff]  }
  0x14   : > { %v348_v41 = vshll.u32 %v3099_v34, 16  ;;  %v354_v42 = vshll.u32 %v290_v35, 16  ;;  %v333_v43 = vrot.slane %v331_v36, 4  ;;  %v690_v45 = vrot.slane %v288_v33, 5  ;;  %v2813_v60 = vld [vmem:[%s3537_s2 + $0x180] sm:$0xff]   ;;  %v2817_v6 = vld [vmem:[%s3537_s2 + $0x188] sm:$0xff]  }
  0x15   : > { %2561 = vmatpush3.bf16.msra.mxu0 %v2790_v14  ;;  %v336_v44 = vrot.slane %v334_v37, 5  ;;  %v694_v46 = vrot.slane %v290_v35, 5  ;;  %674 = vmatprep.mubr.bf16.mxu1 %v2174_v38  ;;  %v342_v49 = vrot.slane %v340_v39, 5  ;;  %v347_v50 = vrot.slane %v345_v40, 4  ;;  %v2811_v63 = vld [vmem:[%s3537_s2 + $0x100] sm:$0xff]   ;;  %v2814_v8 = vld [vmem:[%s3537_s2 + $0x148] sm:$0xff]  }
  0x16   : > { %2583 = vmatpush3.bf16.msra.mxu1 %v2791_v15  ;;  %2562 = vmatprep.subr.bf16.mxu0 %v2792_v16  ;;  %v350_v51 = vrot.slane %v348_v41, 5  ;;  %v356_v52 = vrot.slane %v354_v42, 5  ;;  %v2173_v55 = vcombine.low %v287_v32, %v3099_v34  ;;  %v2191_v58 = vrot.slane %v287_v32, 9  ;;  %v2815_v10 = vld [vmem:[%s3537_s2 + $0x108] sm:$0xff]   ;;  %v2821_v12 = vld [vmem:[%s3537_s2 + $0x190] sm:$0xff]   ;;  %v2824_v15 = vld [vmem:[%s3537_s2 + $0x1d8] sm:$0xff]  }
  0x17   : > { %2584 = vmatprep.subr.bf16.mxu1 %v2793_v17  ;;  %v337_v54 = vor.u32 %v336_v44, %v333_v43  ;;  %v2192_v1 = vrot.slane %v3099_v34, 9  ;;  %v2818_v13 = vld [vmem:[%s3537_s2 + $0x150] sm:$0xff]   ;;  %v2825_v16 = vld [vmem:[%s3537_s2 + $0x198] sm:$0xff]   ;;  %v3236_v35 = vld [vmem:[%s3221_s11] sm:$0xff] }
  0x18   : > { %v351_v56 = vor.u32 %v350_v51, %v347_v50  ;;  %v3132_v0 = vsel %vm3106_vm4, %v2191_v58, %v690_v45  ;;  %v2819_v14 = vld [vmem:[%s3537_s2 + $0x110] sm:$0xff]   ;;  %v2822_v17 = vld [vmem:[%s3537_s2 + $0x158] sm:$0xff]   ;;  %v2276_v37 = vcombine.high %v3099_v34, %v3236_v35  ;;  %v2275_v38 = vcombine.low %v3099_v34, %v3236_v35  ;;  %v2844_v39 = vld [vmem:[%s3537_s2 + $0x2c0] sm:$0xff]  }
  0x19   : > { %2563 = vmatpush3.bf16.msra.mxu0 %v2794_v18  ;;  %v338_v59 = vrot.slane %v337_v54, 4  ;;  %v3149_v7 = vsel %vm3106_vm4, %v2192_v1, %v694_v46  ;;  %v2823_v18 = vld [vmem:[%s3537_s2 + $0x118] sm:$0xff]   ;;  %v2845_v40 = vld [vmem:[%s3537_s2 + $0x280] sm:$0xff]   ;;  %v2848_v43 = vld [vmem:[%s3537_s2 + $0x2c8] sm:$0xff]  }
  0x1a   : > { %2585 = vmatpush3.bf16.msra.mxu1 %v2795_v19  ;;  %2564 = vmatprep.subr.bf16.mxu0 %v2796_v20  ;;  %v352_v61 = vrot.slane %v351_v56, 4  ;;  %v2226_v9 = vcombine.high %v3132_v0, %v3149_v7  ;;  %v2828_v19 = vld [vmem:[%s3537_s2 + $0x1e0] sm:$0xff]   ;;  %v2841_v32 = vld [vmem:[%s3537_s2 + $0x1b8] sm:$0xff]   ;;  %v2225_v42 = vcombine.low %v3132_v0, %v3149_v7  ;;  %v2849_v44 = vld [vmem:[%s3537_s2 + $0x288] sm:$0xff]  }
  0x1b   : > { %2586 = vmatprep.subr.bf16.mxu1 %v2797_v21  ;;  %v343_v62 = vsel %vm3111_vm5, %v338_v59, %v342_v49  ;;  %v2829_v20 = vld [vmem:[%s3537_s2 + $0x1a0] sm:$0xff]   ;;  %v2838_v33 = vld [vmem:[%s3537_s2 + $0x178] sm:$0xff]   ;;  %v2846_v45 = vld [vmem:[%s3537_s2 + $0x248] sm:$0xff]   ;;  %v1059_v59 = vshll.u32 %v3236_v35, 16 }
  0x1c   : > { %v3137_v2 = vsel %vm3111_vm5, %v352_v61, %v356_v52  ;;  %v2826_v21 = vld [vmem:[%s3537_s2 + $0x160] sm:$0xff]   ;;  %v2839_v36 = vld [vmem:[%s3537_s2 + $0x138] sm:$0xff]   ;;  %v2847_v46 = vld [vmem:[%s3537_s2 + $0x208] sm:$0xff]  }
  0x1d   : > { %2565 = vmatpush3.bf16.msra.mxu0 %v2798_v22  ;;  %v2155_v4 = vcombine.low %v343_v62, %v3137_v2  ;;  %v2156_v5 = vcombine.high %v343_v62, %v3137_v2  ;;  %v2827_v22 = vld [vmem:[%s3537_s2 + $0x120] sm:$0xff]   ;;  %v2852_v49 = vld [vmem:[%s3537_s2 + $0x2d0] sm:$0xff]   ;;  %v2857_v54 = vld [vmem:[%s3537_s2 + $0x298] sm:$0xff]   ;;  %v1061_v1 = vrot.slane %v1059_v59, 5 }
  0x1e   : > { %2587 = vmatpush3.bf16.msra.mxu1 %v2799_v23  ;;  %2566 = vmatprep.subr.bf16.mxu0 %v2800_v24  ;;  %v2832_v23 = vld [vmem:[%s3537_s2 + $0x1e8] sm:$0xff]   ;;  %v2842_v41 = vld [vmem:[%s3537_s2 + $0x240] sm:$0xff]   ;;  %v2853_v50 = vld [vmem:[%s3537_s2 + $0x290] sm:$0xff]  }
  0x1f   : > { %2588 = vmatprep.subr.bf16.mxu1 %v2801_v25  ;;  %527 = vmatprep.mubr.bf16.mxu0 %v2156_v5  ;;  %v2833_v24 = vld [vmem:[%s3537_s2 + $0x1a8] sm:$0xff]   ;;  %v2843_v34 = vld [vmem:[%s3537_s2 + $0x200] sm:$0xff]   ;;  %v2850_v51 = vld [vmem:[%s3537_s2 + $0x250] sm:$0xff]  }
  0x20   : > { %v2830_v25 = vld [vmem:[%s3537_s2 + $0x168] sm:$0xff]   ;;  %v2851_v52 = vld [vmem:[%s3537_s2 + $0x210] sm:$0xff]   ;;  %v2855_v56 = vld [vmem:[%s3537_s2 + $0x218] sm:$0xff]  }
  0x21   : > { %2567 = vmatpush3.bf16.msra.mxu0 %v2802_v26  ;;  %v2831_v26 = vld [vmem:[%s3537_s2 + $0x128] sm:$0xff]   ;;  %v2860_v58 = vld [vmem:[%s3537_s2 + $0x2e0] sm:$0xff]   ;;  %v2902_v59 = vld [vmem:[%s3537_s2 + $0x378] sm:$0xff]  }
  0x22   : > { %2589 = vmatpush3.bf16.msra.mxu1 %v2803_v27  ;;  %2568 = vmatprep.subr.bf16.mxu0 %v2804_v28  ;;  %v2836_v27 = vld [vmem:[%s3537_s2 + $0x1f0] sm:$0xff]   ;;  %v2858_v61 = vld [vmem:[%s3537_s2 + $0x260] sm:$0xff]   ;;  %v2864_v0 = vld [vmem:[%s3537_s2 + $0x2e8] sm:$0xff]  }
  0x23   : > { %2590 = vmatprep.subr.bf16.mxu1 %v2805_v29  ;;  %v2837_v28 = vld [vmem:[%s3537_s2 + $0x1b0] sm:$0xff]   ;;  %v2859_v62 = vld [vmem:[%s3537_s2 + $0x220] sm:$0xff]   ;;  %v2863_v5 = vld [vmem:[%s3537_s2 + $0x228] sm:$0xff]  }
  0x24   : > { %v2834_v29 = vld [vmem:[%s3537_s2 + $0x170] sm:$0xff]  }
  0x25   : > { %2569 = vmatpush3.bf16.msra.mxu0 %v2806_v30  ;;  %v2835_v30 = vld [vmem:[%s3537_s2 + $0x130] sm:$0xff]  }
  0x26   : > { %2591 = vmatpush3.bf16.msra.mxu1 %v2807_v31  ;;  %2598 = vmatprep.subr.bf16.mxu0 %v2810_v53  ;;  %v2840_v31 = vld [vmem:[%s3537_s2 + $0x1f8] sm:$0xff]   ;;  %v2912_v47 = vld [vmem:[%s3537_s2 + $0x450] sm:$0xff]  }
  0x27   : > { %2620 = vmatprep.subr.bf16.mxu1 %v2812_v57  ;;  %v2856_v53 = vld [vmem:[%s3537_s2 + $0x2d8] sm:$0xff]   ;;  %v1056_v57 = vshrl.u32 %v3236_v35, 16  ;;  %v2913_v48 = vld [vmem:[%s3537_s2 + $0x410] sm:$0xff]  }
  0x28   : > { %528 = vmatmul.mubr.bf16.vlgmr.msra.gmra.mrb[0].mxu0 %v2155_v4  ;;  %v2862_v4 = vld [vmem:[%s3537_s2 + $0x268] sm:$0xff]  }
  0x29   : > { %675 = vmatmul.mubr.bf16.vlgmr.msra.gmra.mrb[0].mxu1 %v2173_v55  ;;  %2599 = vmatpush3.bf16.msra.mxu0 %v2811_v63  ;;  %v2854_v55 = vld [vmem:[%s3537_s2 + $0x258] sm:$0xff]   ;;  %v1058_v63 = vrot.slane %v1056_v57, 4 }
  0x2a   : > { %2621 = vmatpush3.bf16.msra.mxu1 %v2813_v60  ;;  %865 = vmatprep.mubr.bf16.mxu0 %v2226_v9  ;;  %v2861_v60 = vld [vmem:[%s3537_s2 + $0x2a0] sm:$0xff]   ;;  %v2869_v9 = vld [vmem:[%s3537_s2 + $0x2b0] sm:$0xff]   ;;  %v2904_v57 = vld [vmem:[%s3537_s2 + $0x3f8] sm:$0xff]  }
  0x2b   : > { %2622 = vmatprep.subr.bf16.mxu1 %v2816_v3  ;;  %2600 = vmatprep.subr.bf16.mxu0 %v2814_v8  ;;  %v2865_v3 = vld [vmem:[%s3537_s2 + $0x2a8] sm:$0xff]   ;;  %v1062_v8 = vor.u32 %v1061_v1, %v1058_v63  ;;  %v294_v63 = vld [vmem:[%s3221_s11 + $0x18] sm:$0x11] }
  0x2c   : > { %1044 = vmatprep.mubr.bf16.mxu1 %v2276_v37  ;;  %v2882_v37 = vld [vmem:[%s3537_s2 + $0x350] sm:$0xff]  }
  0x2d   : > { %2601 = vmatpush3.bf16.msra.mxu0 %v2815_v10  ;;  %v2866_v10 = vld [vmem:[%s3537_s2 + $0x270] sm:$0xff]  }
  0x2e   : > { %2623 = vmatpush3.bf16.msra.mxu1 %v2817_v6  ;;  %2602 = vmatprep.subr.bf16.mxu0 %v2818_v13  ;;  %v2868_v6 = vld [vmem:[%s3537_s2 + $0x2f0] sm:$0xff]   ;;  %v2870_v13 = vld [vmem:[%s3537_s2 + $0x278] sm:$0xff]  }
  0x2f   : > { %2624 = vmatprep.subr.bf16.mxu1 %v2820_v11  ;;  %v2867_v11 = vld [vmem:[%s3537_s2 + $0x230] sm:$0xff]  }
  0x31   : > { %2603 = vmatpush3.bf16.msra.mxu0 %v2819_v14  ;;  %v2872_v14 = vld [vmem:[%s3537_s2 + $0x2f8] sm:$0xff]  }
  0x32   : > { %2625 = vmatpush3.bf16.msra.mxu1 %v2821_v12  ;;  %2604 = vmatprep.subr.bf16.mxu0 %v2822_v17  ;;  %v2343_v12 = vrot.slane %v3236_v35, 9 }
  0x33   : > { %2626 = vmatprep.subr.bf16.mxu1 %v2824_v15  ;;  %v1063_v15 = vrot.slane %v1062_v8, 4 }
  0x35   : > { %2605 = vmatpush3.bf16.msra.mxu0 %v2823_v18  ;;  %v2873_v18 = vld [vmem:[%s3537_s2 + $0x2b8] sm:$0xff]  }
  0x36   : > { %2627 = vmatpush3.bf16.msra.mxu1 %v2825_v16  ;;  %2606 = vmatprep.subr.bf16.mxu0 %v2826_v21  ;;  %v292_v16 = vld [vmem:[%s3221_s11 + $0x8] sm:$0x11] }
  0x37   : > { %2628 = vmatprep.subr.bf16.mxu1 %v2828_v19  ;;  %v1065_v17 = vshll.u32 %v292_v16, 16  ;;  %v1250_v19 = vrot.slane %v292_v16, 5 }
  0x39   : > { %2607 = vmatpush3.bf16.msra.mxu0 %v2827_v22  ;;  %v1067_v21 = vrot.slane %v1065_v17, 5  ;;  %v3349_v22 = vsel %vm3106_vm4, %v2343_v12, %v1250_v19  ;;  %v1804_v12 = vrot.slane %v294_v63, 5 }
  0x3a   : > { %2629 = vmatpush3.bf16.msra.mxu1 %v2829_v20  ;;  %2608 = vmatprep.subr.bf16.mxu0 %v2830_v25  ;;  %v2871_v20 = vld [vmem:[%s3537_s2 + $0x238] sm:$0xff]   ;;  %v2874_v25 = vld [vmem:[%s3537_s2 + $0x340] sm:$0xff]  }
  0x3b   : > { %2630 = vmatprep.subr.bf16.mxu1 %v2832_v23  ;;  %v2876_v23 = vld [vmem:[%s3537_s2 + $0x3c0] sm:$0xff]  }
  0x3d   : > { %2609 = vmatpush3.bf16.msra.mxu0 %v2831_v26  ;;  %v2377_v26 = vcombine.high %v3149_v7, %v3349_v22 }
  0x3e   : > { %2631 = vmatpush3.bf16.msra.mxu1 %v2833_v24  ;;  %2610 = vmatprep.subr.bf16.mxu0 %v2834_v29  ;;  %v3356_v24 = vsel %vm3111_vm5, %v1063_v15, %v1067_v21  ;;  %v2877_v29 = vld [vmem:[%s3537_s2 + $0x380] sm:$0xff]   ;;  %v2910_v15 = vld [vmem:[%s3537_s2 + $0x448] sm:$0xff]   ;;  %v2914_v21 = vld [vmem:[%s3537_s2 + $0x458] sm:$0xff]  }
  0x3f   : > { %2632 = vmatprep.subr.bf16.mxu1 %v2836_v27  ;;  %v2376_v27 = vcombine.low %v3149_v7, %v3349_v22  ;;  %v2880_v7 = vld [vmem:[%s3537_s2 + $0x3c8] sm:$0xff]  }
  0x41   : > { %2611 = vmatpush3.bf16.msra.mxu0 %v2835_v30  ;;  %v2325_v30 = vcombine.low %v3137_v2, %v3356_v24 }
  0x42   : > { %2633 = vmatpush3.bf16.msra.mxu1 %v2837_v28  ;;  %2612 = vmatprep.subr.bf16.mxu0 %v2838_v33  ;;  %v2326_v28 = vcombine.high %v3137_v2, %v3356_v24  ;;  %v2881_v2 = vld [vmem:[%s3537_s2 + $0x388] sm:$0xff]  }
  0x43   : > { %2634 = vmatprep.subr.bf16.mxu1 %v2840_v31  ;;  %v2875_v31 = vld [vmem:[%s3537_s2 + $0x300] sm:$0xff]   ;;  %v2879_v33 = vld [vmem:[%s3537_s2 + $0x308] sm:$0xff]  }
  0x45   : > { %2613 = vmatpush3.bf16.msra.mxu0 %v2839_v36  ;;  %v2884_v36 = vld [vmem:[%s3537_s2 + $0x3d0] sm:$0xff]  }
  0x46   : > { %2635 = vmatpush3.bf16.msra.mxu1 %v2841_v32  ;;  %2642 = vmatprep.subr.bf16.mxu0 %v2842_v41  ;;  %v2878_v32 = vld [vmem:[%s3537_s2 + $0x348] sm:$0xff]   ;;  %v2886_v41 = vld [vmem:[%s3537_s2 + $0x358] sm:$0xff]  }
  0x47   : > { %2664 = vmatprep.subr.bf16.mxu1 %v2844_v39  ;;  %v2883_v39 = vld [vmem:[%s3537_s2 + $0x310] sm:$0xff]  }
  0x48   : > { %866 = vmatmul.mubr.bf16.vlgmr.msra.gmra.mrb[4].mxu0 %v2225_v42  ;;  %v2887_v42 = vld [vmem:[%s3537_s2 + $0x318] sm:$0xff]  }
  0x49   : > { %1045 = vmatmul.mubr.bf16.vlgmr.msra.gmra.mrb[4].mxu1 %v2275_v38  ;;  %2643 = vmatpush3.bf16.msra.mxu0 %v2843_v34  ;;  %v2885_v38 = vld [vmem:[%s3537_s2 + $0x390] sm:$0xff]   ;;  %v2889_v34 = vld [vmem:[%s3537_s2 + $0x398] sm:$0xff]  }
  0x4a   : > { %2665 = vmatpush3.bf16.msra.mxu1 %v2845_v40  ;;  %2644 = vmatprep.subr.bf16.mxu0 %v2846_v45  ;;  %v2888_v40 = vld [vmem:[%s3537_s2 + $0x3d8] sm:$0xff]   ;;  %v2893_v45 = vld [vmem:[%s3537_s2 + $0x3a0] sm:$0xff]  }
  0x4b   : > { %2666 = vmatprep.subr.bf16.mxu1 %v2848_v43  ;;  %1419 = vmatprep.mubr.bf16.mxu1 %v2377_v26  ;;  %v2892_v43 = vld [vmem:[%s3537_s2 + $0x3e0] sm:$0xff]   ;;  %v2918_v26 = vld [vmem:[%s3537_s2 + $0x468] sm:$0xff]  }
  0x4c   : > { %1236 = vmatprep.mubr.bf16.mxu0 %v2326_v28  ;;  %v2920_v28 = vld [vmem:[%s3537_s2 + $0x470] sm:$0xff]  }
  0x4d   : > { %2645 = vmatpush3.bf16.msra.mxu0 %v2847_v46  ;;  %v2891_v46 = vld [vmem:[%s3537_s2 + $0x320] sm:$0xff]  }
  0x4e   : > { %2667 = vmatpush3.bf16.msra.mxu1 %v2849_v44  ;;  %2646 = vmatprep.subr.bf16.mxu0 %v2850_v51  ;;  %v2890_v44 = vld [vmem:[%s3537_s2 + $0x360] sm:$0xff]   ;;  %v2897_v51 = vld [vmem:[%s3537_s2 + $0x3a8] sm:$0xff]  }
  0x4f   : > { %2668 = vmatprep.subr.bf16.mxu1 %v2852_v49  ;;  %v2896_v49 = vld [vmem:[%s3537_s2 + $0x3e8] sm:$0xff]  }
  0x51   : > { %2647 = vmatpush3.bf16.msra.mxu0 %v2851_v52  ;;  %v2895_v52 = vld [vmem:[%s3537_s2 + $0x328] sm:$0xff]  }
  0x52   : > { %2669 = vmatpush3.bf16.msra.mxu1 %v2853_v50  ;;  %2648 = vmatprep.subr.bf16.mxu0 %v2854_v55  ;;  %v2894_v50 = vld [vmem:[%s3537_s2 + $0x368] sm:$0xff]   ;;  %v2901_v55 = vld [vmem:[%s3537_s2 + $0x3b0] sm:$0xff]  }
  0x53   : > { %2670 = vmatprep.subr.bf16.mxu1 %v2856_v53  ;;  %v2900_v53 = vld [vmem:[%s3537_s2 + $0x3f0] sm:$0xff]  }
  0x55   : > { %2649 = vmatpush3.bf16.msra.mxu0 %v2855_v56  ;;  %v2899_v56 = vld [vmem:[%s3537_s2 + $0x330] sm:$0xff]  }
  0x56   : > { %2671 = vmatpush3.bf16.msra.mxu1 %v2857_v54  ;;  %2650 = vmatprep.subr.bf16.mxu0 %v2858_v61  ;;  %v2898_v54 = vld [vmem:[%s3537_s2 + $0x370] sm:$0xff]  }
  0x57   : > { %2672 = vmatprep.subr.bf16.mxu1 %v2860_v58  ;;  %v293_v58 = vld [vmem:[%s3221_s11 + $0x10] sm:$0xff] }
  0x58   : > { %v1610_v61 = vshrl.u32 %v293_v58, 16 }
  0x59   : > { %2651 = vmatpush3.bf16.msra.mxu0 %v2859_v62  ;;  %v2906_v62 = vld [vmem:[%s3537_s2 + $0x3b8] sm:$0xff]  }
  0x5a   : > { %2673 = vmatpush3.bf16.msra.mxu1 %v2861_v60  ;;  %2652 = vmatprep.subr.bf16.mxu0 %v2862_v4  ;;  %v2427_v60 = vcombine.high %v3236_v35, %v293_v58  ;;  %v1612_v1 = vrot.slane %v1610_v61, 4  ;;  %v2903_v4 = vld [vmem:[%s3537_s2 + $0x338] sm:$0xff]  }
  0x5b   : > { %2674 = vmatprep.subr.bf16.mxu1 %v2864_v0  ;;  %v1613_v0 = vshll.u32 %v293_v58, 16 }
  0x5d   : > { %2653 = vmatpush3.bf16.msra.mxu0 %v2863_v5  ;;  %v1615_v5 = vrot.slane %v1613_v0, 5 }
  0x5e   : > { %2675 = vmatpush3.bf16.msra.mxu1 %v2865_v3  ;;  %2654 = vmatprep.subr.bf16.mxu0 %v2866_v10  ;;  %v1619_v3 = vshll.u32 %v294_v63, 16  ;;  %v2494_v10 = vrot.slane %v293_v58, 9 }
  0x5f   : > { %2676 = vmatprep.subr.bf16.mxu1 %v2868_v6  ;;  %v2908_v6 = vld [vmem:[%s3537_s2 + $0x440] sm:$0xff]   ;;  %v1616_v8 = vor.u32 %v1615_v5, %v1612_v1 }
  0x60   : > { %v1805_v16 = vsel %vm3106_vm4, %v2494_v10, %v1804_v12 }
  0x61   : > { %2655 = vmatpush3.bf16.msra.mxu0 %v2867_v11  ;;  %v2426_v11 = vcombine.low %v3236_v35, %v293_v58  ;;  %v2528_v35 = vcombine.high %v3349_v22, %v1805_v16 }
  0x62   : > { %2677 = vmatpush3.bf16.msra.mxu1 %v2869_v9  ;;  %2656 = vmatprep.subr.bf16.mxu0 %v2870_v13  ;;  %v1621_v9 = vrot.slane %v1619_v3, 5  ;;  %v1617_v13 = vrot.slane %v1616_v8, 4 }
  0x63   : > { %2678 = vmatprep.subr.bf16.mxu1 %v2872_v14  ;;  %v2909_v14 = vld [vmem:[%s3537_s2 + $0x400] sm:$0xff]  }
  0x64   : > { %v1622_v17 = vsel %vm3111_vm5, %v1617_v13, %v1621_v9 }
  0x65   : > { %2657 = vmatpush3.bf16.msra.mxu0 %v2871_v20  ;;  %v2477_v19 = vcombine.high %v3356_v24, %v1622_v17  ;;  %v2911_v20 = vld [vmem:[%s3537_s2 + $0x408] sm:$0xff]  }
  0x66   : > { %2679 = vmatpush3.bf16.msra.mxu1 %v2873_v18  ;;  %2686 = vmatprep.subr.bf16.mxu0 %v2874_v25  ;;  %v2476_v18 = vcombine.low %v3356_v24, %v1622_v17  ;;  %v2916_v24 = vld [vmem:[%s3537_s2 + $0x460] sm:$0xff]  }
  0x67   : > { %2708 = vmatprep.subr.bf16.mxu1 %v2876_v23  ;;  %v2915_v23 = vld [vmem:[%s3537_s2 + $0x418] sm:$0xff]   ;;  %v2917_v25 = vld [vmem:[%s3537_s2 + $0x420] sm:$0xff]  }
  0x68   : > { %1237 = vmatmul.mubr.bf16.vlgmr.msra.gmra.mrb[8].mxu0 %v2325_v30  ;;  %v2922_v30 = vld [vmem:[%s3537_s2 + $0x478] sm:$0xff]  }
  0x69   : > { %1420 = vmatmul.mubr.bf16.vlgmr.msra.gmra.mrb[8].mxu1 %v2376_v27  ;;  %2687 = vmatpush3.bf16.msra.mxu0 %v2875_v31  ;;  %v2919_v27 = vld [vmem:[%s3537_s2 + $0x428] sm:$0xff]   ;;  %v2923_v31 = vld [vmem:[%s3537_s2 + $0x438] sm:$0xff]  }
  0x6a   : > { %2709 = vmatpush3.bf16.msra.mxu1 %v2877_v29  ;;  %2688 = vmatprep.subr.bf16.mxu0 %v2878_v32  ;;  %v2921_v29 = vld [vmem:[%s3537_s2 + $0x430] sm:$0xff]  }
  0x6b   : > { %2710 = vmatprep.subr.bf16.mxu1 %v2880_v7  ;;  %1598 = vmatprep.mubr.bf16.mxu0 %v2427_v60  ;;  %v2527_v7 = vcombine.low %v3349_v22, %v1805_v16 }
  0x6c   : > { %1790 = vmatprep.mubr.bf16.mxu1 %v2477_v19 }
  0x6d   : > { %2689 = vmatpush3.bf16.msra.mxu0 %v2879_v33 }
  0x6e   : > { %2711 = vmatpush3.bf16.msra.mxu1 %v2881_v2  ;;  %2690 = vmatprep.subr.bf16.mxu0 %v2882_v37 }
  0x6f   : > { %2712 = vmatprep.subr.bf16.mxu1 %v2884_v36 }
  0x71   : > { %2691 = vmatpush3.bf16.msra.mxu0 %v2883_v39 }
  0x72   : > { %2713 = vmatpush3.bf16.msra.mxu1 %v2885_v38  ;;  %2692 = vmatprep.subr.bf16.mxu0 %v2886_v41 }
  0x73   : > { %2714 = vmatprep.subr.bf16.mxu1 %v2888_v40 }
  0x75   : > { %2693 = vmatpush3.bf16.msra.mxu0 %v2887_v42 }
  0x76   : > { %2715 = vmatpush3.bf16.msra.mxu1 %v2889_v34  ;;  %2694 = vmatprep.subr.bf16.mxu0 %v2890_v44 }
  0x77   : > { %2716 = vmatprep.subr.bf16.mxu1 %v2892_v43 }
  0x79   : > { %2695 = vmatpush3.bf16.msra.mxu0 %v2891_v46 }
  0x7a   : > { %2717 = vmatpush3.bf16.msra.mxu1 %v2893_v45  ;;  %2696 = vmatprep.subr.bf16.mxu0 %v2894_v50 }
  0x7b   : > { %2718 = vmatprep.subr.bf16.mxu1 %v2896_v49 }
  0x7d   : > { %2697 = vmatpush3.bf16.msra.mxu0 %v2895_v52 }
  0x7e   : > { %2719 = vmatpush3.bf16.msra.mxu1 %v2897_v51  ;;  %2698 = vmatprep.subr.bf16.mxu0 %v2898_v54 }
  0x7f   : > { %2720 = vmatprep.subr.bf16.mxu1 %v2900_v53 }
  0x81   : > { %2699 = vmatpush3.bf16.msra.mxu0 %v2899_v56 }
  0x82   : > { %2721 = vmatpush3.bf16.msra.mxu1 %v2901_v55  ;;  %2700 = vmatprep.subr.bf16.mxu0 %v2902_v59 }
  0x83   : > { %2722 = vmatprep.subr.bf16.mxu1 %v2904_v57 }
  0x85   : > { %2701 = vmatpush3.bf16.msra.mxu0 %v2903_v4 }
  0x86   : > { %2723 = vmatpush3.bf16.msra.mxu1 %v2906_v62  ;;  %2730 = vmatprep.subr.bf16.mxu0 %v2908_v6 }
  0x88   : > { %1599 = vmatmul.mubr.bf16.vlgmr.msra.gmra.mrb[12].mxu0 %v2426_v11 }
  0x89   : > { %2731 = vmatpush3.bf16.msra.mxu0 %v2909_v14  ;;  %1973 = vmatprep.mubr.bf16.mxu0 %v2528_v35 }
  0x8a   : > { %2732 = vmatprep.subr.bf16.mxu0 %v2910_v15  ;;  %1791 = vmatmul.mubr.bf16.vlgmr.msra.gmra.mrb[12].mxu1 %v2476_v18 }
  0x8d   : > { %2733 = vmatpush3.bf16.msra.mxu0 %v2911_v20 }
  0x8e   : > { %2734 = vmatprep.subr.bf16.mxu0 %v2912_v47 }
  0x91   : > { %2735 = vmatpush3.bf16.msra.mxu0 %v2913_v48 }
  0x92   : > { %2736 = vmatprep.subr.bf16.mxu0 %v2914_v21 }
  0x95   : > { %2737 = vmatpush3.bf16.msra.mxu0 %v2915_v23 }
  0x96   : > { %2738 = vmatprep.subr.bf16.mxu0 %v2916_v24 }
  0x99   : > { %2739 = vmatpush3.bf16.msra.mxu0 %v2917_v25 }
  0x9a   : > { %2740 = vmatprep.subr.bf16.mxu0 %v2918_v26 }
  0x9d   : > { %2741 = vmatpush3.bf16.msra.mxu0 %v2919_v27 }
  0x9e   : > { %2742 = vmatprep.subr.bf16.mxu0 %v2920_v28 }
  0xa1   : > { %2743 = vmatpush3.bf16.msra.mxu0 %v2921_v29 }
  0xa2   : > { %2744 = vmatprep.subr.bf16.mxu0 %v2922_v30 }
  0xa5   : > { %2745 = vmatpush3.bf16.msra.mxu0 %v2923_v31 }
  0xa8   : > { %1974 = vmatmul.mubr.bf16.vlgmr.msra.gmra.mrb[16].mxu0 %v2527_v7 }
  0xfb   : > { %v2570_v39 = vpop.f32.mrb[0].mxu0 }
  0xfc   : > { %v2592_v32 = vpop.f32.mrb[0].mxu1  ;;  %v2571_v40 = vpop.f32.mrb[1].mxu0 }
  0xfd   : > { %v2593_v2 = vpop.f32.mrb[1].mxu1  ;;  %v2572_v41 = vadd.f32 %v2571_v40, %v2570_v39  ;;  %v2573_v34 = vpop.f32.mrb[2].mxu0 }
  0xfe   : > { %v2594_v33 = vadd.f32 %v2593_v2, %v2592_v32  ;;  %v2595_v36 = vpop.f32.mrb[2].mxu1  ;;  %v2574_v42 = vpop.f32.mrb[3].mxu0 }
  0xff   : > { %v2596_v37 = vpop.f32.mrb[3].mxu1  ;;  %v2575_v44 = vadd.f32 %v2574_v42, %v2573_v34 }
 0x100   : > { %v2597_v38 = vadd.f32 %v2596_v37, %v2595_v36  ;;  %v677_v43 = vadd.f32 %v2594_v33, %v2572_v41  ;;  %v2545_v33 = vld [vmem:[%s3538_s3] ss:$0 sm:$0xff] }
 0x102   : > { %v680_v45 = vadd.f32 %v2597_v38, %v2575_v44 }
 0x11b   : > { %v2614_v53 = vpop.f32.mrb[4].mxu0 }
 0x11c   : > { %v2636_v46 = vpop.f32.mrb[4].mxu1  ;;  %v2615_v54 = vpop.f32.mrb[5].mxu0 }
 0x11d   : > { %v2637_v49 = vpop.f32.mrb[5].mxu1  ;;  %v2616_v55 = vadd.f32 %v2615_v54, %v2614_v53  ;;  %v2617_v56 = vpop.f32.mrb[6].mxu0 }
 0x11e   : > { %v2638_v50 = vadd.f32 %v2637_v49, %v2636_v46  ;;  %v2639_v22 = vpop.f32.mrb[6].mxu1  ;;  %v2618_v57 = vpop.f32.mrb[7].mxu0 }
 0x11f   : > { %v2640_v51 = vpop.f32.mrb[7].mxu1  ;;  %v874_v58 = vadd.f32 %v2616_v55, %v677_v43  ;;  %v2619_v59 = vadd.f32 %v2618_v57, %v2617_v56 }
 0x120   : > { %v2641_v52 = vadd.f32 %v2640_v51, %v2639_v22 }
 0x121   : > { %v875_v60 = vadd.f32 %v2619_v59, %v680_v45  ;;  %v1053_v61 = vadd.f32 %v2638_v50, %v874_v58 }
 0x123   : > { %v1054_v62 = vadd.f32 %v2641_v52, %v875_v60 }
 0x13b   : > { %v2658_v1 = vpop.f32.mrb[8].mxu0 }
 0x13c   : > { %v2680_v63 = vpop.f32.mrb[8].mxu1  ;;  %v2659_v5 = vpop.f32.mrb[9].mxu0 }
 0x13d   : > { %v2681_v0 = vpop.f32.mrb[9].mxu1  ;;  %v2660_v8 = vadd.f32 %v2659_v5, %v2658_v1  ;;  %v2661_v9 = vpop.f32.mrb[10].mxu0 }
 0x13e   : > { %v2682_v3 = vadd.f32 %v2681_v0, %v2680_v63  ;;  %v2683_v4 = vpop.f32.mrb[10].mxu1  ;;  %v2662_v11 = vpop.f32.mrb[11].mxu0 }
 0x13f   : > { %v2684_v6 = vpop.f32.mrb[11].mxu1  ;;  %v1245_v12 = vadd.f32 %v2660_v8, %v1053_v61  ;;  %v2663_v13 = vadd.f32 %v2662_v11, %v2661_v9 }
 0x140   : > { %v2685_v10 = vadd.f32 %v2684_v6, %v2683_v4 }
 0x141   : > { %v1246_v14 = vadd.f32 %v2663_v13, %v1054_v62  ;;  %v1428_v15 = vadd.f32 %v2682_v3, %v1245_v12 }
 0x143   : > { %v1429_v16 = vadd.f32 %v2685_v10, %v1246_v14 }
 0x15b   : > { %v2702_v17 = vpop.f32.mrb[12].mxu0 }
 0x15c   : > { %v2703_v35 = vpop.f32.mrb[13].mxu0 }
 0x15d   : > { %v2704_v18 = vadd.f32 %v2703_v35, %v2702_v17  ;;  %v2705_v19 = vpop.f32.mrb[14].mxu0  ;;  %v2724_v20 = vpop.f32.mrb[12].mxu1 }
 0x15e   : > { %v2706_v47 = vpop.f32.mrb[15].mxu0  ;;  %v2725_v23 = vpop.f32.mrb[13].mxu1 }
 0x15f   : > { %v1607_v48 = vadd.f32 %v2704_v18, %v1428_v15  ;;  %v2707_v21 = vadd.f32 %v2706_v47, %v2705_v19  ;;  %v2726_v24 = vadd.f32 %v2725_v23, %v2724_v20  ;;  %v2727_v25 = vpop.f32.mrb[14].mxu1 }
 0x160   : > { %v2728_v27 = vpop.f32.mrb[15].mxu1 }
 0x161   : > { %v1608_v26 = vadd.f32 %v2707_v21, %v1429_v16  ;;  %v1799_v28 = vadd.f32 %v2726_v24, %v1607_v48  ;;  %v2729_v29 = vadd.f32 %v2728_v27, %v2727_v25 }
 0x163   : > { %v1800_v30 = vadd.f32 %v2729_v29, %v1608_v26 }
 0x17b   : > { %v2746_v31 = vpop.f32.mrb[16].mxu0 }
 0x17c   : > { %v2747_v7 = vpop.f32.mrb[17].mxu0 }
 0x17d   : > { %v2748_v32 = vadd.f32 %v2747_v7, %v2746_v31  ;;  %v2749_v2 = vpop.f32.mrb[18].mxu0 }
 0x17e   : > { %v2750_v36 = vpop.f32.mrb[19].mxu0 }
 0x17f   : > { %v1982_v37 = vadd.f32 %v2748_v32, %v1799_v28  ;;  %v2751_v38 = vadd.f32 %v2750_v36, %v2749_v2 }
 0x181   : > { %v1991_v39 = vadd.f32 %v2545_v33, %v1982_v37  ;;  %v1983_v40 = vadd.f32 %v2751_v38, %v1800_v30 }
 0x183   : > { %v1992_v41 = vmax.f32 %v1991_v39, 0.0  ;;  %v1996_v34 = vadd.f32 %v2545_v33, %v1983_v40 }
 0x185   : > { %v1993_v42 = vpack.c.bf16 %v1992_v41, %v1992_v41  ;;  %v1997_v43 = vmax.f32 %v1996_v34, 0.0 }
 0x187   : > { %1995 = vst.msk [vmem:[%s284_s20] sm:$0xf] %vm1994_vm6, %v1993_v42  ;;  %v1998_v44 = vpack.c.bf16 %v1997_v43, %v1997_v43 }
 0x189   : > { %2546 = vst.msk [vmem:[%s284_s20 + $0x4] sm:$0xf] %vm1994_vm6, %v1998_v44 }
 0x18a PF: > { %s14_s17 = sadd.s32 1, %s2946_s17   ;;  %s3544_s15 = smov %s2942_s16 }
 0x18b   : > { %p11_p5 = scmp.ge.s32.totalorder %s14_s17, 4   ;;  %s3545_s16 = smov %s3547_s18 }
 0x18d   :  { %13 = sbr.rel (!%p11_p5) target bundleno = 2 (0x2), region = 78 }

// kernel: denoising_cnn_512_forward.14
= control target key start
LH: loop header
LB: loop body
LE: loop exit
PB: predicated region body
PF: predicated region fallthrough
CT: control target
= control target key end

     0   :  { %s928_s1 = inlined_call_operand.vmem [shape: bf16[256,512], index: 1, kind: input, shape index: {}]   ;;  %s929_s0 = inlined_call_operand.vmem [shape: bf16[8,256], index: 0, kind: input, shape index: {}]   ;;  %s930_s2 = inlined_call_operand.vmem [shape: f32[1,512], index: 2, kind: input, shape index: {}]   ;;  %s931_s3 = inlined_call_operand.vmem [shape: bf16[8,512], index: 3, kind: output, shape index: {}]  }
   0x1   :  { %v606_v0 = vld [vmem:[%s928_s1 + $0x4] ss:$16 sps:$4 sm:$0xff]   ;;  %v608_v1 = vld [vmem:[%s928_s1 + $0xc] ss:$16 sps:$4 sm:$0xff]   ;;  %v610_v2 = vld [vmem:[%s928_s1] ss:$16 sps:$4 sm:$0xff]  }
   0x2   :  { %428 = vmatprep.subr.bf16.mxu0 %v606_v0  ;;  %v611_v3 = vld [vmem:[%s928_s1 + $0x8] ss:$16 sps:$4 sm:$0xff]   ;;  %469 = vmatprep.subr.bf16.mxu1 %v608_v1  ;;  %v612_v4 = vld [vmem:[%s928_s1 + $0x24] ss:$16 sps:$4 sm:$0xff]   ;;  %v614_v5 = vld [vmem:[%s928_s1 + $0x2c] ss:$16 sps:$4 sm:$0xff]  }
   0x3   :  { %429 = vmatpush1.bf16.msra.mxu0 %v610_v2  ;;  %470 = vmatpush1.bf16.msra.mxu1 %v611_v3  ;;  %v616_v6 = vld [vmem:[%s928_s1 + $0x20] ss:$16 sps:$4 sm:$0xff]   ;;  %v617_v7 = vld [vmem:[%s928_s1 + $0x28] ss:$16 sps:$4 sm:$0xff]   ;;  %v618_v8 = vld [vmem:[%s928_s1 + $0x44] ss:$16 sps:$4 sm:$0xff]   ;;  %v81_v3 = vlaneseq }
   0x4   :  { %430 = vmatprep.subr.bf16.mxu0 %v612_v4  ;;  %471 = vmatprep.subr.bf16.mxu1 %v614_v5  ;;  %v620_v9 = vld [vmem:[%s928_s1 + $0x4c] ss:$16 sps:$4 sm:$0xff]   ;;  %v622_v10 = vld [vmem:[%s928_s1 + $0x40] ss:$16 sps:$4 sm:$0xff]   ;;  %v623_v11 = vld [vmem:[%s928_s1 + $0x48] ss:$16 sps:$4 sm:$0xff]  }
   0x5   :  { %v624_v12 = vld [vmem:[%s928_s1 + $0x64] ss:$16 sps:$4 sm:$0xff]   ;;  %v626_v13 = vld [vmem:[%s928_s1 + $0x6c] ss:$16 sps:$4 sm:$0xff]   ;;  %v628_v14 = vld [vmem:[%s928_s1 + $0x60] ss:$16 sps:$4 sm:$0xff]  }
   0x6   :  { %v629_v15 = vld [vmem:[%s928_s1 + $0x68] ss:$16 sps:$4 sm:$0xff]   ;;  %v630_v16 = vld [vmem:[%s928_s1 + $0x84] ss:$16 sps:$4 sm:$0xff]   ;;  %v632_v17 = vld [vmem:[%s928_s1 + $0x8c] ss:$16 sps:$4 sm:$0xff]  }
   0x7   :  { %431 = vmatpush1.bf16.msra.mxu0 %v616_v6  ;;  %472 = vmatpush1.bf16.msra.mxu1 %v617_v7  ;;  %v634_v18 = vld [vmem:[%s928_s1 + $0x80] ss:$16 sps:$4 sm:$0xff]   ;;  %v635_v19 = vld [vmem:[%s928_s1 + $0x88] ss:$16 sps:$4 sm:$0xff]   ;;  %v636_v20 = vld [vmem:[%s928_s1 + $0xa4] ss:$16 sps:$4 sm:$0xff]  }
   0x8   :  { %432 = vmatprep.subr.bf16.mxu0 %v618_v8  ;;  %473 = vmatprep.subr.bf16.mxu1 %v620_v9  ;;  %v638_v21 = vld [vmem:[%s928_s1 + $0xac] ss:$16 sps:$4 sm:$0xff]   ;;  %v640_v22 = vld [vmem:[%s928_s1 + $0xa0] ss:$16 sps:$4 sm:$0xff]   ;;  %v641_v23 = vld [vmem:[%s928_s1 + $0xa8] ss:$16 sps:$4 sm:$0xff]  }
   0x9   :  { %v642_v24 = vld [vmem:[%s928_s1 + $0xc4] ss:$16 sps:$4 sm:$0xff]   ;;  %v644_v25 = vld [vmem:[%s928_s1 + $0xcc] ss:$16 sps:$4 sm:$0xff]   ;;  %v646_v26 = vld [vmem:[%s928_s1 + $0xc0] ss:$16 sps:$4 sm:$0xff]  }
   0xa   :  { %v647_v27 = vld [vmem:[%s928_s1 + $0xc8] ss:$16 sps:$4 sm:$0xff]   ;;  %v648_v28 = vld [vmem:[%s928_s1 + $0xe4] ss:$16 sps:$4 sm:$0xff]   ;;  %v650_v29 = vld [vmem:[%s928_s1 + $0xec] ss:$16 sps:$4 sm:$0xff]  }
   0xb   :  { %433 = vmatpush1.bf16.msra.mxu0 %v622_v10  ;;  %474 = vmatpush1.bf16.msra.mxu1 %v623_v11  ;;  %v652_v30 = vld [vmem:[%s928_s1 + $0xe0] ss:$16 sps:$4 sm:$0xff]   ;;  %v653_v31 = vld [vmem:[%s928_s1 + $0xe8] ss:$16 sps:$4 sm:$0xff]   ;;  %v654_v32 = vld [vmem:[%s928_s1 + $0x104] ss:$16 sps:$4 sm:$0xff]  }
   0xc   :  { %434 = vmatprep.subr.bf16.mxu0 %v624_v12  ;;  %475 = vmatprep.subr.bf16.mxu1 %v626_v13  ;;  %v656_v33 = vld [vmem:[%s928_s1 + $0x10c] ss:$16 sps:$4 sm:$0xff]   ;;  %v658_v34 = vld [vmem:[%s928_s1 + $0x100] ss:$16 sps:$4 sm:$0xff]   ;;  %v659_v35 = vld [vmem:[%s928_s1 + $0x108] ss:$16 sps:$4 sm:$0xff]  }
   0xd   :  { %v660_v36 = vld [vmem:[%s928_s1 + $0x124] ss:$16 sps:$4 sm:$0xff]   ;;  %v662_v37 = vld [vmem:[%s928_s1 + $0x12c] ss:$16 sps:$4 sm:$0xff]   ;;  %v664_v38 = vld [vmem:[%s928_s1 + $0x120] ss:$16 sps:$4 sm:$0xff]  }
   0xe   :  { %v665_v39 = vld [vmem:[%s928_s1 + $0x128] ss:$16 sps:$4 sm:$0xff]   ;;  %v666_v40 = vld [vmem:[%s928_s1 + $0x144] ss:$16 sps:$4 sm:$0xff]   ;;  %v668_v41 = vld [vmem:[%s928_s1 + $0x14c] ss:$16 sps:$4 sm:$0xff]  }
   0xf   :  { %435 = vmatpush1.bf16.msra.mxu0 %v628_v14  ;;  %476 = vmatpush1.bf16.msra.mxu1 %v629_v15  ;;  %v670_v42 = vld [vmem:[%s928_s1 + $0x140] ss:$16 sps:$4 sm:$0xff]   ;;  %v671_v43 = vld [vmem:[%s928_s1 + $0x148] ss:$16 sps:$4 sm:$0xff]   ;;  %v672_v44 = vld [vmem:[%s928_s1 + $0x164] ss:$16 sps:$4 sm:$0xff]  }
  0x10   :  { %436 = vmatprep.subr.bf16.mxu0 %v630_v16  ;;  %477 = vmatprep.subr.bf16.mxu1 %v632_v17  ;;  %v674_v45 = vld [vmem:[%s928_s1 + $0x16c] ss:$16 sps:$4 sm:$0xff]   ;;  %v14_v46 = vld [vmem:[%s929_s0] sm:$0xff]  ;;  %v677_v49 = vld [vmem:[%s928_s1 + $0x168] ss:$16 sps:$4 sm:$0xff]   ;;  %v82_v4 = vshrl.u32 %v81_v3, 7 }
  0x11   :  { %v537_v47 = vcombine.high %v14_v46, %v14_v46  ;;  %v676_v48 = vld [vmem:[%s928_s1 + $0x160] ss:$16 sps:$4 sm:$0xff]   ;;  %v678_v50 = vld [vmem:[%s928_s1 + $0x184] ss:$16 sps:$4 sm:$0xff]   ;;  %v680_v51 = vld [vmem:[%s928_s1 + $0x18c] ss:$16 sps:$4 sm:$0xff]   ;;  %v536_v2 = vcombine.low %v14_v46, %v14_v46 }
  0x12   :  { %v682_v52 = vld [vmem:[%s928_s1 + $0x180] ss:$16 sps:$4 sm:$0xff]   ;;  %v683_v53 = vld [vmem:[%s928_s1 + $0x188] ss:$16 sps:$4 sm:$0xff]   ;;  %v684_v54 = vld [vmem:[%s928_s1 + $0x1a4] ss:$16 sps:$4 sm:$0xff]  }
  0x13   :  { %437 = vmatpush1.bf16.msra.mxu0 %v634_v18  ;;  %478 = vmatpush1.bf16.msra.mxu1 %v635_v19  ;;  %v686_v55 = vld [vmem:[%s928_s1 + $0x1ac] ss:$16 sps:$4 sm:$0xff]   ;;  %v688_v56 = vld [vmem:[%s928_s1 + $0x1a0] ss:$16 sps:$4 sm:$0xff]   ;;  %v689_v57 = vld [vmem:[%s928_s1 + $0x1a8] ss:$16 sps:$4 sm:$0xff]  }
  0x14   :  { %438 = vmatprep.subr.bf16.mxu0 %v636_v20  ;;  %479 = vmatprep.subr.bf16.mxu1 %v638_v21  ;;  %v690_v58 = vld [vmem:[%s928_s1 + $0x1c4] ss:$16 sps:$4 sm:$0xff]   ;;  %v692_v59 = vld [vmem:[%s928_s1 + $0x1cc] ss:$16 sps:$4 sm:$0xff]   ;;  %v694_v60 = vld [vmem:[%s928_s1 + $0x1c0] ss:$16 sps:$4 sm:$0xff]  }
  0x15   :  { %460 = vmatprep.mubr.bf16.mxu0 %v537_v47  ;;  %501 = vmatprep.mubr.bf16.mxu1 %v537_v47  ;;  %v695_v61 = vld [vmem:[%s928_s1 + $0x1c8] ss:$16 sps:$4 sm:$0xff]   ;;  %v696_v62 = vld [vmem:[%s928_s1 + $0x1e4] ss:$16 sps:$4 sm:$0xff]   ;;  %v698_v63 = vld [vmem:[%s928_s1 + $0x1ec] ss:$16 sps:$4 sm:$0xff]  }
  0x16   :  { %v700_v0 = vld [vmem:[%s928_s1 + $0x1e0] ss:$16 sps:$4 sm:$0xff]   ;;  %v701_v1 = vld [vmem:[%s928_s1 + $0x1e8] ss:$16 sps:$4 sm:$0xff]   ;;  %v83_v5 = vsub.s32 0, %v82_v4  ;;  %v91_v6 = vsub.s32 2, %v82_v4 }
  0x17   :  { %439 = vmatpush1.bf16.msra.mxu0 %v640_v22  ;;  %480 = vmatpush1.bf16.msra.mxu1 %v641_v23  ;;  %v79_v7 = vld [vmem:[%s930_s2] sm:$0xf]  ;;  %v87_v8 = vsub.s32 1, %v82_v4  ;;  %v95_v9 = vsub.s32 3, %v82_v4 }
  0x18   :  { %440 = vmatprep.subr.bf16.mxu0 %v642_v24  ;;  %481 = vmatprep.subr.bf16.mxu1 %v644_v25  ;;  %v84_v10 = vrot.slane %v79_v7, %v83_v5  ;;  %v92_v11 = vrot.slane %v79_v7, %v91_v6 }
  0x19   :  { %v88_v12 = vrot.slane %v79_v7, %v87_v8  ;;  %v96_v13 = vrot.slane %v79_v7, %v95_v9 }
  0x1b   :  { %441 = vmatpush1.bf16.msra.mxu0 %v646_v26  ;;  %482 = vmatpush1.bf16.msra.mxu1 %v647_v27 }
  0x1c   :  { %442 = vmatprep.subr.bf16.mxu0 %v648_v28  ;;  %483 = vmatprep.subr.bf16.mxu1 %v650_v29 }
  0x1f   :  { %443 = vmatpush1.bf16.msra.mxu0 %v652_v30  ;;  %484 = vmatpush1.bf16.msra.mxu1 %v653_v31 }
  0x20   :  { %444 = vmatprep.subr.bf16.mxu0 %v654_v32  ;;  %485 = vmatprep.subr.bf16.mxu1 %v656_v33 }
  0x23   :  { %445 = vmatpush1.bf16.msra.mxu0 %v658_v34  ;;  %486 = vmatpush1.bf16.msra.mxu1 %v659_v35 }
  0x24   :  { %446 = vmatprep.subr.bf16.mxu0 %v660_v36  ;;  %487 = vmatprep.subr.bf16.mxu1 %v662_v37 }
  0x27   :  { %447 = vmatpush1.bf16.msra.mxu0 %v664_v38  ;;  %488 = vmatpush1.bf16.msra.mxu1 %v665_v39 }
  0x28   :  { %448 = vmatprep.subr.bf16.mxu0 %v666_v40  ;;  %489 = vmatprep.subr.bf16.mxu1 %v668_v41 }
  0x2b   :  { %449 = vmatpush1.bf16.msra.mxu0 %v670_v42  ;;  %490 = vmatpush1.bf16.msra.mxu1 %v671_v43 }
  0x2c   :  { %450 = vmatprep.subr.bf16.mxu0 %v672_v44  ;;  %491 = vmatprep.subr.bf16.mxu1 %v674_v45 }
  0x2f   :  { %451 = vmatpush1.bf16.msra.mxu0 %v676_v48  ;;  %492 = vmatpush1.bf16.msra.mxu1 %v677_v49 }
  0x30   :  { %452 = vmatprep.subr.bf16.mxu0 %v678_v50  ;;  %493 = vmatprep.subr.bf16.mxu1 %v680_v51 }
  0x33   :  { %453 = vmatpush1.bf16.msra.mxu0 %v682_v52  ;;  %494 = vmatpush1.bf16.msra.mxu1 %v683_v53 }
  0x34   :  { %454 = vmatprep.subr.bf16.mxu0 %v684_v54  ;;  %495 = vmatprep.subr.bf16.mxu1 %v686_v55 }
  0x37   :  { %455 = vmatpush1.bf16.msra.mxu0 %v688_v56  ;;  %496 = vmatpush1.bf16.msra.mxu1 %v689_v57 }
  0x38   :  { %456 = vmatprep.subr.bf16.mxu0 %v690_v58  ;;  %497 = vmatprep.subr.bf16.mxu1 %v692_v59 }
  0x3b   :  { %457 = vmatpush1.bf16.msra.mxu0 %v694_v60  ;;  %498 = vmatpush1.bf16.msra.mxu1 %v695_v61 }
  0x3c   :  { %458 = vmatprep.subr.bf16.mxu0 %v696_v62  ;;  %499 = vmatprep.subr.bf16.mxu1 %v698_v63 }
  0x3f   :  { %459 = vmatpush1.bf16.msra.mxu0 %v700_v0  ;;  %500 = vmatpush1.bf16.msra.mxu1 %v701_v1 }
  0x42   :  { %461 = vmatmul.mubr.bf16.vlgmr.msra.gmra.mrb[0].mxu0 %v536_v2  ;;  %502 = vmatmul.mubr.bf16.vlgmr.msra.gmra.mrb[0].mxu1 %v536_v2 }
 0x115   :  { %v462_v14 = vpop.f32.mrb[0].mxu0  ;;  %v503_v15 = vpop.f32.mrb[0].mxu1 }
 0x116   :  { %v463_v16 = vadd.f32 %v462_v14, %v84_v10  ;;  %v504_v17 = vadd.f32 %v503_v15, %v92_v11  ;;  %v464_v18 = vpop.f32.mrb[1].mxu0  ;;  %v505_v19 = vpop.f32.mrb[1].mxu1 }
 0x117   :  { %v465_v20 = vadd.f32 %v464_v18, %v88_v12  ;;  %v506_v21 = vadd.f32 %v505_v19, %v96_v13  ;;  %v466_v22 = vpop.f32.mrb[2].mxu0  ;;  %v507_v23 = vpop.f32.mrb[2].mxu1 }
 0x118   :  { %v510_v24 = vmax.f32 %v463_v16, 0.0  ;;  %v512_v25 = vmax.f32 %v504_v17, 0.0  ;;  %v467_v26 = vpop.f32.mrb[3].mxu0  ;;  %v508_v27 = vpop.f32.mrb[3].mxu1 }
 0x119   :  { %v511_v28 = vmax.f32 %v465_v20, 0.0  ;;  %v513_v29 = vmax.f32 %v506_v21, 0.0 }
 0x11b   :  { %v604_v30 = vpack.c.bf16 %v511_v28, %v510_v24  ;;  %v605_v31 = vpack.c.bf16 %v513_v29, %v512_v25 }
 0x11d   :  { %530 = vst [vmem:[%s931_s3] sm:$0xff] %v604_v30  ;;  %531 = vst [vmem:[%s931_s3 + $0x8] sm:$0xff] %v605_v31 }

// kernel: tile.18
= control target key start
LH: loop header
LB: loop body
LE: loop exit
PB: predicated region body
PF: predicated region fallthrough
CT: control target
= control target key end

     0   :  { %s22_s0 = inlined_call_operand.vmem [shape: f32[64], index: 0, kind: input, shape index: {}]   ;;  %s23_s1 = inlined_call_operand.vmem [shape: f32[4,64], index: 1, kind: output, shape index: {}]  }
   0x1   :  { %v4_v0 = vld [vmem:[%s22_s0] ss:$0 sm:$0xff] }
   0x2   :  { %5 = vst [vmem:[%s23_s1] sm:$0xf] %v4_v0 }

// kernel: tile.19
= control target key start
LH: loop header
LB: loop body
LE: loop exit
PB: predicated region body
PF: predicated region fallthrough
CT: control target
= control target key end

     0   :  { %s6_s8 = smov 3  ;;  %vm8_vm0 = vcmask 523264   ;;  %s30_s9 = smov 64   ;;  %vm15_vm1 = vcmask 1048064   ;;  %s50_s0 = inlined_call_operand.vmem [shape: f32[4,64], index: 0, kind: input, shape index: {}]   ;;  %s51_s1 = inlined_call_operand.vmem [shape: f32[1,256], index: 1, kind: output, shape index: {}]  }
   0x1   :  { %v4_v0 = vld [vmem:[%s50_s0] sm:$0xf]  ;;  %s11_s0 = smov 3 }
   0x2   :  { %5 = vst [vmem:[#allocation1] sm:$0xf] %v4_v0 }
   0x9   :  { %v12_v1 = vld [vmem:[#allocation1 + $0x1] ss:$2 sm:%s11_s0]   ;;  %v7_v2 = vld [vmem:[#allocation1] ss:$2 sm:%s6_s8]  }
   0xa   :  { %13 = vrot.lane.b32.xlu0 %v12_v1, %s30_s9  ;;  %9 = vst.msk [vmem:[#allocation0] ss:$8 sm:$0x3] %vm8_vm0, %v7_v2  }
  0x7c   :  { %v14_v3 = vpop.permute.xlu0 %13  }
  0x7d   :  { %16 = vst.msk [vmem:[#allocation0] ss:$8 sm:$0x3] %vm15_vm1, %v14_v3  }
  0x84   :  { %v20_v4 = vld [vmem:[#allocation0] sm:$0x1]  ;;  %v24_v5 = vld [vmem:[#allocation0 + $0x8] sm:$0x1] }
  0x85   :  { %22 = vst [vmem:[%s51_s1] sm:$0x1] %v20_v4  ;;  %28 = vst [vmem:[%s51_s1 + $0x1] sm:$0x1] %v24_v5 }

// kernel: denoising_cnn_512_forward.15
= control target key start
LH: loop header
LB: loop body
LE: loop exit
PB: predicated region body
PF: predicated region fallthrough
CT: control target
= control target key end

     0   :  { %v702_v1 = vmov 0   ;;  %v45_v23 = vlaneseq  ;;  %vm244_vm0 = vcmask 523264   ;;  %s705_s13 = smov 4   ;;  %s706_s14 = smov 12   ;;  %vm525_vm1 = vcmask 31744   ;;  %s885_s1 = inlined_call_operand.vmem [shape: bf16[128,256], index: 1, kind: input, shape index: {}]   ;;  %s886_s0 = inlined_call_operand.vmem [shape: bf16[32,128], index: 0, kind: input, shape index: {}]   ;;  %s887_s3 = inlined_call_operand.vmem [shape: bf16[64,4], index: 3, kind: input, shape index: {}]   ;;  %s888_s2 = inlined_call_operand.vmem [shape: f32[1,256], index: 2, kind: input, shape index: {}]   ;;  %s889_s4 = inlined_call_operand.<no memory space> [shape: f32[1,1], index: 4, kind: input, shape index: {}]   ;;  %s890_s5 = inlined_call_operand.vmem [shape: f32[32,16], index: 5, kind: output, shape index: {}]  }
   0x1   :  { %v672_v0 = vld [vmem:[%s885_s1 + $0x4] ss:$8 sps:$4 sm:$0xff]   ;;  %179 = vmatprep.mubr.bf16.mxu0 %v702_v1  ;;  %671 = vset.pattern.permute.xlu0 %v702_v1  ;;  %v674_v2 = vld [vmem:[%s885_s1] ss:$8 sps:$4 sm:$0xff]   ;;  %v675_v3 = vld [vmem:[%s885_s1 + $0x14] ss:$8 sps:$4 sm:$0xff]   ;;  %v10_v58 = vstv %s889_s4 }
   0x2   :  { %147 = vmatprep.subr.bf16.mxu0 %v672_v0  ;;  %v677_v4 = vld [vmem:[%s885_s1 + $0x10] ss:$8 sps:$4 sm:$0xff]   ;;  %v678_v5 = vld [vmem:[%s885_s1 + $0x24] ss:$8 sps:$4 sm:$0xff]   ;;  %v680_v6 = vld [vmem:[%s885_s1 + $0x20] ss:$8 sps:$4 sm:$0xff]  }
   0x3   :  { %148 = vmatpush1.bf16.msra.mxu0 %v674_v2  ;;  %v681_v7 = vld [vmem:[%s885_s1 + $0x34] ss:$8 sps:$4 sm:$0xff]   ;;  %v683_v8 = vld [vmem:[%s885_s1 + $0x30] ss:$8 sps:$4 sm:$0xff]   ;;  %v684_v9 = vld [vmem:[%s885_s1 + $0x44] ss:$8 sps:$4 sm:$0xff]  }
   0x4   :  { %149 = vmatprep.subr.bf16.mxu0 %v675_v3  ;;  %v686_v10 = vld [vmem:[%s885_s1 + $0x40] ss:$8 sps:$4 sm:$0xff]   ;;  %v687_v11 = vld [vmem:[%s885_s1 + $0x54] ss:$8 sps:$4 sm:$0xff]   ;;  %v689_v12 = vld [vmem:[%s885_s1 + $0x50] ss:$8 sps:$4 sm:$0xff]  }
   0x5   :  { %v690_v13 = vld [vmem:[%s885_s1 + $0x64] ss:$8 sps:$4 sm:$0xff]   ;;  %v692_v14 = vld [vmem:[%s885_s1 + $0x60] ss:$8 sps:$4 sm:$0xff]   ;;  %v693_v15 = vld [vmem:[%s885_s1 + $0x74] ss:$8 sps:$4 sm:$0xff]  }
   0x6   :  { %v695_v16 = vld [vmem:[%s885_s1 + $0x70] ss:$8 sps:$4 sm:$0xff]   ;;  %v696_v17 = vld [vmem:[%s886_s0] sm:$0xff]   ;;  %v697_v18 = vld [vmem:[%s886_s0 + $0x8] sm:$0xff]   ;;  %v46_v24 = vshrl.u32 %v45_v23, 7  ;;  %s704_s4 = smov 8  }
   0x7   :  { %150 = vmatpush1.bf16.msra.mxu0 %v677_v4  ;;  %v794_v19 = vld [vmem:[%s887_s3] sm:$0xff]   ;;  %v803_v20 = vld [vmem:[%s887_s3 + $0x8] sm:$0xff]   ;;  %v812_v21 = vld [vmem:[%s887_s3 + $0x10] sm:$0xff]   ;;  %11 = vst [vmem:[#allocation2] sm:$0x1] %v10_v58  ;;  %vm530_vm2 = vcmask 64512  }
   0x8   :  { %151 = vmatprep.subr.bf16.mxu0 %v678_v5  ;;  %618 = vmatprep.subr.bf16.mxu1 %v794_v19  ;;  %v821_v22 = vld [vmem:[%s887_s3 + $0x18] sm:$0xff]   ;;  %v47_v25 = vsub.s32 0, %v46_v24  ;;  %v43_v26 = vld [vmem:[%s888_s2] sm:$0x3]  ;;  %v51_v27 = vsub.s32 1, %v46_v24  ;;  %s703_s2 = smov 64  }
   0x9   :  { %619 = vmatpush3.bf16.msra.mxu1 %v794_v19  ;;  %vm535_vm3 = vcmask 97280   ;;  %vm554_vm4 = vcmask 130048  }
   0xa   :  { %620 = vmatprep.subr.bf16.mxu1 %v803_v20  ;;  %v48_v28 = vrot.slane %v43_v26, %v47_v25  ;;  %v52_v29 = vrot.slane %v43_v26, %v51_v27 }
   0xb   :  { %152 = vmatpush1.bf16.msra.mxu0 %v680_v6 }
   0xc   :  { %153 = vmatprep.subr.bf16.mxu0 %v681_v7 }
   0xd   :  { %621 = vmatpush3.bf16.msra.mxu1 %v803_v20 }
   0xe   :  { %622 = vmatprep.subr.bf16.mxu1 %v812_v21  ;;  %v593_v59 = vld [vmem:[#allocation2] ss:$0 sm:$0xff] }
   0xf   :  { %154 = vmatpush1.bf16.msra.mxu0 %v683_v8 }
  0x10   :  { %155 = vmatprep.subr.bf16.mxu0 %v684_v9 }
  0x11   :  { %623 = vmatpush3.bf16.msra.mxu1 %v812_v21 }
  0x12   :  { %624 = vmatprep.subr.bf16.mxu1 %v821_v22 }
  0x13   :  { %156 = vmatpush1.bf16.msra.mxu0 %v686_v10 }
  0x14   :  { %157 = vmatprep.subr.bf16.mxu0 %v687_v11 }
  0x15   :  { %625 = vmatpush3.bf16.msra.mxu1 %v821_v22 }
  0x16   :  { %630 = vmatprep.subr.bf16.mxu1 %v794_v19 }
  0x17   :  { %158 = vmatpush1.bf16.msra.mxu0 %v689_v12 }
  0x18   :  { %159 = vmatprep.subr.bf16.mxu0 %v690_v13 }
  0x1b   :  { %160 = vmatpush1.bf16.msra.mxu0 %v692_v14 }
  0x1c   :  { %161 = vmatprep.subr.bf16.mxu0 %v693_v15 }
  0x1f   :  { %162 = vmatpush1.bf16.msra.mxu0 %v695_v16 }
  0x20   :  { %642 = vmatprep.subr.bf16.mxu0 %v794_v19 }
  0x22   :  { %180 = vmatmul.mubr.bf16.vlgmr.msra.gmra.mrb[0].mxu0 %v696_v17 }
  0x23   :  { %189 = vmatprep.mubr.bf16.mxu0 %v702_v1  ;;  %643 = vmatpush3.bf16.msra.mxu0 %v794_v19 }
  0x24   :  { %644 = vmatprep.subr.bf16.mxu0 %v803_v20 }
  0x27   :  { %645 = vmatpush3.bf16.msra.mxu0 %v803_v20 }
  0x28   :  { %646 = vmatprep.subr.bf16.mxu0 %v812_v21 }
  0x2a   :  { %190 = vmatmul.mubr.bf16.gmra.mrb[4].mxu0 %v697_v18 }
  0x2b   :  { %647 = vmatpush3.bf16.msra.mxu0 %v812_v21 }
  0x2c   :  { %648 = vmatprep.subr.bf16.mxu0 %v821_v22 }
  0x2f   :  { %649 = vmatpush3.bf16.msra.mxu0 %v821_v22 }
  0xf5   :  { %v181_v30 = vpop.f32.mrb[0].mxu0 }
  0xf6   :  { %v182_v31 = vadd.f32 %v181_v30, %v48_v28  ;;  %v183_v32 = vpop.f32.mrb[1].mxu0 }
  0xf7   :  { %v184_v33 = vadd.f32 %v183_v32, %v52_v29  ;;  %v185_v34 = vpop.f32.mrb[2].mxu0 }
  0xf8   :  { %v186_v35 = vadd.f32 %v185_v34, %v48_v28  ;;  %v187_v36 = vpop.f32.mrb[3].mxu0  ;;  %v200_v38 = vmax.f32 %v182_v31, 0.0 }
  0xf9   :  { %v188_v37 = vadd.f32 %v187_v36, %v52_v29  ;;  %v201_v40 = vmax.f32 %v184_v33, 0.0 }
  0xfa   :  { %v202_v39 = vmax.f32 %v186_v35, 0.0 }
  0xfb   :  { %v203_v41 = vmax.f32 %v188_v37, 0.0 }
  0xfc   :  { %v208_v42 = vpack.c.bf16 %v202_v39, %v200_v38 }
  0xfd   :  { %v191_v43 = vpop.f32.mrb[4].mxu0  ;;  %v209_v44 = vpack.c.bf16 %v203_v41, %v201_v40 }
  0xfe   :  { %v192_v45 = vadd.f32 %v191_v43, %v48_v28  ;;  %v193_v46 = vpop.f32.mrb[5].mxu0  ;;  %302 = vrot.lane.b32.xlu0 %v208_v42, %s703_s2  ;;  %626 = vmatprep.mubr.msk.bf16.mxu1 %vm244_vm0, %v208_v42 }
  0xff   :  { %v194_v47 = vadd.f32 %v193_v46, %v52_v29  ;;  %v195_v48 = vpop.f32.mrb[6].mxu0  ;;  %418 = vrot.lane.b32.xlu1 %v209_v44, %s703_s2  ;;  %650 = vmatprep.mubr.msk.bf16.mxu0 %vm244_vm0, %v209_v44 }
 0x100   :  { %v196_v49 = vadd.f32 %v195_v48, %v48_v28  ;;  %v197_v50 = vpop.f32.mrb[7].mxu0  ;;  %v204_v52 = vmax.f32 %v192_v45, 0.0 }
 0x101   :  { %v198_v51 = vadd.f32 %v197_v50, %v52_v29  ;;  %v205_v54 = vmax.f32 %v194_v47, 0.0 }
 0x102   :  { %v206_v53 = vmax.f32 %v196_v49, 0.0 }
 0x103   :  { %v207_v55 = vmax.f32 %v198_v51, 0.0 }
 0x104   :  { %v210_v56 = vpack.c.bf16 %v206_v53, %v204_v52 }
 0x105   :  { %v211_v57 = vpack.c.bf16 %v207_v55, %v205_v54 }
 0x106   :  { %304 = vrot.lane.b32.xlu0 %v210_v56, %s703_s2  ;;  %627 = vmatmul.mubr.msk.bf16.vlgmr.msra.gmra.mrb[0].mxu1 %vm244_vm0, %v210_v56 }
 0x107   :  { %420 = vrot.lane.b32.xlu1 %v211_v57, %s703_s2  ;;  %651 = vmatmul.mubr.msk.bf16.vlgmr.msra.gmra.mrb[8].mxu0 %vm244_vm0, %v211_v57 }
 0x108   :  { %631 = vmatpush3.bf16.msra.mxu1 %v794_v19 }
 0x109   :  { %632 = vmatprep.subr.bf16.mxu1 %v803_v20 }
 0x10a   :  { %547 = vperm.xlu0 %671, %v593_v59  }
 0x10c   :  { %633 = vmatpush3.bf16.msra.mxu1 %v803_v20 }
 0x10d   :  { %634 = vmatprep.subr.bf16.mxu1 %v812_v21 }
 0x110   :  { %635 = vmatpush3.bf16.msra.mxu1 %v812_v21 }
 0x111   :  { %636 = vmatprep.subr.bf16.mxu1 %v821_v22 }
 0x114   :  { %637 = vmatpush3.bf16.msra.mxu1 %v821_v22 }
 0x115   :  { %654 = vmatprep.subr.bf16.mxu1 %v794_v19 }
 0x170   :  { %v303_v60 = vpop.permute.xlu0 %302 }
 0x171   :  { %638 = vmatprep.mubr.msk.bf16.mxu1 %vm244_vm0, %v303_v60  ;;  %v419_v62 = vpop.permute.xlu1 %418 }
 0x178   :  { %v305_v61 = vpop.permute.xlu0 %304 }
 0x179   :  { %639 = vmatmul.mubr.msk.bf16.vlgmr.msra.gmra.mrb[4].mxu1 %vm244_vm0, %v305_v61  ;;  %v421_v63 = vpop.permute.xlu1 %420 }
 0x17a   :  { %655 = vmatpush3.bf16.msra.mxu1 %v794_v19  ;;  %662 = vmatprep.mubr.msk.bf16.mxu1 %vm244_vm0, %v419_v62 }
 0x17b   :  { %656 = vmatprep.subr.bf16.mxu1 %v803_v20 }
 0x17e   :  { %657 = vmatpush3.bf16.msra.mxu1 %v803_v20 }
 0x17f   :  { %658 = vmatprep.subr.bf16.mxu1 %v812_v21 }
 0x182   :  { %659 = vmatpush3.bf16.msra.mxu1 %v812_v21 }
 0x183   :  { %660 = vmatprep.subr.bf16.mxu1 %v821_v22 }
 0x186   :  { %661 = vmatpush3.bf16.msra.mxu1 %v821_v22 }
 0x189   :  { %663 = vmatmul.mubr.msk.bf16.vlgmr.msra.gmra.mrb[8].mxu1 %vm244_vm0, %v421_v63  ;;  %v548_v17 = vpop.permute.xlu0 %547 }
 0x1d9   :  { %v628_v0 = vpop.f32.mrb[0].mxu1 }
 0x1da   :  { %v285_v1 = vpop.f32.mrb[1].mxu1  ;;  %v652_v2 = vpop.f32.mrb[8].mxu0 }
 0x1db   :  { %v401_v3 = vpop.f32.mrb[9].mxu0  ;;  %501 = vrot.lane.b32.xlu0 %v652_v2, %s704_s4  ;;  %v629_v4 = vpop.f32.mrb[2].mxu1 }
 0x1dc   :  { %v288_v5 = vpop.f32.mrb[3].mxu1  ;;  %v653_v6 = vpop.f32.mrb[10].mxu0 }
 0x1dd   :  { %503 = vrot.lane.b32.xlu1 %v653_v6, %s704_s4  ;;  %v404_v7 = vpop.f32.mrb[11].mxu0 }
 0x1df   :  { %497 = vrot.lane.b32.xlu0 %v401_v3, %s704_s4 }
 0x1e1   :  { %499 = vrot.lane.b32.xlu1 %v404_v7, %s704_s4 }
 0x24c   :  { %v640_v8 = vpop.f32.mrb[4].mxu1 }
 0x24d   :  { %485 = vrot.lane.b32.xlu0 %v640_v8, %s705_s13  ;;  %v346_v9 = vpop.f32.mrb[5].mxu1  ;;  %v502_v20 = vpop.permute.xlu0 %501 }
 0x24e   :  { %481 = vrot.lane.b32.xlu1 %v346_v9, %s705_s13  ;;  %v641_v10 = vpop.f32.mrb[6].mxu1 }
 0x24f   :  { %v349_v11 = vpop.f32.mrb[7].mxu1  ;;  %v504_v16 = vpop.permute.xlu1 %503 }
 0x251   :  { %v498_v22 = vpop.permute.xlu0 %497 }
 0x252   :  { %487 = vrot.lane.b32.xlu1 %v641_v10, %s705_s13 }
 0x253   :  { %v500_v18 = vpop.permute.xlu1 %499 }
 0x256   :  { %483 = vrot.lane.b32.xlu1 %v349_v11, %s705_s13 }
 0x25c   :  { %v664_v12 = vpop.f32.mrb[8].mxu1 }
 0x25d   :  { %v462_v13 = vpop.f32.mrb[9].mxu1 }
 0x25e   :  { %513 = vrot.lane.b32.xlu0 %v462_v13, %s706_s14  ;;  %v665_v14 = vpop.f32.mrb[10].mxu1 }
 0x25f   :  { %v465_v15 = vpop.f32.mrb[11].mxu1 }
 0x260   :  { %515 = vrot.lane.b32.xlu1 %v465_v15, %s706_s14 }
 0x262   :  { %517 = vrot.lane.b32.xlu0 %v664_v12, %s706_s14 }
 0x264   :  { %519 = vrot.lane.b32.xlu1 %v665_v14, %s706_s14 }
 0x2bf   :  { %v486_v23 = vpop.permute.xlu0 %485 }
 0x2c0   :  { %v482_v19 = vpop.permute.xlu1 %481  ;;  %v528_v29 = vsel %vm525_vm1, %v628_v0, %v486_v23 }
 0x2c1   :  { %v526_v25 = vsel %vm525_vm1, %v285_v1, %v482_v19  ;;  %v533_v37 = vsel %vm530_vm2, %v528_v29, %v502_v20 }
 0x2c2   :  { %v531_v27 = vsel %vm530_vm2, %v526_v25, %v498_v22 }
 0x2c4   :  { %v488_v21 = vpop.permute.xlu1 %487 }
 0x2c5   :  { %v529_v34 = vsel %vm525_vm1, %v629_v4, %v488_v21 }
 0x2c6   :  { %v534_v41 = vsel %vm530_vm2, %v529_v34, %v504_v16 }
 0x2c8   :  { %v484_v24 = vpop.permute.xlu1 %483 }
 0x2c9   :  { %v527_v26 = vsel %vm525_vm1, %v288_v5, %v484_v24 }
 0x2ca   :  { %v532_v32 = vsel %vm530_vm2, %v527_v26, %v500_v18 }
 0x2d0   :  { %v514_v28 = vpop.permute.xlu0 %513 }
 0x2d1   :  { %v536_v30 = vsel %vm535_vm3, %v531_v27, %v514_v28 }
 0x2d2   :  { %v550_v31 = vadd.f32 %v548_v17, %v536_v30  ;;  %v516_v33 = vpop.permute.xlu1 %515 }
 0x2d3   :  { %v537_v35 = vsel %vm535_vm3, %v532_v32, %v516_v33 }
 0x2d4   :  { %555 = vst.msk [vmem:[%s890_s5] sm:$0xff] %vm554_vm4, %v550_v31  ;;  %v551_v36 = vadd.f32 %v548_v17, %v537_v35  ;;  %v518_v38 = vpop.permute.xlu0 %517 }
 0x2d5   :  { %v538_v39 = vsel %vm535_vm3, %v533_v37, %v518_v38 }
 0x2d6   :  { %556 = vst.msk [vmem:[%s890_s5 + $0x8] sm:$0xff] %vm554_vm4, %v551_v36  ;;  %v552_v40 = vadd.f32 %v548_v17, %v538_v39  ;;  %v520_v42 = vpop.permute.xlu1 %519 }
 0x2d7   :  { %v539_v43 = vsel %vm535_vm3, %v534_v41, %v520_v42 }
 0x2d8   :  { %557 = vst.msk [vmem:[%s890_s5 + $0x10] sm:$0xff] %vm554_vm4, %v552_v40  ;;  %v553_v44 = vadd.f32 %v548_v17, %v539_v43 }
 0x2da   :  { %558 = vst.msk [vmem:[%s890_s5 + $0x18] sm:$0xff] %vm554_vm4, %v553_v44 }

</bundles_post_ra>
